<compile_context>
chip_gen: v6e
topology: v6e:2x2x1
jax: 0.10.0
libtpu: 0.0.40
codegen_flags: <defaults>
</compile_context>

<pallas_src>
import jax
import jax.numpy as jnp
from jax import lax
from jax.experimental import pallas as pl
from jax.experimental.pallas import tpu as pltpu

# ----------------------------------------------------------------------------
# Padded-flat activation layout: flat row q = r * 58 + c, pixel (0,0) at row
# _CEN, zero halo above/below, pitch columns (c >= width) kept at exact zero.
# ----------------------------------------------------------------------------
_P = 58                      # row pitch (56 + 2 halo columns)
_CEN = 64                    # flat row of pixel (0,0)  (multiple of 8)
_BASE = _CEN - _P - 1        # = 5: tap base offset (dst_row - 59 + tap_off)

_L56 = 56 * _P               # 3248 stored center rows, 56x56 stage
_R56 = _CEN + _L56 + 64      # 3376 buffer rows (covers all tap reads)
_CH56 = 112                  # chunk rows (mult of 8, divides _L56) -> 29 chunks
_NC56 = _L56 // _CH56

_L28 = 28 * _P               # 1624 stored center rows, 28x28 stage
_R28 = _CEN + _L28 + 64      # 1752 buffer rows
_CH28 = 56                   # chunk rows -> 29 chunks
_NC28 = _L28 // _CH28


# ----------------------------------------------------------------------------
# In-kernel helpers.
# ----------------------------------------------------------------------------
def _chunk_iota_f32(chunk):
    # Hoisted once per conv loop (JAX does not CSE broadcast_in_dim).
    return lax.broadcasted_iota(jnp.int32, (chunk, 1), 0).astype(jnp.float32)


def _col_mask(i, chunk, iota_f, width):
    """(q % 58) < width for flat rows q of chunk i, exact in f32 (q < 2^24)."""
    qf = iota_f + (i * chunk).astype(jnp.float32)
    row = jnp.floor((qf + 0.5) * (1.0 / _P))        # exact: margin >> f32 eps
    col = qf - row * _P
    return col < float(width)


def _epilogue(acc, bias, mask, res_ref, c0, chunk):
    v = acc + bias
    if res_ref is not None:
        v = v + res_ref[pl.ds(_CEN + c0, chunk), :]
    v = jnp.maximum(v, 0.0)
    return jnp.where(mask, v, 0.0)                   # NaN-safe exact zeros


def _conv3x3(src_ref, w_ref, b_ref, *, width, chunk, n_chunks,
             stride=1, dst_ref=None, res_ref=None, reduce_gap=False):
    """3x3 pad-1 conv as 9 shifted MXU matmuls (bf16 operands, f32 accum),
    accumulated in vregs per row-chunk; bias+ReLU(+residual)+mask fused; one
    VMEM store per chunk.  If reduce_gap, the (never stored) output is summed
    into the fori_loop carry for global average pooling."""
    f32 = jnp.float32
    taps = [w_ref[k] for k in range(9)]              # (Cin, Cout) bf16, hoisted
    bias = b_ref[...]                                # (1, Cout) f32
    cout = taps[0].shape[1]
    iota_f = _chunk_iota_f32(chunk)

    def body(i, gap):
        c0 = pl.multiple_of(i * chunk, 8)
        acc = None
        for k in range(9):
            off = (k // 3) * _P + (k % 3)
            if stride == 1:
                a = src_ref[pl.ds(_BASE + off + c0, chunk), :]
            else:
                a = src_ref[pl.ds(_BASE + off + 2 * c0, chunk, stride=2), :]
            t = jnp.dot(a.astype(jnp.bfloat16), taps[k],
                        preferred_element_type=f32)
            acc = t if acc is None else acc + t
        v = _epilogue(acc, bias, _col_mask(i, chunk, iota_f, width),
                      res_ref, c0, chunk)
        if dst_ref is not None:
            dst_ref[pl.ds(_CEN + c0, chunk), :] = v
        if reduce_gap:
            gap = gap + jnp.sum(v, axis=0, keepdims=True)
        return gap

    return lax.fori_loop(0, n_chunks, body, jnp.zeros((1, cout), f32))


def _conv1(x1_ref, w1_ref, b1_ref, dst_ref):
    """conv1 3x3 stride-2 (3->16): im2col'd in the wrapper, one matmul/chunk."""
    f32 = jnp.float32
    w1 = w1_ref[...]                                 # (27, 16) bf16
    b1 = b1_ref[...]                                 # (1, 16)  f32
    iota_f = _chunk_iota_f32(_CH56)

    def body(i, carry):
        c0 = pl.multiple_of(i * _CH56, 8)
        a = x1_ref[pl.ds(c0, _CH56), :]              # (112, 27) bf16
        acc = jnp.dot(a, w1, preferred_element_type=f32)
        v = _epilogue(acc, b1, _col_mask(i, _CH56, iota_f, 56), None, c0, _CH56)
        dst_ref[pl.ds(_CEN + c0, _CH56), :] = v
        return carry

    lax.fori_loop(0, _NC56, body, 0)


# ----------------------------------------------------------------------------
# The single fused kernel: whole MainNet forward + softmax/argmax head.
# ----------------------------------------------------------------------------
def _mainnet_kernel(
    x1_ref, w1_ref, b1_ref,
    wa1_ref, ba1_ref, wa2_ref, ba2_ref,
    w2_ref, b2_ref,
    wb1_ref, bb1_ref, wb2_ref, bb2_ref,
    fcw_ref, fcb_ref,
    conf_ref, pred_ref, logits_ref,
    x56, h56, y56, x28, h28,
):
    f32 = jnp.float32

    # Halo-only zero init (top 64 + bottom 64 rows of each buffer that is read
    # through the halo).  Center rows are always overwritten by masked stores.
    for buf, nch in ((x56, 16), (h56, 16), (y56, 16)):
        buf[pl.ds(0, _CEN), :] = jnp.zeros((_CEN, nch), f32)
        buf[pl.ds(_CEN + _L56, _R56 - _CEN - _L56), :] = \
            jnp.zeros((_R56 - _CEN - _L56, nch), f32)
    for buf in (x28, h28):
        buf[pl.ds(0, _CEN), :] = jnp.zeros((_CEN, 32), f32)
        buf[pl.ds(_CEN + _L28, _R28 - _CEN - _L28), :] = \
            jnp.zeros((_R28 - _CEN - _L28, 32), f32)

    # conv1: 112 -> 56, 3 -> 16 (stride 2)
    _conv1(x1_ref, w1_ref, b1_ref, x56)
    # residual block A (56x56, 16 ch)
    _conv3x3(x56, wa1_ref, ba1_ref, width=56, chunk=_CH56, n_chunks=_NC56,
             dst_ref=h56)
    _conv3x3(h56, wa2_ref, ba2_ref, width=56, chunk=_CH56, n_chunks=_NC56,
             dst_ref=y56, res_ref=x56)
    # conv2: 56 -> 28, 16 -> 32 (stride-2 sublane reads of y56)
    _conv3x3(y56, w2_ref, b2_ref, width=28, chunk=_CH28, n_chunks=_NC28,
             dst_ref=x28, stride=2)
    # residual block B (28x28, 32 ch); resB2 output feeds only the GAP, so it
    # is reduced on the fly and never stored.
    _conv3x3(x28, wb1_ref, bb1_ref, width=28, chunk=_CH28, n_chunks=_NC28,
             dst_ref=h28)
    gap = _conv3x3(h28, wb2_ref, bb2_ref, width=28, chunk=_CH28,
                   n_chunks=_NC28, res_ref=x28, reduce_gap=True)

    # Fused head: GAP -> FC -> softmax -> max/argmax.
    feat = gap * (1.0 / 784.0)                                   # (1, 32) f32
    logits = jnp.dot(feat.astype(jnp.bfloat16), fcw_ref[...],
                     preferred_element_type=f32) + fcb_ref[...]  # (1, 6)
    logits_ref[...] = logits
    mx = jnp.max(logits, axis=1, keepdims=True)
    denom = jnp.sum(jnp.exp(logits - mx), axis=1, keepdims=True)
    conf_ref[...] = 1.0 / denom                      # == max(softmax(logits))
    idx = lax.broadcasted_iota(jnp.int32, logits.shape, 1)
    pred = jnp.min(jnp.where(logits >= mx, idx, logits.shape[1]),
                   axis=1, keepdims=True)            # first argmax (torch.max)
    pred_ref[...] = pred.astype(jnp.int32)


def _full_spec(shape):
    return pl.BlockSpec(shape, lambda i: (0,) * len(shape))


# ----------------------------------------------------------------------------
# Wrapper: conv1 im2col (bf16) + weight casts, then ONE pallas_call.
# ----------------------------------------------------------------------------
@jax.jit
def detector_forward(image_nchw, params):
    """Equivalent of: outputs = net(image); out = softmax(outputs,1); max(out,1)."""
    bf16 = jnp.bfloat16

    # conv1 im2col (stride-2, pad-1), emitted in the kernel's padded-flat pixel
    # order (row q = r*58 + c), shipped as bf16 to halve its HBM traffic.
    x = jnp.transpose(image_nchw, (0, 2, 3, 1))                    # (1,112,112,3)
    xp = jnp.pad(x, ((0, 0), (1, 1), (1, 1), (0, 0)))              # (1,114,114,3)
    cols = [xp[:, ki:ki + 112:2, kj:kj + 112:2, :]
            for ki in range(3) for kj in range(3)]
    col = jnp.concatenate(cols, axis=-1)                           # (1,56,56,27)
    col = jnp.pad(col, ((0, 0), (0, 0), (0, _P - 56), (0, 0)))     # (1,56,58,27)
    x1col = col.reshape(_L56, 27).astype(bf16)

    (w1, b1) = params["conv1"]
    (wa1, ba1) = params["resA1"]
    (wa2, ba2) = params["resA2"]
    (w2, b2) = params["conv2"]
    (wb1, bb1) = params["resB1"]
    (wb2, bb2) = params["resB2"]
    fcw, fcb = params["fc_w"], params["fc_b"]

    inputs = (x1col,
              w1.astype(bf16), b1,
              wa1.astype(bf16), ba1, wa2.astype(bf16), ba2,
              w2.astype(bf16), b2,
              wb1.astype(bf16), bb1, wb2.astype(bf16), bb2,
              fcw.astype(bf16), fcb)

    conf, pred, logits = pl.pallas_call(
        _mainnet_kernel,
        grid=(1,),
        in_specs=[_full_spec(a.shape) for a in inputs],
        out_specs=(_full_spec((1, 1)), _full_spec((1, 1)), _full_spec((1, 6))),
        out_shape=(jax.ShapeDtypeStruct((1, 1), jnp.float32),
                   jax.ShapeDtypeStruct((1, 1), jnp.int32),
                   jax.ShapeDtypeStruct((1, 6), jnp.float32)),
        scratch_shapes=[
            pltpu.VMEM((_R56, 16), jnp.float32),   # x56: conv1 out
            pltpu.VMEM((_R56, 16), jnp.float32),   # h56: resA1 out
            pltpu.VMEM((_R56, 16), jnp.float32),   # y56: resA2 out
            pltpu.VMEM((_R28, 32), jnp.float32),   # x28: conv2 out
            pltpu.VMEM((_R28, 32), jnp.float32),   # h28: resB1 out
        ],
        compiler_params=pltpu.CompilerParams(
            dimension_semantics=("arbitrary",),
            vmem_limit_bytes=32 * 1024 * 1024),
    )(*inputs)
    return conf, pred, logits


# ----------------------------------------------------------------------------
# Deterministic stand-in MainNet parameters (same I/O contract as the original).
# ----------------------------------------------------------------------------
def _init_conv(key, cin, cout, taps=True):
    k1, k2 = jax.random.split(key)
    w = jax.random.normal(k1, (3, 3, cin, cout), jnp.float32) / jnp.sqrt(9.0 * cin)
    b = 0.01 * jax.random.normal(k2, (1, cout), jnp.float32)
    if taps:
        return w.reshape(9, cin, cout), b       # per-tap (9, Cin, Cout)
    return w.reshape(9 * cin, cout), b          # flattened for the im2col matmul


def init_params(key):
    ks = jax.random.split(key, 8)
    p = {}
    p["conv1"] = _init_conv(ks[0], 3, 16, taps=False)    # 112 -> 56, stride 2
    p["resA1"] = _init_conv(ks[1], 16, 16)
    p["resA2"] = _init_conv(ks[2], 16, 16)
    p["conv2"] = _init_conv(ks[3], 16, 32)               # 56 -> 28, stride 2
    p["resB1"] = _init_conv(ks[4], 32, 32)
    p["resB2"] = _init_conv(ks[5], 32, 32)
    kw_, kb_ = jax.random.split(ks[6])
    p["fc_w"] = jax.random.normal(kw_, (32, 6), jnp.float32) / jnp.sqrt(32.0)
    p["fc_b"] = 0.01 * jax.random.normal(kb_, (1, 6), jnp.float32)
    return p


# ----------------------------------------------------------------------------
# Plain-XLA reference of the same stand-in network, with the same bf16-operand
# / f32-accumulation compute mode as the kernel (for correctness check).
# ----------------------------------------------------------------------------
@jax.jit
def reference_forward(image_nchw, params):
    bf16 = jnp.bfloat16

    def conv(x, w, b, stride):
        y = lax.conv_general_dilated(
            x.astype(bf16), w.astype(bf16),
            window_strides=(stride, stride), padding=((1, 1), (1, 1)),
            dimension_numbers=("NHWC", "HWIO", "NHWC"),
            preferred_element_type=jnp.float32)
        return y + b.reshape(1, 1, 1, -1)

    x = jnp.transpose(image_nchw, (0, 2, 3, 1))
    x = jax.nn.relu(conv(x, params["conv1"][0].reshape(3, 3, 3, 16), params["conv1"][1], 2))
    h = jax.nn.relu(conv(x, params["resA1"][0].reshape(3, 3, 16, 16), params["resA1"][1], 1))
    x = jax.nn.relu(conv(h, params["resA2"][0].reshape(3, 3, 16, 16), params["resA2"][1], 1) + x)
    x = jax.nn.relu(conv(x, params["conv2"][0].reshape(3, 3, 16, 32), params["conv2"][1], 2))
    h = jax.nn.relu(conv(x, params["resB1"][0].reshape(3, 3, 32, 32), params["resB1"][1], 1))
    x = jax.nn.relu(conv(h, params["resB2"][0].reshape(3, 3, 32, 32), params["resB2"][1], 1) + x)
    feat = jnp.mean(x, axis=(1, 2))                                    # (1, 32)
    logits = jnp.dot(feat.astype(bf16), params["fc_w"].astype(bf16),
                     preferred_element_type=jnp.float32) + params["fc_b"]
    probs = jax.nn.softmax(logits, axis=1)
    return logits, jnp.max(probs, axis=1), jnp.argmax(probs, axis=1)


# ----------------------------------------------------------------------------
if __name__ == "__main__":
    key = jax.random.PRNGKey(0)
    # Preprocessed crop as produced by ToTensor().unsqueeze(0): (1, 3, 112, 112)
    image = jax.random.uniform(key, (1, 3, 112, 112), dtype=jnp.float32)
    params = init_params(jax.random.PRNGKey(42))

    conf, pred, logits = detector_forward(image, params)
    (conf, pred, logits) = jax.block_until_ready((conf, pred, logits))

    # Sanity check against the plain-XLA reference of the same stand-in net.
    ref_logits, ref_conf, ref_pred = reference_forward(image, params)
    assert jnp.allclose(logits, ref_logits, rtol=5e-3, atol=5e-3), (logits, ref_logits)
    assert int(pred[0, 0]) == int(ref_pred[0])

    dics_CS = {0: 'CS1', 1: 'CS2', 2: 'CS3', 3: 'CS4', 4: 'CS5', 5: 'CS6'}
    result = dics_CS[int(pred[0, 0])]
    assert result in dics_CS.values()
    assert 0.0 < float(conf[0, 0]) <= 1.0
    print("KERNEL_OK")
</pallas_src>

<mosaic_0001>
module attributes {stable_mosaic.version = 11 : i64} {
  func.func @_mainnet_kernel(%arg0: i32, %arg1: memref<3248x27xbf16, #tpu.memory_space<vmem>>, %arg2: memref<27x16xbf16, #tpu.memory_space<vmem>>, %arg3: memref<1x16xf32, #tpu.memory_space<vmem>>, %arg4: memref<9x16x16xbf16, #tpu.memory_space<vmem>>, %arg5: memref<1x16xf32, #tpu.memory_space<vmem>>, %arg6: memref<9x16x16xbf16, #tpu.memory_space<vmem>>, %arg7: memref<1x16xf32, #tpu.memory_space<vmem>>, %arg8: memref<9x16x32xbf16, #tpu.memory_space<vmem>>, %arg9: memref<1x32xf32, #tpu.memory_space<vmem>>, %arg10: memref<9x32x32xbf16, #tpu.memory_space<vmem>>, %arg11: memref<1x32xf32, #tpu.memory_space<vmem>>, %arg12: memref<9x32x32xbf16, #tpu.memory_space<vmem>>, %arg13: memref<1x32xf32, #tpu.memory_space<vmem>>, %arg14: memref<32x6xbf16, #tpu.memory_space<vmem>>, %arg15: memref<1x6xf32, #tpu.memory_space<vmem>>, %arg16: memref<1x1xf32, #tpu.memory_space<vmem>>, %arg17: memref<1x1xi32, #tpu.memory_space<vmem>>, %arg18: memref<1x6xf32, #tpu.memory_space<vmem>>, %arg19: memref<3376x16xf32, #tpu.memory_space<vmem>>, %arg20: memref<3376x16xf32, #tpu.memory_space<vmem>>, %arg21: memref<3376x16xf32, #tpu.memory_space<vmem>>, %arg22: memref<1752x32xf32, #tpu.memory_space<vmem>>, %arg23: memref<1752x32xf32, #tpu.memory_space<vmem>>) attributes {dimension_semantics = [#tpu.dimension_semantics<arbitrary>], iteration_bounds = array<i64: 1>, scalar_prefetch = 0 : i64, scratch_operands = 5 : i64, tpu.core_type = #tpu.core_type<tc>, window_params = [{pipeline_mode = #tpu.pipeline_mode<synchronous>, transform_indices = @transform_0, window_bounds = array<i64: 3248, 27>}, {pipeline_mode = #tpu.pipeline_mode<synchronous>, transform_indices = @transform_1, window_bounds = array<i64: 27, 16>}, {pipeline_mode = #tpu.pipeline_mode<synchronous>, transform_indices = @transform_2, window_bounds = array<i64: 1, 16>}, {pipeline_mode = #tpu.pipeline_mode<synchronous>, transform_indices = @transform_3, window_bounds = array<i64: 9, 16, 16>}, {pipeline_mode = #tpu.pipeline_mode<synchronous>, transform_indices = @transform_4, window_bounds = array<i64: 1, 16>}, {pipeline_mode = #tpu.pipeline_mode<synchronous>, transform_indices = @transform_5, window_bounds = array<i64: 9, 16, 16>}, {pipeline_mode = #tpu.pipeline_mode<synchronous>, transform_indices = @transform_6, window_bounds = array<i64: 1, 16>}, {pipeline_mode = #tpu.pipeline_mode<synchronous>, transform_indices = @transform_7, window_bounds = array<i64: 9, 16, 32>}, {pipeline_mode = #tpu.pipeline_mode<synchronous>, transform_indices = @transform_8, window_bounds = array<i64: 1, 32>}, {pipeline_mode = #tpu.pipeline_mode<synchronous>, transform_indices = @transform_9, window_bounds = array<i64: 9, 32, 32>}, {pipeline_mode = #tpu.pipeline_mode<synchronous>, transform_indices = @transform_10, window_bounds = array<i64: 1, 32>}, {pipeline_mode = #tpu.pipeline_mode<synchronous>, transform_indices = @transform_11, window_bounds = array<i64: 9, 32, 32>}, {pipeline_mode = #tpu.pipeline_mode<synchronous>, transform_indices = @transform_12, window_bounds = array<i64: 1, 32>}, {pipeline_mode = #tpu.pipeline_mode<synchronous>, transform_indices = @transform_13, window_bounds = array<i64: 32, 6>}, {pipeline_mode = #tpu.pipeline_mode<synchronous>, transform_indices = @transform_14, window_bounds = array<i64: 1, 6>}, {pipeline_mode = #tpu.pipeline_mode<synchronous>, transform_indices = @transform_15, window_bounds = array<i64: 1, 1>}, {pipeline_mode = #tpu.pipeline_mode<synchronous>, transform_indices = @transform_16, window_bounds = array<i64: 1, 1>}, {pipeline_mode = #tpu.pipeline_mode<synchronous>, transform_indices = @transform_17, window_bounds = array<i64: 1, 6>}]} {
    %cst = arith.constant 0.000000e+00 : f32
    %0 = vector.broadcast %cst : f32 to vector<64x16xf32>
    %c0 = arith.constant 0 : index
    %c0_0 = arith.constant 0 : index
    %1 = vector.load %arg19[%c0, %c0_0] : memref<3376x16xf32, #tpu.memory_space<vmem>>, vector<64x16xf32>
    tpu.vector_store %arg19[%c0, %c0_0], %0 {strides = array<i32>} : memref<3376x16xf32, #tpu.memory_space<vmem>>, vector<64x16xf32>,
    %cst_1 = arith.constant 0.000000e+00 : f32
    %2 = vector.broadcast %cst_1 : f32 to vector<64x16xf32>
    %c3312 = arith.constant 3312 : index
    %c0_2 = arith.constant 0 : index
    %3 = vector.load %arg19[%c3312, %c0_2] : memref<3376x16xf32, #tpu.memory_space<vmem>>, vector<64x16xf32>
    tpu.vector_store %arg19[%c3312, %c0_2], %2 {strides = array<i32>} : memref<3376x16xf32, #tpu.memory_space<vmem>>, vector<64x16xf32>,
    %cst_3 = arith.constant 0.000000e+00 : f32
    %4 = vector.broadcast %cst_3 : f32 to vector<64x16xf32>
    %c0_4 = arith.constant 0 : index
    %c0_5 = arith.constant 0 : index
    %5 = vector.load %arg20[%c0_4, %c0_5] : memref<3376x16xf32, #tpu.memory_space<vmem>>, vector<64x16xf32>
    tpu.vector_store %arg20[%c0_4, %c0_5], %4 {strides = array<i32>} : memref<3376x16xf32, #tpu.memory_space<vmem>>, vector<64x16xf32>,
    %cst_6 = arith.constant 0.000000e+00 : f32
    %6 = vector.broadcast %cst_6 : f32 to vector<64x16xf32>
    %c3312_7 = arith.constant 3312 : index
    %c0_8 = arith.constant 0 : index
    %7 = vector.load %arg20[%c3312_7, %c0_8] : memref<3376x16xf32, #tpu.memory_space<vmem>>, vector<64x16xf32>
    tpu.vector_store %arg20[%c3312_7, %c0_8], %6 {strides = array<i32>} : memref<3376x16xf32, #tpu.memory_space<vmem>>, vector<64x16xf32>,
    %cst_9 = arith.constant 0.000000e+00 : f32
    %8 = vector.broadcast %cst_9 : f32 to vector<64x16xf32>
    %c0_10 = arith.constant 0 : index
    %c0_11 = arith.constant 0 : index
    %9 = vector.load %arg21[%c0_10, %c0_11] : memref<3376x16xf32, #tpu.memory_space<vmem>>, vector<64x16xf32>
    tpu.vector_store %arg21[%c0_10, %c0_11], %8 {strides = array<i32>} : memref<3376x16xf32, #tpu.memory_space<vmem>>, vector<64x16xf32>,
    %cst_12 = arith.constant 0.000000e+00 : f32
    %10 = vector.broadcast %cst_12 : f32 to vector<64x16xf32>
    %c3312_13 = arith.constant 3312 : index
    %c0_14 = arith.constant 0 : index
    %11 = vector.load %arg21[%c3312_13, %c0_14] : memref<3376x16xf32, #tpu.memory_space<vmem>>, vector<64x16xf32>
    tpu.vector_store %arg21[%c3312_13, %c0_14], %10 {strides = array<i32>} : memref<3376x16xf32, #tpu.memory_space<vmem>>, vector<64x16xf32>,
    %cst_15 = arith.constant 0.000000e+00 : f32
    %12 = vector.broadcast %cst_15 : f32 to vector<64x32xf32>
    %c0_16 = arith.constant 0 : index
    %c0_17 = arith.constant 0 : index
    %13 = vector.load %arg22[%c0_16, %c0_17] : memref<1752x32xf32, #tpu.memory_space<vmem>>, vector<64x32xf32>
    tpu.vector_store %arg22[%c0_16, %c0_17], %12 {strides = array<i32>} : memref<1752x32xf32, #tpu.memory_space<vmem>>, vector<64x32xf32>,
    %cst_18 = arith.constant 0.000000e+00 : f32
    %14 = vector.broadcast %cst_18 : f32 to vector<64x32xf32>
    %c1688 = arith.constant 1688 : index
    %c0_19 = arith.constant 0 : index
    %15 = vector.load %arg22[%c1688, %c0_19] : memref<1752x32xf32, #tpu.memory_space<vmem>>, vector<64x32xf32>
    tpu.vector_store %arg22[%c1688, %c0_19], %14 {strides = array<i32>} : memref<1752x32xf32, #tpu.memory_space<vmem>>, vector<64x32xf32>,
    %cst_20 = arith.constant 0.000000e+00 : f32
    %16 = vector.broadcast %cst_20 : f32 to vector<64x32xf32>
    %c0_21 = arith.constant 0 : index
    %c0_22 = arith.constant 0 : index
    %17 = vector.load %arg23[%c0_21, %c0_22] : memref<1752x32xf32, #tpu.memory_space<vmem>>, vector<64x32xf32>
    tpu.vector_store %arg23[%c0_21, %c0_22], %16 {strides = array<i32>} : memref<1752x32xf32, #tpu.memory_space<vmem>>, vector<64x32xf32>,
    %cst_23 = arith.constant 0.000000e+00 : f32
    %18 = vector.broadcast %cst_23 : f32 to vector<64x32xf32>
    %c1688_24 = arith.constant 1688 : index
    %c0_25 = arith.constant 0 : index
    %19 = vector.load %arg23[%c1688_24, %c0_25] : memref<1752x32xf32, #tpu.memory_space<vmem>>, vector<64x32xf32>
    tpu.vector_store %arg23[%c1688_24, %c0_25], %18 {strides = array<i32>} : memref<1752x32xf32, #tpu.memory_space<vmem>>, vector<64x32xf32>,
    %c0_26 = arith.constant 0 : index
    %c0_27 = arith.constant 0 : index
    %20 = vector.load %arg2[%c0_26, %c0_27] : memref<27x16xbf16, #tpu.memory_space<vmem>>, vector<27x16xbf16>
    %c0_28 = arith.constant 0 : index
    %c0_29 = arith.constant 0 : index
    %21 = vector.load %arg3[%c0_28, %c0_29] : memref<1x16xf32, #tpu.memory_space<vmem>>, vector<1x16xf32>
    %22 = tpu.iota {dimensions = array<i32: 0>} : vector<112x1xi32>
    %23 = arith.sitofp %22 : vector<112x1xi32> to vector<112x1xf32>
    %c0_i32 = arith.constant 0 : i32
    %c29_i32 = arith.constant 29 : i32
    %24 = arith.addi %c0_i32, %c29_i32 : i32
    %c1_i32 = arith.constant 1 : i32
    scf.for %arg24 = %c0_i32 to %24 step %c1_i32  : i32 {
      %c112_i32 = arith.constant 112 : i32
      %163 = arith.muli %arg24, %c112_i32 : i32
      %164 = tpu.assume_multiple %163, 8 : i32
      %165 = arith.index_cast %164 : i32 to index
      %c0_205 = arith.constant 0 : index
      %166 = vector.load %arg1[%165, %c0_205] : memref<3248x27xbf16, #tpu.memory_space<vmem>>, vector<112x27xbf16>
      %cst_206 = arith.constant dense<0.000000e+00> : vector<112x16xf32>
      %167 = tpu.matmul %166, %20, %cst_206 {dimension_numbers = #tpu.dot_dimension_numbers<[1], [0], [0], [1], [0, 0, 1, 1], [], []>} : vector<112x27xbf16>, vector<27x16xbf16>, vector<112x16xf32> -> vector<112x16xf32>
      %c112_i32_207 = arith.constant 112 : i32
      %168 = arith.muli %arg24, %c112_i32_207 : i32
      %169 = arith.sitofp %168 : i32 to f32
      %170 = vector.broadcast %169 : f32 to vector<112x1xf32>
      %171 = arith.addf %23, %170 : vector<112x1xf32>
      %cst_208 = arith.constant 5.000000e-01 : f32
      %172 = vector.broadcast %cst_208 : f32 to vector<112x1xf32>
      %173 = arith.addf %171, %172 : vector<112x1xf32>
      %cst_209 = arith.constant 0.0172413792 : f32
      %174 = vector.broadcast %cst_209 : f32 to vector<112x1xf32>
      %175 = arith.mulf %173, %174 : vector<112x1xf32>
      %176 = math.floor %175 : vector<112x1xf32>
      %cst_210 = arith.constant 5.800000e+01 : f32
      %177 = vector.broadcast %cst_210 : f32 to vector<112x1xf32>
      %178 = arith.mulf %176, %177 : vector<112x1xf32>
      %179 = arith.subf %171, %178 : vector<112x1xf32>
      %cst_211 = arith.constant 5.600000e+01 : f32
      %180 = vector.broadcast %cst_211 : f32 to vector<112x1xf32>
      %181 = arith.cmpf olt, %179, %180 : vector<112x1xf32>
      %182 = vector.broadcast %21 : vector<1x16xf32> to vector<112x16xf32>
      %183 = arith.addf %167, %182 : vector<112x16xf32>
      %cst_212 = arith.constant 0.000000e+00 : f32
      %184 = vector.broadcast %cst_212 : f32 to vector<112x16xf32>
      %185 = arith.maximumf %183, %184 : vector<112x16xf32>
      %cst_213 = arith.constant 0.000000e+00 : f32
      %186 = vector.shape_cast %181 : vector<112x1xi1> to vector<112x1xi1>
      %187 = vector.broadcast %186 : vector<112x1xi1> to vector<112x16xi1>
      %188 = vector.broadcast %cst_213 : f32 to vector<112x16xf32>
      %189 = arith.select %187, %185, %188 : vector<112x16xi1>, vector<112x16xf32>
      %c64_i32 = arith.constant 64 : i32
      %190 = arith.addi %c64_i32, %164 : i32
      %191 = arith.index_cast %190 : i32 to index
      %c0_214 = arith.constant 0 : index
      %192 = vector.load %arg19[%191, %c0_214] : memref<3376x16xf32, #tpu.memory_space<vmem>>, vector<112x16xf32>
      tpu.vector_store %arg19[%191, %c0_214], %189 {strides = array<i32>} : memref<3376x16xf32, #tpu.memory_space<vmem>>, vector<112x16xf32>,
    }
    %c29_i32_30 = arith.constant 29 : i32
    %c0_31 = arith.constant 0 : index
    %c0_32 = arith.constant 0 : index
    %c0_33 = arith.constant 0 : index
    %25 = vector.load %arg4[%c0_31, %c0_32, %c0_33] : memref<9x16x16xbf16, #tpu.memory_space<vmem>>, vector<1x16x16xbf16>
    %26 = vector.shape_cast %25 : vector<1x16x16xbf16> to vector<16x16xbf16>
    %c1 = arith.constant 1 : index
    %c0_34 = arith.constant 0 : index
    %c0_35 = arith.constant 0 : index
    %27 = vector.load %arg4[%c1, %c0_34, %c0_35] : memref<9x16x16xbf16, #tpu.memory_space<vmem>>, vector<1x16x16xbf16>
    %28 = vector.shape_cast %27 : vector<1x16x16xbf16> to vector<16x16xbf16>
    %c2 = arith.constant 2 : index
    %c0_36 = arith.constant 0 : index
    %c0_37 = arith.constant 0 : index
    %29 = vector.load %arg4[%c2, %c0_36, %c0_37] : memref<9x16x16xbf16, #tpu.memory_space<vmem>>, vector<1x16x16xbf16>
    %30 = vector.shape_cast %29 : vector<1x16x16xbf16> to vector<16x16xbf16>
    %c3 = arith.constant 3 : index
    %c0_38 = arith.constant 0 : index
    %c0_39 = arith.constant 0 : index
    %31 = vector.load %arg4[%c3, %c0_38, %c0_39] : memref<9x16x16xbf16, #tpu.memory_space<vmem>>, vector<1x16x16xbf16>
    %32 = vector.shape_cast %31 : vector<1x16x16xbf16> to vector<16x16xbf16>
    %c4 = arith.constant 4 : index
    %c0_40 = arith.constant 0 : index
    %c0_41 = arith.constant 0 : index
    %33 = vector.load %arg4[%c4, %c0_40, %c0_41] : memref<9x16x16xbf16, #tpu.memory_space<vmem>>, vector<1x16x16xbf16>
    %34 = vector.shape_cast %33 : vector<1x16x16xbf16> to vector<16x16xbf16>
    %c5 = arith.constant 5 : index
    %c0_42 = arith.constant 0 : index
    %c0_43 = arith.constant 0 : index
    %35 = vector.load %arg4[%c5, %c0_42, %c0_43] : memref<9x16x16xbf16, #tpu.memory_space<vmem>>, vector<1x16x16xbf16>
    %36 = vector.shape_cast %35 : vector<1x16x16xbf16> to vector<16x16xbf16>
    %c6 = arith.constant 6 : index
    %c0_44 = arith.constant 0 : index
    %c0_45 = arith.constant 0 : index
    %37 = vector.load %arg4[%c6, %c0_44, %c0_45] : memref<9x16x16xbf16, #tpu.memory_space<vmem>>, vector<1x16x16xbf16>
    %38 = vector.shape_cast %37 : vector<1x16x16xbf16> to vector<16x16xbf16>
    %c7 = arith.constant 7 : index
    %c0_46 = arith.constant 0 : index
    %c0_47 = arith.constant 0 : index
    %39 = vector.load %arg4[%c7, %c0_46, %c0_47] : memref<9x16x16xbf16, #tpu.memory_space<vmem>>, vector<1x16x16xbf16>
    %40 = vector.shape_cast %39 : vector<1x16x16xbf16> to vector<16x16xbf16>
    %c8 = arith.constant 8 : index
    %c0_48 = arith.constant 0 : index
    %c0_49 = arith.constant 0 : index
    %41 = vector.load %arg4[%c8, %c0_48, %c0_49] : memref<9x16x16xbf16, #tpu.memory_space<vmem>>, vector<1x16x16xbf16>
    %42 = vector.shape_cast %41 : vector<1x16x16xbf16> to vector<16x16xbf16>
    %c0_50 = arith.constant 0 : index
    %c0_51 = arith.constant 0 : index
    %43 = vector.load %arg5[%c0_50, %c0_51] : memref<1x16xf32, #tpu.memory_space<vmem>>, vector<1x16xf32>
    %44 = tpu.iota {dimensions = array<i32: 0>} : vector<112x1xi32>
    %45 = arith.sitofp %44 : vector<112x1xi32> to vector<112x1xf32>
    %c0_i32_52 = arith.constant 0 : i32
    %c29_i32_53 = arith.constant 29 : i32
    %46 = arith.addi %c0_i32_52, %c29_i32_53 : i32
    %c1_i32_54 = arith.constant 1 : i32
    scf.for %arg24 = %c0_i32_52 to %46 step %c1_i32_54  : i32 {
      %c112_i32 = arith.constant 112 : i32
      %163 = arith.muli %arg24, %c112_i32 : i32
      %164 = tpu.assume_multiple %163, 8 : i32
      %c5_i32 = arith.constant 5 : i32
      %165 = arith.addi %c5_i32, %164 : i32
      %166 = arith.index_cast %165 : i32 to index
      %c0_205 = arith.constant 0 : index
      %167 = vector.load %arg19[%166, %c0_205] : memref<3376x16xf32, #tpu.memory_space<vmem>>, vector<112x16xf32>
      %168 = arith.truncf %167 : vector<112x16xf32> to vector<112x16xbf16>
      %cst_206 = arith.constant dense<0.000000e+00> : vector<112x16xf32>
      %169 = tpu.matmul %168, %26, %cst_206 {dimension_numbers = #tpu.dot_dimension_numbers<[1], [0], [0], [1], [0, 0, 1, 1], [], []>} : vector<112x16xbf16>, vector<16x16xbf16>, vector<112x16xf32> -> vector<112x16xf32>
      %c6_i32_207 = arith.constant 6 : i32
      %170 = arith.addi %c6_i32_207, %164 : i32
      %171 = arith.index_cast %170 : i32 to index
      %c0_208 = arith.constant 0 : index
      %172 = vector.load %arg19[%171, %c0_208] : memref<3376x16xf32, #tpu.memory_space<vmem>>, vector<112x16xf32>
      %173 = arith.truncf %172 : vector<112x16xf32> to vector<112x16xbf16>
      %cst_209 = arith.constant dense<0.000000e+00> : vector<112x16xf32>
      %174 = tpu.matmul %173, %28, %cst_209 {dimension_numbers = #tpu.dot_dimension_numbers<[1], [0], [0], [1], [0, 0, 1, 1], [], []>} : vector<112x16xbf16>, vector<16x16xbf16>, vector<112x16xf32> -> vector<112x16xf32>
      %175 = arith.addf %169, %174 : vector<112x16xf32>
      %c7_i32 = arith.constant 7 : i32
      %176 = arith.addi %c7_i32, %164 : i32
      %177 = arith.index_cast %176 : i32 to index
      %c0_210 = arith.constant 0 : index
      %178 = vector.load %arg19[%177, %c0_210] : memref<3376x16xf32, #tpu.memory_space<vmem>>, vector<112x16xf32>
      %179 = arith.truncf %178 : vector<112x16xf32> to vector<112x16xbf16>
      %cst_211 = arith.constant dense<0.000000e+00> : vector<112x16xf32>
      %180 = tpu.matmul %179, %30, %cst_211 {dimension_numbers = #tpu.dot_dimension_numbers<[1], [0], [0], [1], [0, 0, 1, 1], [], []>} : vector<112x16xbf16>, vector<16x16xbf16>, vector<112x16xf32> -> vector<112x16xf32>
      %181 = arith.addf %175, %180 : vector<112x16xf32>
      %c63_i32 = arith.constant 63 : i32
      %182 = arith.addi %c63_i32, %164 : i32
      %183 = arith.index_cast %182 : i32 to index
      %c0_212 = arith.constant 0 : index
      %184 = vector.load %arg19[%183, %c0_212] : memref<3376x16xf32, #tpu.memory_space<vmem>>, vector<112x16xf32>
      %185 = arith.truncf %184 : vector<112x16xf32> to vector<112x16xbf16>
      %cst_213 = arith.constant dense<0.000000e+00> : vector<112x16xf32>
      %186 = tpu.matmul %185, %32, %cst_213 {dimension_numbers = #tpu.dot_dimension_numbers<[1], [0], [0], [1], [0, 0, 1, 1], [], []>} : vector<112x16xbf16>, vector<16x16xbf16>, vector<112x16xf32> -> vector<112x16xf32>
      %187 = arith.addf %181, %186 : vector<112x16xf32>
      %c64_i32 = arith.constant 64 : i32
      %188 = arith.addi %c64_i32, %164 : i32
      %189 = arith.index_cast %188 : i32 to index
      %c0_214 = arith.constant 0 : index
      %190 = vector.load %arg19[%189, %c0_214] : memref<3376x16xf32, #tpu.memory_space<vmem>>, vector<112x16xf32>
      %191 = arith.truncf %190 : vector<112x16xf32> to vector<112x16xbf16>
      %cst_215 = arith.constant dense<0.000000e+00> : vector<112x16xf32>
      %192 = tpu.matmul %191, %34, %cst_215 {dimension_numbers = #tpu.dot_dimension_numbers<[1], [0], [0], [1], [0, 0, 1, 1], [], []>} : vector<112x16xbf16>, vector<16x16xbf16>, vector<112x16xf32> -> vector<112x16xf32>
      %193 = arith.addf %187, %192 : vector<112x16xf32>
      %c65_i32 = arith.constant 65 : i32
      %194 = arith.addi %c65_i32, %164 : i32
      %195 = arith.index_cast %194 : i32 to index
      %c0_216 = arith.constant 0 : index
      %196 = vector.load %arg19[%195, %c0_216] : memref<3376x16xf32, #tpu.memory_space<vmem>>, vector<112x16xf32>
      %197 = arith.truncf %196 : vector<112x16xf32> to vector<112x16xbf16>
      %cst_217 = arith.constant dense<0.000000e+00> : vector<112x16xf32>
      %198 = tpu.matmul %197, %36, %cst_217 {dimension_numbers = #tpu.dot_dimension_numbers<[1], [0], [0], [1], [0, 0, 1, 1], [], []>} : vector<112x16xbf16>, vector<16x16xbf16>, vector<112x16xf32> -> vector<112x16xf32>
      %199 = arith.addf %193, %198 : vector<112x16xf32>
      %c121_i32 = arith.constant 121 : i32
      %200 = arith.addi %c121_i32, %164 : i32
      %201 = arith.index_cast %200 : i32 to index
      %c0_218 = arith.constant 0 : index
      %202 = vector.load %arg19[%201, %c0_218] : memref<3376x16xf32, #tpu.memory_space<vmem>>, vector<112x16xf32>
      %203 = arith.truncf %202 : vector<112x16xf32> to vector<112x16xbf16>
      %cst_219 = arith.constant dense<0.000000e+00> : vector<112x16xf32>
      %204 = tpu.matmul %203, %38, %cst_219 {dimension_numbers = #tpu.dot_dimension_numbers<[1], [0], [0], [1], [0, 0, 1, 1], [], []>} : vector<112x16xbf16>, vector<16x16xbf16>, vector<112x16xf32> -> vector<112x16xf32>
      %205 = arith.addf %199, %204 : vector<112x16xf32>
      %c122_i32 = arith.constant 122 : i32
      %206 = arith.addi %c122_i32, %164 : i32
      %207 = arith.index_cast %206 : i32 to index
      %c0_220 = arith.constant 0 : index
      %208 = vector.load %arg19[%207, %c0_220] : memref<3376x16xf32, #tpu.memory_space<vmem>>, vector<112x16xf32>
      %209 = arith.truncf %208 : vector<112x16xf32> to vector<112x16xbf16>
      %cst_221 = arith.constant dense<0.000000e+00> : vector<112x16xf32>
      %210 = tpu.matmul %209, %40, %cst_221 {dimension_numbers = #tpu.dot_dimension_numbers<[1], [0], [0], [1], [0, 0, 1, 1], [], []>} : vector<112x16xbf16>, vector<16x16xbf16>, vector<112x16xf32> -> vector<112x16xf32>
      %211 = arith.addf %205, %210 : vector<112x16xf32>
      %c123_i32 = arith.constant 123 : i32
      %212 = arith.addi %c123_i32, %164 : i32
      %213 = arith.index_cast %212 : i32 to index
      %c0_222 = arith.constant 0 : index
      %214 = vector.load %arg19[%213, %c0_222] : memref<3376x16xf32, #tpu.memory_space<vmem>>, vector<112x16xf32>
      %215 = arith.truncf %214 : vector<112x16xf32> to vector<112x16xbf16>
      %cst_223 = arith.constant dense<0.000000e+00> : vector<112x16xf32>
      %216 = tpu.matmul %215, %42, %cst_223 {dimension_numbers = #tpu.dot_dimension_numbers<[1], [0], [0], [1], [0, 0, 1, 1], [], []>} : vector<112x16xbf16>, vector<16x16xbf16>, vector<112x16xf32> -> vector<112x16xf32>
      %217 = arith.addf %211, %216 : vector<112x16xf32>
      %c112_i32_224 = arith.constant 112 : i32
      %218 = arith.muli %arg24, %c112_i32_224 : i32
      %219 = arith.sitofp %218 : i32 to f32
      %220 = vector.broadcast %219 : f32 to vector<112x1xf32>
      %221 = arith.addf %45, %220 : vector<112x1xf32>
      %cst_225 = arith.constant 5.000000e-01 : f32
      %222 = vector.broadcast %cst_225 : f32 to vector<112x1xf32>
      %223 = arith.addf %221, %222 : vector<112x1xf32>
      %cst_226 = arith.constant 0.0172413792 : f32
      %224 = vector.broadcast %cst_226 : f32 to vector<112x1xf32>
      %225 = arith.mulf %223, %224 : vector<112x1xf32>
      %226 = math.floor %225 : vector<112x1xf32>
      %cst_227 = arith.constant 5.800000e+01 : f32
      %227 = vector.broadcast %cst_227 : f32 to vector<112x1xf32>
      %228 = arith.mulf %226, %227 : vector<112x1xf32>
      %229 = arith.subf %221, %228 : vector<112x1xf32>
      %cst_228 = arith.constant 5.600000e+01 : f32
      %230 = vector.broadcast %cst_228 : f32 to vector<112x1xf32>
      %231 = arith.cmpf olt, %229, %230 : vector<112x1xf32>
      %232 = vector.broadcast %43 : vector<1x16xf32> to vector<112x16xf32>
      %233 = arith.addf %217, %232 : vector<112x16xf32>
      %cst_229 = arith.constant 0.000000e+00 : f32
      %234 = vector.broadcast %cst_229 : f32 to vector<112x16xf32>
      %235 = arith.maximumf %233, %234 : vector<112x16xf32>
      %cst_230 = arith.constant 0.000000e+00 : f32
      %236 = vector.shape_cast %231 : vector<112x1xi1> to vector<112x1xi1>
      %237 = vector.broadcast %236 : vector<112x1xi1> to vector<112x16xi1>
      %238 = vector.broadcast %cst_230 : f32 to vector<112x16xf32>
      %239 = arith.select %237, %235, %238 : vector<112x16xi1>, vector<112x16xf32>
      %c64_i32_231 = arith.constant 64 : i32
      %240 = arith.addi %c64_i32_231, %164 : i32
      %241 = arith.index_cast %240 : i32 to index
      %c0_232 = arith.constant 0 : index
      %242 = vector.load %arg20[%241, %c0_232] : memref<3376x16xf32, #tpu.memory_space<vmem>>, vector<112x16xf32>
      tpu.vector_store %arg20[%241, %c0_232], %239 {strides = array<i32>} : memref<3376x16xf32, #tpu.memory_space<vmem>>, vector<112x16xf32>,
    }
    %c29_i32_55 = arith.constant 29 : i32
    %c0_56 = arith.constant 0 : index
    %c0_57 = arith.constant 0 : index
    %c0_58 = arith.constant 0 : index
    %47 = vector.load %arg6[%c0_56, %c0_57, %c0_58] : memref<9x16x16xbf16, #tpu.memory_space<vmem>>, vector<1x16x16xbf16>
    %48 = vector.shape_cast %47 : vector<1x16x16xbf16> to vector<16x16xbf16>
    %c1_59 = arith.constant 1 : index
    %c0_60 = arith.constant 0 : index
    %c0_61 = arith.constant 0 : index
    %49 = vector.load %arg6[%c1_59, %c0_60, %c0_61] : memref<9x16x16xbf16, #tpu.memory_space<vmem>>, vector<1x16x16xbf16>
    %50 = vector.shape_cast %49 : vector<1x16x16xbf16> to vector<16x16xbf16>
    %c2_62 = arith.constant 2 : index
    %c0_63 = arith.constant 0 : index
    %c0_64 = arith.constant 0 : index
    %51 = vector.load %arg6[%c2_62, %c0_63, %c0_64] : memref<9x16x16xbf16, #tpu.memory_space<vmem>>, vector<1x16x16xbf16>
    %52 = vector.shape_cast %51 : vector<1x16x16xbf16> to vector<16x16xbf16>
    %c3_65 = arith.constant 3 : index
    %c0_66 = arith.constant 0 : index
    %c0_67 = arith.constant 0 : index
    %53 = vector.load %arg6[%c3_65, %c0_66, %c0_67] : memref<9x16x16xbf16, #tpu.memory_space<vmem>>, vector<1x16x16xbf16>
    %54 = vector.shape_cast %53 : vector<1x16x16xbf16> to vector<16x16xbf16>
    %c4_68 = arith.constant 4 : index
    %c0_69 = arith.constant 0 : index
    %c0_70 = arith.constant 0 : index
    %55 = vector.load %arg6[%c4_68, %c0_69, %c0_70] : memref<9x16x16xbf16, #tpu.memory_space<vmem>>, vector<1x16x16xbf16>
    %56 = vector.shape_cast %55 : vector<1x16x16xbf16> to vector<16x16xbf16>
    %c5_71 = arith.constant 5 : index
    %c0_72 = arith.constant 0 : index
    %c0_73 = arith.constant 0 : index
    %57 = vector.load %arg6[%c5_71, %c0_72, %c0_73] : memref<9x16x16xbf16, #tpu.memory_space<vmem>>, vector<1x16x16xbf16>
    %58 = vector.shape_cast %57 : vector<1x16x16xbf16> to vector<16x16xbf16>
    %c6_74 = arith.constant 6 : index
    %c0_75 = arith.constant 0 : index
    %c0_76 = arith.constant 0 : index
    %59 = vector.load %arg6[%c6_74, %c0_75, %c0_76] : memref<9x16x16xbf16, #tpu.memory_space<vmem>>, vector<1x16x16xbf16>
    %60 = vector.shape_cast %59 : vector<1x16x16xbf16> to vector<16x16xbf16>
    %c7_77 = arith.constant 7 : index
    %c0_78 = arith.constant 0 : index
    %c0_79 = arith.constant 0 : index
    %61 = vector.load %arg6[%c7_77, %c0_78, %c0_79] : memref<9x16x16xbf16, #tpu.memory_space<vmem>>, vector<1x16x16xbf16>
    %62 = vector.shape_cast %61 : vector<1x16x16xbf16> to vector<16x16xbf16>
    %c8_80 = arith.constant 8 : index
    %c0_81 = arith.constant 0 : index
    %c0_82 = arith.constant 0 : index
    %63 = vector.load %arg6[%c8_80, %c0_81, %c0_82] : memref<9x16x16xbf16, #tpu.memory_space<vmem>>, vector<1x16x16xbf16>
    %64 = vector.shape_cast %63 : vector<1x16x16xbf16> to vector<16x16xbf16>
    %c0_83 = arith.constant 0 : index
    %c0_84 = arith.constant 0 : index
    %65 = vector.load %arg7[%c0_83, %c0_84] : memref<1x16xf32, #tpu.memory_space<vmem>>, vector<1x16xf32>
    %66 = tpu.iota {dimensions = array<i32: 0>} : vector<112x1xi32>
    %67 = arith.sitofp %66 : vector<112x1xi32> to vector<112x1xf32>
    %c0_i32_85 = arith.constant 0 : i32
    %c29_i32_86 = arith.constant 29 : i32
    %68 = arith.addi %c0_i32_85, %c29_i32_86 : i32
    %c1_i32_87 = arith.constant 1 : i32
    scf.for %arg24 = %c0_i32_85 to %68 step %c1_i32_87  : i32 {
      %c112_i32 = arith.constant 112 : i32
      %163 = arith.muli %arg24, %c112_i32 : i32
      %164 = tpu.assume_multiple %163, 8 : i32
      %c5_i32 = arith.constant 5 : i32
      %165 = arith.addi %c5_i32, %164 : i32
      %166 = arith.index_cast %165 : i32 to index
      %c0_205 = arith.constant 0 : index
      %167 = vector.load %arg20[%166, %c0_205] : memref<3376x16xf32, #tpu.memory_space<vmem>>, vector<112x16xf32>
      %168 = arith.truncf %167 : vector<112x16xf32> to vector<112x16xbf16>
      %cst_206 = arith.constant dense<0.000000e+00> : vector<112x16xf32>
      %169 = tpu.matmul %168, %48, %cst_206 {dimension_numbers = #tpu.dot_dimension_numbers<[1], [0], [0], [1], [0, 0, 1, 1], [], []>} : vector<112x16xbf16>, vector<16x16xbf16>, vector<112x16xf32> -> vector<112x16xf32>
      %c6_i32_207 = arith.constant 6 : i32
      %170 = arith.addi %c6_i32_207, %164 : i32
      %171 = arith.index_cast %170 : i32 to index
      %c0_208 = arith.constant 0 : index
      %172 = vector.load %arg20[%171, %c0_208] : memref<3376x16xf32, #tpu.memory_space<vmem>>, vector<112x16xf32>
      %173 = arith.truncf %172 : vector<112x16xf32> to vector<112x16xbf16>
      %cst_209 = arith.constant dense<0.000000e+00> : vector<112x16xf32>
      %174 = tpu.matmul %173, %50, %cst_209 {dimension_numbers = #tpu.dot_dimension_numbers<[1], [0], [0], [1], [0, 0, 1, 1], [], []>} : vector<112x16xbf16>, vector<16x16xbf16>, vector<112x16xf32> -> vector<112x16xf32>
      %175 = arith.addf %169, %174 : vector<112x16xf32>
      %c7_i32 = arith.constant 7 : i32
      %176 = arith.addi %c7_i32, %164 : i32
      %177 = arith.index_cast %176 : i32 to index
      %c0_210 = arith.constant 0 : index
      %178 = vector.load %arg20[%177, %c0_210] : memref<3376x16xf32, #tpu.memory_space<vmem>>, vector<112x16xf32>
      %179 = arith.truncf %178 : vector<112x16xf32> to vector<112x16xbf16>
      %cst_211 = arith.constant dense<0.000000e+00> : vector<112x16xf32>
      %180 = tpu.matmul %179, %52, %cst_211 {dimension_numbers = #tpu.dot_dimension_numbers<[1], [0], [0], [1], [0, 0, 1, 1], [], []>} : vector<112x16xbf16>, vector<16x16xbf16>, vector<112x16xf32> -> vector<112x16xf32>
      %181 = arith.addf %175, %180 : vector<112x16xf32>
      %c63_i32 = arith.constant 63 : i32
      %182 = arith.addi %c63_i32, %164 : i32
      %183 = arith.index_cast %182 : i32 to index
      %c0_212 = arith.constant 0 : index
      %184 = vector.load %arg20[%183, %c0_212] : memref<3376x16xf32, #tpu.memory_space<vmem>>, vector<112x16xf32>
      %185 = arith.truncf %184 : vector<112x16xf32> to vector<112x16xbf16>
      %cst_213 = arith.constant dense<0.000000e+00> : vector<112x16xf32>
      %186 = tpu.matmul %185, %54, %cst_213 {dimension_numbers = #tpu.dot_dimension_numbers<[1], [0], [0], [1], [0, 0, 1, 1], [], []>} : vector<112x16xbf16>, vector<16x16xbf16>, vector<112x16xf32> -> vector<112x16xf32>
      %187 = arith.addf %181, %186 : vector<112x16xf32>
      %c64_i32 = arith.constant 64 : i32
      %188 = arith.addi %c64_i32, %164 : i32
      %189 = arith.index_cast %188 : i32 to index
      %c0_214 = arith.constant 0 : index
      %190 = vector.load %arg20[%189, %c0_214] : memref<3376x16xf32, #tpu.memory_space<vmem>>, vector<112x16xf32>
      %191 = arith.truncf %190 : vector<112x16xf32> to vector<112x16xbf16>
      %cst_215 = arith.constant dense<0.000000e+00> : vector<112x16xf32>
      %192 = tpu.matmul %191, %56, %cst_215 {dimension_numbers = #tpu.dot_dimension_numbers<[1], [0], [0], [1], [0, 0, 1, 1], [], []>} : vector<112x16xbf16>, vector<16x16xbf16>, vector<112x16xf32> -> vector<112x16xf32>
      %193 = arith.addf %187, %192 : vector<112x16xf32>
      %c65_i32 = arith.constant 65 : i32
      %194 = arith.addi %c65_i32, %164 : i32
      %195 = arith.index_cast %194 : i32 to index
      %c0_216 = arith.constant 0 : index
      %196 = vector.load %arg20[%195, %c0_216] : memref<3376x16xf32, #tpu.memory_space<vmem>>, vector<112x16xf32>
      %197 = arith.truncf %196 : vector<112x16xf32> to vector<112x16xbf16>
      %cst_217 = arith.constant dense<0.000000e+00> : vector<112x16xf32>
      %198 = tpu.matmul %197, %58, %cst_217 {dimension_numbers = #tpu.dot_dimension_numbers<[1], [0], [0], [1], [0, 0, 1, 1], [], []>} : vector<112x16xbf16>, vector<16x16xbf16>, vector<112x16xf32> -> vector<112x16xf32>
      %199 = arith.addf %193, %198 : vector<112x16xf32>
      %c121_i32 = arith.constant 121 : i32
      %200 = arith.addi %c121_i32, %164 : i32
      %201 = arith.index_cast %200 : i32 to index
      %c0_218 = arith.constant 0 : index
      %202 = vector.load %arg20[%201, %c0_218] : memref<3376x16xf32, #tpu.memory_space<vmem>>, vector<112x16xf32>
      %203 = arith.truncf %202 : vector<112x16xf32> to vector<112x16xbf16>
      %cst_219 = arith.constant dense<0.000000e+00> : vector<112x16xf32>
      %204 = tpu.matmul %203, %60, %cst_219 {dimension_numbers = #tpu.dot_dimension_numbers<[1], [0], [0], [1], [0, 0, 1, 1], [], []>} : vector<112x16xbf16>, vector<16x16xbf16>, vector<112x16xf32> -> vector<112x16xf32>
      %205 = arith.addf %199, %204 : vector<112x16xf32>
      %c122_i32 = arith.constant 122 : i32
      %206 = arith.addi %c122_i32, %164 : i32
      %207 = arith.index_cast %206 : i32 to index
      %c0_220 = arith.constant 0 : index
      %208 = vector.load %arg20[%207, %c0_220] : memref<3376x16xf32, #tpu.memory_space<vmem>>, vector<112x16xf32>
      %209 = arith.truncf %208 : vector<112x16xf32> to vector<112x16xbf16>
      %cst_221 = arith.constant dense<0.000000e+00> : vector<112x16xf32>
      %210 = tpu.matmul %209, %62, %cst_221 {dimension_numbers = #tpu.dot_dimension_numbers<[1], [0], [0], [1], [0, 0, 1, 1], [], []>} : vector<112x16xbf16>, vector<16x16xbf16>, vector<112x16xf32> -> vector<112x16xf32>
      %211 = arith.addf %205, %210 : vector<112x16xf32>
      %c123_i32 = arith.constant 123 : i32
      %212 = arith.addi %c123_i32, %164 : i32
      %213 = arith.index_cast %212 : i32 to index
      %c0_222 = arith.constant 0 : index
      %214 = vector.load %arg20[%213, %c0_222] : memref<3376x16xf32, #tpu.memory_space<vmem>>, vector<112x16xf32>
      %215 = arith.truncf %214 : vector<112x16xf32> to vector<112x16xbf16>
      %cst_223 = arith.constant dense<0.000000e+00> : vector<112x16xf32>
      %216 = tpu.matmul %215, %64, %cst_223 {dimension_numbers = #tpu.dot_dimension_numbers<[1], [0], [0], [1], [0, 0, 1, 1], [], []>} : vector<112x16xbf16>, vector<16x16xbf16>, vector<112x16xf32> -> vector<112x16xf32>
      %217 = arith.addf %211, %216 : vector<112x16xf32>
      %c112_i32_224 = arith.constant 112 : i32
      %218 = arith.muli %arg24, %c112_i32_224 : i32
      %219 = arith.sitofp %218 : i32 to f32
      %220 = vector.broadcast %219 : f32 to vector<112x1xf32>
      %221 = arith.addf %67, %220 : vector<112x1xf32>
      %cst_225 = arith.constant 5.000000e-01 : f32
      %222 = vector.broadcast %cst_225 : f32 to vector<112x1xf32>
      %223 = arith.addf %221, %222 : vector<112x1xf32>
      %cst_226 = arith.constant 0.0172413792 : f32
      %224 = vector.broadcast %cst_226 : f32 to vector<112x1xf32>
      %225 = arith.mulf %223, %224 : vector<112x1xf32>
      %226 = math.floor %225 : vector<112x1xf32>
      %cst_227 = arith.constant 5.800000e+01 : f32
      %227 = vector.broadcast %cst_227 : f32 to vector<112x1xf32>
      %228 = arith.mulf %226, %227 : vector<112x1xf32>
      %229 = arith.subf %221, %228 : vector<112x1xf32>
      %cst_228 = arith.constant 5.600000e+01 : f32
      %230 = vector.broadcast %cst_228 : f32 to vector<112x1xf32>
      %231 = arith.cmpf olt, %229, %230 : vector<112x1xf32>
      %232 = vector.broadcast %65 : vector<1x16xf32> to vector<112x16xf32>
      %233 = arith.addf %217, %232 : vector<112x16xf32>
      %c64_i32_229 = arith.constant 64 : i32
      %234 = arith.addi %c64_i32_229, %164 : i32
      %235 = arith.index_cast %234 : i32 to index
      %c0_230 = arith.constant 0 : index
      %236 = vector.load %arg19[%235, %c0_230] : memref<3376x16xf32, #tpu.memory_space<vmem>>, vector<112x16xf32>
      %237 = arith.addf %233, %236 : vector<112x16xf32>
      %cst_231 = arith.constant 0.000000e+00 : f32
      %238 = vector.broadcast %cst_231 : f32 to vector<112x16xf32>
      %239 = arith.maximumf %237, %238 : vector<112x16xf32>
      %cst_232 = arith.constant 0.000000e+00 : f32
      %240 = vector.shape_cast %231 : vector<112x1xi1> to vector<112x1xi1>
      %241 = vector.broadcast %240 : vector<112x1xi1> to vector<112x16xi1>
      %242 = vector.broadcast %cst_232 : f32 to vector<112x16xf32>
      %243 = arith.select %241, %239, %242 : vector<112x16xi1>, vector<112x16xf32>
      %c64_i32_233 = arith.constant 64 : i32
      %244 = arith.addi %c64_i32_233, %164 : i32
      %245 = arith.index_cast %244 : i32 to index
      %c0_234 = arith.constant 0 : index
      %246 = vector.load %arg21[%245, %c0_234] : memref<3376x16xf32, #tpu.memory_space<vmem>>, vector<112x16xf32>
      tpu.vector_store %arg21[%245, %c0_234], %243 {strides = array<i32>} : memref<3376x16xf32, #tpu.memory_space<vmem>>, vector<112x16xf32>,
    }
    %c29_i32_88 = arith.constant 29 : i32
    %c0_89 = arith.constant 0 : index
    %c0_90 = arith.constant 0 : index
    %c0_91 = arith.constant 0 : index
    %69 = vector.load %arg8[%c0_89, %c0_90, %c0_91] : memref<9x16x32xbf16, #tpu.memory_space<vmem>>, vector<1x16x32xbf16>
    %70 = vector.shape_cast %69 : vector<1x16x32xbf16> to vector<16x32xbf16>
    %c1_92 = arith.constant 1 : index
    %c0_93 = arith.constant 0 : index
    %c0_94 = arith.constant 0 : index
    %71 = vector.load %arg8[%c1_92, %c0_93, %c0_94] : memref<9x16x32xbf16, #tpu.memory_space<vmem>>, vector<1x16x32xbf16>
    %72 = vector.shape_cast %71 : vector<1x16x32xbf16> to vector<16x32xbf16>
    %c2_95 = arith.constant 2 : index
    %c0_96 = arith.constant 0 : index
    %c0_97 = arith.constant 0 : index
    %73 = vector.load %arg8[%c2_95, %c0_96, %c0_97] : memref<9x16x32xbf16, #tpu.memory_space<vmem>>, vector<1x16x32xbf16>
    %74 = vector.shape_cast %73 : vector<1x16x32xbf16> to vector<16x32xbf16>
    %c3_98 = arith.constant 3 : index
    %c0_99 = arith.constant 0 : index
    %c0_100 = arith.constant 0 : index
    %75 = vector.load %arg8[%c3_98, %c0_99, %c0_100] : memref<9x16x32xbf16, #tpu.memory_space<vmem>>, vector<1x16x32xbf16>
    %76 = vector.shape_cast %75 : vector<1x16x32xbf16> to vector<16x32xbf16>
    %c4_101 = arith.constant 4 : index
    %c0_102 = arith.constant 0 : index
    %c0_103 = arith.constant 0 : index
    %77 = vector.load %arg8[%c4_101, %c0_102, %c0_103] : memref<9x16x32xbf16, #tpu.memory_space<vmem>>, vector<1x16x32xbf16>
    %78 = vector.shape_cast %77 : vector<1x16x32xbf16> to vector<16x32xbf16>
    %c5_104 = arith.constant 5 : index
    %c0_105 = arith.constant 0 : index
    %c0_106 = arith.constant 0 : index
    %79 = vector.load %arg8[%c5_104, %c0_105, %c0_106] : memref<9x16x32xbf16, #tpu.memory_space<vmem>>, vector<1x16x32xbf16>
    %80 = vector.shape_cast %79 : vector<1x16x32xbf16> to vector<16x32xbf16>
    %c6_107 = arith.constant 6 : index
    %c0_108 = arith.constant 0 : index
    %c0_109 = arith.constant 0 : index
    %81 = vector.load %arg8[%c6_107, %c0_108, %c0_109] : memref<9x16x32xbf16, #tpu.memory_space<vmem>>, vector<1x16x32xbf16>
    %82 = vector.shape_cast %81 : vector<1x16x32xbf16> to vector<16x32xbf16>
    %c7_110 = arith.constant 7 : index
    %c0_111 = arith.constant 0 : index
    %c0_112 = arith.constant 0 : index
    %83 = vector.load %arg8[%c7_110, %c0_111, %c0_112] : memref<9x16x32xbf16, #tpu.memory_space<vmem>>, vector<1x16x32xbf16>
    %84 = vector.shape_cast %83 : vector<1x16x32xbf16> to vector<16x32xbf16>
    %c8_113 = arith.constant 8 : index
    %c0_114 = arith.constant 0 : index
    %c0_115 = arith.constant 0 : index
    %85 = vector.load %arg8[%c8_113, %c0_114, %c0_115] : memref<9x16x32xbf16, #tpu.memory_space<vmem>>, vector<1x16x32xbf16>
    %86 = vector.shape_cast %85 : vector<1x16x32xbf16> to vector<16x32xbf16>
    %c0_116 = arith.constant 0 : index
    %c0_117 = arith.constant 0 : index
    %87 = vector.load %arg9[%c0_116, %c0_117] : memref<1x32xf32, #tpu.memory_space<vmem>>, vector<1x32xf32>
    %88 = tpu.iota {dimensions = array<i32: 0>} : vector<56x1xi32>
    %89 = arith.sitofp %88 : vector<56x1xi32> to vector<56x1xf32>
    %c0_i32_118 = arith.constant 0 : i32
    %c29_i32_119 = arith.constant 29 : i32
    %90 = arith.addi %c0_i32_118, %c29_i32_119 : i32
    %c1_i32_120 = arith.constant 1 : i32
    scf.for %arg24 = %c0_i32_118 to %90 step %c1_i32_120  : i32 {
      %c56_i32 = arith.constant 56 : i32
      %163 = arith.muli %arg24, %c56_i32 : i32
      %164 = tpu.assume_multiple %163, 8 : i32
      %c2_i32 = arith.constant 2 : i32
      %165 = arith.muli %c2_i32, %164 : i32
      %c5_i32 = arith.constant 5 : i32
      %166 = arith.addi %c5_i32, %165 : i32
      %167 = arith.index_cast %166 : i32 to index
      %c0_205 = arith.constant 0 : index
      %168 = tpu.strided_load %arg21[%167, %c0_205] {strides = array<i32: 2, 1>} : memref<3376x16xf32, #tpu.memory_space<vmem>>, vector<56x16xf32>
      %169 = arith.truncf %168 : vector<56x16xf32> to vector<56x16xbf16>
      %cst_206 = arith.constant dense<0.000000e+00> : vector<56x32xf32>
      %170 = tpu.matmul %169, %70, %cst_206 {dimension_numbers = #tpu.dot_dimension_numbers<[1], [0], [0], [1], [0, 0, 1, 1], [], []>} : vector<56x16xbf16>, vector<16x32xbf16>, vector<56x32xf32> -> vector<56x32xf32>
      %c2_i32_207 = arith.constant 2 : i32
      %171 = arith.muli %c2_i32_207, %164 : i32
      %c6_i32_208 = arith.constant 6 : i32
      %172 = arith.addi %c6_i32_208, %171 : i32
      %173 = arith.index_cast %172 : i32 to index
      %c0_209 = arith.constant 0 : index
      %174 = tpu.strided_load %arg21[%173, %c0_209] {strides = array<i32: 2, 1>} : memref<3376x16xf32, #tpu.memory_space<vmem>>, vector<56x16xf32>
      %175 = arith.truncf %174 : vector<56x16xf32> to vector<56x16xbf16>
      %cst_210 = arith.constant dense<0.000000e+00> : vector<56x32xf32>
      %176 = tpu.matmul %175, %72, %cst_210 {dimension_numbers = #tpu.dot_dimension_numbers<[1], [0], [0], [1], [0, 0, 1, 1], [], []>} : vector<56x16xbf16>, vector<16x32xbf16>, vector<56x32xf32> -> vector<56x32xf32>
      %177 = arith.addf %170, %176 : vector<56x32xf32>
      %c2_i32_211 = arith.constant 2 : i32
      %178 = arith.muli %c2_i32_211, %164 : i32
      %c7_i32 = arith.constant 7 : i32
      %179 = arith.addi %c7_i32, %178 : i32
      %180 = arith.index_cast %179 : i32 to index
      %c0_212 = arith.constant 0 : index
      %181 = tpu.strided_load %arg21[%180, %c0_212] {strides = array<i32: 2, 1>} : memref<3376x16xf32, #tpu.memory_space<vmem>>, vector<56x16xf32>
      %182 = arith.truncf %181 : vector<56x16xf32> to vector<56x16xbf16>
      %cst_213 = arith.constant dense<0.000000e+00> : vector<56x32xf32>
      %183 = tpu.matmul %182, %74, %cst_213 {dimension_numbers = #tpu.dot_dimension_numbers<[1], [0], [0], [1], [0, 0, 1, 1], [], []>} : vector<56x16xbf16>, vector<16x32xbf16>, vector<56x32xf32> -> vector<56x32xf32>
      %184 = arith.addf %177, %183 : vector<56x32xf32>
      %c2_i32_214 = arith.constant 2 : i32
      %185 = arith.muli %c2_i32_214, %164 : i32
      %c63_i32 = arith.constant 63 : i32
      %186 = arith.addi %c63_i32, %185 : i32
      %187 = arith.index_cast %186 : i32 to index
      %c0_215 = arith.constant 0 : index
      %188 = tpu.strided_load %arg21[%187, %c0_215] {strides = array<i32: 2, 1>} : memref<3376x16xf32, #tpu.memory_space<vmem>>, vector<56x16xf32>
      %189 = arith.truncf %188 : vector<56x16xf32> to vector<56x16xbf16>
      %cst_216 = arith.constant dense<0.000000e+00> : vector<56x32xf32>
      %190 = tpu.matmul %189, %76, %cst_216 {dimension_numbers = #tpu.dot_dimension_numbers<[1], [0], [0], [1], [0, 0, 1, 1], [], []>} : vector<56x16xbf16>, vector<16x32xbf16>, vector<56x32xf32> -> vector<56x32xf32>
      %191 = arith.addf %184, %190 : vector<56x32xf32>
      %c2_i32_217 = arith.constant 2 : i32
      %192 = arith.muli %c2_i32_217, %164 : i32
      %c64_i32 = arith.constant 64 : i32
      %193 = arith.addi %c64_i32, %192 : i32
      %194 = arith.index_cast %193 : i32 to index
      %c0_218 = arith.constant 0 : index
      %195 = tpu.strided_load %arg21[%194, %c0_218] {strides = array<i32: 2, 1>} : memref<3376x16xf32, #tpu.memory_space<vmem>>, vector<56x16xf32>
      %196 = arith.truncf %195 : vector<56x16xf32> to vector<56x16xbf16>
      %cst_219 = arith.constant dense<0.000000e+00> : vector<56x32xf32>
      %197 = tpu.matmul %196, %78, %cst_219 {dimension_numbers = #tpu.dot_dimension_numbers<[1], [0], [0], [1], [0, 0, 1, 1], [], []>} : vector<56x16xbf16>, vector<16x32xbf16>, vector<56x32xf32> -> vector<56x32xf32>
      %198 = arith.addf %191, %197 : vector<56x32xf32>
      %c2_i32_220 = arith.constant 2 : i32
      %199 = arith.muli %c2_i32_220, %164 : i32
      %c65_i32 = arith.constant 65 : i32
      %200 = arith.addi %c65_i32, %199 : i32
      %201 = arith.index_cast %200 : i32 to index
      %c0_221 = arith.constant 0 : index
      %202 = tpu.strided_load %arg21[%201, %c0_221] {strides = array<i32: 2, 1>} : memref<3376x16xf32, #tpu.memory_space<vmem>>, vector<56x16xf32>
      %203 = arith.truncf %202 : vector<56x16xf32> to vector<56x16xbf16>
      %cst_222 = arith.constant dense<0.000000e+00> : vector<56x32xf32>
      %204 = tpu.matmul %203, %80, %cst_222 {dimension_numbers = #tpu.dot_dimension_numbers<[1], [0], [0], [1], [0, 0, 1, 1], [], []>} : vector<56x16xbf16>, vector<16x32xbf16>, vector<56x32xf32> -> vector<56x32xf32>
      %205 = arith.addf %198, %204 : vector<56x32xf32>
      %c2_i32_223 = arith.constant 2 : i32
      %206 = arith.muli %c2_i32_223, %164 : i32
      %c121_i32 = arith.constant 121 : i32
      %207 = arith.addi %c121_i32, %206 : i32
      %208 = arith.index_cast %207 : i32 to index
      %c0_224 = arith.constant 0 : index
      %209 = tpu.strided_load %arg21[%208, %c0_224] {strides = array<i32: 2, 1>} : memref<3376x16xf32, #tpu.memory_space<vmem>>, vector<56x16xf32>
      %210 = arith.truncf %209 : vector<56x16xf32> to vector<56x16xbf16>
      %cst_225 = arith.constant dense<0.000000e+00> : vector<56x32xf32>
      %211 = tpu.matmul %210, %82, %cst_225 {dimension_numbers = #tpu.dot_dimension_numbers<[1], [0], [0], [1], [0, 0, 1, 1], [], []>} : vector<56x16xbf16>, vector<16x32xbf16>, vector<56x32xf32> -> vector<56x32xf32>
      %212 = arith.addf %205, %211 : vector<56x32xf32>
      %c2_i32_226 = arith.constant 2 : i32
      %213 = arith.muli %c2_i32_226, %164 : i32
      %c122_i32 = arith.constant 122 : i32
      %214 = arith.addi %c122_i32, %213 : i32
      %215 = arith.index_cast %214 : i32 to index
      %c0_227 = arith.constant 0 : index
      %216 = tpu.strided_load %arg21[%215, %c0_227] {strides = array<i32: 2, 1>} : memref<3376x16xf32, #tpu.memory_space<vmem>>, vector<56x16xf32>
      %217 = arith.truncf %216 : vector<56x16xf32> to vector<56x16xbf16>
      %cst_228 = arith.constant dense<0.000000e+00> : vector<56x32xf32>
      %218 = tpu.matmul %217, %84, %cst_228 {dimension_numbers = #tpu.dot_dimension_numbers<[1], [0], [0], [1], [0, 0, 1, 1], [], []>} : vector<56x16xbf16>, vector<16x32xbf16>, vector<56x32xf32> -> vector<56x32xf32>
      %219 = arith.addf %212, %218 : vector<56x32xf32>
      %c2_i32_229 = arith.constant 2 : i32
      %220 = arith.muli %c2_i32_229, %164 : i32
      %c123_i32 = arith.constant 123 : i32
      %221 = arith.addi %c123_i32, %220 : i32
      %222 = arith.index_cast %221 : i32 to index
      %c0_230 = arith.constant 0 : index
      %223 = tpu.strided_load %arg21[%222, %c0_230] {strides = array<i32: 2, 1>} : memref<3376x16xf32, #tpu.memory_space<vmem>>, vector<56x16xf32>
      %224 = arith.truncf %223 : vector<56x16xf32> to vector<56x16xbf16>
      %cst_231 = arith.constant dense<0.000000e+00> : vector<56x32xf32>
      %225 = tpu.matmul %224, %86, %cst_231 {dimension_numbers = #tpu.dot_dimension_numbers<[1], [0], [0], [1], [0, 0, 1, 1], [], []>} : vector<56x16xbf16>, vector<16x32xbf16>, vector<56x32xf32> -> vector<56x32xf32>
      %226 = arith.addf %219, %225 : vector<56x32xf32>
      %c56_i32_232 = arith.constant 56 : i32
      %227 = arith.muli %arg24, %c56_i32_232 : i32
      %228 = arith.sitofp %227 : i32 to f32
      %229 = vector.broadcast %228 : f32 to vector<56x1xf32>
      %230 = arith.addf %89, %229 : vector<56x1xf32>
      %cst_233 = arith.constant 5.000000e-01 : f32
      %231 = vector.broadcast %cst_233 : f32 to vector<56x1xf32>
      %232 = arith.addf %230, %231 : vector<56x1xf32>
      %cst_234 = arith.constant 0.0172413792 : f32
      %233 = vector.broadcast %cst_234 : f32 to vector<56x1xf32>
      %234 = arith.mulf %232, %233 : vector<56x1xf32>
      %235 = math.floor %234 : vector<56x1xf32>
      %cst_235 = arith.constant 5.800000e+01 : f32
      %236 = vector.broadcast %cst_235 : f32 to vector<56x1xf32>
      %237 = arith.mulf %235, %236 : vector<56x1xf32>
      %238 = arith.subf %230, %237 : vector<56x1xf32>
      %cst_236 = arith.constant 2.800000e+01 : f32
      %239 = vector.broadcast %cst_236 : f32 to vector<56x1xf32>
      %240 = arith.cmpf olt, %238, %239 : vector<56x1xf32>
      %241 = vector.broadcast %87 : vector<1x32xf32> to vector<56x32xf32>
      %242 = arith.addf %226, %241 : vector<56x32xf32>
      %cst_237 = arith.constant 0.000000e+00 : f32
      %243 = vector.broadcast %cst_237 : f32 to vector<56x32xf32>
      %244 = arith.maximumf %242, %243 : vector<56x32xf32>
      %cst_238 = arith.constant 0.000000e+00 : f32
      %245 = vector.shape_cast %240 : vector<56x1xi1> to vector<56x1xi1>
      %246 = vector.broadcast %245 : vector<56x1xi1> to vector<56x32xi1>
      %247 = vector.broadcast %cst_238 : f32 to vector<56x32xf32>
      %248 = arith.select %246, %244, %247 : vector<56x32xi1>, vector<56x32xf32>
      %c64_i32_239 = arith.constant 64 : i32
      %249 = arith.addi %c64_i32_239, %164 : i32
      %250 = arith.index_cast %249 : i32 to index
      %c0_240 = arith.constant 0 : index
      %251 = vector.load %arg22[%250, %c0_240] : memref<1752x32xf32, #tpu.memory_space<vmem>>, vector<56x32xf32>
      tpu.vector_store %arg22[%250, %c0_240], %248 {strides = array<i32>} : memref<1752x32xf32, #tpu.memory_space<vmem>>, vector<56x32xf32>,
    }
    %c29_i32_121 = arith.constant 29 : i32
    %c0_122 = arith.constant 0 : index
    %c0_123 = arith.constant 0 : index
    %c0_124 = arith.constant 0 : index
    %91 = vector.load %arg10[%c0_122, %c0_123, %c0_124] : memref<9x32x32xbf16, #tpu.memory_space<vmem>>, vector<1x32x32xbf16>
    %92 = vector.shape_cast %91 : vector<1x32x32xbf16> to vector<32x32xbf16>
    %c1_125 = arith.constant 1 : index
    %c0_126 = arith.constant 0 : index
    %c0_127 = arith.constant 0 : index
    %93 = vector.load %arg10[%c1_125, %c0_126, %c0_127] : memref<9x32x32xbf16, #tpu.memory_space<vmem>>, vector<1x32x32xbf16>
    %94 = vector.shape_cast %93 : vector<1x32x32xbf16> to vector<32x32xbf16>
    %c2_128 = arith.constant 2 : index
    %c0_129 = arith.constant 0 : index
    %c0_130 = arith.constant 0 : index
    %95 = vector.load %arg10[%c2_128, %c0_129, %c0_130] : memref<9x32x32xbf16, #tpu.memory_space<vmem>>, vector<1x32x32xbf16>
    %96 = vector.shape_cast %95 : vector<1x32x32xbf16> to vector<32x32xbf16>
    %c3_131 = arith.constant 3 : index
    %c0_132 = arith.constant 0 : index
    %c0_133 = arith.constant 0 : index
    %97 = vector.load %arg10[%c3_131, %c0_132, %c0_133] : memref<9x32x32xbf16, #tpu.memory_space<vmem>>, vector<1x32x32xbf16>
    %98 = vector.shape_cast %97 : vector<1x32x32xbf16> to vector<32x32xbf16>
    %c4_134 = arith.constant 4 : index
    %c0_135 = arith.constant 0 : index
    %c0_136 = arith.constant 0 : index
    %99 = vector.load %arg10[%c4_134, %c0_135, %c0_136] : memref<9x32x32xbf16, #tpu.memory_space<vmem>>, vector<1x32x32xbf16>
    %100 = vector.shape_cast %99 : vector<1x32x32xbf16> to vector<32x32xbf16>
    %c5_137 = arith.constant 5 : index
    %c0_138 = arith.constant 0 : index
    %c0_139 = arith.constant 0 : index
    %101 = vector.load %arg10[%c5_137, %c0_138, %c0_139] : memref<9x32x32xbf16, #tpu.memory_space<vmem>>, vector<1x32x32xbf16>
    %102 = vector.shape_cast %101 : vector<1x32x32xbf16> to vector<32x32xbf16>
    %c6_140 = arith.constant 6 : index
    %c0_141 = arith.constant 0 : index
    %c0_142 = arith.constant 0 : index
    %103 = vector.load %arg10[%c6_140, %c0_141, %c0_142] : memref<9x32x32xbf16, #tpu.memory_space<vmem>>, vector<1x32x32xbf16>
    %104 = vector.shape_cast %103 : vector<1x32x32xbf16> to vector<32x32xbf16>
    %c7_143 = arith.constant 7 : index
    %c0_144 = arith.constant 0 : index
    %c0_145 = arith.constant 0 : index
    %105 = vector.load %arg10[%c7_143, %c0_144, %c0_145] : memref<9x32x32xbf16, #tpu.memory_space<vmem>>, vector<1x32x32xbf16>
    %106 = vector.shape_cast %105 : vector<1x32x32xbf16> to vector<32x32xbf16>
    %c8_146 = arith.constant 8 : index
    %c0_147 = arith.constant 0 : index
    %c0_148 = arith.constant 0 : index
    %107 = vector.load %arg10[%c8_146, %c0_147, %c0_148] : memref<9x32x32xbf16, #tpu.memory_space<vmem>>, vector<1x32x32xbf16>
    %108 = vector.shape_cast %107 : vector<1x32x32xbf16> to vector<32x32xbf16>
    %c0_149 = arith.constant 0 : index
    %c0_150 = arith.constant 0 : index
    %109 = vector.load %arg11[%c0_149, %c0_150] : memref<1x32xf32, #tpu.memory_space<vmem>>, vector<1x32xf32>
    %110 = tpu.iota {dimensions = array<i32: 0>} : vector<56x1xi32>
    %111 = arith.sitofp %110 : vector<56x1xi32> to vector<56x1xf32>
    %c0_i32_151 = arith.constant 0 : i32
    %c29_i32_152 = arith.constant 29 : i32
    %112 = arith.addi %c0_i32_151, %c29_i32_152 : i32
    %c1_i32_153 = arith.constant 1 : i32
    scf.for %arg24 = %c0_i32_151 to %112 step %c1_i32_153  : i32 {
      %c56_i32 = arith.constant 56 : i32
      %163 = arith.muli %arg24, %c56_i32 : i32
      %164 = tpu.assume_multiple %163, 8 : i32
      %c5_i32 = arith.constant 5 : i32
      %165 = arith.addi %c5_i32, %164 : i32
      %166 = arith.index_cast %165 : i32 to index
      %c0_205 = arith.constant 0 : index
      %167 = vector.load %arg22[%166, %c0_205] : memref<1752x32xf32, #tpu.memory_space<vmem>>, vector<56x32xf32>
      %168 = arith.truncf %167 : vector<56x32xf32> to vector<56x32xbf16>
      %cst_206 = arith.constant dense<0.000000e+00> : vector<56x32xf32>
      %169 = tpu.matmul %168, %92, %cst_206 {dimension_numbers = #tpu.dot_dimension_numbers<[1], [0], [0], [1], [0, 0, 1, 1], [], []>} : vector<56x32xbf16>, vector<32x32xbf16>, vector<56x32xf32> -> vector<56x32xf32>
      %c6_i32_207 = arith.constant 6 : i32
      %170 = arith.addi %c6_i32_207, %164 : i32
      %171 = arith.index_cast %170 : i32 to index
      %c0_208 = arith.constant 0 : index
      %172 = vector.load %arg22[%171, %c0_208] : memref<1752x32xf32, #tpu.memory_space<vmem>>, vector<56x32xf32>
      %173 = arith.truncf %172 : vector<56x32xf32> to vector<56x32xbf16>
      %cst_209 = arith.constant dense<0.000000e+00> : vector<56x32xf32>
      %174 = tpu.matmul %173, %94, %cst_209 {dimension_numbers = #tpu.dot_dimension_numbers<[1], [0], [0], [1], [0, 0, 1, 1], [], []>} : vector<56x32xbf16>, vector<32x32xbf16>, vector<56x32xf32> -> vector<56x32xf32>
      %175 = arith.addf %169, %174 : vector<56x32xf32>
      %c7_i32 = arith.constant 7 : i32
      %176 = arith.addi %c7_i32, %164 : i32
      %177 = arith.index_cast %176 : i32 to index
      %c0_210 = arith.constant 0 : index
      %178 = vector.load %arg22[%177, %c0_210] : memref<1752x32xf32, #tpu.memory_space<vmem>>, vector<56x32xf32>
      %179 = arith.truncf %178 : vector<56x32xf32> to vector<56x32xbf16>
      %cst_211 = arith.constant dense<0.000000e+00> : vector<56x32xf32>
      %180 = tpu.matmul %179, %96, %cst_211 {dimension_numbers = #tpu.dot_dimension_numbers<[1], [0], [0], [1], [0, 0, 1, 1], [], []>} : vector<56x32xbf16>, vector<32x32xbf16>, vector<56x32xf32> -> vector<56x32xf32>
      %181 = arith.addf %175, %180 : vector<56x32xf32>
      %c63_i32 = arith.constant 63 : i32
      %182 = arith.addi %c63_i32, %164 : i32
      %183 = arith.index_cast %182 : i32 to index
      %c0_212 = arith.constant 0 : index
      %184 = vector.load %arg22[%183, %c0_212] : memref<1752x32xf32, #tpu.memory_space<vmem>>, vector<56x32xf32>
      %185 = arith.truncf %184 : vector<56x32xf32> to vector<56x32xbf16>
      %cst_213 = arith.constant dense<0.000000e+00> : vector<56x32xf32>
      %186 = tpu.matmul %185, %98, %cst_213 {dimension_numbers = #tpu.dot_dimension_numbers<[1], [0], [0], [1], [0, 0, 1, 1], [], []>} : vector<56x32xbf16>, vector<32x32xbf16>, vector<56x32xf32> -> vector<56x32xf32>
      %187 = arith.addf %181, %186 : vector<56x32xf32>
      %c64_i32 = arith.constant 64 : i32
      %188 = arith.addi %c64_i32, %164 : i32
      %189 = arith.index_cast %188 : i32 to index
      %c0_214 = arith.constant 0 : index
      %190 = vector.load %arg22[%189, %c0_214] : memref<1752x32xf32, #tpu.memory_space<vmem>>, vector<56x32xf32>
      %191 = arith.truncf %190 : vector<56x32xf32> to vector<56x32xbf16>
      %cst_215 = arith.constant dense<0.000000e+00> : vector<56x32xf32>
      %192 = tpu.matmul %191, %100, %cst_215 {dimension_numbers = #tpu.dot_dimension_numbers<[1], [0], [0], [1], [0, 0, 1, 1], [], []>} : vector<56x32xbf16>, vector<32x32xbf16>, vector<56x32xf32> -> vector<56x32xf32>
      %193 = arith.addf %187, %192 : vector<56x32xf32>
      %c65_i32 = arith.constant 65 : i32
      %194 = arith.addi %c65_i32, %164 : i32
      %195 = arith.index_cast %194 : i32 to index
      %c0_216 = arith.constant 0 : index
      %196 = vector.load %arg22[%195, %c0_216] : memref<1752x32xf32, #tpu.memory_space<vmem>>, vector<56x32xf32>
      %197 = arith.truncf %196 : vector<56x32xf32> to vector<56x32xbf16>
      %cst_217 = arith.constant dense<0.000000e+00> : vector<56x32xf32>
      %198 = tpu.matmul %197, %102, %cst_217 {dimension_numbers = #tpu.dot_dimension_numbers<[1], [0], [0], [1], [0, 0, 1, 1], [], []>} : vector<56x32xbf16>, vector<32x32xbf16>, vector<56x32xf32> -> vector<56x32xf32>
      %199 = arith.addf %193, %198 : vector<56x32xf32>
      %c121_i32 = arith.constant 121 : i32
      %200 = arith.addi %c121_i32, %164 : i32
      %201 = arith.index_cast %200 : i32 to index
      %c0_218 = arith.constant 0 : index
      %202 = vector.load %arg22[%201, %c0_218] : memref<1752x32xf32, #tpu.memory_space<vmem>>, vector<56x32xf32>
      %203 = arith.truncf %202 : vector<56x32xf32> to vector<56x32xbf16>
      %cst_219 = arith.constant dense<0.000000e+00> : vector<56x32xf32>
      %204 = tpu.matmul %203, %104, %cst_219 {dimension_numbers = #tpu.dot_dimension_numbers<[1], [0], [0], [1], [0, 0, 1, 1], [], []>} : vector<56x32xbf16>, vector<32x32xbf16>, vector<56x32xf32> -> vector<56x32xf32>
      %205 = arith.addf %199, %204 : vector<56x32xf32>
      %c122_i32 = arith.constant 122 : i32
      %206 = arith.addi %c122_i32, %164 : i32
      %207 = arith.index_cast %206 : i32 to index
      %c0_220 = arith.constant 0 : index
      %208 = vector.load %arg22[%207, %c0_220] : memref<1752x32xf32, #tpu.memory_space<vmem>>, vector<56x32xf32>
      %209 = arith.truncf %208 : vector<56x32xf32> to vector<56x32xbf16>
      %cst_221 = arith.constant dense<0.000000e+00> : vector<56x32xf32>
      %210 = tpu.matmul %209, %106, %cst_221 {dimension_numbers = #tpu.dot_dimension_numbers<[1], [0], [0], [1], [0, 0, 1, 1], [], []>} : vector<56x32xbf16>, vector<32x32xbf16>, vector<56x32xf32> -> vector<56x32xf32>
      %211 = arith.addf %205, %210 : vector<56x32xf32>
      %c123_i32 = arith.constant 123 : i32
      %212 = arith.addi %c123_i32, %164 : i32
      %213 = arith.index_cast %212 : i32 to index
      %c0_222 = arith.constant 0 : index
      %214 = vector.load %arg22[%213, %c0_222] : memref<1752x32xf32, #tpu.memory_space<vmem>>, vector<56x32xf32>
      %215 = arith.truncf %214 : vector<56x32xf32> to vector<56x32xbf16>
      %cst_223 = arith.constant dense<0.000000e+00> : vector<56x32xf32>
      %216 = tpu.matmul %215, %108, %cst_223 {dimension_numbers = #tpu.dot_dimension_numbers<[1], [0], [0], [1], [0, 0, 1, 1], [], []>} : vector<56x32xbf16>, vector<32x32xbf16>, vector<56x32xf32> -> vector<56x32xf32>
      %217 = arith.addf %211, %216 : vector<56x32xf32>
      %c56_i32_224 = arith.constant 56 : i32
      %218 = arith.muli %arg24, %c56_i32_224 : i32
      %219 = arith.sitofp %218 : i32 to f32
      %220 = vector.broadcast %219 : f32 to vector<56x1xf32>
      %221 = arith.addf %111, %220 : vector<56x1xf32>
      %cst_225 = arith.constant 5.000000e-01 : f32
      %222 = vector.broadcast %cst_225 : f32 to vector<56x1xf32>
      %223 = arith.addf %221, %222 : vector<56x1xf32>
      %cst_226 = arith.constant 0.0172413792 : f32
      %224 = vector.broadcast %cst_226 : f32 to vector<56x1xf32>
      %225 = arith.mulf %223, %224 : vector<56x1xf32>
      %226 = math.floor %225 : vector<56x1xf32>
      %cst_227 = arith.constant 5.800000e+01 : f32
      %227 = vector.broadcast %cst_227 : f32 to vector<56x1xf32>
      %228 = arith.mulf %226, %227 : vector<56x1xf32>
      %229 = arith.subf %221, %228 : vector<56x1xf32>
      %cst_228 = arith.constant 2.800000e+01 : f32
      %230 = vector.broadcast %cst_228 : f32 to vector<56x1xf32>
      %231 = arith.cmpf olt, %229, %230 : vector<56x1xf32>
      %232 = vector.broadcast %109 : vector<1x32xf32> to vector<56x32xf32>
      %233 = arith.addf %217, %232 : vector<56x32xf32>
      %cst_229 = arith.constant 0.000000e+00 : f32
      %234 = vector.broadcast %cst_229 : f32 to vector<56x32xf32>
      %235 = arith.maximumf %233, %234 : vector<56x32xf32>
      %cst_230 = arith.constant 0.000000e+00 : f32
      %236 = vector.shape_cast %231 : vector<56x1xi1> to vector<56x1xi1>
      %237 = vector.broadcast %236 : vector<56x1xi1> to vector<56x32xi1>
      %238 = vector.broadcast %cst_230 : f32 to vector<56x32xf32>
      %239 = arith.select %237, %235, %238 : vector<56x32xi1>, vector<56x32xf32>
      %c64_i32_231 = arith.constant 64 : i32
      %240 = arith.addi %c64_i32_231, %164 : i32
      %241 = arith.index_cast %240 : i32 to index
      %c0_232 = arith.constant 0 : index
      %242 = vector.load %arg23[%241, %c0_232] : memref<1752x32xf32, #tpu.memory_space<vmem>>, vector<56x32xf32>
      tpu.vector_store %arg23[%241, %c0_232], %239 {strides = array<i32>} : memref<1752x32xf32, #tpu.memory_space<vmem>>, vector<56x32xf32>,
    }
    %c29_i32_154 = arith.constant 29 : i32
    %c0_155 = arith.constant 0 : index
    %c0_156 = arith.constant 0 : index
    %c0_157 = arith.constant 0 : index
    %113 = vector.load %arg12[%c0_155, %c0_156, %c0_157] : memref<9x32x32xbf16, #tpu.memory_space<vmem>>, vector<1x32x32xbf16>
    %114 = vector.shape_cast %113 : vector<1x32x32xbf16> to vector<32x32xbf16>
    %c1_158 = arith.constant 1 : index
    %c0_159 = arith.constant 0 : index
    %c0_160 = arith.constant 0 : index
    %115 = vector.load %arg12[%c1_158, %c0_159, %c0_160] : memref<9x32x32xbf16, #tpu.memory_space<vmem>>, vector<1x32x32xbf16>
    %116 = vector.shape_cast %115 : vector<1x32x32xbf16> to vector<32x32xbf16>
    %c2_161 = arith.constant 2 : index
    %c0_162 = arith.constant 0 : index
    %c0_163 = arith.constant 0 : index
    %117 = vector.load %arg12[%c2_161, %c0_162, %c0_163] : memref<9x32x32xbf16, #tpu.memory_space<vmem>>, vector<1x32x32xbf16>
    %118 = vector.shape_cast %117 : vector<1x32x32xbf16> to vector<32x32xbf16>
    %c3_164 = arith.constant 3 : index
    %c0_165 = arith.constant 0 : index
    %c0_166 = arith.constant 0 : index
    %119 = vector.load %arg12[%c3_164, %c0_165, %c0_166] : memref<9x32x32xbf16, #tpu.memory_space<vmem>>, vector<1x32x32xbf16>
    %120 = vector.shape_cast %119 : vector<1x32x32xbf16> to vector<32x32xbf16>
    %c4_167 = arith.constant 4 : index
    %c0_168 = arith.constant 0 : index
    %c0_169 = arith.constant 0 : index
    %121 = vector.load %arg12[%c4_167, %c0_168, %c0_169] : memref<9x32x32xbf16, #tpu.memory_space<vmem>>, vector<1x32x32xbf16>
    %122 = vector.shape_cast %121 : vector<1x32x32xbf16> to vector<32x32xbf16>
    %c5_170 = arith.constant 5 : index
    %c0_171 = arith.constant 0 : index
    %c0_172 = arith.constant 0 : index
    %123 = vector.load %arg12[%c5_170, %c0_171, %c0_172] : memref<9x32x32xbf16, #tpu.memory_space<vmem>>, vector<1x32x32xbf16>
    %124 = vector.shape_cast %123 : vector<1x32x32xbf16> to vector<32x32xbf16>
    %c6_173 = arith.constant 6 : index
    %c0_174 = arith.constant 0 : index
    %c0_175 = arith.constant 0 : index
    %125 = vector.load %arg12[%c6_173, %c0_174, %c0_175] : memref<9x32x32xbf16, #tpu.memory_space<vmem>>, vector<1x32x32xbf16>
    %126 = vector.shape_cast %125 : vector<1x32x32xbf16> to vector<32x32xbf16>
    %c7_176 = arith.constant 7 : index
    %c0_177 = arith.constant 0 : index
    %c0_178 = arith.constant 0 : index
    %127 = vector.load %arg12[%c7_176, %c0_177, %c0_178] : memref<9x32x32xbf16, #tpu.memory_space<vmem>>, vector<1x32x32xbf16>
    %128 = vector.shape_cast %127 : vector<1x32x32xbf16> to vector<32x32xbf16>
    %c8_179 = arith.constant 8 : index
    %c0_180 = arith.constant 0 : index
    %c0_181 = arith.constant 0 : index
    %129 = vector.load %arg12[%c8_179, %c0_180, %c0_181] : memref<9x32x32xbf16, #tpu.memory_space<vmem>>, vector<1x32x32xbf16>
    %130 = vector.shape_cast %129 : vector<1x32x32xbf16> to vector<32x32xbf16>
    %c0_182 = arith.constant 0 : index
    %c0_183 = arith.constant 0 : index
    %131 = vector.load %arg13[%c0_182, %c0_183] : memref<1x32xf32, #tpu.memory_space<vmem>>, vector<1x32xf32>
    %132 = tpu.iota {dimensions = array<i32: 0>} : vector<56x1xi32>
    %133 = arith.sitofp %132 : vector<56x1xi32> to vector<56x1xf32>
    %cst_184 = arith.constant 0.000000e+00 : f32
    %134 = vector.broadcast %cst_184 : f32 to vector<1x32xf32>
    %c0_i32_185 = arith.constant 0 : i32
    %c29_i32_186 = arith.constant 29 : i32
    %135 = arith.addi %c0_i32_185, %c29_i32_186 : i32
    %c1_i32_187 = arith.constant 1 : i32
    %136 = scf.for %arg24 = %c0_i32_185 to %135 step %c1_i32_187 iter_args(%arg25 = %134) -> (vector<1x32xf32>)  : i32 {
      %c56_i32 = arith.constant 56 : i32
      %163 = arith.muli %arg24, %c56_i32 : i32
      %164 = tpu.assume_multiple %163, 8 : i32
      %c5_i32 = arith.constant 5 : i32
      %165 = arith.addi %c5_i32, %164 : i32
      %166 = arith.index_cast %165 : i32 to index
      %c0_205 = arith.constant 0 : index
      %167 = vector.load %arg23[%166, %c0_205] : memref<1752x32xf32, #tpu.memory_space<vmem>>, vector<56x32xf32>
      %168 = arith.truncf %167 : vector<56x32xf32> to vector<56x32xbf16>
      %cst_206 = arith.constant dense<0.000000e+00> : vector<56x32xf32>
      %169 = tpu.matmul %168, %114, %cst_206 {dimension_numbers = #tpu.dot_dimension_numbers<[1], [0], [0], [1], [0, 0, 1, 1], [], []>} : vector<56x32xbf16>, vector<32x32xbf16>, vector<56x32xf32> -> vector<56x32xf32>
      %c6_i32_207 = arith.constant 6 : i32
      %170 = arith.addi %c6_i32_207, %164 : i32
      %171 = arith.index_cast %170 : i32 to index
      %c0_208 = arith.constant 0 : index
      %172 = vector.load %arg23[%171, %c0_208] : memref<1752x32xf32, #tpu.memory_space<vmem>>, vector<56x32xf32>
      %173 = arith.truncf %172 : vector<56x32xf32> to vector<56x32xbf16>
      %cst_209 = arith.constant dense<0.000000e+00> : vector<56x32xf32>
      %174 = tpu.matmul %173, %116, %cst_209 {dimension_numbers = #tpu.dot_dimension_numbers<[1], [0], [0], [1], [0, 0, 1, 1], [], []>} : vector<56x32xbf16>, vector<32x32xbf16>, vector<56x32xf32> -> vector<56x32xf32>
      %175 = arith.addf %169, %174 : vector<56x32xf32>
      %c7_i32 = arith.constant 7 : i32
      %176 = arith.addi %c7_i32, %164 : i32
      %177 = arith.index_cast %176 : i32 to index
      %c0_210 = arith.constant 0 : index
      %178 = vector.load %arg23[%177, %c0_210] : memref<1752x32xf32, #tpu.memory_space<vmem>>, vector<56x32xf32>
      %179 = arith.truncf %178 : vector<56x32xf32> to vector<56x32xbf16>
      %cst_211 = arith.constant dense<0.000000e+00> : vector<56x32xf32>
      %180 = tpu.matmul %179, %118, %cst_211 {dimension_numbers = #tpu.dot_dimension_numbers<[1], [0], [0], [1], [0, 0, 1, 1], [], []>} : vector<56x32xbf16>, vector<32x32xbf16>, vector<56x32xf32> -> vector<56x32xf32>
      %181 = arith.addf %175, %180 : vector<56x32xf32>
      %c63_i32 = arith.constant 63 : i32
      %182 = arith.addi %c63_i32, %164 : i32
      %183 = arith.index_cast %182 : i32 to index
      %c0_212 = arith.constant 0 : index
      %184 = vector.load %arg23[%183, %c0_212] : memref<1752x32xf32, #tpu.memory_space<vmem>>, vector<56x32xf32>
      %185 = arith.truncf %184 : vector<56x32xf32> to vector<56x32xbf16>
      %cst_213 = arith.constant dense<0.000000e+00> : vector<56x32xf32>
      %186 = tpu.matmul %185, %120, %cst_213 {dimension_numbers = #tpu.dot_dimension_numbers<[1], [0], [0], [1], [0, 0, 1, 1], [], []>} : vector<56x32xbf16>, vector<32x32xbf16>, vector<56x32xf32> -> vector<56x32xf32>
      %187 = arith.addf %181, %186 : vector<56x32xf32>
      %c64_i32 = arith.constant 64 : i32
      %188 = arith.addi %c64_i32, %164 : i32
      %189 = arith.index_cast %188 : i32 to index
      %c0_214 = arith.constant 0 : index
      %190 = vector.load %arg23[%189, %c0_214] : memref<1752x32xf32, #tpu.memory_space<vmem>>, vector<56x32xf32>
      %191 = arith.truncf %190 : vector<56x32xf32> to vector<56x32xbf16>
      %cst_215 = arith.constant dense<0.000000e+00> : vector<56x32xf32>
      %192 = tpu.matmul %191, %122, %cst_215 {dimension_numbers = #tpu.dot_dimension_numbers<[1], [0], [0], [1], [0, 0, 1, 1], [], []>} : vector<56x32xbf16>, vector<32x32xbf16>, vector<56x32xf32> -> vector<56x32xf32>
      %193 = arith.addf %187, %192 : vector<56x32xf32>
      %c65_i32 = arith.constant 65 : i32
      %194 = arith.addi %c65_i32, %164 : i32
      %195 = arith.index_cast %194 : i32 to index
      %c0_216 = arith.constant 0 : index
      %196 = vector.load %arg23[%195, %c0_216] : memref<1752x32xf32, #tpu.memory_space<vmem>>, vector<56x32xf32>
      %197 = arith.truncf %196 : vector<56x32xf32> to vector<56x32xbf16>
      %cst_217 = arith.constant dense<0.000000e+00> : vector<56x32xf32>
      %198 = tpu.matmul %197, %124, %cst_217 {dimension_numbers = #tpu.dot_dimension_numbers<[1], [0], [0], [1], [0, 0, 1, 1], [], []>} : vector<56x32xbf16>, vector<32x32xbf16>, vector<56x32xf32> -> vector<56x32xf32>
      %199 = arith.addf %193, %198 : vector<56x32xf32>
      %c121_i32 = arith.constant 121 : i32
      %200 = arith.addi %c121_i32, %164 : i32
      %201 = arith.index_cast %200 : i32 to index
      %c0_218 = arith.constant 0 : index
      %202 = vector.load %arg23[%201, %c0_218] : memref<1752x32xf32, #tpu.memory_space<vmem>>, vector<56x32xf32>
      %203 = arith.truncf %202 : vector<56x32xf32> to vector<56x32xbf16>
      %cst_219 = arith.constant dense<0.000000e+00> : vector<56x32xf32>
      %204 = tpu.matmul %203, %126, %cst_219 {dimension_numbers = #tpu.dot_dimension_numbers<[1], [0], [0], [1], [0, 0, 1, 1], [], []>} : vector<56x32xbf16>, vector<32x32xbf16>, vector<56x32xf32> -> vector<56x32xf32>
      %205 = arith.addf %199, %204 : vector<56x32xf32>
      %c122_i32 = arith.constant 122 : i32
      %206 = arith.addi %c122_i32, %164 : i32
      %207 = arith.index_cast %206 : i32 to index
      %c0_220 = arith.constant 0 : index
      %208 = vector.load %arg23[%207, %c0_220] : memref<1752x32xf32, #tpu.memory_space<vmem>>, vector<56x32xf32>
      %209 = arith.truncf %208 : vector<56x32xf32> to vector<56x32xbf16>
      %cst_221 = arith.constant dense<0.000000e+00> : vector<56x32xf32>
      %210 = tpu.matmul %209, %128, %cst_221 {dimension_numbers = #tpu.dot_dimension_numbers<[1], [0], [0], [1], [0, 0, 1, 1], [], []>} : vector<56x32xbf16>, vector<32x32xbf16>, vector<56x32xf32> -> vector<56x32xf32>
      %211 = arith.addf %205, %210 : vector<56x32xf32>
      %c123_i32 = arith.constant 123 : i32
      %212 = arith.addi %c123_i32, %164 : i32
      %213 = arith.index_cast %212 : i32 to index
      %c0_222 = arith.constant 0 : index
      %214 = vector.load %arg23[%213, %c0_222] : memref<1752x32xf32, #tpu.memory_space<vmem>>, vector<56x32xf32>
      %215 = arith.truncf %214 : vector<56x32xf32> to vector<56x32xbf16>
      %cst_223 = arith.constant dense<0.000000e+00> : vector<56x32xf32>
      %216 = tpu.matmul %215, %130, %cst_223 {dimension_numbers = #tpu.dot_dimension_numbers<[1], [0], [0], [1], [0, 0, 1, 1], [], []>} : vector<56x32xbf16>, vector<32x32xbf16>, vector<56x32xf32> -> vector<56x32xf32>
      %217 = arith.addf %211, %216 : vector<56x32xf32>
      %c56_i32_224 = arith.constant 56 : i32
      %218 = arith.muli %arg24, %c56_i32_224 : i32
      %219 = arith.sitofp %218 : i32 to f32
      %220 = vector.broadcast %219 : f32 to vector<56x1xf32>
      %221 = arith.addf %133, %220 : vector<56x1xf32>
      %cst_225 = arith.constant 5.000000e-01 : f32
      %222 = vector.broadcast %cst_225 : f32 to vector<56x1xf32>
      %223 = arith.addf %221, %222 : vector<56x1xf32>
      %cst_226 = arith.constant 0.0172413792 : f32
      %224 = vector.broadcast %cst_226 : f32 to vector<56x1xf32>
      %225 = arith.mulf %223, %224 : vector<56x1xf32>
      %226 = math.floor %225 : vector<56x1xf32>
      %cst_227 = arith.constant 5.800000e+01 : f32
      %227 = vector.broadcast %cst_227 : f32 to vector<56x1xf32>
      %228 = arith.mulf %226, %227 : vector<56x1xf32>
      %229 = arith.subf %221, %228 : vector<56x1xf32>
      %cst_228 = arith.constant 2.800000e+01 : f32
      %230 = vector.broadcast %cst_228 : f32 to vector<56x1xf32>
      %231 = arith.cmpf olt, %229, %230 : vector<56x1xf32>
      %232 = vector.broadcast %131 : vector<1x32xf32> to vector<56x32xf32>
      %233 = arith.addf %217, %232 : vector<56x32xf32>
      %c64_i32_229 = arith.constant 64 : i32
      %234 = arith.addi %c64_i32_229, %164 : i32
      %235 = arith.index_cast %234 : i32 to index
      %c0_230 = arith.constant 0 : index
      %236 = vector.load %arg22[%235, %c0_230] : memref<1752x32xf32, #tpu.memory_space<vmem>>, vector<56x32xf32>
      %237 = arith.addf %233, %236 : vector<56x32xf32>
      %cst_231 = arith.constant 0.000000e+00 : f32
      %238 = vector.broadcast %cst_231 : f32 to vector<56x32xf32>
      %239 = arith.maximumf %237, %238 : vector<56x32xf32>
      %cst_232 = arith.constant 0.000000e+00 : f32
      %240 = vector.shape_cast %231 : vector<56x1xi1> to vector<56x1xi1>
      %241 = vector.broadcast %240 : vector<56x1xi1> to vector<56x32xi1>
      %242 = vector.broadcast %cst_232 : f32 to vector<56x32xf32>
      %243 = arith.select %241, %239, %242 : vector<56x32xi1>, vector<56x32xf32>
      %cst_233 = arith.constant dense<0.000000e+00> : vector<32xf32>
      %244 = vector.multi_reduction <add>, %243, %cst_233 [0] : vector<56x32xf32> to vector<32xf32>
      %245 = vector.shape_cast %244 : vector<32xf32> to vector<1x32xf32>
      %246 = arith.addf %arg25, %245 : vector<1x32xf32>
      scf.yield %246 : vector<1x32xf32>
    }
    %c29_i32_188 = arith.constant 29 : i32
    %cst_189 = arith.constant 0.00127551018 : f32
    %137 = vector.broadcast %cst_189 : f32 to vector<1x32xf32>
    %138 = arith.mulf %136, %137 : vector<1x32xf32>
    %139 = arith.truncf %138 : vector<1x32xf32> to vector<1x32xbf16>
    %c0_190 = arith.constant 0 : index
    %c0_191 = arith.constant 0 : index
    %140 = vector.load %arg14[%c0_190, %c0_191] : memref<32x6xbf16, #tpu.memory_space<vmem>>, vector<32x6xbf16>
    %cst_192 = arith.constant dense<0.000000e+00> : vector<1x6xf32>
    %141 = tpu.matmul %139, %140, %cst_192 {dimension_numbers = #tpu.dot_dimension_numbers<[1], [0], [0], [1], [0, 0, 1, 1], [], []>} : vector<1x32xbf16>, vector<32x6xbf16>, vector<1x6xf32> -> vector<1x6xf32>
    %c0_193 = arith.constant 0 : index
    %c0_194 = arith.constant 0 : index
    %142 = vector.load %arg15[%c0_193, %c0_194] : memref<1x6xf32, #tpu.memory_space<vmem>>, vector<1x6xf32>
    %143 = arith.addf %141, %142 : vector<1x6xf32>
    %c0_195 = arith.constant 0 : index
    %c0_196 = arith.constant 0 : index
    %144 = vector.load %arg18[%c0_195, %c0_196] : memref<1x6xf32, #tpu.memory_space<vmem>>, vector<1x6xf32>
    tpu.vector_store %arg18[%c0_195, %c0_196], %143 {strides = array<i32>} : memref<1x6xf32, #tpu.memory_space<vmem>>, vector<1x6xf32>,
    %cst_197 = arith.constant dense<0xFF800000> : vector<1xf32>
    %145 = vector.multi_reduction <maximumf>, %143, %cst_197 [1] : vector<1x6xf32> to vector<1xf32>
    %146 = vector.shape_cast %145 : vector<1xf32> to vector<1x1xf32>
    %147 = vector.broadcast %146 : vector<1x1xf32> to vector<1x6xf32>
    %148 = arith.subf %143, %147 : vector<1x6xf32>
    %149 = math.exp %148 : vector<1x6xf32>
    %cst_198 = arith.constant dense<0.000000e+00> : vector<1xf32>
    %150 = vector.multi_reduction <add>, %149, %cst_198 [1] : vector<1x6xf32> to vector<1xf32>
    %151 = vector.shape_cast %150 : vector<1xf32> to vector<1x1xf32>
    %cst_199 = arith.constant 1.000000e+00 : f32
    %152 = vector.broadcast %cst_199 : f32 to vector<1x1xf32>
    %153 = arith.divf %152, %151 : vector<1x1xf32>
    %c0_200 = arith.constant 0 : index
    %c0_201 = arith.constant 0 : index
    %154 = vector.load %arg16[%c0_200, %c0_201] : memref<1x1xf32, #tpu.memory_space<vmem>>, vector<1x1xf32>
    tpu.vector_store %arg16[%c0_200, %c0_201], %153 {strides = array<i32>} : memref<1x1xf32, #tpu.memory_space<vmem>>, vector<1x1xf32>,
    %155 = tpu.iota {dimensions = array<i32: 1>} : vector<1x6xi32>
    %156 = vector.broadcast %146 : vector<1x1xf32> to vector<1x6xf32>
    %157 = arith.cmpf oge, %143, %156 : vector<1x6xf32>
    %c6_i32 = arith.constant 6 : i32
    %158 = vector.broadcast %c6_i32 : i32 to vector<1x6xi32>
    %159 = arith.select %157, %155, %158 : vector<1x6xi1>, vector<1x6xi32>
    %cst_202 = arith.constant dense<2147483647> : vector<1xi32>
    %160 = vector.multi_reduction <minsi>, %159, %cst_202 [1] : vector<1x6xi32> to vector<1xi32>
    %161 = vector.shape_cast %160 : vector<1xi32> to vector<1x1xi32>
    %c0_203 = arith.constant 0 : index
    %c0_204 = arith.constant 0 : index
    %162 = vector.load %arg17[%c0_203, %c0_204] : memref<1x1xi32, #tpu.memory_space<vmem>>, vector<1x1xi32>
    tpu.vector_store %arg17[%c0_203, %c0_204], %161 {strides = array<i32>} : memref<1x1xi32, #tpu.memory_space<vmem>>, vector<1x1xi32>,
    return
  }
  func.func @transform_0(%arg0: i32) -> (i32, i32) {
    %c0_i32 = arith.constant 0 : i32
    %c0_i32_0 = arith.constant 0 : i32
    %c0_i32_1 = arith.constant 0 : i32
    return %c0_i32, %c0_i32_0 : i32, i32
  }
  func.func @transform_1(%arg0: i32) -> (i32, i32) {
    %c0_i32 = arith.constant 0 : i32
    %c0_i32_0 = arith.constant 0 : i32
    %c0_i32_1 = arith.constant 0 : i32
    return %c0_i32, %c0_i32_0 : i32, i32
  }
  func.func @transform_2(%arg0: i32) -> (i32, i32) {
    %c0_i32 = arith.constant 0 : i32
    %c0_i32_0 = arith.constant 0 : i32
    %c0_i32_1 = arith.constant 0 : i32
    return %c0_i32, %c0_i32_0 : i32, i32
  }
  func.func @transform_3(%arg0: i32) -> (i32, i32, i32) {
    %c0_i32 = arith.constant 0 : i32
    %c0_i32_0 = arith.constant 0 : i32
    %c0_i32_1 = arith.constant 0 : i32
    %c0_i32_2 = arith.constant 0 : i32
    return %c0_i32, %c0_i32_0, %c0_i32_1 : i32, i32, i32
  }
  func.func @transform_4(%arg0: i32) -> (i32, i32) {
    %c0_i32 = arith.constant 0 : i32
    %c0_i32_0 = arith.constant 0 : i32
    %c0_i32_1 = arith.constant 0 : i32
    return %c0_i32, %c0_i32_0 : i32, i32
  }
  func.func @transform_5(%arg0: i32) -> (i32, i32, i32) {
    %c0_i32 = arith.constant 0 : i32
    %c0_i32_0 = arith.constant 0 : i32
    %c0_i32_1 = arith.constant 0 : i32
    %c0_i32_2 = arith.constant 0 : i32
    return %c0_i32, %c0_i32_0, %c0_i32_1 : i32, i32, i32
  }
  func.func @transform_6(%arg0: i32) -> (i32, i32) {
    %c0_i32 = arith.constant 0 : i32
    %c0_i32_0 = arith.constant 0 : i32
    %c0_i32_1 = arith.constant 0 : i32
    return %c0_i32, %c0_i32_0 : i32, i32
  }
  func.func @transform_7(%arg0: i32) -> (i32, i32, i32) {
    %c0_i32 = arith.constant 0 : i32
    %c0_i32_0 = arith.constant 0 : i32
    %c0_i32_1 = arith.constant 0 : i32
    %c0_i32_2 = arith.constant 0 : i32
    return %c0_i32, %c0_i32_0, %c0_i32_1 : i32, i32, i32
  }
  func.func @transform_8(%arg0: i32) -> (i32, i32) {
    %c0_i32 = arith.constant 0 : i32
    %c0_i32_0 = arith.constant 0 : i32
    %c0_i32_1 = arith.constant 0 : i32
    return %c0_i32, %c0_i32_0 : i32, i32
  }
  func.func @transform_9(%arg0: i32) -> (i32, i32, i32) {
    %c0_i32 = arith.constant 0 : i32
    %c0_i32_0 = arith.constant 0 : i32
    %c0_i32_1 = arith.constant 0 : i32
    %c0_i32_2 = arith.constant 0 : i32
    return %c0_i32, %c0_i32_0, %c0_i32_1 : i32, i32, i32
  }
  func.func @transform_10(%arg0: i32) -> (i32, i32) {
    %c0_i32 = arith.constant 0 : i32
    %c0_i32_0 = arith.constant 0 : i32
    %c0_i32_1 = arith.constant 0 : i32
    return %c0_i32, %c0_i32_0 : i32, i32
  }
  func.func @transform_11(%arg0: i32) -> (i32, i32, i32) {
    %c0_i32 = arith.constant 0 : i32
    %c0_i32_0 = arith.constant 0 : i32
    %c0_i32_1 = arith.constant 0 : i32
    %c0_i32_2 = arith.constant 0 : i32
    return %c0_i32, %c0_i32_0, %c0_i32_1 : i32, i32, i32
  }
  func.func @transform_12(%arg0: i32) -> (i32, i32) {
    %c0_i32 = arith.constant 0 : i32
    %c0_i32_0 = arith.constant 0 : i32
    %c0_i32_1 = arith.constant 0 : i32
    return %c0_i32, %c0_i32_0 : i32, i32
  }
  func.func @transform_13(%arg0: i32) -> (i32, i32) {
    %c0_i32 = arith.constant 0 : i32
    %c0_i32_0 = arith.constant 0 : i32
    %c0_i32_1 = arith.constant 0 : i32
    return %c0_i32, %c0_i32_0 : i32, i32
  }
  func.func @transform_14(%arg0: i32) -> (i32, i32) {
    %c0_i32 = arith.constant 0 : i32
    %c0_i32_0 = arith.constant 0 : i32
    %c0_i32_1 = arith.constant 0 : i32
    return %c0_i32, %c0_i32_0 : i32, i32
  }
  func.func @transform_15(%arg0: i32) -> (i32, i32) {
    %c0_i32 = arith.constant 0 : i32
    %c0_i32_0 = arith.constant 0 : i32
    %c0_i32_1 = arith.constant 0 : i32
    return %c0_i32, %c0_i32_0 : i32, i32
  }
  func.func @transform_16(%arg0: i32) -> (i32, i32) {
    %c0_i32 = arith.constant 0 : i32
    %c0_i32_0 = arith.constant 0 : i32
    %c0_i32_1 = arith.constant 0 : i32
    return %c0_i32, %c0_i32_0 : i32, i32
  }
  func.func @transform_17(%arg0: i32) -> (i32, i32) {
    %c0_i32 = arith.constant 0 : i32
    %c0_i32_0 = arith.constant 0 : i32
    %c0_i32_1 = arith.constant 0 : i32
    return %c0_i32, %c0_i32_0 : i32, i32
  }
}

</mosaic_0001>

<bundles_post_ra>
// kernel: detector_forward.1
= control target key start
LH: loop header
LB: loop body
LE: loop exit
PB: predicated region body
PF: predicated region fallthrough
CT: control target
= control target key end

     0   :  { %s13360_s0 = inlined_call_operand.vmem [shape: bf16[3248,27], index: 0, kind: input, shape index: {}]   ;;  %s13361_s1 = inlined_call_operand.vmem [shape: bf16[27,16], index: 1, kind: input, shape index: {}]   ;;  %s13362_s2 = inlined_call_operand.vmem [shape: f32[1,16], index: 2, kind: input, shape index: {}]   ;;  %s13363_s3 = inlined_call_operand.vmem [shape: bf16[9,16,16], index: 3, kind: input, shape index: {}]   ;;  %s13364_s4 = inlined_call_operand.vmem [shape: f32[1,16], index: 4, kind: input, shape index: {}]   ;;  %s13365_s5 = inlined_call_operand.vmem [shape: bf16[9,16,16], index: 5, kind: input, shape index: {}]   ;;  %s13366_s6 = inlined_call_operand.vmem [shape: f32[1,16], index: 6, kind: input, shape index: {}]   ;;  %s13367_s7 = inlined_call_operand.vmem [shape: bf16[9,16,32], index: 7, kind: input, shape index: {}]   ;;  %s13368_s8 = inlined_call_operand.vmem [shape: f32[1,32], index: 8, kind: input, shape index: {}]   ;;  %s13369_s9 = inlined_call_operand.vmem [shape: bf16[9,32,32], index: 9, kind: input, shape index: {}]   ;;  %s13370_s10 = inlined_call_operand.vmem [shape: f32[1,32], index: 10, kind: input, shape index: {}]   ;;  %s13371_s11 = inlined_call_operand.vmem [shape: bf16[9,32,32], index: 11, kind: input, shape index: {}]   ;;  %s13372_s12 = inlined_call_operand.vmem [shape: f32[1,32], index: 12, kind: input, shape index: {}]   ;;  %s13373_s13 = inlined_call_operand.vmem [shape: bf16[32,6], index: 13, kind: input, shape index: {}]   ;;  %s13374_s14 = inlined_call_operand.vmem [shape: f32[1,6], index: 14, kind: input, shape index: {}]   ;;  %s13375_s15 = inlined_call_operand.hbm [shape: f32[1,1], index: 15, kind: output, shape index: {0}]   ;;  %s13376_s16 = inlined_call_operand.hbm [shape: s32[1,1], index: 16, kind: output, shape index: {1}]   ;;  %s13377_s17 = inlined_call_operand.hbm [shape: f32[1,6], index: 17, kind: output, shape index: {2}]  }
   0x1   :  { %13387 = sst [smem:[#allocation79_spill]] %s13360_s0 }
   0x2   :  { %13388 = sst [smem:[#allocation80_spill]] %s13361_s1 }
   0x3   :  { %23 = vsyncpa [#allocation8], 0 }
   0x4   :  { %24 = vsyncpa [#allocation10], 0  ;;  %vm56_vm0 = vcmask 130048   ;;  %s13389_s26 = sld [smem:[#allocation80_spill]]  ;;  %v13379_v1 = vlaneseq  ;;  %v13380_v2 = vmov 0.0   ;;  %vm105_vm1 = vcmask 261120  }
   0x5   :  { %57 = vst.msk [vmem:[#allocation2] sm:$0xff] %vm56_vm0, %v13380_v2  ;;  %58 = vst.msk [vmem:[#allocation2 + $0x8] sm:$0xff] %vm56_vm0, %v13380_v2  ;;  %v10029_v6 = vld [vmem:[%s13362_s2] ss:$0 sm:$0xff]  ;;  %s10124_s2 = smov 0  }
   0x6   :  { %59 = vst.msk [vmem:[#allocation2 + $0x10] sm:$0xff] %vm56_vm0, %v13380_v2  ;;  %60 = vst.msk [vmem:[#allocation2 + $0x18] sm:$0xff] %vm56_vm0, %v13380_v2  ;;  %v144_v7 = vshrl.u32 %v13379_v1, 7 }
   0x7   :  { %61 = vst.msk [vmem:[#allocation2 + $0x20] sm:$0xff] %vm56_vm0, %v13380_v2  ;;  %62 = vst.msk [vmem:[#allocation2 + $0x28] sm:$0xff] %vm56_vm0, %v13380_v2 }
   0x8   :  { %63 = vst.msk [vmem:[#allocation2 + $0x30] sm:$0xff] %vm56_vm0, %v13380_v2  ;;  %64 = vst.msk [vmem:[#allocation2 + $0x38] sm:$0xff] %vm56_vm0, %v13380_v2  ;;  %v145_v8 = vadd.s32 8, %v144_v7  ;;  %v146_v9 = vadd.s32 16, %v144_v7  ;;  %v147_v10 = vadd.s32 24, %v144_v7  ;;  %v148_v11 = vadd.s32 32, %v144_v7 }
   0x9   :  { %65 = vst.msk [vmem:[#allocation2 + $0xcf0] sm:$0xff] %vm56_vm0, %v13380_v2  ;;  %66 = vst.msk [vmem:[#allocation2 + $0xcf8] sm:$0xff] %vm56_vm0, %v13380_v2  ;;  %v149_v12 = vadd.s32 40, %v144_v7  ;;  %v150_v13 = vadd.s32 48, %v144_v7  ;;  %v151_v14 = vadd.s32 56, %v144_v7  ;;  %v152_v15 = vadd.s32 64, %v144_v7 }
   0xa   :  { %v9913_v0 = vld [vmem:[%s13389_s26] sm:$0xf]  ;;  %67 = vst.msk [vmem:[#allocation2 + $0xd00] sm:$0xff] %vm56_vm0, %v13380_v2  ;;  %68 = vst.msk [vmem:[#allocation2 + $0xd08] sm:$0xff] %vm56_vm0, %v13380_v2  ;;  %v10014_v3 = vld [vmem:[%s13389_s26 + $0x4] sm:$0xf]  ;;  %v10096_v21 = vcvt.s32.f32 %v144_v7  ;;  %v10098_v22 = vcvt.s32.f32 %v145_v8  ;;  %v10100_v23 = vcvt.s32.f32 %v146_v9  ;;  %v10102_v24 = vcvt.s32.f32 %v147_v10 }
   0xb   :  { %69 = vst.msk [vmem:[#allocation2 + $0xd10] sm:$0xff] %vm56_vm0, %v13380_v2  ;;  %70 = vst.msk [vmem:[#allocation2 + $0xd18] sm:$0xff] %vm56_vm0, %v13380_v2  ;;  %v10019_v4 = vld [vmem:[%s13389_s26 + $0x8] sm:$0xf]  ;;  %v10024_v5 = vld [vmem:[%s13389_s26 + $0xc] sm:$0x3]  ;;  %v10104_v25 = vcvt.s32.f32 %v148_v11  ;;  %v10106_v26 = vcvt.s32.f32 %v149_v12  ;;  %v10108_v27 = vcvt.s32.f32 %v150_v13  ;;  %v10110_v28 = vcvt.s32.f32 %v151_v14 }
   0xc   :  { %71 = vst.msk [vmem:[#allocation2 + $0xd20] sm:$0xff] %vm56_vm0, %v13380_v2  ;;  %72 = vst.msk [vmem:[#allocation2 + $0xd28] sm:$0xff] %vm56_vm0, %v13380_v2  ;;  %v153_v16 = vadd.s32 72, %v144_v7  ;;  %v154_v17 = vadd.s32 80, %v144_v7  ;;  %v155_v18 = vadd.s32 88, %v144_v7  ;;  %v156_v19 = vadd.s32 96, %v144_v7 }
   0xd   :  { %73 = vst.msk [vmem:[#allocation3] sm:$0xff] %vm56_vm0, %v13380_v2  ;;  %74 = vst.msk [vmem:[#allocation3 + $0x8] sm:$0xff] %vm56_vm0, %v13380_v2  ;;  %v157_v20 = vadd.s32 104, %v144_v7  ;;  %v10112_v29 = vcvt.s32.f32 %v152_v15 }
   0xe   :  { %75 = vst.msk [vmem:[#allocation3 + $0x10] sm:$0xff] %vm56_vm0, %v13380_v2  ;;  %76 = vst.msk [vmem:[#allocation3 + $0x18] sm:$0xff] %vm56_vm0, %v13380_v2  ;;  %v10114_v30 = vcvt.s32.f32 %v153_v16  ;;  %v10116_v31 = vcvt.s32.f32 %v154_v17  ;;  %v10118_v32 = vcvt.s32.f32 %v155_v18  ;;  %v10120_v33 = vcvt.s32.f32 %v156_v19 }
   0xf   :  { %77 = vst.msk [vmem:[#allocation3 + $0x20] sm:$0xff] %vm56_vm0, %v13380_v2  ;;  %78 = vst.msk [vmem:[#allocation3 + $0x28] sm:$0xff] %vm56_vm0, %v13380_v2  ;;  %v10122_v34 = vcvt.s32.f32 %v157_v20 }
  0x10   :  { %79 = vst.msk [vmem:[#allocation3 + $0x30] sm:$0xff] %vm56_vm0, %v13380_v2  ;;  %80 = vst.msk [vmem:[#allocation3 + $0x38] sm:$0xff] %vm56_vm0, %v13380_v2 }
  0x11   :  { %81 = vst.msk [vmem:[#allocation3 + $0xcf0] sm:$0xff] %vm56_vm0, %v13380_v2  ;;  %82 = vst.msk [vmem:[#allocation3 + $0xcf8] sm:$0xff] %vm56_vm0, %v13380_v2 }
  0x12   :  { %83 = vst.msk [vmem:[#allocation3 + $0xd00] sm:$0xff] %vm56_vm0, %v13380_v2  ;;  %84 = vst.msk [vmem:[#allocation3 + $0xd08] sm:$0xff] %vm56_vm0, %v13380_v2 }
  0x13   :  { %85 = vst.msk [vmem:[#allocation3 + $0xd10] sm:$0xff] %vm56_vm0, %v13380_v2  ;;  %86 = vst.msk [vmem:[#allocation3 + $0xd18] sm:$0xff] %vm56_vm0, %v13380_v2 }
  0x14   :  { %87 = vst.msk [vmem:[#allocation3 + $0xd20] sm:$0xff] %vm56_vm0, %v13380_v2  ;;  %88 = vst.msk [vmem:[#allocation3 + $0xd28] sm:$0xff] %vm56_vm0, %v13380_v2 }
  0x15   :  { %89 = vst.msk [vmem:[#allocation4] sm:$0xff] %vm56_vm0, %v13380_v2  ;;  %90 = vst.msk [vmem:[#allocation4 + $0x8] sm:$0xff] %vm56_vm0, %v13380_v2 }
  0x16   :  { %91 = vst.msk [vmem:[#allocation4 + $0x10] sm:$0xff] %vm56_vm0, %v13380_v2  ;;  %92 = vst.msk [vmem:[#allocation4 + $0x18] sm:$0xff] %vm56_vm0, %v13380_v2 }
  0x17   :  { %93 = vst.msk [vmem:[#allocation4 + $0x20] sm:$0xff] %vm56_vm0, %v13380_v2  ;;  %94 = vst.msk [vmem:[#allocation4 + $0x28] sm:$0xff] %vm56_vm0, %v13380_v2 }
  0x18   :  { %95 = vst.msk [vmem:[#allocation4 + $0x30] sm:$0xff] %vm56_vm0, %v13380_v2  ;;  %96 = vst.msk [vmem:[#allocation4 + $0x38] sm:$0xff] %vm56_vm0, %v13380_v2 }
  0x19   :  { %97 = vst.msk [vmem:[#allocation4 + $0xcf0] sm:$0xff] %vm56_vm0, %v13380_v2  ;;  %98 = vst.msk [vmem:[#allocation4 + $0xcf8] sm:$0xff] %vm56_vm0, %v13380_v2 }
  0x1a   :  { %99 = vst.msk [vmem:[#allocation4 + $0xd00] sm:$0xff] %vm56_vm0, %v13380_v2  ;;  %100 = vst.msk [vmem:[#allocation4 + $0xd08] sm:$0xff] %vm56_vm0, %v13380_v2 }
  0x1b   :  { %101 = vst.msk [vmem:[#allocation4 + $0xd10] sm:$0xff] %vm56_vm0, %v13380_v2  ;;  %102 = vst.msk [vmem:[#allocation4 + $0xd18] sm:$0xff] %vm56_vm0, %v13380_v2 }
  0x1c   :  { %103 = vst.msk [vmem:[#allocation4 + $0xd20] sm:$0xff] %vm56_vm0, %v13380_v2  ;;  %104 = vst.msk [vmem:[#allocation4 + $0xd28] sm:$0xff] %vm56_vm0, %v13380_v2 }
  0x1d   :  { %106 = vst.msk [vmem:[#allocation5] sm:$0xff] %vm105_vm1, %v13380_v2  ;;  %107 = vst.msk [vmem:[#allocation5 + $0x8] sm:$0xff] %vm105_vm1, %v13380_v2 }
  0x1e   :  { %108 = vst.msk [vmem:[#allocation5 + $0x10] sm:$0xff] %vm105_vm1, %v13380_v2  ;;  %109 = vst.msk [vmem:[#allocation5 + $0x18] sm:$0xff] %vm105_vm1, %v13380_v2 }
  0x1f   :  { %110 = vst.msk [vmem:[#allocation5 + $0x20] sm:$0xff] %vm105_vm1, %v13380_v2  ;;  %111 = vst.msk [vmem:[#allocation5 + $0x28] sm:$0xff] %vm105_vm1, %v13380_v2 }
  0x20   :  { %112 = vst.msk [vmem:[#allocation5 + $0x30] sm:$0xff] %vm105_vm1, %v13380_v2  ;;  %113 = vst.msk [vmem:[#allocation5 + $0x38] sm:$0xff] %vm105_vm1, %v13380_v2 }
  0x21   :  { %114 = vst.msk [vmem:[#allocation5 + $0x698] sm:$0xff] %vm105_vm1, %v13380_v2  ;;  %115 = vst.msk [vmem:[#allocation5 + $0x6a0] sm:$0xff] %vm105_vm1, %v13380_v2 }
  0x22   :  { %116 = vst.msk [vmem:[#allocation5 + $0x6a8] sm:$0xff] %vm105_vm1, %v13380_v2  ;;  %117 = vst.msk [vmem:[#allocation5 + $0x6b0] sm:$0xff] %vm105_vm1, %v13380_v2 }
  0x23   :  { %118 = vst.msk [vmem:[#allocation5 + $0x6b8] sm:$0xff] %vm105_vm1, %v13380_v2  ;;  %119 = vst.msk [vmem:[#allocation5 + $0x6c0] sm:$0xff] %vm105_vm1, %v13380_v2 }
  0x24   :  { %120 = vst.msk [vmem:[#allocation5 + $0x6c8] sm:$0xff] %vm105_vm1, %v13380_v2  ;;  %121 = vst.msk [vmem:[#allocation5 + $0x6d0] sm:$0xff] %vm105_vm1, %v13380_v2 }
  0x25   :  { %122 = vst.msk [vmem:[#allocation6] sm:$0xff] %vm105_vm1, %v13380_v2  ;;  %123 = vst.msk [vmem:[#allocation6 + $0x8] sm:$0xff] %vm105_vm1, %v13380_v2 }
  0x26   :  { %124 = vst.msk [vmem:[#allocation6 + $0x10] sm:$0xff] %vm105_vm1, %v13380_v2  ;;  %125 = vst.msk [vmem:[#allocation6 + $0x18] sm:$0xff] %vm105_vm1, %v13380_v2 }
  0x27   :  { %126 = vst.msk [vmem:[#allocation6 + $0x20] sm:$0xff] %vm105_vm1, %v13380_v2  ;;  %127 = vst.msk [vmem:[#allocation6 + $0x28] sm:$0xff] %vm105_vm1, %v13380_v2 }
  0x28   :  { %128 = vst.msk [vmem:[#allocation6 + $0x30] sm:$0xff] %vm105_vm1, %v13380_v2  ;;  %129 = vst.msk [vmem:[#allocation6 + $0x38] sm:$0xff] %vm105_vm1, %v13380_v2 }
  0x29   :  { %130 = vst.msk [vmem:[#allocation6 + $0x698] sm:$0xff] %vm105_vm1, %v13380_v2  ;;  %131 = vst.msk [vmem:[#allocation6 + $0x6a0] sm:$0xff] %vm105_vm1, %v13380_v2 }
  0x2a   :  { %132 = vst.msk [vmem:[#allocation6 + $0x6a8] sm:$0xff] %vm105_vm1, %v13380_v2  ;;  %133 = vst.msk [vmem:[#allocation6 + $0x6b0] sm:$0xff] %vm105_vm1, %v13380_v2 }
  0x2b   :  { %134 = vst.msk [vmem:[#allocation6 + $0x6b8] sm:$0xff] %vm105_vm1, %v13380_v2  ;;  %135 = vst.msk [vmem:[#allocation6 + $0x6c0] sm:$0xff] %vm105_vm1, %v13380_v2 }
  0x2c   :  { %136 = vst.msk [vmem:[#allocation6 + $0x6c8] sm:$0xff] %vm105_vm1, %v13380_v2  ;;  %137 = vst.msk [vmem:[#allocation6 + $0x6d0] sm:$0xff] %vm105_vm1, %v13380_v2 }
  0x2d   :  { %13390 = vst [vmem:[#allocation14_spill] sm:$0xff] %v10096_v21  ;;  %13391 = vst [vmem:[#allocation15_spill] sm:$0xff] %v10098_v22 }
  0x2e   :  { %13392 = vst [vmem:[#allocation16_spill] sm:$0xff] %v10100_v23  ;;  %13393 = vst [vmem:[#allocation17_spill] sm:$0xff] %v10102_v24 }
  0x2f   :  { %13394 = vst [vmem:[#allocation18_spill] sm:$0xff] %v10104_v25 }
  0x30 LB: > { %v7451_v35 = vcombine.low %v10019_v4, %v10024_v5  ;;  %vm371_vm2 = vcmask 1044480   ;;  %vm372_vm3 = vcmask 1045504   ;;  %v9809_v36 = vmov 0.0   ;;  %s10133_s20 = smul.u32 112, %s9782_s2  ;;  %s13395_s25 = sld [smem:[#allocation79_spill]]  ;;  %s9782_s2 = sphi %s10124_s2, %s177_s2  }
  0x31   : > { %8703 = vmatprep.subr.bf16.mxu0 %v9809_v36  ;;  %9589 = vmatprep.subr.bf16.mxu1 %v9809_v36  ;;  %v9810_v37 = vmov 65535   ;;  %vm9811_vm4 = vmmov 0   ;;  %v7450_v41 = vcombine.low %v9913_v0, %v10014_v3  ;;  %vm349_vm5 = vcmask 220160   ;;  %s177_s2 = sadd.s32 1, %s9782_s2  }
  0x32   : > { %v373_v38 = vsel %vm371_vm2, 4294967295, %v9810_v37  ;;  %8707 = vmatprep.mubr.msk.bf16.mxu0 %vm9811_vm4, %v9809_v36  ;;  %8723 = vmatprep.mubr.msk.bf16.mxu1 %vm9811_vm4, %v9809_v36  ;;  %s179_s21 = sshra.s32 %s10133_s20, 3  ;;  %s197_s27 = scvt.s32.f32 %s10133_s20 }
  0x33   : > { %v374_v39 = vsel %vm372_vm3, %v373_v38, 0  ;;  %s7441_s22 = sshll.u32 %s179_s21, 2  ;;  %s10236_s28 = scalar_lea.vmem [#allocation2], %s10133_s20 }
  0x34   : > { %v376_v40 = vand.u32 %v7451_v35, %v374_v39  ;;  %v10155_v49 = vstv %s197_s27  ;;  %p174_p0 = scmp.ge.s32.totalorder %s177_s2, 29  }
  0x35   : > { %v199_v50 = vadd.f32 %v10155_v49, %v10096_v21  ;;  %v200_v51 = vadd.f32 %v10155_v49, %v10098_v22  ;;  %v207_v52 = vadd.f32 %v10155_v49, %v10112_v29  ;;  %v208_v54 = vadd.f32 %v10155_v49, %v10114_v30  ;;  %v10350_v0 = vld [vmem:[%s13363_s3 + $0x10] sm:$0xf] (%p174_p0)  ;;  %v10355_v3 = vld [vmem:[%s13363_s3 + $0x14] sm:$0xf] (%p174_p0)  ;;  %v10360_v4 = vld [vmem:[%s13363_s3 + $0x18] sm:$0xf] (%p174_p0) }
  0x36   : > { %8704 = vmatpush3.bf16.msra.mxu0 %v376_v40  ;;  %9591 = vmatpush3.bf16.msra.mxu1 %v376_v40  ;;  %s182_s26 = scalar_lea.vmem %s13395_s25, %s7441_s22  ;;  %v10167_v56 = vadd.f32 %v10155_v49, %v10100_v23  ;;  %v10171_v60 = vadd.f32 %v10155_v49, %v10116_v31  ;;  %v10176_v9 = vadd.f32 %v10155_v49, %v10102_v24  ;;  %v10365_v5 = vld [vmem:[%s13363_s3 + $0x1c] sm:$0xf] (%p174_p0)  ;;  %s10422_s20 = smov (%p174_p0), 0  }
  0x37   : > { %8705 = vmatprep.subr.bf16.mxu0 %v9809_v36  ;;  %9590 = vmatprep.subr.bf16.mxu1 %v9809_v36  ;;  %v9675_v42 = vld [vmem:[%s182_s26] sm:$0xff]   ;;  %v9677_v44 = vld [vmem:[%s182_s26 + $0x8] sm:$0xff]   ;;  %v9679_v46 = vld [vmem:[%s182_s26 + $0x10] sm:$0xff]   ;;  %v213_v53 = vadd.f32 0.5, %v199_v50  ;;  %v214_v55 = vadd.f32 0.5, %v200_v51  ;;  %v221_v57 = vadd.f32 0.5, %v207_v52  ;;  %v10181_v11 = vadd.f32 %v10155_v49, %v10118_v32 }
  0x38   : > { %v9676_v43 = vld [vmem:[%s182_s26 + $0x20] sm:$0xff]   ;;  %v9678_v45 = vld [vmem:[%s182_s26 + $0x28] sm:$0xff]   ;;  %v9680_v47 = vld [vmem:[%s182_s26 + $0x30] sm:$0xff]   ;;  %v222_v59 = vadd.f32 0.5, %v208_v54  ;;  %v215_v62 = vadd.f32 0.5, %v10167_v56  ;;  %v223_v10 = vadd.f32 0.5, %v10171_v60  ;;  %v10187_v20 = vadd.f32 %v10155_v49, %v10104_v25 }
  0x39   : > { %v9681_v48 = vld [vmem:[%s182_s26 + $0x18] sm:$0xff]   ;;  %v227_v58 = vmul.f32 0.01724138, %v213_v53  ;;  %v228_v61 = vmul.f32 0.01724138, %v214_v55  ;;  %v216_v17 = vadd.f32 0.5, %v10176_v9  ;;  %v10191_v38 = vadd.f32 %v10155_v49, %v10120_v33 }
  0x3a   : > { %8706 = vmatpush3.bf16.msra.mxu0 %v7450_v41  ;;  %9592 = vmatpush3.bf16.msra.mxu1 %v7450_v41  ;;  %v235_v63 = vmul.f32 0.01724138, %v221_v57  ;;  %v236_v8 = vmul.f32 0.01724138, %v222_v59  ;;  %v229_v13 = vmul.f32 0.01724138, %v215_v62  ;;  %v10201_v55 = vadd.f32 %v10155_v49, %v10122_v34 }
  0x3b   : > { %v241_v7 = vfloor.f32 %v227_v58  ;;  %v242_v12 = vfloor.f32 %v228_v61  ;;  %v237_v18 = vmul.f32 0.01724138, %v223_v10  ;;  %v224_v19 = vadd.f32 0.5, %v10181_v11  ;;  %13418 = vst [vmem:[#allocation23_spill] sm:$0xff] (%p174_p0), %v10350_v0  ;;  %13419 = vst [vmem:[#allocation24_spill] sm:$0xff] (%p174_p0), %v10355_v3 }
  0x3c   : > { %v249_v14 = vfloor.f32 %v235_v63  ;;  %v250_v16 = vfloor.f32 %v236_v8  ;;  %v230_v41 = vmul.f32 0.01724138, %v216_v17  ;;  %v225_v53 = vadd.f32 0.5, %v10191_v38  ;;  %13420 = vst [vmem:[#allocation25_spill] sm:$0xff] (%p174_p0), %v10360_v4  ;;  %13421 = vst [vmem:[#allocation26_spill] sm:$0xff] (%p174_p0), %v10365_v5 }
  0x3d   : > { %8708 = vmatmul.mubr.msk.bf16.vlgmr.msra.gmra.mxu0 %vm349_vm5, %v9675_v42  ;;  %8724 = vmatmul.mubr.msk.bf16.vlgmr.msra.gmra.mxu1 %vm349_vm5, %v9676_v43  ;;  %v255_v15 = vmul.f32 58.0, %v241_v7  ;;  %v256_v35 = vmul.f32 58.0, %v242_v12  ;;  %v251_v42 = vfloor.f32 %v237_v18  ;;  %v238_v43 = vmul.f32 0.01724138, %v224_v19 }
  0x3e   : > { %8711 = vmatprep.mubr.msk.bf16.mxu0 %vm9811_vm4, %v9809_v36  ;;  %8727 = vmatprep.mubr.msk.bf16.mxu1 %vm9811_vm4, %v9809_v36  ;;  %v263_v37 = vmul.f32 58.0, %v249_v14  ;;  %v264_v40 = vmul.f32 58.0, %v250_v16  ;;  %v244_v58 = vfloor.f32 %v230_v41  ;;  %v226_v16 = vadd.f32 0.5, %v10201_v55 }
  0x3f   : > { %v269_v39 = vsub.f32 %v199_v50, %v255_v15  ;;  %v265_v62 = vmul.f32 58.0, %v251_v42  ;;  %v252_v63 = vfloor.f32 %v238_v43  ;;  %v239_v15 = vmul.f32 0.01724138, %v225_v53 }
  0x40   : > { %v278_v57 = vsub.f32 %v208_v54, %v264_v40  ;;  %v10222_v17 = vadd.f32 %v10155_v49, %v10108_v27  ;;  %v240_v50 = vmul.f32 0.01724138, %v226_v16 }
  0x41   : > { %vm10203_vm6 = vcmp.lt.f32.partialorder %v269_v39, 56.0  ;;  %v279_v39 = vsub.f32 %v10171_v60, %v265_v62  ;;  %v266_v40 = vmul.f32 58.0, %v252_v63  ;;  %v253_v53 = vfloor.f32 %v239_v15  ;;  %v10345_v62 = vld [vmem:[%s13363_s3 + $0xc] sm:$0xf] (%p174_p0) }
  0x42   : > { %vm10224_vm9 = vcmp.lt.f32.partialorder %v278_v57, 56.0  ;;  %v219_v57 = vadd.f32 0.5, %v10222_v17  ;;  %13417 = vst [vmem:[#allocation22_spill] sm:$0xff] (%p174_p0), %v10345_v62 }
  0x43   : > { %vm10252_vm11 = vcmp.lt.f32.partialorder %v279_v39, 56.0 }
  0x45   : > { %8712 = vmatmul.mubr.msk.bf16.gmra.mxu0 %vm349_vm5, %v9677_v44  ;;  %8728 = vmatmul.mubr.msk.bf16.gmra.mxu1 %vm349_vm5, %v9678_v45  ;;  %v217_v44 = vadd.f32 0.5, %v10187_v20  ;;  %v10196_v45 = vadd.f32 %v10155_v49, %v10106_v26 }
  0x46   : > { %8715 = vmatprep.mubr.msk.bf16.mxu0 %vm9811_vm4, %v9809_v36  ;;  %8731 = vmatprep.mubr.msk.bf16.mxu1 %vm9811_vm4, %v9809_v36 }
  0x47   : > { %v231_v7 = vmul.f32 0.01724138, %v217_v44 }
  0x49   : > { %v245_v41 = vfloor.f32 %v231_v7 }
  0x4d   : > { %8716 = vmatmul.mubr.msk.bf16.gmra.mxu0 %vm349_vm5, %v9679_v46  ;;  %8732 = vmatmul.mubr.msk.bf16.gmra.mxu1 %vm349_vm5, %v9680_v47  ;;  %v270_v46 = vsub.f32 %v200_v51, %v256_v35  ;;  %v218_v51 = vadd.f32 0.5, %v10196_v45 }
  0x4e   : > { %8719 = vmatprep.mubr.msk.bf16.mxu0 %vm9811_vm4, %v9809_v36  ;;  %v243_v36 = vfloor.f32 %v229_v13 }
  0x4f   : > { %vm10210_vm7 = vcmp.lt.f32.partialorder %v270_v46, 56.0  ;;  %v232_v42 = vmul.f32 0.01724138, %v218_v51 }
  0x50   : > { %v257_v47 = vmul.f32 58.0, %v243_v36 }
  0x52   : > { %v271_v12 = vsub.f32 %v10167_v56, %v257_v47  ;;  %v258_v56 = vmul.f32 58.0, %v244_v58  ;;  %v10245_v58 = vadd.f32 %v10155_v49, %v10110_v28  ;;  %v246_v49 = vfloor.f32 %v232_v42 }
  0x54   : > { %vm10247_vm10 = vcmp.lt.f32.partialorder %v271_v12, 56.0  ;;  %v272_v63 = vsub.f32 %v10176_v9, %v258_v56  ;;  %v220_v10 = vadd.f32 0.5, %v10245_v58  ;;  %v260_v42 = vmul.f32 58.0, %v246_v49 }
  0x55   : > { %8720 = vmatmul.mubr.msk.bf16.gmra.mxu0 %vm349_vm5, %v9681_v48  ;;  %v277_v48 = vsub.f32 %v207_v52, %v263_v37 }
  0x56   : > { %vm10268_vm12 = vcmp.lt.f32.partialorder %v272_v63, 56.0  ;;  %v274_v51 = vsub.f32 %v10196_v45, %v260_v42 }
  0x57   : > { %vm10215_vm8 = vcmp.lt.f32.partialorder %v277_v48, 56.0 }
  0x58   : > { %vm288_vm2 = vcmp.lt.f32.partialorder %v274_v51, 56.0  ;;  %v10385_v51 = vld [vmem:[%s13363_s3 + $0x2c] sm:$0xf] (%p174_p0) }
  0x59   :  { %13425 = vst [vmem:[#allocation30_spill] sm:$0xff] (%p174_p0), %v10385_v51 }
  0xfd   : > { %v412_v59 = vpop.f32.mrf.mxu0  ;;  %v444_v61 = vpop.f32.mrf.mxu1 }
  0xfe   : > { %v413_v52 = vadd.f32 %v10029_v6, %v412_v59  ;;  %v445_v8 = vadd.f32 %v10029_v6, %v444_v61 }
  0xff   : > { %v8709_v13 = vpop.f32.mrf.mxu0  ;;  %v8725_v14 = vpop.f32.mrf.mxu1 }
 0x100   : > { %v467_v18 = vmax.f32 %v413_v52, 0.0  ;;  %v475_v19 = vmax.f32 %v445_v8, 0.0  ;;  %v280_v8 = vsub.f32 %v10181_v11, %v266_v40  ;;  %v259_v13 = vmul.f32 58.0, %v245_v41 }
 0x101   : > { %v415_v36 = vpop.f32.mrf.mxu0  ;;  %v447_v37 = vpop.f32.mrf.mxu1  ;;  %v254_v11 = vfloor.f32 %v240_v50 }
 0x102   : > { %v509_v43 = vsel %vm10203_vm6, %v467_v18, 0.0  ;;  %v517_v44 = vsel %vm10215_vm8, %v475_v19, 0.0  ;;  %v416_v46 = vadd.f32 %v10029_v6, %v415_v36  ;;  %v448_v47 = vadd.f32 %v10029_v6, %v447_v37 }
 0x103   : > { %7459 = vst.msk [vmem:[%s10236_s28 + $0x40] sm:$0xff] %vm56_vm0, %v509_v43  ;;  %7467 = vst.msk [vmem:[%s10236_s28 + $0x80] sm:$0xff] %vm56_vm0, %v517_v44  ;;  %v8710_v60 = vpop.f32.mrf.mxu0  ;;  %v8726_v48 = vpop.f32.mrf.mxu1  ;;  %v267_v18 = vmul.f32 58.0, %v253_v53  ;;  %v233_v19 = vmul.f32 0.01724138, %v219_v57  ;;  %vm10272_vm13 = vcmp.lt.f32.partialorder %v280_v8, 56.0  ;;  %v273_v41 = vsub.f32 %v10187_v20, %v259_v13 }
 0x104   : > { %v468_v59 = vmax.f32 %v416_v46, 0.0  ;;  %v476_v61 = vmax.f32 %v448_v47, 0.0  ;;  %v268_v53 = vmul.f32 58.0, %v254_v11  ;;  %v234_v57 = vmul.f32 0.01724138, %v220_v10 }
 0x105   : > { %v420_v7 = vpop.f32.mrf.mxu0  ;;  %v452_v52 = vpop.f32.mrf.mxu1  ;;  %v281_v20 = vsub.f32 %v10191_v38, %v267_v18  ;;  %v247_v50 = vfloor.f32 %v233_v19  ;;  %vm10288_vm14 = vcmp.lt.f32.partialorder %v273_v41, 56.0 }
 0x106   : > { %v510_v54 = vsel %vm10210_vm7, %v468_v59, 0.0  ;;  %v518_v12 = vsel %vm10224_vm9, %v476_v61, 0.0  ;;  %v421_v14 = vadd.f32 %v10029_v6, %v420_v7  ;;  %v453_v9 = vadd.f32 %v10029_v6, %v452_v52 }
 0x107   : > { %7460 = vst.msk [vmem:[%s10236_s28 + $0x48] sm:$0xff] %vm56_vm0, %v510_v54  ;;  %7468 = vst.msk [vmem:[%s10236_s28 + $0x88] sm:$0xff] %vm56_vm0, %v518_v12  ;;  %v8713_v15 = vpop.f32.mrf.mxu0  ;;  %v8729_v16 = vpop.f32.mrf.mxu1  ;;  %vm295_vm15 = vcmp.lt.f32.partialorder %v281_v20, 56.0  ;;  %v282_v45 = vsub.f32 %v10201_v55, %v268_v53  ;;  %v261_v12 = vmul.f32 58.0, %v247_v50 }
 0x108   : > { %v469_v56 = vmax.f32 %v421_v14, 0.0  ;;  %v477_v35 = vmax.f32 %v453_v9, 0.0  ;;  %v248_v14 = vfloor.f32 %v234_v57 }
 0x109   : > { %v423_v37 = vpop.f32.mrf.mxu0  ;;  %v455_v40 = vpop.f32.mrf.mxu1  ;;  %vm296_vm3 = vcmp.lt.f32.partialorder %v282_v45, 56.0  ;;  %v10420_v45 = vld [vmem:[%s13364_s4] ss:$0 sm:$0xff] (%p174_p0) }
 0x10a   : > { %v511_v43 = vsel %vm10247_vm10, %v469_v56, 0.0  ;;  %v519_v44 = vsel %vm10252_vm11, %v477_v35, 0.0  ;;  %v424_v46 = vadd.f32 %v10029_v6, %v423_v37  ;;  %v456_v47 = vadd.f32 %v10029_v6, %v455_v40 }
 0x10b   : > { %7461 = vst.msk [vmem:[%s10236_s28 + $0x50] sm:$0xff] %vm56_vm0, %v511_v43  ;;  %7469 = vst.msk [vmem:[%s10236_s28 + $0x90] sm:$0xff] %vm56_vm0, %v519_v44  ;;  %v8714_v60 = vpop.f32.mrf.mxu0  ;;  %v8730_v48 = vpop.f32.mrf.mxu1  ;;  %v275_v35 = vsub.f32 %v10222_v17, %v261_v12  ;;  %v262_v37 = vmul.f32 58.0, %v248_v14 }
 0x10c   : > { %v470_v59 = vmax.f32 %v424_v46, 0.0  ;;  %v478_v61 = vmax.f32 %v456_v47, 0.0 }
 0x10d   : > { %v428_v63 = vpop.f32.mrf.mxu0  ;;  %v460_v7 = vpop.f32.mrf.mxu1  ;;  %vm289_vm4 = vcmp.lt.f32.partialorder %v275_v35, 56.0  ;;  %v276_v47 = vsub.f32 %v10245_v58, %v262_v37  ;;  %v10330_v58 = vld [vmem:[%s13363_s3] sm:$0xf] (%p174_p0) }
 0x10e   : > { %v512_v52 = vsel %vm10268_vm12, %v470_v59, 0.0  ;;  %v520_v8 = vsel %vm10272_vm13, %v478_v61, 0.0  ;;  %v429_v38 = vadd.f32 %v10029_v6, %v428_v63  ;;  %v461_v13 = vadd.f32 %v10029_v6, %v460_v7  ;;  %13414 = vst [vmem:[#allocation19_spill] sm:$0xff] (%p174_p0), %v10330_v58  ;;  %v10335_v59 = vld [vmem:[%s13363_s3 + $0x4] sm:$0xf] (%p174_p0) }
 0x10f   : > { %7462 = vst.msk [vmem:[%s10236_s28 + $0x58] sm:$0xff] %vm56_vm0, %v512_v52  ;;  %7470 = vst.msk [vmem:[%s10236_s28 + $0x98] sm:$0xff] %vm56_vm0, %v520_v8  ;;  %v8717_v49 = vpop.f32.mrf.mxu0  ;;  %v8733_v54 = vpop.f32.mrf.mxu1  ;;  %vm290_vm5 = vcmp.lt.f32.partialorder %v276_v47, 56.0  ;;  %v10340_v61 = vld [vmem:[%s13363_s3 + $0x8] sm:$0xf] (%p174_p0) }
 0x110   : > { %v471_v9 = vmax.f32 %v429_v38, 0.0  ;;  %v479_v15 = vmax.f32 %v461_v13, 0.0  ;;  %13415 = vst [vmem:[#allocation20_spill] sm:$0xff] (%p174_p0), %v10335_v59  ;;  %13416 = vst [vmem:[#allocation21_spill] sm:$0xff] (%p174_p0), %v10340_v61  ;;  %v10375_v63 = vld [vmem:[%s13363_s3 + $0x24] sm:$0xf] (%p174_p0) }
 0x111   : > { %v431_v16 = vpop.f32.mrf.mxu0  ;;  %v463_v18 = vpop.f32.mrf.mxu1  ;;  %13423 = vst [vmem:[#allocation28_spill] sm:$0xff] (%p174_p0), %v10375_v63  ;;  %v10380_v7 = vld [vmem:[%s13363_s3 + $0x28] sm:$0xf] (%p174_p0)  ;;  %v10390_v52 = vld [vmem:[%s13363_s3 + $0x30] sm:$0xf] (%p174_p0) }
 0x112   : > { %v513_v11 = vsel %vm10288_vm14, %v471_v9, 0.0  ;;  %v521_v19 = vsel %vm295_vm15, %v479_v15, 0.0  ;;  %v432_v10 = vadd.f32 %v10029_v6, %v431_v16  ;;  %v464_v56 = vadd.f32 %v10029_v6, %v463_v18  ;;  %13424 = vst [vmem:[#allocation29_spill] sm:$0xff] (%p174_p0), %v10380_v7  ;;  %13426 = vst [vmem:[#allocation31_spill] sm:$0xff] (%p174_p0), %v10390_v52  ;;  %v10395_v8 = vld [vmem:[%s13363_s3 + $0x34] sm:$0xf] (%p174_p0) }
 0x113   : > { %7463 = vst.msk [vmem:[%s10236_s28 + $0x60] sm:$0xff] %vm56_vm0, %v513_v11  ;;  %7471 = vst.msk [vmem:[%s10236_s28 + $0xa0] sm:$0xff] %vm56_vm0, %v521_v19  ;;  %v8718_v55 = vpop.f32.mrf.mxu0  ;;  %v8734_v36 = vpop.f32.mrf.mxu1  ;;  %v10400_v38 = vld [vmem:[%s13363_s3 + $0x38] sm:$0xf] (%p174_p0)  ;;  %v10405_v13 = vld [vmem:[%s13363_s3 + $0x3c] sm:$0xf] (%p174_p0) }
 0x114   : > { %v472_v39 = vmax.f32 %v432_v10, 0.0  ;;  %v480_v40 = vmax.f32 %v464_v56, 0.0  ;;  %13427 = vst [vmem:[#allocation32_spill] sm:$0xff] (%p174_p0), %v10395_v8  ;;  %13428 = vst [vmem:[#allocation33_spill] sm:$0xff] (%p174_p0), %v10400_v38  ;;  %v10410_v49 = vld [vmem:[%s13363_s3 + $0x40] sm:$0xf] (%p174_p0) }
 0x115   : > { %v436_v41 = vpop.f32.mrf.mxu0  ;;  %13429 = vst [vmem:[#allocation34_spill] sm:$0xff] (%p174_p0), %v10405_v13  ;;  %13430 = vst [vmem:[#allocation35_spill] sm:$0xff] (%p174_p0), %v10410_v49  ;;  %v10415_v54 = vld [vmem:[%s13363_s3 + $0x44] sm:$0xf] (%p174_p0) }
 0x116   : > { %v514_v42 = vsel %vm288_vm2, %v472_v39, 0.0  ;;  %v522_v43 = vsel %vm296_vm3, %v480_v40, 0.0  ;;  %v437_v44 = vadd.f32 %v10029_v6, %v436_v41  ;;  %13431 = vst [vmem:[#allocation36_spill] sm:$0xff] (%p174_p0), %v10415_v54 }
 0x117   : > { %7464 = vst.msk [vmem:[%s10236_s28 + $0x68] sm:$0xff] %vm56_vm0, %v514_v42  ;;  %7472 = vst.msk [vmem:[%s10236_s28 + $0xa8] sm:$0xff] %vm56_vm0, %v522_v43  ;;  %v8721_v46 = vpop.f32.mrf.mxu0 }
 0x118   : > { %v473_v17 = vmax.f32 %v437_v44, 0.0 }
 0x119   : > { %v439_v60 = vpop.f32.mrf.mxu0 }
 0x11a   : > { %v515_v48 = vsel %vm289_vm4, %v473_v17, 0.0  ;;  %v440_v20 = vadd.f32 %v10029_v6, %v439_v60  ;;  %v10370_v6 = vld [vmem:[%s13363_s3 + $0x20] sm:$0xf] (%p174_p0) }
 0x11b   : > { %7465 = vst.msk [vmem:[%s10236_s28 + $0x70] sm:$0xff] %vm56_vm0, %v515_v48  ;;  %v8722_v53 = vpop.f32.mrf.mxu0  ;;  %176 = sbr.rel (!%p174_p0) target bundleno = 48 (0x30), region = 285  ;;  %13422 = vst [vmem:[#allocation27_spill] sm:$0xff] (%p174_p0), %v10370_v6 }
 0x11c   : > { %v474_v50 = vmax.f32 %v440_v20, 0.0 }
 0x11e   : > { %v516_v57 = vsel %vm290_vm5, %v474_v50, 0.0 }
 0x11f   : > { %7466 = vst.msk [vmem:[%s10236_s28 + $0x78] sm:$0xff] %vm56_vm0, %v516_v57 }
 0x120 LB: > { %v13432_v62 = vld [vmem:[#allocation22_spill] sm:$0xff]  ;;  %v13433_v61 = vld [vmem:[#allocation21_spill] sm:$0xff]  ;;  %v9812_v14 = vmov 0.0   ;;  %s10432_s3 = smul.u32 112, %s9786_s20  ;;  %vm9813_vm6 = vmmov 0   ;;  %v13434_v3 = vld [vmem:[#allocation24_spill] sm:$0xff]  ;;  %s9786_s20 = sphi %s10422_s20, %s571_s20  }
 0x121   : > { %v7517_v12 = vcombine.low %v13433_v61, %v13432_v62  ;;  %8735 = vmatprep.subr.bf16.mxu0 %v9812_v14  ;;  %9593 = vmatprep.subr.bf16.mxu1 %v9812_v14  ;;  %v13435_v0 = vld [vmem:[#allocation23_spill] sm:$0xff]  ;;  %v13436_v59 = vld [vmem:[#allocation20_spill] sm:$0xff]  ;;  %v13438_v5 = vld [vmem:[#allocation26_spill] sm:$0xff]  ;;  %s571_s20 = sadd.s32 1, %s9786_s20  }
 0x122   : > { %8737 = vmatprep.mubr.msk.bf16.mxu0 %vm9813_vm6, %v9812_v14  ;;  %8753 = vmatprep.mubr.msk.bf16.mxu1 %vm9813_vm6, %v9812_v14  ;;  %s10441_s4 = scalar_lea.vmem [#allocation2], %s10432_s3  ;;  %v7547_v18 = vcombine.low %v13435_v0, %v13434_v3  ;;  %v13437_v58 = vld [vmem:[#allocation19_spill] sm:$0xff]  ;;  %v13439_v4 = vld [vmem:[#allocation25_spill] sm:$0xff]  ;;  %v13440_v63 = vld [vmem:[#allocation28_spill] sm:$0xff]  ;;  %s1922_s21 = scvt.s32.f32 %s10432_s3 }
 0x123   : > { %8736 = vmatpush3.bf16.msra.mxu0 %v7517_v12  ;;  %9594 = vmatpush3.bf16.msra.mxu1 %v7517_v12  ;;  %v7525_v10 = vcombine.low %v13437_v58, %v13436_v59  ;;  %v7569_v57 = vcombine.low %v13439_v4, %v13438_v5  ;;  %v13441_v6 = vld [vmem:[#allocation27_spill] sm:$0xff]  ;;  %v13442_v51 = vld [vmem:[#allocation30_spill] sm:$0xff]  ;;  %v13443_v7 = vld [vmem:[#allocation29_spill] sm:$0xff]  ;;  %s10984_s2 = scalar_lea.vmem [#allocation3], %s10432_s3  ;;  %p568_p1 = scmp.ge.s32.totalorder %s571_s20, 29  }
 0x124   : > { %8795 = vmatprep.subr.bf16.mxu0 %v9812_v14  ;;  %8765 = vmatprep.subr.bf16.mxu1 %v9812_v14  ;;  %v13444_v8 = vld [vmem:[#allocation32_spill] sm:$0xff]  ;;  %v13445_v52 = vld [vmem:[#allocation31_spill] sm:$0xff]  ;;  %v13446_v13 = vld [vmem:[#allocation34_spill] sm:$0xff]  ;;  %s11224_s24 = smov (%p568_p1), 0  }
 0x125   : > { %v13447_v38 = vld [vmem:[#allocation33_spill] sm:$0xff]  ;;  %v13448_v54 = vld [vmem:[#allocation36_spill] sm:$0xff]  ;;  %v13449_v49 = vld [vmem:[#allocation35_spill] sm:$0xff] }
 0x126   : > { %v7503_v9 = vld [vmem:[%s10441_s4 + $0x6] sm:$0xff]  ;;  %v7504_v15 = vld [vmem:[%s10441_s4 + $0xe] sm:$0xff]  ;;  %v7505_v55 = vld [vmem:[%s10441_s4 + $0x16] sm:$0xff] }
 0x127   : > { %v7511_v16 = vld [vmem:[%s10441_s4 + $0x46] sm:$0xff]  ;;  %v612_v11 = vpack.c.bf16 %v7504_v15, %v7503_v9  ;;  %v7512_v19 = vld [vmem:[%s10441_s4 + $0x4e] sm:$0xff]  ;;  %v7506_v35 = vld [vmem:[%s10441_s4 + $0x1e] sm:$0xff] }
 0x128   : > { %v616_v56 = vpack.c.bf16 %v7512_v19, %v7511_v16  ;;  %v7513_v36 = vld [vmem:[%s10441_s4 + $0x56] sm:$0xff]  ;;  %v7514_v37 = vld [vmem:[%s10441_s4 + $0x5e] sm:$0xff]  ;;  %v613_v39 = vpack.c.bf16 %v7506_v35, %v7505_v55  ;;  %v7507_v41 = vld [vmem:[%s10441_s4 + $0x26] sm:$0xff]  ;;  %v7591_v19 = vcombine.low %v13441_v6, %v13440_v63 }
 0x129   : > { %8738 = vmatmul.mubr.msk.bf16.vlgmr.msra.gmra.mxu0 %vm56_vm0, %v612_v11  ;;  %v617_v40 = vpack.c.bf16 %v7514_v37, %v7513_v36  ;;  %v7508_v42 = vld [vmem:[%s10441_s4 + $0x2e] sm:$0xff]  ;;  %v7515_v43 = vld [vmem:[%s10441_s4 + $0x66] sm:$0xff]  ;;  %v7509_v17 = vld [vmem:[%s10441_s4 + $0x36] sm:$0xff] }
 0x12a   : > { %8754 = vmatmul.mubr.msk.bf16.vlgmr.msra.gmra.mxu1 %vm56_vm0, %v616_v56  ;;  %8796 = vmatpush3.bf16.msra.mxu0 %v7547_v18  ;;  %v7516_v44 = vld [vmem:[%s10441_s4 + $0x6e] sm:$0xff]  ;;  %v614_v46 = vpack.c.bf16 %v7508_v42, %v7507_v41  ;;  %v7510_v60 = vld [vmem:[%s10441_s4 + $0x3e] sm:$0xff]  ;;  %v13455_v21 = vld [vmem:[#allocation14_spill] sm:$0xff] }
 0x12b   : > { %8766 = vmatpush3.bf16.msra.mxu1 %v7525_v10  ;;  %8741 = vmatprep.mubr.msk.bf16.mxu0 %vm9813_vm6, %v9812_v14  ;;  %v618_v47 = vpack.c.bf16 %v7516_v44, %v7515_v43  ;;  %v7489_v48 = vld [vmem:[%s10441_s4 + $0x5] sm:$0xff]  ;;  %v7490_v20 = vld [vmem:[%s10441_s4 + $0xd] sm:$0xff]  ;;  %v615_v53 = vpack.c.bf16 %v7510_v60, %v7509_v17  ;;  %v7491_v15 = vld [vmem:[%s10441_s4 + $0x15] sm:$0xff] }
 0x12c   : > { %8757 = vmatprep.mubr.msk.bf16.mxu1 %vm9813_vm6, %v9812_v14  ;;  %8825 = vmatprep.subr.bf16.mxu1 %v9812_v14  ;;  %v589_v50 = vpack.c.bf16 %v7490_v20, %v7489_v48  ;;  %v7533_v12 = vld [vmem:[%s10441_s4 + $0x7] sm:$0xff]  ;;  %v7534_v9 = vld [vmem:[%s10441_s4 + $0xf] sm:$0xff]  ;;  %v7492_v16 = vld [vmem:[%s10441_s4 + $0x1d] sm:$0xff] }
 0x12d   : > { %8855 = vmatprep.subr.bf16.mxu0 %v9812_v14  ;;  %v867_v18 = vpack.c.bf16 %v7534_v9, %v7533_v12  ;;  %v590_v11 = vpack.c.bf16 %v7492_v16, %v7491_v15  ;;  %v7535_v10 = vld [vmem:[%s10441_s4 + $0x17] sm:$0xff]  ;;  %v7536_v56 = vld [vmem:[%s10441_s4 + $0x1f] sm:$0xff]  ;;  %v7494_v35 = vld [vmem:[%s10441_s4 + $0x2d] sm:$0xff] }
 0x12e   : > { %v7493_v55 = vld [vmem:[%s10441_s4 + $0x25] sm:$0xff]  ;;  %v868_v36 = vpack.c.bf16 %v7536_v56, %v7535_v10  ;;  %v7495_v41 = vld [vmem:[%s10441_s4 + $0x35] sm:$0xff]  ;;  %v7496_v42 = vld [vmem:[%s10441_s4 + $0x3d] sm:$0xff] }
 0x12f   : > { %v591_v37 = vpack.c.bf16 %v7494_v35, %v7493_v55  ;;  %v592_v44 = vpack.c.bf16 %v7496_v42, %v7495_v41  ;;  %v7497_v17 = vld [vmem:[%s10441_s4 + $0x45] sm:$0xff]  ;;  %v7498_v60 = vld [vmem:[%s10441_s4 + $0x4d] sm:$0xff]  ;;  %v7500_v12 = vld [vmem:[%s10441_s4 + $0x5d] sm:$0xff] }
 0x130   : > { %v593_v20 = vpack.c.bf16 %v7498_v60, %v7497_v17  ;;  %v7543_v16 = vld [vmem:[%s10441_s4 + $0x57] sm:$0xff]  ;;  %v7545_v55 = vld [vmem:[%s10441_s4 + $0x67] sm:$0xff]  ;;  %v7546_v35 = vld [vmem:[%s10441_s4 + $0x6f] sm:$0xff] }
 0x131   : > { %8742 = vmatmul.mubr.msk.bf16.gmra.mxu0 %vm56_vm0, %v613_v39  ;;  %v7537_v39 = vld [vmem:[%s10441_s4 + $0x27] sm:$0xff]  ;;  %v13460_v23 = vld [vmem:[#allocation16_spill] sm:$0xff]  ;;  %v13464_v24 = vld [vmem:[#allocation17_spill] sm:$0xff] }
 0x132   : > { %8758 = vmatmul.mubr.msk.bf16.gmra.mxu1 %vm56_vm0, %v617_v40  ;;  %8745 = vmatprep.mubr.msk.bf16.mxu0 %vm9813_vm6, %v9812_v14  ;;  %v7538_v40 = vld [vmem:[%s10441_s4 + $0x2f] sm:$0xff]  ;;  %v13466_v25 = vld [vmem:[#allocation18_spill] sm:$0xff] }
 0x133   : > { %8761 = vmatprep.mubr.msk.bf16.mxu1 %vm9813_vm6, %v9812_v14  ;;  %v869_v43 = vpack.c.bf16 %v7538_v40, %v7537_v39  ;;  %v7613_v39 = vcombine.low %v13443_v7, %v13442_v51  ;;  %v7577_v40 = vld [vmem:[%s10441_s4 + $0x40] sm:$0xff]  ;;  %v7578_v41 = vld [vmem:[%s10441_s4 + $0x48] sm:$0xff] }
 0x134   : > { %v1173_v42 = vpack.c.bf16 %v7578_v41, %v7577_v40  ;;  %v7567_v40 = vld [vmem:[%s10441_s4 + $0x9f] sm:$0xff]  ;;  %v7568_v41 = vld [vmem:[%s10441_s4 + $0xa7] sm:$0xff] }
 0x135   : > { %v13457_v22 = vld [vmem:[#allocation15_spill] sm:$0xff] }
 0x139   : > { %8746 = vmatmul.mubr.msk.bf16.gmra.mxu0 %vm56_vm0, %v614_v46  ;;  %v7539_v46 = vld [vmem:[%s10441_s4 + $0x37] sm:$0xff] }
 0x13a   : > { %8762 = vmatmul.mubr.msk.bf16.gmra.mxu1 %vm56_vm0, %v618_v47  ;;  %8749 = vmatprep.mubr.msk.bf16.mxu0 %vm9813_vm6, %v9812_v14  ;;  %v7540_v47 = vld [vmem:[%s10441_s4 + $0x3f] sm:$0xff] }
 0x13b   : > { %8767 = vmatprep.mubr.msk.bf16.mxu1 %vm9813_vm6, %v9812_v14  ;;  %v870_v48 = vpack.c.bf16 %v7540_v47, %v7539_v46  ;;  %v7579_v46 = vld [vmem:[%s10441_s4 + $0x50] sm:$0xff] }
 0x141   : > { %8750 = vmatmul.mubr.msk.bf16.gmra.mxu0 %vm56_vm0, %v615_v53  ;;  %v7541_v53 = vld [vmem:[%s10441_s4 + $0x47] sm:$0xff] }
 0x142   : > { %8768 = vmatmul.mubr.msk.bf16.vlgmr.msra.gmra.mxu1 %vm56_vm0, %v589_v50  ;;  %8797 = vmatprep.mubr.msk.bf16.mxu0 %vm9813_vm6, %v9812_v14  ;;  %v7542_v50 = vld [vmem:[%s10441_s4 + $0x4f] sm:$0xff] }
 0x143   : > { %8826 = vmatpush3.bf16.msra.mxu1 %v7569_v57  ;;  %8771 = vmatprep.mubr.msk.bf16.mxu1 %vm9813_vm6, %v9812_v14  ;;  %v7499_v57 = vld [vmem:[%s10441_s4 + $0x55] sm:$0xff]  ;;  %v871_v9 = vpack.c.bf16 %v7542_v50, %v7541_v53 }
 0x144   : > { %8885 = vmatprep.subr.bf16.mxu1 %v9812_v14  ;;  %v594_v15 = vpack.c.bf16 %v7500_v12, %v7499_v57  ;;  %v7583_v12 = vld [vmem:[%s10441_s4 + $0x70] sm:$0xff] }
 0x149   : > { %8798 = vmatmul.mubr.msk.bf16.vlgmr.msra.gmra.mxu0 %vm56_vm0, %v867_v18  ;;  %v7544_v18 = vld [vmem:[%s10441_s4 + $0x5f] sm:$0xff] }
 0x14a   : > { %8772 = vmatmul.mubr.msk.bf16.gmra.mxu1 %vm56_vm0, %v590_v11  ;;  %8856 = vmatpush3.bf16.msra.mxu0 %v7591_v19  ;;  %v7501_v11 = vld [vmem:[%s10441_s4 + $0x65] sm:$0xff]  ;;  %v7502_v19 = vld [vmem:[%s10441_s4 + $0x6d] sm:$0xff]  ;;  %v872_v10 = vpack.c.bf16 %v7544_v18, %v7543_v16  ;;  %v1022_v60 = vpack.c.bf16 %v7545_v55, %v7544_v18 }
 0x14b   : > { %8775 = vmatprep.mubr.msk.bf16.mxu1 %vm9813_vm6, %v9812_v14  ;;  %8801 = vmatprep.mubr.msk.bf16.mxu0 %vm9813_vm6, %v9812_v14  ;;  %v595_v56 = vpack.c.bf16 %v7502_v19, %v7501_v11  ;;  %v7585_v19 = vld [vmem:[%s10441_s4 + $0x80] sm:$0xff] }
 0x14c   : > { %8915 = vmatprep.subr.bf16.mxu0 %v9812_v14 }
 0x151   : > { %8802 = vmatmul.mubr.msk.bf16.gmra.mxu0 %vm56_vm0, %v868_v36  ;;  %v873_v36 = vpack.c.bf16 %v7546_v35, %v7545_v55  ;;  %v7566_v55 = vld [vmem:[%s10441_s4 + $0x97] sm:$0xff] }
 0x152   : > { %8776 = vmatmul.mubr.msk.bf16.gmra.mxu1 %vm56_vm0, %v591_v37  ;;  %8805 = vmatprep.mubr.msk.bf16.mxu0 %vm9813_vm6, %v9812_v14  ;;  %v1020_v37 = vpack.c.bf16 %v7541_v53, %v7540_v47  ;;  %v7580_v47 = vld [vmem:[%s10441_s4 + $0x58] sm:$0xff] }
 0x153   : > { %8779 = vmatprep.mubr.msk.bf16.mxu1 %vm9813_vm6, %v9812_v14  ;;  %v1174_v17 = vpack.c.bf16 %v7580_v47, %v7579_v46  ;;  %v7562_v53 = vld [vmem:[%s10441_s4 + $0x77] sm:$0xff]  ;;  %v7590_v46 = vld [vmem:[%s10441_s4 + $0xa8] sm:$0xff] }
 0x154   : > { %v1023_v57 = vpack.c.bf16 %v7562_v53, %v7546_v35  ;;  %v7599_v47 = vld [vmem:[%s10441_s4 + $0x41] sm:$0xff]  ;;  %v7621_v53 = vld [vmem:[%s10441_s4 + $0x79] sm:$0xff] }
 0x159   : > { %8806 = vmatmul.mubr.msk.bf16.gmra.mxu0 %vm56_vm0, %v869_v43  ;;  %v1021_v43 = vpack.c.bf16 %v7543_v16, %v7542_v50  ;;  %v7564_v16 = vld [vmem:[%s10441_s4 + $0x87] sm:$0xff] }
 0x15a   : > { %8780 = vmatmul.mubr.msk.bf16.gmra.mxu1 %vm56_vm0, %v592_v44  ;;  %8809 = vmatprep.mubr.msk.bf16.mxu0 %vm9813_vm6, %v9812_v14  ;;  %v7635_v44 = vcombine.low %v13445_v52, %v13444_v8 }
 0x15b   : > { %8783 = vmatprep.mubr.msk.bf16.mxu1 %vm9813_vm6, %v9812_v14 }
 0x161   : > { %8810 = vmatmul.mubr.msk.bf16.gmra.mxu0 %vm56_vm0, %v870_v48  ;;  %v7581_v48 = vld [vmem:[%s10441_s4 + $0x60] sm:$0xff] }
 0x162   : > { %8784 = vmatmul.mubr.msk.bf16.gmra.mxu1 %vm56_vm0, %v593_v20  ;;  %8813 = vmatprep.mubr.msk.bf16.mxu0 %vm9813_vm6, %v9812_v14  ;;  %v7582_v20 = vld [vmem:[%s10441_s4 + $0x68] sm:$0xff] }
 0x163   : > { %8787 = vmatprep.mubr.msk.bf16.mxu1 %vm9813_vm6, %v9812_v14  ;;  %v1175_v50 = vpack.c.bf16 %v7582_v20, %v7581_v48  ;;  %v7657_v20 = vcombine.low %v13447_v38, %v13446_v13  ;;  %v10907_v38 = vstv %s1922_s21 }
 0x164   : > { %v1924_v51 = vadd.f32 %v10907_v38, %v13455_v21 }
 0x169   : > { %8814 = vmatmul.mubr.msk.bf16.gmra.mxu0 %vm56_vm0, %v871_v9  ;;  %v7584_v9 = vld [vmem:[%s10441_s4 + $0x78] sm:$0xff] }
 0x16a   : > { %8788 = vmatmul.mubr.msk.bf16.gmra.mxu1 %vm56_vm0, %v594_v15  ;;  %8817 = vmatprep.mubr.msk.bf16.mxu0 %vm9813_vm6, %v9812_v14  ;;  %v7563_v15 = vld [vmem:[%s10441_s4 + $0x7f] sm:$0xff]  ;;  %v1176_v18 = vpack.c.bf16 %v7584_v9, %v7583_v12 }
 0x16b   : > { %8791 = vmatprep.mubr.msk.bf16.mxu1 %vm9813_vm6, %v9812_v14  ;;  %v1024_v11 = vpack.c.bf16 %v7564_v16, %v7563_v15  ;;  %v7602_v12 = vld [vmem:[%s10441_s4 + $0x59] sm:$0xff]  ;;  %v7679_v16 = vcombine.low %v13449_v49, %v13448_v54  ;;  %v1938_v54 = vadd.f32 0.5, %v1924_v51 }
 0x16d   : > { %v1952_v63 = vmul.f32 0.01724138, %v1938_v54 }
 0x171   : > { %8818 = vmatmul.mubr.msk.bf16.gmra.mxu0 %vm56_vm0, %v872_v10  ;;  %v7586_v10 = vld [vmem:[%s10441_s4 + $0x88] sm:$0xff] }
 0x172   : > { %8792 = vmatmul.mubr.msk.bf16.gmra.mxu1 %vm56_vm0, %v595_v56  ;;  %8821 = vmatprep.mubr.msk.bf16.mxu0 %vm9813_vm6, %v9812_v14  ;;  %v7565_v56 = vld [vmem:[%s10441_s4 + $0x8f] sm:$0xff]  ;;  %v1177_v35 = vpack.c.bf16 %v7586_v10, %v7585_v19  ;;  %v7603_v19 = vld [vmem:[%s10441_s4 + $0x61] sm:$0xff] }
 0x173   : > { %8827 = vmatprep.mubr.msk.bf16.mxu1 %vm9813_vm6, %v9812_v14  ;;  %v7604_v10 = vld [vmem:[%s10441_s4 + $0x69] sm:$0xff] }
 0x179   : > { %8822 = vmatmul.mubr.msk.bf16.gmra.mxu0 %vm56_vm0, %v873_v36  ;;  %v1025_v36 = vpack.c.bf16 %v7566_v55, %v7565_v56  ;;  %v1328_v55 = vpack.c.bf16 %v7604_v10, %v7603_v19  ;;  %v7665_v10 = vld [vmem:[%s10441_s4 + $0x7b] sm:$0xff] }
 0x17a   : > { %8828 = vmatmul.mubr.msk.bf16.vlgmr.msra.gmra.mxu1 %vm56_vm0, %v1020_v37  ;;  %8857 = vmatprep.mubr.msk.bf16.mxu0 %vm9813_vm6, %v9812_v14  ;;  %v7587_v37 = vld [vmem:[%s10441_s4 + $0x90] sm:$0xff] }
 0x17b   : > { %8886 = vmatpush3.bf16.msra.mxu1 %v7613_v39  ;;  %8831 = vmatprep.mubr.msk.bf16.mxu1 %vm9813_vm6, %v9812_v14  ;;  %v7588_v39 = vld [vmem:[%s10441_s4 + $0x98] sm:$0xff] }
 0x17c   : > { %8945 = vmatprep.subr.bf16.mxu1 %v9812_v14 }
 0x181   : > { %8858 = vmatmul.mubr.msk.bf16.vlgmr.msra.gmra.mxu0 %vm56_vm0, %v1173_v42  ;;  %v1178_v42 = vpack.c.bf16 %v7588_v39, %v7587_v37  ;;  %v7605_v37 = vld [vmem:[%s10441_s4 + $0x71] sm:$0xff] }
 0x182   : > { %8832 = vmatmul.mubr.msk.bf16.gmra.mxu1 %vm56_vm0, %v1021_v43  ;;  %8916 = vmatpush3.bf16.msra.mxu0 %v7635_v44  ;;  %v1026_v43 = vpack.c.bf16 %v7568_v41, %v7567_v40  ;;  %v7589_v44 = vld [vmem:[%s10441_s4 + $0xa0] sm:$0xff]  ;;  %v1329_v40 = vpack.c.bf16 %v7621_v53, %v7605_v37  ;;  %v7627_v41 = vld [vmem:[%s10441_s4 + $0xa9] sm:$0xff] }
 0x183   : > { %8835 = vmatprep.mubr.msk.bf16.mxu1 %vm9813_vm6, %v9812_v14  ;;  %8861 = vmatprep.mubr.msk.bf16.mxu0 %vm9813_vm6, %v9812_v14 }
 0x184   : > { %8975 = vmatprep.subr.bf16.mxu0 %v9812_v14 }
 0x189   : > { %8862 = vmatmul.mubr.msk.bf16.gmra.mxu0 %vm56_vm0, %v1174_v17  ;;  %v7600_v17 = vld [vmem:[%s10441_s4 + $0x49] sm:$0xff] }
 0x18a   : > { %8836 = vmatmul.mubr.msk.bf16.gmra.mxu1 %vm56_vm0, %v1022_v60  ;;  %8865 = vmatprep.mubr.msk.bf16.mxu0 %vm9813_vm6, %v9812_v14  ;;  %v1179_v60 = vpack.c.bf16 %v7590_v46, %v7589_v44  ;;  %v1326_v48 = vpack.c.bf16 %v7600_v17, %v7599_v47  ;;  %v7629_v46 = vld [vmem:[%s10441_s4 + $0xb9] sm:$0xff]  ;;  %v7630_v47 = vld [vmem:[%s10441_s4 + $0xc1] sm:$0xff] }
 0x18b   : > { %8839 = vmatprep.mubr.msk.bf16.mxu1 %vm9813_vm6, %v9812_v14  ;;  %v1483_v17 = vpack.c.bf16 %v7630_v47, %v7629_v46 }
 0x191   : > { %8866 = vmatmul.mubr.msk.bf16.gmra.mxu0 %vm56_vm0, %v1175_v50  ;;  %v7622_v50 = vld [vmem:[%s10441_s4 + $0x81] sm:$0xff] }
 0x192   : > { %8840 = vmatmul.mubr.msk.bf16.gmra.mxu1 %vm56_vm0, %v1023_v57  ;;  %8869 = vmatprep.mubr.msk.bf16.mxu0 %vm9813_vm6, %v9812_v14  ;;  %v7601_v57 = vld [vmem:[%s10441_s4 + $0x51] sm:$0xff]  ;;  %v1479_v9 = vpack.c.bf16 %v7622_v50, %v7621_v53 }
 0x193   : > { %8843 = vmatprep.mubr.msk.bf16.mxu1 %vm9813_vm6, %v9812_v14  ;;  %v1327_v15 = vpack.c.bf16 %v7602_v12, %v7601_v57  ;;  %v7633_v57 = vld [vmem:[%s10441_s4 + $0xd9] sm:$0xff]  ;;  %v7634_v12 = vld [vmem:[%s10441_s4 + $0xe1] sm:$0xff] }
 0x199   : > { %8870 = vmatmul.mubr.msk.bf16.gmra.mxu0 %vm56_vm0, %v1176_v18  ;;  %v7623_v18 = vld [vmem:[%s10441_s4 + $0x89] sm:$0xff] }
 0x19a   : > { %8844 = vmatmul.mubr.msk.bf16.gmra.mxu1 %vm56_vm0, %v1024_v11  ;;  %8873 = vmatprep.mubr.msk.bf16.mxu0 %vm9813_vm6, %v9812_v14  ;;  %v7624_v11 = vld [vmem:[%s10441_s4 + $0x91] sm:$0xff]  ;;  %v1330_v44 = vpack.c.bf16 %v7623_v18, %v7622_v50 }
 0x19b   : > { %8847 = vmatprep.mubr.msk.bf16.mxu1 %vm9813_vm6, %v9812_v14  ;;  %v1480_v56 = vpack.c.bf16 %v7624_v11, %v7623_v18 }
 0x1a1   : > { %8874 = vmatmul.mubr.msk.bf16.gmra.mxu0 %vm56_vm0, %v1177_v35  ;;  %v7625_v35 = vld [vmem:[%s10441_s4 + $0x99] sm:$0xff] }
 0x1a2   : > { %8848 = vmatmul.mubr.msk.bf16.gmra.mxu1 %vm56_vm0, %v1025_v36  ;;  %8877 = vmatprep.mubr.msk.bf16.mxu0 %vm9813_vm6, %v9812_v14  ;;  %v7626_v36 = vld [vmem:[%s10441_s4 + $0xa1] sm:$0xff] }
 0x1a3   : > { %8851 = vmatprep.mubr.msk.bf16.mxu1 %vm9813_vm6, %v9812_v14  ;;  %v1481_v39 = vpack.c.bf16 %v7626_v36, %v7625_v35  ;;  %v1332_v50 = vpack.c.bf16 %v7627_v41, %v7626_v36  ;;  %v7646_v36 = vld [vmem:[%s10441_s4 + $0x92] sm:$0xff] }
 0x1a9   : > { %8878 = vmatmul.mubr.msk.bf16.gmra.mxu0 %vm56_vm0, %v1178_v42  ;;  %v7628_v42 = vld [vmem:[%s10441_s4 + $0xb1] sm:$0xff] }
 0x1aa   : > { %8852 = vmatmul.mubr.msk.bf16.gmra.mxu1 %vm56_vm0, %v1026_v43  ;;  %8881 = vmatprep.mubr.msk.bf16.mxu0 %vm9813_vm6, %v9812_v14  ;;  %v1482_v43 = vpack.c.bf16 %v7628_v42, %v7627_v41 }
 0x1ab   : > { %8887 = vmatprep.mubr.msk.bf16.mxu1 %vm9813_vm6, %v9812_v14 }
 0x1b1   : > { %8882 = vmatmul.mubr.msk.bf16.gmra.mxu0 %vm56_vm0, %v1179_v60  ;;  %v1331_v60 = vpack.c.bf16 %v7625_v35, %v7624_v11  ;;  %v7645_v35 = vld [vmem:[%s10441_s4 + $0x8a] sm:$0xff] }
 0x1b2   : > { %8888 = vmatmul.mubr.msk.bf16.vlgmr.msra.gmra.mxu1 %vm56_vm0, %v1326_v48  ;;  %8917 = vmatprep.mubr.msk.bf16.mxu0 %vm9813_vm6, %v9812_v14  ;;  %v7631_v48 = vld [vmem:[%s10441_s4 + $0xc9] sm:$0xff]  ;;  %v1633_v42 = vpack.c.bf16 %v7646_v36, %v7645_v35 }
 0x1b3   : > { %8946 = vmatpush3.bf16.msra.mxu1 %v7657_v20  ;;  %8891 = vmatprep.mubr.msk.bf16.mxu1 %vm9813_vm6, %v9812_v14  ;;  %v7632_v20 = vld [vmem:[%s10441_s4 + $0xd1] sm:$0xff]  ;;  %v7670_v35 = vld [vmem:[%s10441_s4 + $0xa3] sm:$0xff] }
 0x1b4   : > { %v1484_v53 = vpack.c.bf16 %v7632_v20, %v7631_v48  ;;  %v7647_v20 = vld [vmem:[%s10441_s4 + $0x9a] sm:$0xff] }
 0x1b9   : > { %8918 = vmatmul.mubr.msk.bf16.vlgmr.msra.gmra.mxu0 %vm56_vm0, %v1479_v9  ;;  %v7643_v9 = vld [vmem:[%s10441_s4 + $0x7a] sm:$0xff] }
 0x1ba   : > { %8892 = vmatmul.mubr.msk.bf16.gmra.mxu1 %vm56_vm0, %v1327_v15  ;;  %8976 = vmatpush3.bf16.msra.mxu0 %v7679_v16  ;;  %v7644_v15 = vld [vmem:[%s10441_s4 + $0x82] sm:$0xff]  ;;  %v1485_v16 = vpack.c.bf16 %v7634_v12, %v7633_v57 }
 0x1bb   : > { %8895 = vmatprep.mubr.msk.bf16.mxu1 %vm9813_vm6, %v9812_v14  ;;  %8921 = vmatprep.mubr.msk.bf16.mxu0 %vm9813_vm6, %v9812_v14  ;;  %v1632_v18 = vpack.c.bf16 %v7644_v15, %v7643_v9 }
 0x1c1   : > { %8922 = vmatmul.mubr.msk.bf16.gmra.mxu0 %vm56_vm0, %v1480_v56  ;;  %v7666_v56 = vld [vmem:[%s10441_s4 + $0x83] sm:$0xff] }
 0x1c2   : > { %8896 = vmatmul.mubr.msk.bf16.gmra.mxu1 %vm56_vm0, %v1328_v55  ;;  %8925 = vmatprep.mubr.msk.bf16.mxu0 %vm9813_vm6, %v9812_v14 }
 0x1c3   : > { %8899 = vmatprep.mubr.msk.bf16.mxu1 %vm9813_vm6, %v9812_v14 }
 0x1c9   : > { %8926 = vmatmul.mubr.msk.bf16.gmra.mxu0 %vm56_vm0, %v1481_v39 }
 0x1ca   : > { %8900 = vmatmul.mubr.msk.bf16.gmra.mxu1 %vm56_vm0, %v1329_v40  ;;  %8929 = vmatprep.mubr.msk.bf16.mxu0 %vm9813_vm6, %v9812_v14  ;;  %v1785_v40 = vpack.c.bf16 %v7666_v56, %v7665_v10 }
 0x1cb   : > { %8903 = vmatprep.mubr.msk.bf16.mxu1 %vm9813_vm6, %v9812_v14 }
 0x1d1   : > { %8930 = vmatmul.mubr.msk.bf16.gmra.mxu0 %vm56_vm0, %v1482_v43 }
 0x1d2   : > { %8904 = vmatmul.mubr.msk.bf16.gmra.mxu1 %vm56_vm0, %v1330_v44  ;;  %8933 = vmatprep.mubr.msk.bf16.mxu0 %vm9813_vm6, %v9812_v14 }
 0x1d3   : > { %8907 = vmatprep.mubr.msk.bf16.mxu1 %vm9813_vm6, %v9812_v14 }
 0x1d9   : > { %8934 = vmatmul.mubr.msk.bf16.gmra.mxu0 %vm56_vm0, %v1483_v17  ;;  %v7667_v17 = vld [vmem:[%s10441_s4 + $0x8b] sm:$0xff] }
 0x1da   : > { %8908 = vmatmul.mubr.msk.bf16.gmra.mxu1 %vm56_vm0, %v1331_v60  ;;  %8937 = vmatprep.mubr.msk.bf16.mxu0 %vm9813_vm6, %v9812_v14  ;;  %v7668_v60 = vld [vmem:[%s10441_s4 + $0x93] sm:$0xff] }
 0x1db   : > { %8911 = vmatprep.mubr.msk.bf16.mxu1 %vm9813_vm6, %v9812_v14  ;;  %v1786_v12 = vpack.c.bf16 %v7668_v60, %v7667_v17 }
 0x1e1   : > { %8938 = vmatmul.mubr.msk.bf16.gmra.mxu0 %vm56_vm0, %v1484_v53  ;;  %v7648_v53 = vld [vmem:[%s10441_s4 + $0xa2] sm:$0xff] }
 0x1e2   : > { %8912 = vmatmul.mubr.msk.bf16.gmra.mxu1 %vm56_vm0, %v1332_v50  ;;  %8941 = vmatprep.mubr.msk.bf16.mxu0 %vm9813_vm6, %v9812_v14  ;;  %v1634_v15 = vpack.c.bf16 %v7648_v53, %v7647_v20 }
 0x1e3   : > { %8947 = vmatprep.mubr.msk.bf16.mxu1 %vm9813_vm6, %v9812_v14 }
 0x1e9   : > { %v680_v11 = vpop.f32.mrf.mxu0  ;;  %8942 = vmatmul.mubr.msk.bf16.gmra.mxu0 %vm56_vm0, %v1485_v16 }
 0x1ea   : > { %v10696_v19 = vpop.f32.mrf.mxu1  ;;  %8948 = vmatmul.mubr.msk.bf16.vlgmr.msra.gmra.mxu1 %vm56_vm0, %v1632_v18  ;;  %8977 = vmatprep.mubr.msk.bf16.mxu0 %vm9813_vm6, %v9812_v14 }
 0x1eb   : > { %v8739_v55 = vpop.f32.mrf.mxu0  ;;  %8951 = vmatprep.mubr.msk.bf16.mxu1 %vm9813_vm6, %v9812_v14 }
 0x1ec   : > { %v8755_v37 = vpop.f32.mrf.mxu1  ;;  %v7669_v55 = vld [vmem:[%s10441_s4 + $0x9b] sm:$0xff] }
 0x1ed   : > { %v683_v39 = vpop.f32.mrf.mxu0  ;;  %v7649_v37 = vld [vmem:[%s10441_s4 + $0xaa] sm:$0xff] }
 0x1ee   : > { %v10707_v41 = vpop.f32.mrf.mxu1 }
 0x1ef   : > { %v8740_v43 = vpop.f32.mrf.mxu0 }
 0x1f0   : > { %v8756_v44 = vpop.f32.mrf.mxu1 }
 0x1f1   : > { %v10709_v46 = vpop.f32.mrf.mxu0  ;;  %8978 = vmatmul.mubr.msk.bf16.vlgmr.msra.gmra.mxu0 %vm56_vm0, %v1785_v40  ;;  %v7650_v40 = vld [vmem:[%s10441_s4 + $0xb2] sm:$0xff]  ;;  %v1787_v44 = vpack.c.bf16 %v7670_v35, %v7669_v55  ;;  %v7651_v55 = vld [vmem:[%s10441_s4 + $0xba] sm:$0xff]  ;;  %v7652_v35 = vld [vmem:[%s10441_s4 + $0xc2] sm:$0xff] }
 0x1f2   : > { %v10712_v47 = vpop.f32.mrf.mxu1  ;;  %8952 = vmatmul.mubr.msk.bf16.gmra.mxu1 %vm56_vm0, %v1633_v42  ;;  %8981 = vmatprep.mubr.msk.bf16.mxu0 %vm9813_vm6, %v9812_v14  ;;  %v1635_v60 = vpack.c.bf16 %v7650_v40, %v7649_v37 }
 0x1f3   : > { %v8743_v48 = vpop.f32.mrf.mxu0  ;;  %8955 = vmatprep.mubr.msk.bf16.mxu1 %vm9813_vm6, %v9812_v14 }
 0x1f4   : > { %v8759_v50 = vpop.f32.mrf.mxu1 }
 0x1f5   : > { %v10723_v57 = vpop.f32.mrf.mxu0 }
 0x1f6   : > { %v10725_v9 = vpop.f32.mrf.mxu1 }
 0x1f7   : > { %v8744_v16 = vpop.f32.mrf.mxu0 }
 0x1f8   : > { %v8760_v18 = vpop.f32.mrf.mxu1 }
 0x1f9   : > { %v10727_v10 = vpop.f32.mrf.mxu0  ;;  %8982 = vmatmul.mubr.msk.bf16.gmra.mxu0 %vm56_vm0, %v1786_v12  ;;  %v7671_v12 = vld [vmem:[%s10441_s4 + $0xab] sm:$0xff] }
 0x1fa   : > { %v10730_v56 = vpop.f32.mrf.mxu1  ;;  %8956 = vmatmul.mubr.msk.bf16.gmra.mxu1 %vm56_vm0, %v1634_v15  ;;  %8985 = vmatprep.mubr.msk.bf16.mxu0 %vm9813_vm6, %v9812_v14  ;;  %v7672_v15 = vld [vmem:[%s10441_s4 + $0xb3] sm:$0xff] }
 0x1fb   : > { %v8747_v36 = vpop.f32.mrf.mxu0  ;;  %8959 = vmatprep.mubr.msk.bf16.mxu1 %vm9813_vm6, %v9812_v14  ;;  %v1788_v40 = vpack.c.bf16 %v7672_v15, %v7671_v12  ;;  %v7674_v12 = vld [vmem:[%s10441_s4 + $0xc3] sm:$0xff] }
 0x1fc   : > { %v8763_v42 = vpop.f32.mrf.mxu1 }
 0x1fd   : > { %v10741_v43 = vpop.f32.mrf.mxu0 }
 0x1fe   : > { %v10743_v17 = vpop.f32.mrf.mxu1 }
 0x1ff   : > { %v8748_v48 = vpop.f32.mrf.mxu0 }
 0x200   : > { %v8764_v20 = vpop.f32.mrf.mxu1 }
 0x201   : > { %v10745_v53 = vpop.f32.mrf.mxu0  ;;  %8986 = vmatmul.mubr.msk.bf16.gmra.mxu0 %vm56_vm0, %v1787_v44  ;;  %v1636_v44 = vpack.c.bf16 %v7652_v35, %v7651_v55  ;;  %v7654_v35 = vld [vmem:[%s10441_s4 + $0xd2] sm:$0xff] }
 0x202   : > { %v796_v50 = vpop.f32.mrf.mxu1  ;;  %8960 = vmatmul.mubr.msk.bf16.gmra.mxu1 %vm56_vm0, %v1635_v60  ;;  %8989 = vmatprep.mubr.msk.bf16.mxu0 %vm9813_vm6, %v9812_v14 }
 0x203   : > { %v797_v16 = vadd.f32 %v796_v50, %v680_v11  ;;  %v8751_v18 = vpop.f32.mrf.mxu0  ;;  %8963 = vmatprep.mubr.msk.bf16.mxu1 %vm9813_vm6, %v9812_v14 }
 0x204   : > { %v8769_v36 = vpop.f32.mrf.mxu1 }
 0x205   : > { %v10757_v37 = vpop.f32.mrf.mxu0  ;;  %v7673_v36 = vld [vmem:[%s10441_s4 + $0xbb] sm:$0xff] }
 0x206   : > { %v799_v42 = vpop.f32.mrf.mxu1 }
 0x207   : > { %v800_v60 = vadd.f32 %v799_v42, %v683_v39  ;;  %v8752_v48 = vpop.f32.mrf.mxu0  ;;  %v7653_v39 = vld [vmem:[%s10441_s4 + $0xca] sm:$0xff]  ;;  %v1789_v42 = vpack.c.bf16 %v7674_v12, %v7673_v36  ;;  %v7676_v36 = vld [vmem:[%s10441_s4 + $0xd3] sm:$0xff] }
 0x208   : > { %v8770_v20 = vpop.f32.mrf.mxu1 }
 0x209   : > { %v935_v11 = vpop.f32.mrf.mxu0  ;;  %8990 = vmatmul.mubr.msk.bf16.gmra.mxu0 %vm56_vm0, %v1788_v40  ;;  %v1637_v20 = vpack.c.bf16 %v7654_v35, %v7653_v39  ;;  %v7656_v35 = vld [vmem:[%s10441_s4 + $0xe2] sm:$0xff] }
 0x20a   : > { %v804_v50 = vpop.f32.mrf.mxu1  ;;  %v10760_v18 = vadd.f32 %v935_v11, %v797_v16  ;;  %8964 = vmatmul.mubr.msk.bf16.gmra.mxu1 %vm56_vm0, %v1636_v44  ;;  %8993 = vmatprep.mubr.msk.bf16.mxu0 %vm9813_vm6, %v9812_v14 }
 0x20b   : > { %v805_v15 = vadd.f32 %v804_v50, %v10709_v46  ;;  %v8799_v55 = vpop.f32.mrf.mxu0  ;;  %8967 = vmatprep.mubr.msk.bf16.mxu1 %vm9813_vm6, %v9812_v14 }
 0x20c   : > { %v8773_v40 = vpop.f32.mrf.mxu1 }
 0x20d   : > { %v938_v16 = vpop.f32.mrf.mxu0 }
 0x20e   : > { %v807_v48 = vpop.f32.mrf.mxu1  ;;  %v10772_v44 = vadd.f32 %v938_v16, %v800_v60  ;;  %v7675_v60 = vld [vmem:[%s10441_s4 + $0xcb] sm:$0xff] }
 0x20f   : > { %v808_v11 = vadd.f32 %v807_v48, %v10723_v57  ;;  %v8800_v46 = vpop.f32.mrf.mxu0  ;;  %v7655_v57 = vld [vmem:[%s10441_s4 + $0xda] sm:$0xff]  ;;  %v1790_v16 = vpack.c.bf16 %v7676_v36, %v7675_v60  ;;  %v7678_v36 = vld [vmem:[%s10441_s4 + $0xe3] sm:$0xff] }
 0x210   : > { %v8774_v50 = vpop.f32.mrf.mxu1  ;;  %v7677_v60 = vld [vmem:[%s10441_s4 + $0xdb] sm:$0xff] }
 0x211   : > { %v943_v55 = vpop.f32.mrf.mxu0  ;;  %8994 = vmatmul.mubr.msk.bf16.gmra.mxu0 %vm56_vm0, %v1789_v42 }
 0x212   : > { %v812_v1 = vpop.f32.mrf.mxu1  ;;  %v10776_v2 = vadd.f32 %v943_v55, %v805_v15  ;;  %8968 = vmatmul.mubr.msk.bf16.gmra.mxu1 %vm56_vm0, %v1637_v20  ;;  %8997 = vmatprep.mubr.msk.bf16.mxu0 %vm9813_vm6, %v9812_v14  ;;  %v1638_v20 = vpack.c.bf16 %v7656_v35, %v7655_v57 }
 0x213   : > { %v813_v12 = vadd.f32 %v812_v1, %v10727_v10  ;;  %v8803_v39 = vpop.f32.mrf.mxu0  ;;  %8971 = vmatprep.mubr.msk.bf16.mxu1 %vm9813_vm6, %v9812_v14 }
 0x214   : > { %v8777_v40 = vpop.f32.mrf.mxu1 }
 0x215   : > { %v946_v15 = vpop.f32.mrf.mxu0  ;;  %v1791_v40 = vpack.c.bf16 %v7678_v36, %v7677_v60 }
 0x216   : > { %v815_v42 = vpop.f32.mrf.mxu1  ;;  %v10788_v48 = vadd.f32 %v946_v15, %v808_v11 }
 0x217   : > { %v816_v46 = vadd.f32 %v815_v42, %v10741_v43  ;;  %v8804_v50 = vpop.f32.mrf.mxu0 }
 0x218   : > { %v8778_v55 = vpop.f32.mrf.mxu1 }
 0x219   : > { %v951_v1 = vpop.f32.mrf.mxu0  ;;  %8998 = vmatmul.mubr.msk.bf16.gmra.mxu0 %vm56_vm0, %v1790_v16 }
 0x21a   : > { %v820_v10 = vpop.f32.mrf.mxu1  ;;  %v10792_v39 = vadd.f32 %v951_v1, %v813_v12  ;;  %8972 = vmatmul.mubr.msk.bf16.gmra.mxu1 %vm56_vm0, %v1638_v20  ;;  %9001 = vmatprep.mubr.msk.bf16.mxu0 %vm9813_vm6, %v9812_v14 }
 0x21b   : > { %v821_v11 = vadd.f32 %v820_v10, %v10745_v53  ;;  %v8807_v57 = vpop.f32.mrf.mxu0 }
 0x21c   : > { %v8781_v35 = vpop.f32.mrf.mxu1 }
 0x21d   : > { %v954_v43 = vpop.f32.mrf.mxu0 }
 0x21e   : > { %v823_v15 = vpop.f32.mrf.mxu1  ;;  %v10800_v42 = vadd.f32 %v954_v43, %v816_v46 }
 0x21f   : > { %v824_v16 = vadd.f32 %v823_v15, %v10757_v37  ;;  %v8808_v12 = vpop.f32.mrf.mxu0 }
 0x220   : > { %v8782_v50 = vpop.f32.mrf.mxu1 }
 0x221   : > { %v959_v55 = vpop.f32.mrf.mxu0  ;;  %9002 = vmatmul.mubr.msk.bf16.gmra.mxu0 %vm56_vm0, %v1791_v40 }
 0x222   : > { %v828_v20 = vpop.f32.mrf.mxu1  ;;  %v10804_v14 = vadd.f32 %v959_v55, %v821_v11 }
 0x223   : > { %v829_v1 = vadd.f32 %v828_v20, %v10696_v19  ;;  %v8811_v53 = vpop.f32.mrf.mxu0 }
 0x224   : > { %v8785_v10 = vpop.f32.mrf.mxu1 }
 0x225   : > { %v962_v57 = vpop.f32.mrf.mxu0 }
 0x226   : > { %v831_v35 = vpop.f32.mrf.mxu1  ;;  %v10807_v60 = vadd.f32 %v962_v57, %v824_v16 }
 0x227   : > { %v832_v46 = vadd.f32 %v831_v35, %v10707_v41  ;;  %v8812_v36 = vpop.f32.mrf.mxu0 }
 0x228   : > { %v8786_v37 = vpop.f32.mrf.mxu1 }
 0x229   : > { %v967_v43 = vpop.f32.mrf.mxu0 }
 0x22a   : > { %v836_v15 = vpop.f32.mrf.mxu1  ;;  %v10810_v12 = vadd.f32 %v967_v43, %v829_v1 }
 0x22b   : > { %v837_v40 = vadd.f32 %v836_v15, %v10712_v47  ;;  %v8815_v11 = vpop.f32.mrf.mxu0 }
 0x22c   : > { %v8789_v50 = vpop.f32.mrf.mxu1 }
 0x22d   : > { %v970_v55 = vpop.f32.mrf.mxu0 }
 0x22e   : > { %v839_v19 = vpop.f32.mrf.mxu1  ;;  %v10813_v20 = vadd.f32 %v970_v55, %v832_v46 }
 0x22f   : > { %v840_v53 = vadd.f32 %v839_v19, %v10725_v9  ;;  %v8816_v16 = vpop.f32.mrf.mxu0 }
 0x230   : > { %v8790_v10 = vpop.f32.mrf.mxu1 }
 0x231   : > { %v975_v57 = vpop.f32.mrf.mxu0 }
 0x232   : > { %v844_v41 = vpop.f32.mrf.mxu1  ;;  %v10816_v35 = vadd.f32 %v975_v57, %v837_v40 }
 0x233   : > { %v845_v36 = vadd.f32 %v844_v41, %v10730_v56  ;;  %v8819_v1 = vpop.f32.mrf.mxu0 }
 0x234   : > { %v8793_v37 = vpop.f32.mrf.mxu1 }
 0x235   : > { %v978_v43 = vpop.f32.mrf.mxu0 }
 0x236   : > { %v847_v47 = vpop.f32.mrf.mxu1  ;;  %v10819_v15 = vadd.f32 %v978_v43, %v840_v53 }
 0x237   : > { %v848_v11 = vadd.f32 %v847_v47, %v10743_v17  ;;  %v8820_v46 = vpop.f32.mrf.mxu0 }
 0x238   : > { %v8794_v50 = vpop.f32.mrf.mxu1 }
 0x239   : > { %v983_v55 = vpop.f32.mrf.mxu0 }
 0x23a   : > { %v10822_v9 = vadd.f32 %v983_v55, %v845_v36  ;;  %v1088_v19 = vpop.f32.mrf.mxu1 }
 0x23b   : > { %v1143_v16 = vadd.f32 %v1088_v19, %v10760_v18  ;;  %v8823_v40 = vpop.f32.mrf.mxu0 }
 0x23c   : > { %v8829_v10 = vpop.f32.mrf.mxu1 }
 0x23d   : > { %v986_v57 = vpop.f32.mrf.mxu0 }
 0x23e   : > { %v10825_v56 = vadd.f32 %v986_v57, %v848_v11  ;;  %v1091_v41 = vpop.f32.mrf.mxu1 }
 0x23f   : > { %v1144_v1 = vadd.f32 %v1091_v41, %v10772_v44  ;;  %v8824_v53 = vpop.f32.mrf.mxu0 }
 0x240   : > { %v8830_v37 = vpop.f32.mrf.mxu1 }
 0x241   : > { %v1241_v43 = vpop.f32.mrf.mxu0 }
 0x242   : > { %v1096_v17 = vpop.f32.mrf.mxu1  ;;  %v10828_v47 = vadd.f32 %v1241_v43, %v1143_v16 }
 0x243   : > { %v1145_v36 = vadd.f32 %v1096_v17, %v10776_v2  ;;  %v8859_v46 = vpop.f32.mrf.mxu0 }
 0x244   : > { %v8833_v50 = vpop.f32.mrf.mxu1 }
 0x245   : > { %v1244_v55 = vpop.f32.mrf.mxu0 }
 0x246   : > { %v1099_v18 = vpop.f32.mrf.mxu1  ;;  %v10831_v19 = vadd.f32 %v1244_v55, %v1144_v1 }
 0x247   : > { %v1146_v11 = vadd.f32 %v1099_v18, %v10788_v48  ;;  %v8860_v40 = vpop.f32.mrf.mxu0 }
 0x248   : > { %v8834_v10 = vpop.f32.mrf.mxu1 }
 0x249   : > { %v1249_v57 = vpop.f32.mrf.mxu0 }
 0x24a   : > { %v1104_v44 = vpop.f32.mrf.mxu1  ;;  %v10834_v41 = vadd.f32 %v1249_v57, %v1145_v36 }
 0x24b   : > { %v1147_v53 = vadd.f32 %v1104_v44, %v10792_v39  ;;  %v8863_v16 = vpop.f32.mrf.mxu0 }
 0x24c   : > { %v8837_v37 = vpop.f32.mrf.mxu1 }
 0x24d   : > { %v1252_v43 = vpop.f32.mrf.mxu0 }
 0x24e   : > { %v1107_v2 = vpop.f32.mrf.mxu1  ;;  %v10837_v17 = vadd.f32 %v1252_v43, %v1146_v11 }
 0x24f   : > { %v1148_v46 = vadd.f32 %v1107_v2, %v10800_v42  ;;  %v8864_v1 = vpop.f32.mrf.mxu0 }
 0x250   : > { %v8838_v50 = vpop.f32.mrf.mxu1 }
 0x251   : > { %v1257_v55 = vpop.f32.mrf.mxu0 }
 0x252   : > { %v1112_v48 = vpop.f32.mrf.mxu1  ;;  %v10840_v18 = vadd.f32 %v1257_v55, %v1147_v53 }
 0x253   : > { %v1149_v40 = vadd.f32 %v1112_v48, %v10804_v14  ;;  %v8867_v36 = vpop.f32.mrf.mxu0 }
 0x254   : > { %v8841_v10 = vpop.f32.mrf.mxu1 }
 0x255   : > { %v1260_v57 = vpop.f32.mrf.mxu0 }
 0x256   : > { %v1115_v39 = vpop.f32.mrf.mxu1  ;;  %v10843_v44 = vadd.f32 %v1260_v57, %v1148_v46 }
 0x257   : > { %v1150_v16 = vadd.f32 %v1115_v39, %v10807_v60  ;;  %v8868_v11 = vpop.f32.mrf.mxu0 }
 0x258   : > { %v8842_v37 = vpop.f32.mrf.mxu1 }
 0x259   : > { %v1265_v43 = vpop.f32.mrf.mxu0 }
 0x25a   : > { %v1120_v42 = vpop.f32.mrf.mxu1  ;;  %v10846_v2 = vadd.f32 %v1265_v43, %v1149_v40 }
 0x25b   : > { %v1151_v1 = vadd.f32 %v1120_v42, %v10810_v12  ;;  %v8871_v53 = vpop.f32.mrf.mxu0 }
 0x25c   : > { %v8845_v50 = vpop.f32.mrf.mxu1 }
 0x25d   : > { %v1268_v55 = vpop.f32.mrf.mxu0 }
 0x25e   : > { %v1123_v14 = vpop.f32.mrf.mxu1  ;;  %v10849_v48 = vadd.f32 %v1268_v55, %v1150_v16 }
 0x25f   : > { %v1152_v36 = vadd.f32 %v1123_v14, %v10813_v20  ;;  %v8872_v46 = vpop.f32.mrf.mxu0 }
 0x260   : > { %v8846_v10 = vpop.f32.mrf.mxu1 }
 0x261   : > { %v1273_v57 = vpop.f32.mrf.mxu0 }
 0x262   : > { %v1128_v60 = vpop.f32.mrf.mxu1  ;;  %v10852_v39 = vadd.f32 %v1273_v57, %v1151_v1 }
 0x263   : > { %v1153_v11 = vadd.f32 %v1128_v60, %v10816_v35  ;;  %v8875_v40 = vpop.f32.mrf.mxu0 }
 0x264   : > { %v8849_v37 = vpop.f32.mrf.mxu1 }
 0x265   : > { %v1276_v43 = vpop.f32.mrf.mxu0 }
 0x266   : > { %v1131_v12 = vpop.f32.mrf.mxu1  ;;  %v10855_v42 = vadd.f32 %v1276_v43, %v1152_v36 }
 0x267   : > { %v1154_v53 = vadd.f32 %v1131_v12, %v10819_v15  ;;  %v8876_v16 = vpop.f32.mrf.mxu0 }
 0x268   : > { %v8850_v50 = vpop.f32.mrf.mxu1 }
 0x269   : > { %v1281_v55 = vpop.f32.mrf.mxu0 }
 0x26a   : > { %v1136_v20 = vpop.f32.mrf.mxu1  ;;  %v10858_v14 = vadd.f32 %v1281_v55, %v1153_v11 }
 0x26b   : > { %v1155_v46 = vadd.f32 %v1136_v20, %v10822_v9  ;;  %v8879_v1 = vpop.f32.mrf.mxu0 }
 0x26c   : > { %13450 = vst [vmem:[#allocation37_spill] sm:$0xff] %v10858_v14  ;;  %v8853_v10 = vpop.f32.mrf.mxu1 }
 0x26d   : > { %v1284_v57 = vpop.f32.mrf.mxu0 }
 0x26e   : > { %v1139_v35 = vpop.f32.mrf.mxu1  ;;  %v10861_v60 = vadd.f32 %v1284_v57, %v1154_v53 }
 0x26f   : > { %v1156_v40 = vadd.f32 %v1139_v35, %v10825_v56  ;;  %v8880_v36 = vpop.f32.mrf.mxu0 }
 0x270   : > { %13451 = vst [vmem:[#allocation38_spill] sm:$0xff] %v10861_v60  ;;  %v8854_v37 = vpop.f32.mrf.mxu1 }
 0x271   : > { %v1289_v43 = vpop.f32.mrf.mxu0 }
 0x272   : > { %v10864_v15 = vadd.f32 %v1289_v43, %v1155_v46  ;;  %v10866_v12 = vpop.f32.mrf.mxu1 }
 0x273   : > { %v8883_v16 = vpop.f32.mrf.mxu0 }
 0x274   : > { %13452 = vst [vmem:[#allocation39_spill] sm:$0xff] %v10864_v15  ;;  %v8889_v11 = vpop.f32.mrf.mxu1 }
 0x275   : > { %v1292_v50 = vpop.f32.mrf.mxu0 }
 0x276   : > { %v10868_v55 = vadd.f32 %v1292_v50, %v1156_v40  ;;  %v10870_v9 = vpop.f32.mrf.mxu1 }
 0x277   : > { %v8884_v20 = vpop.f32.mrf.mxu0 }
 0x278   : > { %13453 = vst [vmem:[#allocation40_spill] sm:$0xff] %v10868_v55  ;;  %v8890_v1 = vpop.f32.mrf.mxu1 }
 0x279   : > { %v10872_v53 = vpop.f32.mrf.mxu0 }
 0x27a   : > { %v10874_v10 = vpop.f32.mrf.mxu1 }
 0x27b   : > { %v8919_v56 = vpop.f32.mrf.mxu0 }
 0x27c   : > { %v8893_v57 = vpop.f32.mrf.mxu1 }
 0x27d   : > { %v10876_v35 = vpop.f32.mrf.mxu0 }
 0x27e   : > { %v10878_v46 = vpop.f32.mrf.mxu1 }
 0x27f   : > { %v8920_v36 = vpop.f32.mrf.mxu0 }
 0x280   : > { %v8894_v37 = vpop.f32.mrf.mxu1 }
 0x281   : > { %v10880_v43 = vpop.f32.mrf.mxu0 }
 0x282   : > { %v10882_v40 = vpop.f32.mrf.mxu1 }
 0x283   : > { %v8923_v16 = vpop.f32.mrf.mxu0 }
 0x284   : > { %v8897_v11 = vpop.f32.mrf.mxu1 }
 0x285   : > { %v10884_v50 = vpop.f32.mrf.mxu0 }
 0x286   : > { %v10886_v20 = vpop.f32.mrf.mxu1 }
 0x287   : > { %v8924_v1 = vpop.f32.mrf.mxu0 }
 0x288   : > { %v8898_v56 = vpop.f32.mrf.mxu1 }
 0x289   : > { %v10888_v57 = vpop.f32.mrf.mxu0 }
 0x28a   : > { %v10890_v0 = vpop.f32.mrf.mxu1 }
 0x28b   : > { %v8927_v3 = vpop.f32.mrf.mxu0 }
 0x28c   : > { %v8901_v36 = vpop.f32.mrf.mxu1 }
 0x28d   : > { %v10892_v37 = vpop.f32.mrf.mxu0 }
 0x28e   : > { %v10894_v4 = vpop.f32.mrf.mxu1 }
 0x28f   : > { %v8928_v5 = vpop.f32.mrf.mxu0 }
 0x290   : > { %v8902_v16 = vpop.f32.mrf.mxu1 }
 0x291   : > { %v10896_v11 = vpop.f32.mrf.mxu0 }
 0x292   : > { %v10898_v6 = vpop.f32.mrf.mxu1 }
 0x293   : > { %v8931_v7 = vpop.f32.mrf.mxu0 }
 0x294   : > { %v8905_v8 = vpop.f32.mrf.mxu1 }
 0x295   : > { %v10900_v1 = vpop.f32.mrf.mxu0 }
 0x296   : > { %v10903_v56 = vpop.f32.mrf.mxu1 }
 0x297   : > { %v8932_v13 = vpop.f32.mrf.mxu0 }
 0x298   : > { %v8906_v3 = vpop.f32.mrf.mxu1  ;;  %v1925_v13 = vadd.f32 %v10907_v38, %v13457_v22 }
 0x299   : > { %v10905_v36 = vpop.f32.mrf.mxu0 }
 0x29a   : > { %v10909_v49 = vpop.f32.mrf.mxu1 }
 0x29b   : > { %13454 = vst [vmem:[#allocation41_spill] sm:$0xff] %v10909_v49  ;;  %v8935_v5 = vpop.f32.mrf.mxu0 }
 0x29c   : > { %v8909_v16 = vpop.f32.mrf.mxu1  ;;  %v1939_v5 = vadd.f32 0.5, %v1925_v13 }
 0x29d   : > { %v10913_v7 = vpop.f32.mrf.mxu0  ;;  %v10925_v16 = vadd.f32 %v10907_v38, %v13460_v23 }
 0x29e   : > { %v10915_v8 = vpop.f32.mrf.mxu1  ;;  %v1953_v22 = vmul.f32 0.01724138, %v1939_v5 }
 0x29f   : > { %13456 = vst [vmem:[#allocation42_spill] sm:$0xff] %v10915_v8  ;;  %v8936_v52 = vpop.f32.mrf.mxu0  ;;  %v1966_v8 = vfloor.f32 %v1952_v63  ;;  %v10945_v63 = vadd.f32 %v10907_v38, %v13466_v25  ;;  %v10953_v25 = vadd.f32 %v10907_v38, %v10106_v26 }
 0x2a0   : > { %v8910_v3 = vpop.f32.mrf.mxu1 }
 0x2a1   : > { %v10919_v58 = vpop.f32.mrf.mxu0  ;;  %v1940_v3 = vadd.f32 0.5, %v10925_v16  ;;  %v1942_v49 = vadd.f32 0.5, %v10945_v63 }
 0x2a2   : > { %13458 = vst [vmem:[#allocation43_spill] sm:$0xff] %v10919_v58  ;;  %v10921_v59 = vpop.f32.mrf.mxu1 }
 0x2a3   : > { %13459 = vst [vmem:[#allocation44_spill] sm:$0xff] %v10921_v59  ;;  %v8939_v61 = vpop.f32.mrf.mxu0  ;;  %v1954_v54 = vmul.f32 0.01724138, %v1940_v3  ;;  %v1450_v3 = vadd.f32 %v10870_v9, %v10831_v19 }
 0x2a4   : > { %v8913_v62 = vpop.f32.mrf.mxu1  ;;  %v10936_v61 = vadd.f32 %v10907_v38, %v13464_v24 }
 0x2a5   : > { %v10927_v21 = vpop.f32.mrf.mxu0  ;;  %v1967_v62 = vfloor.f32 %v1953_v22  ;;  %v1968_v22 = vfloor.f32 %v1954_v54 }
 0x2a6   : > { %13461 = vst [vmem:[#allocation45_spill] sm:$0xff] %v10927_v21  ;;  %v10929_v52 = vpop.f32.mrf.mxu1  ;;  %v1449_v21 = vadd.f32 %v10866_v12, %v10828_v47 }
 0x2a7   : > { %13462 = vst [vmem:[#allocation46_spill] sm:$0xff] %v10929_v52  ;;  %v8940_v55 = vpop.f32.mrf.mxu0  ;;  %v1982_v14 = vmul.f32 58.0, %v1968_v22 }
 0x2a8   : > { %v8914_v15 = vpop.f32.mrf.mxu1  ;;  %v1980_v55 = vmul.f32 58.0, %v1966_v8  ;;  %v1602_v24 = vadd.f32 %v10872_v53, %v1449_v21  ;;  %v1603_v21 = vadd.f32 %v10876_v35, %v1450_v3  ;;  %v1943_v35 = vadd.f32 0.5, %v10953_v25 }
 0x2a9   : > { %v10932_v60 = vpop.f32.mrf.mxu0  ;;  %v1941_v15 = vadd.f32 0.5, %v10936_v61 }
 0x2aa   : > { %13463 = vst [vmem:[#allocation47_spill] sm:$0xff] %v10932_v60  ;;  %v1700_v23 = vpop.f32.mrf.mxu1  ;;  %v1994_v8 = vsub.f32 %v1924_v51, %v1980_v55 }
 0x2ab   : > { %v8943_v59 = vpop.f32.mrf.mxu0  ;;  %v1755_v47 = vadd.f32 %v1700_v23, %v1602_v24  ;;  %v1451_v23 = vadd.f32 %v10874_v10, %v10834_v41 }
 0x2ac   : > { %v8949_v52 = vpop.f32.mrf.mxu1  ;;  %v1981_v59 = vmul.f32 58.0, %v1967_v62  ;;  %vm10958_vm7 = vcmp.lt.f32.partialorder %v1994_v8, 56.0 }
 0x2ad   : > { %v10940_v5 = vpop.f32.mrf.mxu0  ;;  %v1604_v41 = vadd.f32 %v10880_v43, %v1451_v23 }
 0x2ae   : > { %13465 = vst [vmem:[#allocation48_spill] sm:$0xff] %v10940_v5  ;;  %v1703_v60 = vpop.f32.mrf.mxu1  ;;  %v1955_v5 = vmul.f32 0.01724138, %v1941_v15  ;;  %v1995_v54 = vsub.f32 %v1925_v13, %v1981_v59  ;;  %v10966_v13 = vadd.f32 %v10907_v38, %v10108_v27 }
 0x2af   : > { %v8944_v58 = vpop.f32.mrf.mxu0  ;;  %v1756_v24 = vadd.f32 %v1703_v60, %v1603_v21 }
 0x2b0   : > { %v8950_v12 = vpop.f32.mrf.mxu1  ;;  %v1969_v15 = vfloor.f32 %v1955_v5  ;;  %vm10969_vm8 = vcmp.lt.f32.partialorder %v1995_v54, 56.0  ;;  %v1996_v5 = vsub.f32 %v10925_v16, %v1982_v14  ;;  %v1944_v54 = vadd.f32 0.5, %v10966_v13 }
 0x2b1   : > { %v1853_v52 = vpop.f32.mrf.mxu0  ;;  %v1956_v12 = vmul.f32 0.01724138, %v1942_v49  ;;  %v10976_v49 = vadd.f32 %v10907_v38, %v10110_v28 }
 0x2b2   : > { %v1708_v53 = vpop.f32.mrf.mxu1  ;;  %v1908_v58 = vadd.f32 %v1853_v52, %v1755_v47  ;;  %v1452_v47 = vadd.f32 %v10878_v46, %v10837_v17  ;;  %v1983_v16 = vmul.f32 58.0, %v1969_v15  ;;  %vm10990_vm9 = vcmp.lt.f32.partialorder %v1996_v5, 56.0 }
 0x2b3   : > { %v8979_v62 = vpop.f32.mrf.mxu0  ;;  %v1757_v8 = vadd.f32 %v1708_v53, %v1604_v41  ;;  %v1958_v5 = vmul.f32 0.01724138, %v1944_v54 }
 0x2b4   : > { %v2028_v19 = vadd.f32 %v10420_v45, %v1908_v58  ;;  %v8953_v9 = vpop.f32.mrf.mxu1  ;;  %v1970_v58 = vfloor.f32 %v1956_v12  ;;  %v1957_v62 = vmul.f32 0.01724138, %v1943_v35  ;;  %v1605_v17 = vadd.f32 %v10884_v50, %v1452_v47 }
 0x2b5   : > { %v1856_v55 = vpop.f32.mrf.mxu0  ;;  %v10997_v9 = vadd.f32 %v10907_v38, %v10112_v29 }
 0x2b6   : > { %v2042_v60 = vmax.f32 %v2028_v19, 0.0  ;;  %v1711_v10 = vpop.f32.mrf.mxu1  ;;  %v1909_v59 = vadd.f32 %v1856_v55, %v1756_v24  ;;  %v1945_v19 = vadd.f32 0.5, %v10976_v49  ;;  %v1453_v55 = vadd.f32 %v10882_v40, %v10840_v18 }
 0x2b7   : > { %v8980_v3 = vpop.f32.mrf.mxu0  ;;  %v1758_v15 = vadd.f32 %v1711_v10, %v1605_v17  ;;  %v1972_v17 = vfloor.f32 %v1958_v5 }
 0x2b8   : > { %v2084_v43 = vsel %vm10958_vm7, %v2042_v60, 0.0  ;;  %v2029_v52 = vadd.f32 %v10420_v45, %v1909_v59  ;;  %v8954_v21 = vpop.f32.mrf.mxu1  ;;  %v1997_v60 = vsub.f32 %v10936_v61, %v1983_v16  ;;  %v1984_v59 = vmul.f32 58.0, %v1970_v58 }
 0x2b9   : > { %7688 = vst.msk [vmem:[%s10984_s2 + $0x40] sm:$0xff] %vm56_vm0, %v2084_v43  ;;  %v1861_v14 = vpop.f32.mrf.mxu0  ;;  %v1971_v3 = vfloor.f32 %v1957_v62  ;;  %v1606_v47 = vadd.f32 %v10888_v57, %v1453_v55  ;;  %v1959_v22 = vmul.f32 0.01724138, %v1945_v19  ;;  %v1946_v43 = vadd.f32 0.5, %v10997_v9 }
 0x2ba   : > { %v2043_v46 = vmax.f32 %v2029_v52, 0.0  ;;  %v1716_v53 = vpop.f32.mrf.mxu1  ;;  %v1910_v23 = vadd.f32 %v1861_v14, %v1757_v8  ;;  %v11011_v52 = vadd.f32 %v10907_v38, %v10114_v30  ;;  %v1454_v61 = vadd.f32 %v10886_v20, %v10843_v44 }
 0x2bb   : > { %v8983_v51 = vpop.f32.mrf.mxu0  ;;  %v1759_v21 = vadd.f32 %v1716_v53, %v1606_v47  ;;  %vm2011_vm10 = vcmp.lt.f32.partialorder %v1997_v60, 56.0  ;;  %v1998_v62 = vsub.f32 %v10945_v63, %v1984_v59  ;;  %v1985_v54 = vmul.f32 58.0, %v1971_v3 }
 0x2bc   : > { %v2085_v50 = vsel %vm10969_vm8, %v2043_v46, 0.0  ;;  %v2030_v12 = vadd.f32 %v10420_v45, %v1910_v23  ;;  %v8957_v35 = vpop.f32.mrf.mxu1  ;;  %v1607_v46 = vadd.f32 %v10892_v37, %v1454_v61  ;;  %v1973_v24 = vfloor.f32 %v1959_v22 }
 0x2bd   : > { %7689 = vst.msk [vmem:[%s10984_s2 + $0x48] sm:$0xff] %vm56_vm0, %v2085_v50  ;;  %v1864_v41 = vpop.f32.mrf.mxu0  ;;  %v1960_v51 = vmul.f32 0.01724138, %v1946_v43  ;;  %v1947_v19 = vadd.f32 0.5, %v11011_v52  ;;  %v1455_v55 = vadd.f32 %v10890_v0, %v10846_v2  ;;  %vm2012_vm11 = vcmp.lt.f32.partialorder %v1998_v62, 56.0 }
 0x2be   : > { %v2044_v8 = vmax.f32 %v2030_v12, 0.0  ;;  %v1719_v18 = vpop.f32.mrf.mxu1  ;;  %v1911_v40 = vadd.f32 %v1864_v41, %v1758_v15  ;;  %v1999_v35 = vsub.f32 %v10953_v25, %v1985_v54  ;;  %v1986_v41 = vmul.f32 58.0, %v1972_v17 }
 0x2bf   : > { %v8984_v10 = vpop.f32.mrf.mxu0  ;;  %v1760_v15 = vadd.f32 %v1719_v18, %v1607_v46  ;;  %v11031_v60 = vadd.f32 %v10907_v38, %v10116_v31  ;;  %v1608_v59 = vadd.f32 %v10896_v11, %v1455_v55  ;;  %v1987_v47 = vmul.f32 58.0, %v1973_v24 }
 0x2c0   : > { %v2086_v14 = vsel %vm10990_vm9, %v2044_v8, 0.0  ;;  %v2031_v57 = vadd.f32 %v10420_v45, %v1911_v40  ;;  %v8958_v16 = vpop.f32.mrf.mxu1  ;;  %v1974_v8 = vfloor.f32 %v1960_v51  ;;  %v1961_v18 = vmul.f32 0.01724138, %v1947_v19 }
 0x2c1   : > { %7690 = vst.msk [vmem:[%s10984_s2 + $0x50] sm:$0xff] %vm56_vm0, %v2086_v14  ;;  %v1869_v58 = vpop.f32.mrf.mxu0  ;;  %v1456_v40 = vadd.f32 %v10894_v4, %v10849_v48  ;;  %vm2013_vm12 = vcmp.lt.f32.partialorder %v1999_v35, 56.0  ;;  %v2000_v11 = vsub.f32 %v10966_v13, %v1986_v41  ;;  %v11043_v14 = vadd.f32 %v10907_v38, %v10118_v32 }
 0x2c2   : > { %v2045_v23 = vmax.f32 %v2031_v57, 0.0  ;;  %v1724_v44 = vpop.f32.mrf.mxu1  ;;  %v1912_v20 = vadd.f32 %v1869_v58, %v1759_v21  ;;  %v1948_v21 = vadd.f32 0.5, %v11031_v60  ;;  %v2001_v62 = vsub.f32 %v10976_v49, %v1987_v47 }
 0x2c3   : > { %v8987_v53 = vpop.f32.mrf.mxu0  ;;  %v1761_v10 = vadd.f32 %v1724_v44, %v1608_v59  ;;  %v1609_v4 = vadd.f32 %v10900_v1, %v1456_v40  ;;  %v1988_v54 = vmul.f32 58.0, %v1974_v8  ;;  %v1975_v17 = vfloor.f32 %v1961_v18  ;;  %v13487_v8 = vld [vmem:[#allocation47_spill] sm:$0xff] }
 0x2c4   : > { %v2087_v50 = vsel %vm2011_vm10, %v2045_v23, 0.0  ;;  %v2032_v63 = vadd.f32 %v10420_v45, %v1912_v20  ;;  %v8961_v12 = vpop.f32.mrf.mxu1  ;;  %v1457_v13 = vadd.f32 %v10898_v6, %v10852_v39  ;;  %vm2014_vm13 = vcmp.lt.f32.partialorder %v2000_v11, 56.0 }
 0x2c5   : > { %7691 = vst.msk [vmem:[%s10984_s2 + $0x58] sm:$0xff] %vm56_vm0, %v2087_v50  ;;  %v1872_v37 = vpop.f32.mrf.mxu0  ;;  %v1962_v53 = vmul.f32 0.01724138, %v1948_v21  ;;  %v1949_v24 = vadd.f32 0.5, %v11043_v14  ;;  %v11055_v49 = vadd.f32 %v10907_v38, %v10120_v33  ;;  %vm11058_vm14 = vcmp.lt.f32.partialorder %v2001_v62, 56.0 }
 0x2c6   : > { %v2046_v0 = vmax.f32 %v2032_v63, 0.0  ;;  %v1727_v2 = vpop.f32.mrf.mxu1  ;;  %v1913_v3 = vadd.f32 %v1872_v37, %v1760_v15  ;;  %v1610_v51 = vadd.f32 %v10905_v36, %v1457_v13  ;;  %v2002_v50 = vsub.f32 %v10997_v9, %v1988_v54 }
 0x2c7   : > { %v8988_v5 = vpop.f32.mrf.mxu0  ;;  %v1762_v46 = vadd.f32 %v1727_v2, %v1609_v4  ;;  %v1989_v63 = vmul.f32 58.0, %v1975_v17  ;;  %v1458_v12 = vadd.f32 %v10903_v56, %v10855_v42  ;;  %v1963_v2 = vmul.f32 0.01724138, %v1949_v24 }
 0x2c8   : > { %v2088_v25 = vsel %vm2012_vm11, %v2046_v0, 0.0  ;;  %v2033_v22 = vadd.f32 %v10420_v45, %v1913_v3  ;;  %v8962_v43 = vpop.f32.mrf.mxu1  ;;  %v1976_v0 = vfloor.f32 %v1962_v53  ;;  %v1950_v3 = vadd.f32 0.5, %v11055_v49 }
 0x2c9   : > { %7692 = vst.msk [vmem:[%s10984_s2 + $0x60] sm:$0xff] %vm56_vm0, %v2088_v25  ;;  %v1877_v61 = vpop.f32.mrf.mxu0  ;;  %v11071_v9 = vadd.f32 %v10907_v38, %v10122_v34  ;;  %v1611_v5 = vadd.f32 %v10913_v7, %v1458_v12  ;;  %vm11074_vm15 = vcmp.lt.f32.partialorder %v2002_v50, 56.0  ;;  %v2003_v40 = vsub.f32 %v11011_v52, %v1989_v63  ;;  %v13478_v25 = vld [vmem:[#allocation41_spill] sm:$0xff]  ;;  %v13479_v52 = vld [vmem:[#allocation43_spill] sm:$0xff] }
 0x2ca   : > { %v2047_v48 = vmax.f32 %v2033_v22, 0.0  ;;  %v1732_v57 = vpop.f32.mrf.mxu1  ;;  %v1914_v16 = vadd.f32 %v1877_v61, %v1761_v10  ;;  %v13477_v10 = vld [vmem:[#allocation37_spill] sm:$0xff]  ;;  %v1990_v21 = vmul.f32 58.0, %v1976_v0  ;;  %v1977_v4 = vfloor.f32 %v1963_v2 }
 0x2cb   : > { %v8991_v58 = vpop.f32.mrf.mxu0  ;;  %v1763_v37 = vadd.f32 %v1732_v57, %v1610_v51  ;;  %v1459_v22 = vadd.f32 %v13478_v25, %v13477_v10  ;;  %v1951_v57 = vadd.f32 0.5, %v11071_v9  ;;  %vm11088_vm2 = vcmp.lt.f32.partialorder %v2003_v40, 56.0 }
 0x2cc   : > { %v2089_v23 = vsel %vm2013_vm12, %v2047_v48, 0.0  ;;  %v2034_v44 = vadd.f32 %v10420_v45, %v1914_v16  ;;  %v8965_v20 = vpop.f32.mrf.mxu1  ;;  %v1964_v48 = vmul.f32 0.01724138, %v1950_v3 }
 0x2cd   : > { %7693 = vst.msk [vmem:[%s10984_s2 + $0x68] sm:$0xff] %vm56_vm0, %v2089_v23  ;;  %v1880_v1 = vpop.f32.mrf.mxu0  ;;  %v1612_v16 = vadd.f32 %v13479_v52, %v1459_v22  ;;  %v13483_v23 = vld [vmem:[#allocation42_spill] sm:$0xff]  ;;  %v1965_v55 = vmul.f32 0.01724138, %v1951_v57  ;;  %v13490_v52 = vld [vmem:[#allocation48_spill] sm:$0xff] }
 0x2ce   : > { %v2048_v6 = vmax.f32 %v2034_v44, 0.0  ;;  %v1735_v39 = vpop.f32.mrf.mxu1  ;;  %v1915_v19 = vadd.f32 %v1880_v1, %v1762_v46  ;;  %v13482_v46 = vld [vmem:[#allocation38_spill] sm:$0xff] }
 0x2cf   : > { %v8992_v15 = vpop.f32.mrf.mxu0  ;;  %v1764_v43 = vadd.f32 %v1735_v39, %v1611_v5  ;;  %v1460_v44 = vadd.f32 %v13483_v23, %v13482_v46  ;;  %v1991_v39 = vmul.f32 58.0, %v1977_v4 }
 0x2d0   : > { %v2090_v35 = vsel %vm2014_vm13, %v2048_v6, 0.0  ;;  %v2035_v41 = vadd.f32 %v10420_v45, %v1915_v19  ;;  %v8966_v59 = vpop.f32.mrf.mxu1  ;;  %v2004_v6 = vsub.f32 %v11031_v60, %v1990_v21  ;;  %v1978_v19 = vfloor.f32 %v1964_v48  ;;  %v13484_v15 = vld [vmem:[#allocation45_spill] sm:$0xff] }
 0x2d1   : > { %7694 = vst.msk [vmem:[%s10984_s2 + $0x70] sm:$0xff] %vm56_vm0, %v2090_v35  ;;  %v1885_v36 = vpop.f32.mrf.mxu0  ;;  %v1613_v50 = vadd.f32 %v13484_v15, %v1460_v44  ;;  %v13486_v59 = vld [vmem:[#allocation44_spill] sm:$0xff]  ;;  %v11157_v15 = vld [vmem:[%s13365_s5 + $0x14] sm:$0xf] (%p568_p1) }
 0x2d2   : > { %v2049_v42 = vmax.f32 %v2035_v41, 0.0  ;;  %v1740_v56 = vpop.f32.mrf.mxu1  ;;  %v1916_v47 = vadd.f32 %v1885_v36, %v1763_v37  ;;  %v13485_v41 = vld [vmem:[#allocation39_spill] sm:$0xff]  ;;  %vm2018_vm3 = vcmp.lt.f32.partialorder %v2004_v6, 56.0  ;;  %13496 = vst [vmem:[#allocation24_spill] sm:$0xff] (%p568_p1), %v11157_v15 }
 0x2d3   : > { %v8995_v18 = vpop.f32.mrf.mxu0  ;;  %v1765_v20 = vadd.f32 %v1740_v56, %v1612_v16  ;;  %v1461_v36 = vadd.f32 %v13486_v59, %v13485_v41  ;;  %v1992_v56 = vmul.f32 58.0, %v1978_v19  ;;  %v11142_v19 = vld [vmem:[%s13365_s5 + $0x8] sm:$0xf] (%p568_p1)  ;;  %v11187_v41 = vld [vmem:[%s13365_s5 + $0x2c] sm:$0xf] (%p568_p1) }
 0x2d4   : > { %v2091_v38 = vsel %vm11058_vm14, %v2049_v42, 0.0  ;;  %v2036_v61 = vadd.f32 %v10420_v45, %v1916_v47  ;;  %v8969_v7 = vpop.f32.mrf.mxu1  ;;  %v2005_v42 = vsub.f32 %v11043_v14, %v1991_v39  ;;  %v1979_v47 = vfloor.f32 %v1965_v55  ;;  %v11137_v39 = vld [vmem:[%s13365_s5 + $0x4] sm:$0xf] (%p568_p1)  ;;  %13493 = vst [vmem:[#allocation21_spill] sm:$0xff] (%p568_p1), %v11142_v19  ;;  %v11147_v55 = vld [vmem:[%s13365_s5 + $0xc] sm:$0xf] (%p568_p1) }
 0x2d5   : > { %7695 = vst.msk [vmem:[%s10984_s2 + $0x78] sm:$0xff] %vm56_vm0, %v2091_v38  ;;  %v1888_v11 = vpop.f32.mrf.mxu0  ;;  %v1614_v18 = vadd.f32 %v13487_v8, %v1461_v36  ;;  %v13489_v38 = vld [vmem:[#allocation46_spill] sm:$0xff]  ;;  %v2006_v48 = vsub.f32 %v11055_v49, %v1992_v56  ;;  %13492 = vst [vmem:[#allocation20_spill] sm:$0xff] (%p568_p1), %v11137_v39  ;;  %v11192_v59 = vld [vmem:[%s13365_s5 + $0x30] sm:$0xf] (%p568_p1) }
 0x2d6   : > { %v2050_v58 = vmax.f32 %v2036_v61, 0.0  ;;  %v1743_v62 = vpop.f32.mrf.mxu1  ;;  %v1917_v54 = vadd.f32 %v1888_v11, %v1764_v43  ;;  %v13488_v43 = vld [vmem:[#allocation40_spill] sm:$0xff]  ;;  %vm2019_vm4 = vcmp.lt.f32.partialorder %v2005_v42, 56.0  ;;  %v1993_v57 = vmul.f32 58.0, %v1979_v47  ;;  %13494 = vst [vmem:[#allocation22_spill] sm:$0xff] (%p568_p1), %v11147_v55  ;;  %13502 = vst [vmem:[#allocation30_spill] sm:$0xff] (%p568_p1), %v11187_v41 }
 0x2d7   : > { %v8996_v13 = vpop.f32.mrf.mxu0  ;;  %v1766_v0 = vadd.f32 %v1743_v62, %v1613_v50  ;;  %v1462_v61 = vadd.f32 %v13489_v38, %v13488_v43  ;;  %vm2020_vm5 = vcmp.lt.f32.partialorder %v2006_v48, 56.0  ;;  %v11162_v50 = vld [vmem:[%s13365_s5 + $0x18] sm:$0xf] (%p568_p1)  ;;  %13503 = vst [vmem:[#allocation31_spill] sm:$0xff] (%p568_p1), %v11192_v59  ;;  %v11197_v36 = vld [vmem:[%s13365_s5 + $0x34] sm:$0xf] (%p568_p1) }
 0x2d8   : > { %v2092_v1 = vsel %vm11074_vm15, %v2050_v58, 0.0  ;;  %v2037_v53 = vadd.f32 %v10420_v45, %v1917_v54  ;;  %v8970_v24 = vpop.f32.mrf.mxu1  ;;  %v2007_v44 = vsub.f32 %v11071_v9, %v1993_v57  ;;  %v11132_v9 = vld [vmem:[%s13365_s5] sm:$0xf] (%p568_p1)  ;;  %13497 = vst [vmem:[#allocation25_spill] sm:$0xff] (%p568_p1), %v11162_v50  ;;  %13504 = vst [vmem:[#allocation32_spill] sm:$0xff] (%p568_p1), %v11197_v36 }
 0x2d9   : > { %7696 = vst.msk [vmem:[%s10984_s2 + $0x80] sm:$0xff] %vm56_vm0, %v2092_v1  ;;  %v1893_v51 = vpop.f32.mrf.mxu0  ;;  %v1615_v16 = vadd.f32 %v13490_v52, %v1462_v61  ;;  %13491 = vst [vmem:[#allocation19_spill] sm:$0xff] (%p568_p1), %v11132_v9 }
 0x2da   : > { %v2051_v63 = vmax.f32 %v2037_v53, 0.0  ;;  %v1748_v12 = vpop.f32.mrf.mxu1  ;;  %v1918_v37 = vadd.f32 %v1893_v51, %v1765_v20  ;;  %vm2021_vm6 = vcmp.lt.f32.partialorder %v2007_v44, 56.0 }
 0x2db   : > { %v8999_v35 = vpop.f32.mrf.mxu0  ;;  %v1767_v7 = vadd.f32 %v1748_v12, %v1614_v18  ;;  %v11172_v12 = vld [vmem:[%s13365_s5 + $0x20] sm:$0xf] (%p568_p1) }
 0x2dc   : > { %v2093_v2 = vsel %vm11088_vm2, %v2051_v63, 0.0  ;;  %v2038_v3 = vadd.f32 %v10420_v45, %v1918_v37  ;;  %v8973_v5 = vpop.f32.mrf.mxu1  ;;  %v11167_v63 = vld [vmem:[%s13365_s5 + $0x1c] sm:$0xf] (%p568_p1)  ;;  %13499 = vst [vmem:[#allocation27_spill] sm:$0xff] (%p568_p1), %v11172_v12  ;;  %v11177_v37 = vld [vmem:[%s13365_s5 + $0x24] sm:$0xf] (%p568_p1) }
 0x2dd   : > { %7697 = vst.msk [vmem:[%s10984_s2 + $0x88] sm:$0xff] %vm56_vm0, %v2093_v2  ;;  %v1896_v60 = vpop.f32.mrf.mxu0  ;;  %13498 = vst [vmem:[#allocation26_spill] sm:$0xff] (%p568_p1), %v11167_v63  ;;  %v11182_v35 = vld [vmem:[%s13365_s5 + $0x28] sm:$0xf] (%p568_p1)  ;;  %v11207_v2 = vld [vmem:[%s13365_s5 + $0x3c] sm:$0xf] (%p568_p1) }
 0x2de   : > { %v2052_v40 = vmax.f32 %v2038_v3, 0.0  ;;  %v1751_v10 = vpop.f32.mrf.mxu1  ;;  %v1919_v25 = vadd.f32 %v1896_v60, %v1766_v0  ;;  %13500 = vst [vmem:[#allocation28_spill] sm:$0xff] (%p568_p1), %v11177_v37  ;;  %13501 = vst [vmem:[#allocation29_spill] sm:$0xff] (%p568_p1), %v11182_v35  ;;  %v11202_v0 = vld [vmem:[%s13365_s5 + $0x38] sm:$0xf] (%p568_p1) }
 0x2df   : > { %v9000_v22 = vpop.f32.mrf.mxu0  ;;  %v1768_v17 = vadd.f32 %v1751_v10, %v1615_v16  ;;  %13505 = vst [vmem:[#allocation33_spill] sm:$0xff] (%p568_p1), %v11202_v0  ;;  %13506 = vst [vmem:[#allocation34_spill] sm:$0xff] (%p568_p1), %v11207_v2  ;;  %v11212_v3 = vld [vmem:[%s13365_s5 + $0x40] sm:$0xf] (%p568_p1)  ;;  %v11217_v5 = vld [vmem:[%s13365_s5 + $0x44] sm:$0xf] (%p568_p1) }
 0x2e0   : > { %v2094_v11 = vsel %vm2018_vm3, %v2052_v40, 0.0  ;;  %v2039_v21 = vadd.f32 %v10420_v45, %v1919_v25  ;;  %v8974_v4 = vpop.f32.mrf.mxu1  ;;  %13507 = vst [vmem:[#allocation35_spill] sm:$0xff] (%p568_p1), %v11212_v3  ;;  %13508 = vst [vmem:[#allocation36_spill] sm:$0xff] (%p568_p1), %v11217_v5  ;;  %v11222_v60 = vld [vmem:[%s13366_s6] ss:$0 sm:$0xff] (%p568_p1) }
 0x2e1   : > { %7698 = vst.msk [vmem:[%s10984_s2 + $0x90] sm:$0xff] %vm56_vm0, %v2094_v11  ;;  %v1901_v14 = vpop.f32.mrf.mxu0 }
 0x2e2   : > { %v2053_v58 = vmax.f32 %v2039_v21, 0.0  ;;  %v1920_v62 = vadd.f32 %v1901_v14, %v1767_v7 }
 0x2e3   : > { %v9003_v54 = vpop.f32.mrf.mxu0 }
 0x2e4   : > { %v2095_v13 = vsel %vm2019_vm4, %v2053_v58, 0.0  ;;  %v2040_v46 = vadd.f32 %v10420_v45, %v1920_v62 }
 0x2e5   : > { %7699 = vst.msk [vmem:[%s10984_s2 + $0x98] sm:$0xff] %vm56_vm0, %v2095_v13  ;;  %v1904_v23 = vpop.f32.mrf.mxu0 }
 0x2e6   : > { %v2054_v20 = vmax.f32 %v2040_v46, 0.0  ;;  %v1921_v49 = vadd.f32 %v1904_v23, %v1768_v17 }
 0x2e7   : > { %v9004_v1 = vpop.f32.mrf.mxu0 }
 0x2e8   : > { %v2096_v53 = vsel %vm2020_vm5, %v2054_v20, 0.0  ;;  %v2041_v24 = vadd.f32 %v10420_v45, %v1921_v49  ;;  %v11152_v45 = vld [vmem:[%s13365_s5 + $0x10] sm:$0xf] (%p568_p1) }
 0x2e9   : > { %7700 = vst.msk [vmem:[%s10984_s2 + $0xa0] sm:$0xff] %vm56_vm0, %v2096_v53  ;;  %570 = sbr.rel (!%p568_p1) target bundleno = 288 (0x120), region = 296  ;;  %13495 = vst [vmem:[#allocation23_spill] sm:$0xff] (%p568_p1), %v11152_v45 }
 0x2ea   : > { %v2055_v51 = vmax.f32 %v2041_v24, 0.0 }
 0x2ec   : > { %v2097_v6 = vsel %vm2021_vm6, %v2055_v51, 0.0 }
 0x2ed   : > { %7701 = vst.msk [vmem:[%s10984_s2 + $0xa8] sm:$0xff] %vm56_vm0, %v2097_v6 }
 0x2ee LB: > { %v13509_v55 = vld [vmem:[#allocation22_spill] sm:$0xff]  ;;  %v13510_v19 = vld [vmem:[#allocation21_spill] sm:$0xff]  ;;  %v9814_v56 = vmov 0.0   ;;  %s11234_s5 = smul.u32 112, %s9790_s24  ;;  %vm9815_vm7 = vmmov 0   ;;  %v13511_v15 = vld [vmem:[#allocation24_spill] sm:$0xff]  ;;  %s9790_s24 = sphi %s11224_s24, %s2145_s24  }
 0x2ef   : > { %v7746_v42 = vcombine.low %v13510_v19, %v13509_v55  ;;  %9005 = vmatprep.subr.bf16.mxu0 %v9814_v56  ;;  %9595 = vmatprep.subr.bf16.mxu1 %v9814_v56  ;;  %v13513_v39 = vld [vmem:[#allocation20_spill] sm:$0xff]  ;;  %v13514_v9 = vld [vmem:[#allocation19_spill] sm:$0xff]  ;;  %v13515_v63 = vld [vmem:[#allocation26_spill] sm:$0xff]  ;;  %s2145_s24 = sadd.s32 1, %s9790_s24  }
 0x2f0   : > { %9007 = vmatprep.mubr.msk.bf16.mxu0 %vm9815_vm7, %v9814_v56  ;;  %9023 = vmatprep.mubr.msk.bf16.mxu1 %vm9815_vm7, %v9814_v56  ;;  %s11243_s6 = scalar_lea.vmem [#allocation3], %s11234_s5  ;;  %v13512_v45 = vld [vmem:[#allocation23_spill] sm:$0xff]  ;;  %v7754_v22 = vcombine.low %v13514_v9, %v13513_v39  ;;  %v13516_v50 = vld [vmem:[#allocation25_spill] sm:$0xff]  ;;  %v13517_v37 = vld [vmem:[#allocation28_spill] sm:$0xff]  ;;  %s3496_s25 = scvt.s32.f32 %s11234_s5 }
 0x2f1   : > { %9006 = vmatpush3.bf16.msra.mxu0 %v7746_v42  ;;  %9596 = vmatpush3.bf16.msra.mxu1 %v7746_v42  ;;  %v7776_v40 = vcombine.low %v13512_v45, %v13511_v15  ;;  %v7798_v44 = vcombine.low %v13516_v50, %v13515_v63  ;;  %v13518_v12 = vld [vmem:[#allocation27_spill] sm:$0xff]  ;;  %v13519_v41 = vld [vmem:[#allocation30_spill] sm:$0xff]  ;;  %v13520_v35 = vld [vmem:[#allocation29_spill] sm:$0xff]  ;;  %s11757_s26 = scalar_lea.vmem [#allocation2], %s11234_s5  ;;  %s11796_s27 = scalar_lea.vmem [#allocation4], %s11234_s5 }
 0x2f2   : > { %9065 = vmatprep.subr.bf16.mxu0 %v9814_v56  ;;  %9035 = vmatprep.subr.bf16.mxu1 %v9814_v56  ;;  %v7820_v6 = vcombine.low %v13518_v12, %v13517_v37  ;;  %v13521_v36 = vld [vmem:[#allocation32_spill] sm:$0xff]  ;;  %v13522_v59 = vld [vmem:[#allocation31_spill] sm:$0xff]  ;;  %v13523_v2 = vld [vmem:[#allocation34_spill] sm:$0xff]  ;;  %p2142_p2 = scmp.ge.s32.totalorder %s2145_s24, 29  }
 0x2f3   : > { %v13524_v0 = vld [vmem:[#allocation33_spill] sm:$0xff]  ;;  %v13525_v5 = vld [vmem:[#allocation36_spill] sm:$0xff]  ;;  %v13526_v3 = vld [vmem:[#allocation35_spill] sm:$0xff] }
 0x2f4   : > { %v7732_v47 = vld [vmem:[%s11243_s6 + $0x6] sm:$0xff]  ;;  %v7733_v8 = vld [vmem:[%s11243_s6 + $0xe] sm:$0xff]  ;;  %v7734_v38 = vld [vmem:[%s11243_s6 + $0x16] sm:$0xff] }
 0x2f5   : > { %v7740_v18 = vld [vmem:[%s11243_s6 + $0x46] sm:$0xff]  ;;  %v2186_v10 = vpack.c.bf16 %v7733_v8, %v7732_v47  ;;  %v7741_v25 = vld [vmem:[%s11243_s6 + $0x4e] sm:$0xff]  ;;  %v7735_v61 = vld [vmem:[%s11243_s6 + $0x1e] sm:$0xff] }
 0x2f6   : > { %v2190_v43 = vpack.c.bf16 %v7741_v25, %v7740_v18  ;;  %v7742_v7 = vld [vmem:[%s11243_s6 + $0x56] sm:$0xff]  ;;  %v7743_v11 = vld [vmem:[%s11243_s6 + $0x5e] sm:$0xff]  ;;  %v2187_v21 = vpack.c.bf16 %v7735_v61, %v7734_v38  ;;  %v7736_v14 = vld [vmem:[%s11243_s6 + $0x26] sm:$0xff] }
 0x2f7   : > { %9008 = vmatmul.mubr.msk.bf16.vlgmr.msra.gmra.mxu0 %vm56_vm0, %v2186_v10  ;;  %v2191_v4 = vpack.c.bf16 %v7743_v11, %v7742_v7  ;;  %v7737_v48 = vld [vmem:[%s11243_s6 + $0x2e] sm:$0xff]  ;;  %v7744_v57 = vld [vmem:[%s11243_s6 + $0x66] sm:$0xff]  ;;  %v7738_v62 = vld [vmem:[%s11243_s6 + $0x36] sm:$0xff] }
 0x2f8   : > { %9024 = vmatmul.mubr.msk.bf16.vlgmr.msra.gmra.mxu1 %vm56_vm0, %v2190_v43  ;;  %9066 = vmatpush3.bf16.msra.mxu0 %v7776_v40  ;;  %v7745_v52 = vld [vmem:[%s11243_s6 + $0x6e] sm:$0xff]  ;;  %v2188_v16 = vpack.c.bf16 %v7737_v48, %v7736_v14  ;;  %v7739_v54 = vld [vmem:[%s11243_s6 + $0x3e] sm:$0xff]  ;;  %v13538_v50 = vld [vmem:[#allocation16_spill] sm:$0xff] }
 0x2f9   : > { %9036 = vmatpush3.bf16.msra.mxu1 %v7754_v22  ;;  %9011 = vmatprep.mubr.msk.bf16.mxu0 %vm9815_vm7, %v9814_v56  ;;  %v2192_v58 = vpack.c.bf16 %v7745_v52, %v7744_v57  ;;  %v7718_v17 = vld [vmem:[%s11243_s6 + $0x5] sm:$0xff]  ;;  %v7719_v13 = vld [vmem:[%s11243_s6 + $0xd] sm:$0xff]  ;;  %v2189_v46 = vpack.c.bf16 %v7739_v54, %v7738_v62  ;;  %v7720_v1 = vld [vmem:[%s11243_s6 + $0x15] sm:$0xff] }
 0x2fa   : > { %9027 = vmatprep.mubr.msk.bf16.mxu1 %vm9815_vm7, %v9814_v56  ;;  %9095 = vmatprep.subr.bf16.mxu1 %v9814_v56  ;;  %v2163_v23 = vpack.c.bf16 %v7719_v13, %v7718_v17  ;;  %v7762_v20 = vld [vmem:[%s11243_s6 + $0x7] sm:$0xff]  ;;  %v7763_v49 = vld [vmem:[%s11243_s6 + $0xf] sm:$0xff]  ;;  %v7721_v53 = vld [vmem:[%s11243_s6 + $0x1d] sm:$0xff] }
 0x2fb   : > { %9125 = vmatprep.subr.bf16.mxu0 %v9814_v56  ;;  %v2441_v24 = vpack.c.bf16 %v7763_v49, %v7762_v20  ;;  %v2164_v51 = vpack.c.bf16 %v7721_v53, %v7720_v1  ;;  %v7764_v42 = vld [vmem:[%s11243_s6 + $0x17] sm:$0xff]  ;;  %v7765_v47 = vld [vmem:[%s11243_s6 + $0x1f] sm:$0xff]  ;;  %v7723_v18 = vld [vmem:[%s11243_s6 + $0x2d] sm:$0xff] }
 0x2fc   : > { %v7722_v8 = vld [vmem:[%s11243_s6 + $0x25] sm:$0xff]  ;;  %v2442_v40 = vpack.c.bf16 %v7765_v47, %v7764_v42  ;;  %v7767_v22 = vld [vmem:[%s11243_s6 + $0x2f] sm:$0xff]  ;;  %v7725_v38 = vld [vmem:[%s11243_s6 + $0x3d] sm:$0xff] }
 0x2fd   : > { %v2165_v10 = vpack.c.bf16 %v7723_v18, %v7722_v8  ;;  %v7766_v25 = vld [vmem:[%s11243_s6 + $0x27] sm:$0xff]  ;;  %v7724_v43 = vld [vmem:[%s11243_s6 + $0x35] sm:$0xff]  ;;  %v7729_v62 = vld [vmem:[%s11243_s6 + $0x5d] sm:$0xff] }
 0x2fe   : > { %v2443_v61 = vpack.c.bf16 %v7767_v22, %v7766_v25  ;;  %v2166_v7 = vpack.c.bf16 %v7725_v38, %v7724_v43  ;;  %v7768_v11 = vld [vmem:[%s11243_s6 + $0x37] sm:$0xff]  ;;  %v7727_v14 = vld [vmem:[%s11243_s6 + $0x4d] sm:$0xff]  ;;  %v7806_v42 = vld [vmem:[%s11243_s6 + $0x40] sm:$0xff] }
 0x2ff   : > { %9012 = vmatmul.mubr.msk.bf16.gmra.mxu0 %vm56_vm0, %v2187_v21  ;;  %v7769_v21 = vld [vmem:[%s11243_s6 + $0x3f] sm:$0xff]  ;;  %v7770_v52 = vld [vmem:[%s11243_s6 + $0x47] sm:$0xff]  ;;  %v7772_v13 = vld [vmem:[%s11243_s6 + $0x57] sm:$0xff] }
 0x300   : > { %9028 = vmatmul.mubr.msk.bf16.gmra.mxu1 %vm56_vm0, %v2191_v4  ;;  %9015 = vmatprep.mubr.msk.bf16.mxu0 %vm9815_vm7, %v9814_v56  ;;  %v7726_v4 = vld [vmem:[%s11243_s6 + $0x45] sm:$0xff]  ;;  %v2444_v48 = vpack.c.bf16 %v7769_v21, %v7768_v11  ;;  %v7775_v53 = vld [vmem:[%s11243_s6 + $0x6f] sm:$0xff]  ;;  %v7809_v25 = vld [vmem:[%s11243_s6 + $0x58] sm:$0xff] }
 0x301   : > { %9031 = vmatprep.mubr.msk.bf16.mxu1 %vm9815_vm7, %v9814_v56  ;;  %v2167_v57 = vpack.c.bf16 %v7727_v14, %v7726_v4  ;;  %v7774_v1 = vld [vmem:[%s11243_s6 + $0x67] sm:$0xff]  ;;  %v7812_v4 = vld [vmem:[%s11243_s6 + $0x70] sm:$0xff]  ;;  %v7813_v14 = vld [vmem:[%s11243_s6 + $0x78] sm:$0xff] }
 0x302   : > { %v7807_v47 = vld [vmem:[%s11243_s6 + $0x48] sm:$0xff]  ;;  %v7810_v38 = vld [vmem:[%s11243_s6 + $0x60] sm:$0xff] }
 0x303   : > { %v2747_v8 = vpack.c.bf16 %v7807_v47, %v7806_v42  ;;  %v7829_v42 = vld [vmem:[%s11243_s6 + $0x49] sm:$0xff] }
 0x307   : > { %9016 = vmatmul.mubr.msk.bf16.gmra.mxu0 %vm56_vm0, %v2188_v16  ;;  %v7771_v16 = vld [vmem:[%s11243_s6 + $0x4f] sm:$0xff] }
 0x308   : > { %9032 = vmatmul.mubr.msk.bf16.gmra.mxu1 %vm56_vm0, %v2192_v58  ;;  %9019 = vmatprep.mubr.msk.bf16.mxu0 %vm9815_vm7, %v9814_v56  ;;  %v7728_v58 = vld [vmem:[%s11243_s6 + $0x55] sm:$0xff]  ;;  %v2445_v54 = vpack.c.bf16 %v7771_v16, %v7770_v52  ;;  %v2595_v18 = vpack.c.bf16 %v7772_v13, %v7771_v16 }
 0x309   : > { %9037 = vmatprep.mubr.msk.bf16.mxu1 %vm9815_vm7, %v9814_v56  ;;  %v2168_v17 = vpack.c.bf16 %v7729_v62, %v7728_v58  ;;  %v7814_v58 = vld [vmem:[%s11243_s6 + $0x80] sm:$0xff]  ;;  %v7815_v62 = vld [vmem:[%s11243_s6 + $0x88] sm:$0xff] }
 0x30f   : > { %9020 = vmatmul.mubr.msk.bf16.gmra.mxu0 %vm56_vm0, %v2189_v46  ;;  %v7773_v46 = vld [vmem:[%s11243_s6 + $0x5f] sm:$0xff] }
 0x310   : > { %9038 = vmatmul.mubr.msk.bf16.vlgmr.msra.gmra.mxu1 %vm56_vm0, %v2163_v23  ;;  %9067 = vmatprep.mubr.msk.bf16.mxu0 %vm9815_vm7, %v9814_v56  ;;  %v7730_v23 = vld [vmem:[%s11243_s6 + $0x65] sm:$0xff]  ;;  %v2446_v20 = vpack.c.bf16 %v7773_v46, %v7772_v13  ;;  %v2596_v43 = vpack.c.bf16 %v7774_v1, %v7773_v46  ;;  %v2751_v13 = vpack.c.bf16 %v7815_v62, %v7814_v58 }
 0x311   : > { %9096 = vmatpush3.bf16.msra.mxu1 %v7798_v44  ;;  %9041 = vmatprep.mubr.msk.bf16.mxu1 %vm9815_vm7, %v9814_v56  ;;  %v7731_v44 = vld [vmem:[%s11243_s6 + $0x6d] sm:$0xff] }
 0x312   : > { %9155 = vmatprep.subr.bf16.mxu1 %v9814_v56  ;;  %v2169_v49 = vpack.c.bf16 %v7731_v44, %v7730_v23  ;;  %v7816_v23 = vld [vmem:[%s11243_s6 + $0x90] sm:$0xff]  ;;  %v7817_v44 = vld [vmem:[%s11243_s6 + $0x98] sm:$0xff] }
 0x317   : > { %9068 = vmatmul.mubr.msk.bf16.vlgmr.msra.gmra.mxu0 %vm56_vm0, %v2441_v24  ;;  %v2447_v24 = vpack.c.bf16 %v7775_v53, %v7774_v1  ;;  %v2752_v1 = vpack.c.bf16 %v7817_v44, %v7816_v23  ;;  %v7858_v23 = vld [vmem:[%s11243_s6 + $0xb9] sm:$0xff]  ;;  %v7859_v44 = vld [vmem:[%s11243_s6 + $0xc1] sm:$0xff] }
 0x318   : > { %9042 = vmatmul.mubr.msk.bf16.gmra.mxu1 %vm56_vm0, %v2164_v51  ;;  %9126 = vmatpush3.bf16.msra.mxu0 %v7820_v6  ;;  %v2594_v51 = vpack.c.bf16 %v7770_v52, %v7769_v21  ;;  %v7842_v6 = vcombine.low %v13520_v35, %v13519_v41  ;;  %v2750_v52 = vpack.c.bf16 %v7813_v14, %v7812_v4  ;;  %v7833_v4 = vld [vmem:[%s11243_s6 + $0x69] sm:$0xff] }
 0x319   : > { %9045 = vmatprep.mubr.msk.bf16.mxu1 %vm9815_vm7, %v9814_v56  ;;  %9071 = vmatprep.mubr.msk.bf16.mxu0 %vm9815_vm7, %v9814_v56 }
 0x31a   : > { %9185 = vmatprep.subr.bf16.mxu0 %v9814_v56 }
 0x31f   : > { %9072 = vmatmul.mubr.msk.bf16.gmra.mxu0 %vm56_vm0, %v2442_v40  ;;  %v7864_v40 = vcombine.low %v13522_v59, %v13521_v36 }
 0x320   : > { %9046 = vmatmul.mubr.msk.bf16.gmra.mxu1 %vm56_vm0, %v2165_v10  ;;  %9075 = vmatprep.mubr.msk.bf16.mxu0 %vm9815_vm7, %v9814_v56  ;;  %v7808_v10 = vld [vmem:[%s11243_s6 + $0x50] sm:$0xff] }
 0x321   : > { %9049 = vmatprep.mubr.msk.bf16.mxu1 %vm9815_vm7, %v9814_v56  ;;  %v2748_v22 = vpack.c.bf16 %v7809_v25, %v7808_v10  ;;  %v7851_v10 = vld [vmem:[%s11243_s6 + $0x81] sm:$0xff]  ;;  %v7830_v25 = vld [vmem:[%s11243_s6 + $0x51] sm:$0xff] }
 0x327   : > { %9076 = vmatmul.mubr.msk.bf16.gmra.mxu0 %vm56_vm0, %v2443_v61  ;;  %v7811_v61 = vld [vmem:[%s11243_s6 + $0x68] sm:$0xff] }
 0x328   : > { %9050 = vmatmul.mubr.msk.bf16.gmra.mxu1 %vm56_vm0, %v2166_v7  ;;  %9079 = vmatprep.mubr.msk.bf16.mxu0 %vm9815_vm7, %v9814_v56  ;;  %v7791_v7 = vld [vmem:[%s11243_s6 + $0x77] sm:$0xff]  ;;  %v2749_v11 = vpack.c.bf16 %v7811_v61, %v7810_v38  ;;  %v7908_v61 = vcombine.low %v13526_v3, %v13525_v5 }
 0x329   : > { %9053 = vmatprep.mubr.msk.bf16.mxu1 %vm9815_vm7, %v9814_v56  ;;  %v2597_v21 = vpack.c.bf16 %v7791_v7, %v7775_v53  ;;  %v7852_v7 = vld [vmem:[%s11243_s6 + $0x89] sm:$0xff] }
 0x32f   : > { %9080 = vmatmul.mubr.msk.bf16.gmra.mxu0 %vm56_vm0, %v2444_v48  ;;  %v7792_v48 = vld [vmem:[%s11243_s6 + $0x7f] sm:$0xff] }
 0x330   : > { %9054 = vmatmul.mubr.msk.bf16.gmra.mxu1 %vm56_vm0, %v2167_v57  ;;  %9083 = vmatprep.mubr.msk.bf16.mxu0 %vm9815_vm7, %v9814_v56  ;;  %v7793_v57 = vld [vmem:[%s11243_s6 + $0x87] sm:$0xff] }
 0x331   : > { %9057 = vmatprep.mubr.msk.bf16.mxu1 %vm9815_vm7, %v9814_v56  ;;  %v2598_v16 = vpack.c.bf16 %v7793_v57, %v7792_v48  ;;  %v7854_v57 = vld [vmem:[%s11243_s6 + $0x99] sm:$0xff] }
 0x337   : > { %9084 = vmatmul.mubr.msk.bf16.gmra.mxu0 %vm56_vm0, %v2445_v54  ;;  %v7794_v54 = vld [vmem:[%s11243_s6 + $0x8f] sm:$0xff] }
 0x338   : > { %9058 = vmatmul.mubr.msk.bf16.gmra.mxu1 %vm56_vm0, %v2168_v17  ;;  %9087 = vmatprep.mubr.msk.bf16.mxu0 %vm9815_vm7, %v9814_v56  ;;  %v7795_v17 = vld [vmem:[%s11243_s6 + $0x97] sm:$0xff] }
 0x339   : > { %9061 = vmatprep.mubr.msk.bf16.mxu1 %vm9815_vm7, %v9814_v56  ;;  %v2599_v46 = vpack.c.bf16 %v7795_v17, %v7794_v54  ;;  %v7856_v54 = vld [vmem:[%s11243_s6 + $0xa9] sm:$0xff]  ;;  %v7857_v17 = vld [vmem:[%s11243_s6 + $0xb1] sm:$0xff] }
 0x33f   : > { %9088 = vmatmul.mubr.msk.bf16.gmra.mxu0 %vm56_vm0, %v2446_v20  ;;  %v7796_v20 = vld [vmem:[%s11243_s6 + $0x9f] sm:$0xff] }
 0x340   : > { %9062 = vmatmul.mubr.msk.bf16.gmra.mxu1 %vm56_vm0, %v2169_v49  ;;  %9091 = vmatprep.mubr.msk.bf16.mxu0 %vm9815_vm7, %v9814_v56  ;;  %v7797_v49 = vld [vmem:[%s11243_s6 + $0xa7] sm:$0xff] }
 0x341   : > { %9097 = vmatprep.mubr.msk.bf16.mxu1 %vm9815_vm7, %v9814_v56  ;;  %v2600_v53 = vpack.c.bf16 %v7797_v49, %v7796_v20  ;;  %v3057_v20 = vpack.c.bf16 %v7859_v44, %v7858_v23 }
 0x347   : > { %9092 = vmatmul.mubr.msk.bf16.gmra.mxu0 %vm56_vm0, %v2447_v24  ;;  %v7818_v24 = vld [vmem:[%s11243_s6 + $0xa0] sm:$0xff] }
 0x348   : > { %9098 = vmatmul.mubr.msk.bf16.vlgmr.msra.gmra.mxu1 %vm56_vm0, %v2594_v51  ;;  %9127 = vmatprep.mubr.msk.bf16.mxu0 %vm9815_vm7, %v9814_v56  ;;  %v7819_v51 = vld [vmem:[%s11243_s6 + $0xa8] sm:$0xff] }
 0x349   : > { %9156 = vmatpush3.bf16.msra.mxu1 %v7842_v6  ;;  %9101 = vmatprep.mubr.msk.bf16.mxu1 %vm9815_vm7, %v9814_v56  ;;  %v7828_v6 = vld [vmem:[%s11243_s6 + $0x41] sm:$0xff]  ;;  %v2753_v47 = vpack.c.bf16 %v7819_v51, %v7818_v24 }
 0x34a   : > { %9215 = vmatprep.subr.bf16.mxu1 %v9814_v56 }
 0x34f   : > { %9128 = vmatmul.mubr.msk.bf16.vlgmr.msra.gmra.mxu0 %vm56_vm0, %v2747_v8  ;;  %v2900_v8 = vpack.c.bf16 %v7829_v42, %v7828_v6  ;;  %v7862_v6 = vld [vmem:[%s11243_s6 + $0xd9] sm:$0xff]  ;;  %v7863_v42 = vld [vmem:[%s11243_s6 + $0xe1] sm:$0xff] }
 0x350   : > { %9102 = vmatmul.mubr.msk.bf16.gmra.mxu1 %vm56_vm0, %v2595_v18  ;;  %9186 = vmatpush3.bf16.msra.mxu0 %v7864_v40  ;;  %v7886_v18 = vcombine.low %v13524_v0, %v13523_v2  ;;  %v7850_v40 = vld [vmem:[%s11243_s6 + $0x79] sm:$0xff] }
 0x351   : > { %9105 = vmatprep.mubr.msk.bf16.mxu1 %vm9815_vm7, %v9814_v56  ;;  %9131 = vmatprep.mubr.msk.bf16.mxu0 %vm9815_vm7, %v9814_v56 }
 0x352   : > { %9245 = vmatprep.subr.bf16.mxu0 %v9814_v56 }
 0x357   : > { %9132 = vmatmul.mubr.msk.bf16.gmra.mxu0 %vm56_vm0, %v2748_v22  ;;  %v7831_v22 = vld [vmem:[%s11243_s6 + $0x59] sm:$0xff] }
 0x358   : > { %9106 = vmatmul.mubr.msk.bf16.gmra.mxu1 %vm56_vm0, %v2596_v43  ;;  %9135 = vmatprep.mubr.msk.bf16.mxu0 %vm9815_vm7, %v9814_v56  ;;  %v3053_v43 = vpack.c.bf16 %v7851_v10, %v7850_v40  ;;  %v2901_v38 = vpack.c.bf16 %v7831_v22, %v7830_v25  ;;  %v7894_v22 = vld [vmem:[%s11243_s6 + $0x7b] sm:$0xff] }
 0x359   : > { %9109 = vmatprep.mubr.msk.bf16.mxu1 %vm9815_vm7, %v9814_v56 }
 0x35f   : > { %9136 = vmatmul.mubr.msk.bf16.gmra.mxu0 %vm56_vm0, %v2749_v11  ;;  %v7853_v11 = vld [vmem:[%s11243_s6 + $0x91] sm:$0xff] }
 0x360   : > { %9110 = vmatmul.mubr.msk.bf16.gmra.mxu1 %vm56_vm0, %v2597_v21  ;;  %9139 = vmatprep.mubr.msk.bf16.mxu0 %vm9815_vm7, %v9814_v56  ;;  %v7832_v21 = vld [vmem:[%s11243_s6 + $0x61] sm:$0xff]  ;;  %v3054_v14 = vpack.c.bf16 %v7853_v11, %v7852_v7  ;;  %v2905_v49 = vpack.c.bf16 %v7854_v57, %v7853_v11 }
 0x361   : > { %9113 = vmatprep.mubr.msk.bf16.mxu1 %vm9815_vm7, %v9814_v56  ;;  %v2902_v48 = vpack.c.bf16 %v7833_v4, %v7832_v21 }
 0x367   : > { %9140 = vmatmul.mubr.msk.bf16.gmra.mxu0 %vm56_vm0, %v2750_v52  ;;  %v7855_v52 = vld [vmem:[%s11243_s6 + $0xa1] sm:$0xff] }
 0x368   : > { %9114 = vmatmul.mubr.msk.bf16.gmra.mxu1 %vm56_vm0, %v2598_v16  ;;  %9143 = vmatprep.mubr.msk.bf16.mxu0 %vm9815_vm7, %v9814_v56  ;;  %v7834_v16 = vld [vmem:[%s11243_s6 + $0x71] sm:$0xff]  ;;  %v3055_v58 = vpack.c.bf16 %v7855_v52, %v7854_v57  ;;  %v2906_v51 = vpack.c.bf16 %v7856_v54, %v7855_v52 }
 0x369   : > { %9117 = vmatprep.mubr.msk.bf16.mxu1 %vm9815_vm7, %v9814_v56  ;;  %v2903_v62 = vpack.c.bf16 %v7850_v40, %v7834_v16 }
 0x36f   : > { %9144 = vmatmul.mubr.msk.bf16.gmra.mxu0 %vm56_vm0, %v2751_v13  ;;  %v3056_v13 = vpack.c.bf16 %v7857_v17, %v7856_v54  ;;  %v7897_v54 = vld [vmem:[%s11243_s6 + $0x93] sm:$0xff] }
 0x370   : > { %9118 = vmatmul.mubr.msk.bf16.gmra.mxu1 %vm56_vm0, %v2599_v46  ;;  %9147 = vmatprep.mubr.msk.bf16.mxu0 %vm9815_vm7, %v9814_v56  ;;  %v2904_v46 = vpack.c.bf16 %v7852_v7, %v7851_v10  ;;  %v7875_v7 = vld [vmem:[%s11243_s6 + $0x92] sm:$0xff] }
 0x371   : > { %9121 = vmatprep.mubr.msk.bf16.mxu1 %vm9815_vm7, %v9814_v56 }
 0x377   : > { %9148 = vmatmul.mubr.msk.bf16.gmra.mxu0 %vm56_vm0, %v2752_v1  ;;  %v7860_v1 = vld [vmem:[%s11243_s6 + $0xc9] sm:$0xff] }
 0x378   : > { %9122 = vmatmul.mubr.msk.bf16.gmra.mxu1 %vm56_vm0, %v2600_v53  ;;  %9151 = vmatprep.mubr.msk.bf16.mxu0 %vm9815_vm7, %v9814_v56  ;;  %v7861_v53 = vld [vmem:[%s11243_s6 + $0xd1] sm:$0xff] }
 0x379   : > { %9157 = vmatprep.mubr.msk.bf16.mxu1 %vm9815_vm7, %v9814_v56  ;;  %v3058_v24 = vpack.c.bf16 %v7861_v53, %v7860_v1 }
 0x37f   : > { %9152 = vmatmul.mubr.msk.bf16.gmra.mxu0 %vm56_vm0, %v2753_v47  ;;  %v7872_v47 = vld [vmem:[%s11243_s6 + $0x7a] sm:$0xff] }
 0x380   : > { %9158 = vmatmul.mubr.msk.bf16.vlgmr.msra.gmra.mxu1 %vm56_vm0, %v2900_v8  ;;  %9187 = vmatprep.mubr.msk.bf16.mxu0 %vm9815_vm7, %v9814_v56  ;;  %v7873_v8 = vld [vmem:[%s11243_s6 + $0x82] sm:$0xff] }
 0x381   : > { %9216 = vmatpush3.bf16.msra.mxu1 %v7886_v18  ;;  %9161 = vmatprep.mubr.msk.bf16.mxu1 %vm9815_vm7, %v9814_v56  ;;  %v3059_v18 = vpack.c.bf16 %v7863_v42, %v7862_v6  ;;  %v3206_v40 = vpack.c.bf16 %v7873_v8, %v7872_v47  ;;  %v7898_v42 = vld [vmem:[%s11243_s6 + $0x9b] sm:$0xff]  ;;  %v7899_v47 = vld [vmem:[%s11243_s6 + $0xa3] sm:$0xff] }
 0x387   : > { %9188 = vmatmul.mubr.msk.bf16.vlgmr.msra.gmra.mxu0 %vm56_vm0, %v3053_v43  ;;  %v7895_v43 = vld [vmem:[%s11243_s6 + $0x83] sm:$0xff] }
 0x388   : > { %9162 = vmatmul.mubr.msk.bf16.gmra.mxu1 %vm56_vm0, %v2901_v38  ;;  %9246 = vmatpush3.bf16.msra.mxu0 %v7908_v61  ;;  %v7874_v61 = vld [vmem:[%s11243_s6 + $0x8a] sm:$0xff]  ;;  %v3359_v4 = vpack.c.bf16 %v7895_v43, %v7894_v22 }
 0x389   : > { %9165 = vmatprep.mubr.msk.bf16.mxu1 %vm9815_vm7, %v9814_v56  ;;  %9191 = vmatprep.mubr.msk.bf16.mxu0 %vm9815_vm7, %v9814_v56 }
 0x38f   : > { %9192 = vmatmul.mubr.msk.bf16.gmra.mxu0 %vm56_vm0, %v3054_v14 }
 0x390   : > { %9166 = vmatmul.mubr.msk.bf16.gmra.mxu1 %vm56_vm0, %v2902_v48  ;;  %9195 = vmatprep.mubr.msk.bf16.mxu0 %vm9815_vm7, %v9814_v56  ;;  %v3207_v48 = vpack.c.bf16 %v7875_v7, %v7874_v61 }
 0x391   : > { %9169 = vmatprep.mubr.msk.bf16.mxu1 %vm9815_vm7, %v9814_v56 }
 0x397   : > { %9196 = vmatmul.mubr.msk.bf16.gmra.mxu0 %vm56_vm0, %v3055_v58 }
 0x398   : > { %9170 = vmatmul.mubr.msk.bf16.gmra.mxu1 %vm56_vm0, %v2903_v62  ;;  %9199 = vmatprep.mubr.msk.bf16.mxu0 %vm9815_vm7, %v9814_v56  ;;  %v7896_v62 = vld [vmem:[%s11243_s6 + $0x8b] sm:$0xff] }
 0x399   : > { %9173 = vmatprep.mubr.msk.bf16.mxu1 %vm9815_vm7, %v9814_v56 }
 0x39f   : > { %9200 = vmatmul.mubr.msk.bf16.gmra.mxu0 %vm56_vm0, %v3056_v13  ;;  %v7876_v13 = vld [vmem:[%s11243_s6 + $0x9a] sm:$0xff] }
 0x3a0   : > { %9174 = vmatmul.mubr.msk.bf16.gmra.mxu1 %vm56_vm0, %v2904_v46  ;;  %9203 = vmatprep.mubr.msk.bf16.mxu0 %vm9815_vm7, %v9814_v56  ;;  %v7877_v46 = vld [vmem:[%s11243_s6 + $0xa2] sm:$0xff] }
 0x3a1   : > { %9177 = vmatprep.mubr.msk.bf16.mxu1 %vm9815_vm7, %v9814_v56  ;;  %v3208_v1 = vpack.c.bf16 %v7877_v46, %v7876_v13  ;;  %v7880_v13 = vld [vmem:[%s11243_s6 + $0xba] sm:$0xff]  ;;  %v7881_v46 = vld [vmem:[%s11243_s6 + $0xc2] sm:$0xff] }
 0x3a7   : > { %9204 = vmatmul.mubr.msk.bf16.gmra.mxu0 %vm56_vm0, %v3057_v20  ;;  %v3360_v20 = vpack.c.bf16 %v7897_v54, %v7896_v62  ;;  %v7901_v62 = vld [vmem:[%s11243_s6 + $0xb3] sm:$0xff] }
 0x3a8   : > { %9178 = vmatmul.mubr.msk.bf16.gmra.mxu1 %vm56_vm0, %v2905_v49  ;;  %9207 = vmatprep.mubr.msk.bf16.mxu0 %vm9815_vm7, %v9814_v56 }
 0x3a9   : > { %9181 = vmatprep.mubr.msk.bf16.mxu1 %vm9815_vm7, %v9814_v56 }
 0x3af   : > { %9208 = vmatmul.mubr.msk.bf16.gmra.mxu0 %vm56_vm0, %v3058_v24 }
 0x3b0   : > { %9182 = vmatmul.mubr.msk.bf16.gmra.mxu1 %vm56_vm0, %v2906_v51  ;;  %9211 = vmatprep.mubr.msk.bf16.mxu0 %vm9815_vm7, %v9814_v56 }
 0x3b1   : > { %9217 = vmatprep.mubr.msk.bf16.mxu1 %vm9815_vm7, %v9814_v56 }
 0x3b7   : > { %v2254_v10 = vpop.f32.mrf.mxu0  ;;  %9212 = vmatmul.mubr.msk.bf16.gmra.mxu0 %vm56_vm0, %v3059_v18  ;;  %v7878_v18 = vld [vmem:[%s11243_s6 + $0xaa] sm:$0xff] }
 0x3b8   : > { %v11498_v25 = vpop.f32.mrf.mxu1  ;;  %9218 = vmatmul.mubr.msk.bf16.vlgmr.msra.gmra.mxu1 %vm56_vm0, %v3206_v40  ;;  %9247 = vmatprep.mubr.msk.bf16.mxu0 %vm9815_vm7, %v9814_v56  ;;  %v7879_v40 = vld [vmem:[%s11243_s6 + $0xb2] sm:$0xff] }
 0x3b9   : > { %v9009_v38 = vpop.f32.mrf.mxu0  ;;  %9221 = vmatprep.mubr.msk.bf16.mxu1 %vm9815_vm7, %v9814_v56  ;;  %v3209_v7 = vpack.c.bf16 %v7879_v40, %v7878_v18 }
 0x3ba   : > { %v9025_v11 = vpop.f32.mrf.mxu1  ;;  %v3361_v38 = vpack.c.bf16 %v7899_v47, %v7898_v42 }
 0x3bb   : > { %v2257_v21 = vpop.f32.mrf.mxu0 }
 0x3bc   : > { %v11509_v14 = vpop.f32.mrf.mxu1 }
 0x3bd   : > { %v9010_v57 = vpop.f32.mrf.mxu0 }
 0x3be   : > { %v9026_v52 = vpop.f32.mrf.mxu1 }
 0x3bf   : > { %v11511_v16 = vpop.f32.mrf.mxu0  ;;  %9248 = vmatmul.mubr.msk.bf16.vlgmr.msra.gmra.mxu0 %vm56_vm0, %v3359_v4  ;;  %v7900_v52 = vld [vmem:[%s11243_s6 + $0xab] sm:$0xff] }
 0x3c0   : > { %v11514_v58 = vpop.f32.mrf.mxu1  ;;  %9222 = vmatmul.mubr.msk.bf16.gmra.mxu1 %vm56_vm0, %v3207_v48  ;;  %9251 = vmatprep.mubr.msk.bf16.mxu0 %vm9815_vm7, %v9814_v56 }
 0x3c1   : > { %v9013_v17 = vpop.f32.mrf.mxu0  ;;  %9225 = vmatprep.mubr.msk.bf16.mxu1 %vm9815_vm7, %v9814_v56 }
 0x3c2   : > { %v9029_v23 = vpop.f32.mrf.mxu1 }
 0x3c3   : > { %v11525_v44 = vpop.f32.mrf.mxu0 }
 0x3c4   : > { %v11527_v49 = vpop.f32.mrf.mxu1 }
 0x3c5   : > { %v9014_v53 = vpop.f32.mrf.mxu0 }
 0x3c6   : > { %v9030_v24 = vpop.f32.mrf.mxu1 }
 0x3c7   : > { %v11529_v51 = vpop.f32.mrf.mxu0  ;;  %9252 = vmatmul.mubr.msk.bf16.gmra.mxu0 %vm56_vm0, %v3360_v20  ;;  %v3210_v24 = vpack.c.bf16 %v7881_v46, %v7880_v13 }
 0x3c8   : > { %v11532_v6 = vpop.f32.mrf.mxu1  ;;  %9226 = vmatmul.mubr.msk.bf16.gmra.mxu1 %vm56_vm0, %v3208_v1  ;;  %9255 = vmatprep.mubr.msk.bf16.mxu0 %vm9815_vm7, %v9814_v56  ;;  %v3362_v1 = vpack.c.bf16 %v7901_v62, %v7900_v52 }
 0x3c9   : > { %v9017_v8 = vpop.f32.mrf.mxu0  ;;  %9229 = vmatprep.mubr.msk.bf16.mxu1 %vm9815_vm7, %v9814_v56 }
 0x3ca   : > { %v9033_v22 = vpop.f32.mrf.mxu1 }
 0x3cb   : > { %v11543_v43 = vpop.f32.mrf.mxu0  ;;  %v7902_v22 = vld [vmem:[%s11243_s6 + $0xbb] sm:$0xff] }
 0x3cc   : > { %v11545_v61 = vpop.f32.mrf.mxu1 }
 0x3cd   : > { %v9018_v11 = vpop.f32.mrf.mxu0 }
 0x3ce   : > { %v9034_v4 = vpop.f32.mrf.mxu1 }
 0x3cf   : > { %v11547_v48 = vpop.f32.mrf.mxu0  ;;  %9256 = vmatmul.mubr.msk.bf16.gmra.mxu0 %vm56_vm0, %v3361_v38  ;;  %v7903_v38 = vld [vmem:[%s11243_s6 + $0xc3] sm:$0xff]  ;;  %v7883_v4 = vld [vmem:[%s11243_s6 + $0xd2] sm:$0xff] }
 0x3d0   : > { %v2370_v57 = vpop.f32.mrf.mxu1  ;;  %9230 = vmatmul.mubr.msk.bf16.gmra.mxu1 %vm56_vm0, %v3209_v7  ;;  %9259 = vmatprep.mubr.msk.bf16.mxu0 %vm9815_vm7, %v9814_v56  ;;  %v3363_v62 = vpack.c.bf16 %v7903_v38, %v7902_v22 }
 0x3d1   : > { %v2371_v54 = vadd.f32 %v2370_v57, %v2254_v10  ;;  %v9021_v17 = vpop.f32.mrf.mxu0  ;;  %9233 = vmatprep.mubr.msk.bf16.mxu1 %vm9815_vm7, %v9814_v56 }
 0x3d2   : > { %v9039_v23 = vpop.f32.mrf.mxu1 }
 0x3d3   : > { %v11559_v20 = vpop.f32.mrf.mxu0 }
 0x3d4   : > { %v2373_v53 = vpop.f32.mrf.mxu1 }
 0x3d5   : > { %v2374_v42 = vadd.f32 %v2373_v53, %v2257_v21  ;;  %v9022_v47 = vpop.f32.mrf.mxu0  ;;  %v7882_v21 = vld [vmem:[%s11243_s6 + $0xca] sm:$0xff] }
 0x3d6   : > { %v9040_v8 = vpop.f32.mrf.mxu1  ;;  %v3211_v13 = vpack.c.bf16 %v7883_v4, %v7882_v21  ;;  %v7905_v47 = vld [vmem:[%s11243_s6 + $0xd3] sm:$0xff] }
 0x3d7   : > { %v2509_v10 = vpop.f32.mrf.mxu0  ;;  %9260 = vmatmul.mubr.msk.bf16.gmra.mxu0 %vm56_vm0, %v3362_v1 }
 0x3d8   : > { %v2378_v18 = vpop.f32.mrf.mxu1  ;;  %v11562_v40 = vadd.f32 %v2509_v10, %v2371_v54  ;;  %9234 = vmatmul.mubr.msk.bf16.gmra.mxu1 %vm56_vm0, %v3210_v24  ;;  %9263 = vmatprep.mubr.msk.bf16.mxu0 %vm9815_vm7, %v9814_v56 }
 0x3d9   : > { %v2379_v7 = vadd.f32 %v2378_v18, %v11511_v16  ;;  %v9069_v11 = vpop.f32.mrf.mxu0  ;;  %9237 = vmatprep.mubr.msk.bf16.mxu1 %vm9815_vm7, %v9814_v56  ;;  %v7885_v18 = vld [vmem:[%s11243_s6 + $0xe2] sm:$0xff] }
 0x3da   : > { %v9043_v57 = vpop.f32.mrf.mxu1 }
 0x3db   : > { %v2512_v52 = vpop.f32.mrf.mxu0 }
 0x3dc   : > { %v2381_v54 = vpop.f32.mrf.mxu1  ;;  %v11574_v17 = vadd.f32 %v2512_v52, %v2374_v42  ;;  %v7904_v42 = vld [vmem:[%s11243_s6 + $0xcb] sm:$0xff] }
 0x3dd   : > { %v2382_v46 = vadd.f32 %v2381_v54, %v11525_v44  ;;  %v9070_v16 = vpop.f32.mrf.mxu0  ;;  %v7884_v44 = vld [vmem:[%s11243_s6 + $0xda] sm:$0xff] }
 0x3de   : > { %v9044_v23 = vpop.f32.mrf.mxu1  ;;  %v3212_v4 = vpack.c.bf16 %v7885_v18, %v7884_v44  ;;  %v7906_v16 = vld [vmem:[%s11243_s6 + $0xdb] sm:$0xff] }
 0x3df   : > { %v2517_v1 = vpop.f32.mrf.mxu0  ;;  %9264 = vmatmul.mubr.msk.bf16.gmra.mxu0 %vm56_vm0, %v3363_v62  ;;  %v7907_v23 = vld [vmem:[%s11243_s6 + $0xe3] sm:$0xff] }
 0x3e0   : > { %v2386_v53 = vpop.f32.mrf.mxu1  ;;  %v11578_v24 = vadd.f32 %v2517_v1, %v2379_v7  ;;  %9238 = vmatmul.mubr.msk.bf16.gmra.mxu1 %vm56_vm0, %v3211_v13  ;;  %9267 = vmatprep.mubr.msk.bf16.mxu0 %vm9815_vm7, %v9814_v56  ;;  %v3364_v7 = vpack.c.bf16 %v7905_v47, %v7904_v42  ;;  %v3365_v42 = vpack.c.bf16 %v7907_v23, %v7906_v16 }
 0x3e1   : > { %v2387_v8 = vadd.f32 %v2386_v53, %v11529_v51  ;;  %v9073_v10 = vpop.f32.mrf.mxu0  ;;  %9241 = vmatprep.mubr.msk.bf16.mxu1 %vm9815_vm7, %v9814_v56 }
 0x3e2   : > { %v9047_v22 = vpop.f32.mrf.mxu1 }
 0x3e3   : > { %v2520_v38 = vpop.f32.mrf.mxu0 }
 0x3e4   : > { %v2389_v11 = vpop.f32.mrf.mxu1  ;;  %v11590_v21 = vadd.f32 %v2520_v38, %v2382_v46 }
 0x3e5   : > { %v2390_v57 = vadd.f32 %v2389_v11, %v11543_v43  ;;  %v9074_v52 = vpop.f32.mrf.mxu0 }
 0x3e6   : > { %v9048_v62 = vpop.f32.mrf.mxu1 }
 0x3e7   : > { %v2525_v51 = vpop.f32.mrf.mxu0  ;;  %9268 = vmatmul.mubr.msk.bf16.gmra.mxu0 %vm56_vm0, %v3364_v7 }
 0x3e8   : > { %v2394_v54 = vpop.f32.mrf.mxu1  ;;  %v11594_v13 = vadd.f32 %v2525_v51, %v2387_v8  ;;  %9242 = vmatmul.mubr.msk.bf16.gmra.mxu1 %vm56_vm0, %v3212_v4  ;;  %9271 = vmatprep.mubr.msk.bf16.mxu0 %vm9815_vm7, %v9814_v56 }
 0x3e9   : > { %v2395_v46 = vadd.f32 %v2394_v54, %v11547_v48  ;;  %v9077_v1 = vpop.f32.mrf.mxu0 }
 0x3ea   : > { %v9051_v53 = vpop.f32.mrf.mxu1 }
 0x3eb   : > { %v2528_v43 = vpop.f32.mrf.mxu0 }
 0x3ec   : > { %v2397_v47 = vpop.f32.mrf.mxu1  ;;  %v11602_v10 = vadd.f32 %v2528_v43, %v2390_v57 }
 0x3ed   : > { %v2398_v44 = vadd.f32 %v2397_v47, %v11559_v20  ;;  %v9078_v8 = vpop.f32.mrf.mxu0 }
 0x3ee   : > { %v9052_v18 = vpop.f32.mrf.mxu1 }
 0x3ef   : > { %v2533_v22 = vpop.f32.mrf.mxu0  ;;  %9272 = vmatmul.mubr.msk.bf16.gmra.mxu0 %vm56_vm0, %v3365_v42 }
 0x3f0   : > { %v2402_v38 = vpop.f32.mrf.mxu1  ;;  %v11606_v56 = vadd.f32 %v2533_v22, %v2395_v46 }
 0x3f1   : > { %v2403_v7 = vadd.f32 %v2402_v38, %v11498_v25  ;;  %v9081_v48 = vpop.f32.mrf.mxu0 }
 0x3f2   : > { %v9055_v11 = vpop.f32.mrf.mxu1 }
 0x3f3   : > { %v2536_v4 = vpop.f32.mrf.mxu0 }
 0x3f4   : > { %v2405_v52 = vpop.f32.mrf.mxu1  ;;  %v11609_v62 = vadd.f32 %v2536_v4, %v2398_v44 }
 0x3f5   : > { %v2406_v57 = vadd.f32 %v2405_v52, %v11509_v14  ;;  %v9082_v51 = vpop.f32.mrf.mxu0 }
 0x3f6   : > { %v9056_v20 = vpop.f32.mrf.mxu1 }
 0x3f7   : > { %v2541_v54 = vpop.f32.mrf.mxu0 }
 0x3f8   : > { %v2410_v16 = vpop.f32.mrf.mxu1  ;;  %v11612_v23 = vadd.f32 %v2541_v54, %v2403_v7 }
 0x3f9   : > { %v2411_v1 = vadd.f32 %v2410_v16, %v11514_v58  ;;  %v9085_v46 = vpop.f32.mrf.mxu0 }
 0x3fa   : > { %v9059_v53 = vpop.f32.mrf.mxu1 }
 0x3fb   : > { %v2544_v43 = vpop.f32.mrf.mxu0 }
 0x3fc   : > { %v2413_v25 = vpop.f32.mrf.mxu1  ;;  %v11615_v42 = vadd.f32 %v2544_v43, %v2406_v57 }
 0x3fd   : > { %v2414_v47 = vadd.f32 %v2413_v25, %v11527_v49  ;;  %v9086_v44 = vpop.f32.mrf.mxu0 }
 0x3fe   : > { %v9060_v8 = vpop.f32.mrf.mxu1 }
 0x3ff   : > { %v2549_v18 = vpop.f32.mrf.mxu0 }
 0x400   : > { %v2418_v14 = vpop.f32.mrf.mxu1  ;;  %v11618_v22 = vadd.f32 %v2549_v18, %v2411_v1 }
 0x401   : > { %v2419_v38 = vadd.f32 %v2418_v14, %v11532_v6  ;;  %v9089_v7 = vpop.f32.mrf.mxu0 }
 0x402   : > { %v9063_v48 = vpop.f32.mrf.mxu1 }
 0x403   : > { %v2552_v11 = vpop.f32.mrf.mxu0 }
 0x404   : > { %v2421_v58 = vpop.f32.mrf.mxu1  ;;  %v11621_v4 = vadd.f32 %v2552_v11, %v2414_v47 }
 0x405   : > { %v2422_v52 = vadd.f32 %v2421_v58, %v11545_v61  ;;  %v9090_v57 = vpop.f32.mrf.mxu0 }
 0x406   : > { %v9064_v51 = vpop.f32.mrf.mxu1 }
 0x407   : > { %v2557_v20 = vpop.f32.mrf.mxu0 }
 0x408   : > { %v11624_v49 = vadd.f32 %v2557_v20, %v2419_v38  ;;  %v2662_v54 = vpop.f32.mrf.mxu1 }
 0x409   : > { %v2717_v16 = vadd.f32 %v2662_v54, %v11562_v40  ;;  %v9093_v1 = vpop.f32.mrf.mxu0 }
 0x40a   : > { %v9099_v46 = vpop.f32.mrf.mxu1 }
 0x40b   : > { %v2560_v53 = vpop.f32.mrf.mxu0 }
 0x40c   : > { %v11627_v6 = vadd.f32 %v2560_v53, %v2422_v52  ;;  %v2665_v43 = vpop.f32.mrf.mxu1 }
 0x40d   : > { %v2718_v25 = vadd.f32 %v2665_v43, %v11574_v17  ;;  %v9094_v47 = vpop.f32.mrf.mxu0 }
 0x40e   : > { %v9100_v44 = vpop.f32.mrf.mxu1 }
 0x40f   : > { %v2815_v8 = vpop.f32.mrf.mxu0 }
 0x410   : > { %v2670_v61 = vpop.f32.mrf.mxu1  ;;  %v11630_v18 = vadd.f32 %v2815_v8, %v2717_v16 }
 0x411   : > { %v2719_v14 = vadd.f32 %v2670_v61, %v11578_v24  ;;  %v9129_v38 = vpop.f32.mrf.mxu0 }
 0x412   : > { %v9103_v7 = vpop.f32.mrf.mxu1 }
 0x413   : > { %v2818_v48 = vpop.f32.mrf.mxu0 }
 0x414   : > { %v2673_v40 = vpop.f32.mrf.mxu1  ;;  %v11633_v11 = vadd.f32 %v2818_v48, %v2718_v25 }
 0x415   : > { %v2720_v58 = vadd.f32 %v2673_v40, %v11590_v21  ;;  %v9130_v52 = vpop.f32.mrf.mxu0 }
 0x416   : > { %v9104_v57 = vpop.f32.mrf.mxu1 }
 0x417   : > { %v2823_v51 = vpop.f32.mrf.mxu0 }
 0x418   : > { %v2678_v17 = vpop.f32.mrf.mxu1  ;;  %v11636_v20 = vadd.f32 %v2823_v51, %v2719_v14 }
 0x419   : > { %v2721_v54 = vadd.f32 %v2678_v17, %v11594_v13  ;;  %v9133_v16 = vpop.f32.mrf.mxu0 }
 0x41a   : > { %v9107_v1 = vpop.f32.mrf.mxu1 }
 0x41b   : > { %v2826_v46 = vpop.f32.mrf.mxu0 }
 0x41c   : > { %v2681_v24 = vpop.f32.mrf.mxu1  ;;  %v11639_v53 = vadd.f32 %v2826_v46, %v2720_v58 }
 0x41d   : > { %v2722_v43 = vadd.f32 %v2681_v24, %v11602_v10  ;;  %v9134_v25 = vpop.f32.mrf.mxu0 }
 0x41e   : > { %v9108_v47 = vpop.f32.mrf.mxu1 }
 0x41f   : > { %v2831_v44 = vpop.f32.mrf.mxu0 }
 0x420   : > { %v2686_v21 = vpop.f32.mrf.mxu1  ;;  %v11642_v8 = vadd.f32 %v2831_v44, %v2721_v54 }
 0x421   : > { %v2723_v61 = vadd.f32 %v2686_v21, %v11606_v56  ;;  %v9137_v14 = vpop.f32.mrf.mxu0 }
 0x422   : > { %v9111_v38 = vpop.f32.mrf.mxu1 }
 0x423   : > { %v2834_v7 = vpop.f32.mrf.mxu0 }
 0x424   : > { %v2689_v13 = vpop.f32.mrf.mxu1  ;;  %v11645_v48 = vadd.f32 %v2834_v7, %v2722_v43 }
 0x425   : > { %v2724_v40 = vadd.f32 %v2689_v13, %v11609_v62  ;;  %v9138_v58 = vpop.f32.mrf.mxu0 }
 0x426   : > { %v9112_v52 = vpop.f32.mrf.mxu1 }
 0x427   : > { %v2839_v57 = vpop.f32.mrf.mxu0 }
 0x428   : > { %v2694_v10 = vpop.f32.mrf.mxu1  ;;  %v11648_v51 = vadd.f32 %v2839_v57, %v2723_v61 }
 0x429   : > { %v2725_v17 = vadd.f32 %v2694_v10, %v11612_v23  ;;  %v9141_v54 = vpop.f32.mrf.mxu0 }
 0x42a   : > { %v9115_v16 = vpop.f32.mrf.mxu1 }
 0x42b   : > { %v2842_v1 = vpop.f32.mrf.mxu0 }
 0x42c   : > { %v2697_v56 = vpop.f32.mrf.mxu1  ;;  %v11651_v46 = vadd.f32 %v2842_v1, %v2724_v40 }
 0x42d   : > { %v2726_v24 = vadd.f32 %v2697_v56, %v11615_v42  ;;  %v9142_v43 = vpop.f32.mrf.mxu0 }
 0x42e   : > { %v9116_v25 = vpop.f32.mrf.mxu1 }
 0x42f   : > { %v2847_v47 = vpop.f32.mrf.mxu0 }
 0x430   : > { %v2702_v62 = vpop.f32.mrf.mxu1  ;;  %v11654_v44 = vadd.f32 %v2847_v47, %v2725_v17 }
 0x431   : > { %v2727_v21 = vadd.f32 %v2702_v62, %v11618_v22  ;;  %v9145_v61 = vpop.f32.mrf.mxu0 }
 0x432   : > { %v9119_v14 = vpop.f32.mrf.mxu1 }
 0x433   : > { %v2850_v38 = vpop.f32.mrf.mxu0 }
 0x434   : > { %v2705_v23 = vpop.f32.mrf.mxu1  ;;  %v11657_v7 = vadd.f32 %v2850_v38, %v2726_v24 }
 0x435   : > { %v2728_v13 = vadd.f32 %v2705_v23, %v11621_v4  ;;  %v9146_v40 = vpop.f32.mrf.mxu0 }
 0x436   : > { %v9120_v58 = vpop.f32.mrf.mxu1 }
 0x437   : > { %v2855_v52 = vpop.f32.mrf.mxu0 }
 0x438   : > { %v2710_v42 = vpop.f32.mrf.mxu1  ;;  %v11660_v57 = vadd.f32 %v2855_v52, %v2727_v21 }
 0x439   : > { %v2729_v10 = vadd.f32 %v2710_v42, %v11624_v49  ;;  %v9149_v17 = vpop.f32.mrf.mxu0 }
 0x43a   : > { %13527 = vst [vmem:[#allocation49_spill] sm:$0xff] %v11660_v57  ;;  %v9123_v54 = vpop.f32.mrf.mxu1 }
 0x43b   : > { %v2858_v16 = vpop.f32.mrf.mxu0 }
 0x43c   : > { %v2713_v22 = vpop.f32.mrf.mxu1  ;;  %v11663_v1 = vadd.f32 %v2858_v16, %v2728_v13 }
 0x43d   : > { %v2730_v56 = vadd.f32 %v2713_v22, %v11627_v6  ;;  %v9150_v24 = vpop.f32.mrf.mxu0 }
 0x43e   : > { %13528 = vst [vmem:[#allocation50_spill] sm:$0xff] %v11663_v1  ;;  %v9124_v43 = vpop.f32.mrf.mxu1 }
 0x43f   : > { %v2863_v25 = vpop.f32.mrf.mxu0 }
 0x440   : > { %v11666_v4 = vadd.f32 %v2863_v25, %v2729_v10  ;;  %v11668_v47 = vpop.f32.mrf.mxu1 }
 0x441   : > { %v9153_v62 = vpop.f32.mrf.mxu0 }
 0x442   : > { %13529 = vst [vmem:[#allocation51_spill] sm:$0xff] %v11666_v4  ;;  %v9159_v21 = vpop.f32.mrf.mxu1  ;;  %v13541_v4 = vld [vmem:[#allocation17_spill] sm:$0xff] }
 0x443   : > { %v2866_v61 = vpop.f32.mrf.mxu0 }
 0x444   : > { %v11670_v14 = vadd.f32 %v2866_v61, %v2730_v56  ;;  %v11672_v49 = vpop.f32.mrf.mxu1 }
 0x445   : > { %v9154_v38 = vpop.f32.mrf.mxu0 }
 0x446   : > { %13530 = vst [vmem:[#allocation52_spill] sm:$0xff] %v11670_v14  ;;  %v9160_v23 = vpop.f32.mrf.mxu1 }
 0x447   : > { %v11674_v13 = vpop.f32.mrf.mxu0 }
 0x448   : > { %v11676_v40 = vpop.f32.mrf.mxu1 }
 0x449   : > { %v9189_v6 = vpop.f32.mrf.mxu0 }
 0x44a   : > { %v9163_v58 = vpop.f32.mrf.mxu1 }
 0x44b   : > { %v11678_v52 = vpop.f32.mrf.mxu0 }
 0x44c   : > { %v11680_v42 = vpop.f32.mrf.mxu1 }
 0x44d   : > { %v9190_v10 = vpop.f32.mrf.mxu0 }
 0x44e   : > { %v9164_v17 = vpop.f32.mrf.mxu1 }
 0x44f   : > { %v11682_v54 = vpop.f32.mrf.mxu0 }
 0x450   : > { %v11684_v16 = vpop.f32.mrf.mxu1 }
 0x451   : > { %v9193_v22 = vpop.f32.mrf.mxu0 }
 0x452   : > { %v9167_v56 = vpop.f32.mrf.mxu1 }
 0x453   : > { %v11686_v24 = vpop.f32.mrf.mxu0 }
 0x454   : > { %v11688_v43 = vpop.f32.mrf.mxu1 }
 0x455   : > { %v9194_v25 = vpop.f32.mrf.mxu0 }
 0x456   : > { %v9168_v62 = vpop.f32.mrf.mxu1 }
 0x457   : > { %v11690_v21 = vpop.f32.mrf.mxu0 }
 0x458   : > { %v11692_v61 = vpop.f32.mrf.mxu1 }
 0x459   : > { %v9197_v38 = vpop.f32.mrf.mxu0 }
 0x45a   : > { %v9171_v23 = vpop.f32.mrf.mxu1 }
 0x45b   : > { %v11694_v6 = vpop.f32.mrf.mxu0 }
 0x45c   : > { %v11696_v58 = vpop.f32.mrf.mxu1 }
 0x45d   : > { %v9198_v10 = vpop.f32.mrf.mxu0 }
 0x45e   : > { %v9172_v17 = vpop.f32.mrf.mxu1  ;;  %v11711_v10 = vstv %s3496_s25 }
 0x45f   : > { %v11698_v22 = vpop.f32.mrf.mxu0 }
 0x460   : > { %v11700_v56 = vpop.f32.mrf.mxu1 }
 0x461   : > { %v9201_v0 = vpop.f32.mrf.mxu0 }
 0x462   : > { %v9175_v25 = vpop.f32.mrf.mxu1  ;;  %v13533_v0 = vld [vmem:[#allocation14_spill] sm:$0xff] }
 0x463   : > { %v11702_v62 = vpop.f32.mrf.mxu0  ;;  %v3498_v25 = vadd.f32 %v11711_v10, %v13533_v0  ;;  %v11732_v0 = vadd.f32 %v11711_v10, %v13538_v50  ;;  %v3023_v50 = vadd.f32 %v11668_v47, %v11630_v18  ;;  %v3024_v18 = vadd.f32 %v11672_v49, %v11633_v11 }
 0x464   : > { %v11704_v2 = vpop.f32.mrf.mxu1  ;;  %v11763_v11 = vadd.f32 %v11711_v10, %v10106_v26  ;;  %v3025_v49 = vadd.f32 %v11676_v40, %v11636_v20 }
 0x465   : > { %v9202_v3 = vpop.f32.mrf.mxu0  ;;  %v3514_v14 = vadd.f32 0.5, %v11732_v0 }
 0x466   : > { %v9176_v38 = vpop.f32.mrf.mxu1 }
 0x467   : > { %v11707_v23 = vpop.f32.mrf.mxu0  ;;  %v13535_v38 = vld [vmem:[#allocation15_spill] sm:$0xff] }
 0x468   : > { %v11709_v5 = vpop.f32.mrf.mxu1  ;;  %v11723_v36 = vadd.f32 %v11711_v10, %v13535_v38 }
 0x469   : > { %13531 = vst [vmem:[#allocation53_spill] sm:$0xff] %v11709_v5  ;;  %v9205_v9 = vpop.f32.mrf.mxu0 }
 0x46a   : > { %v9179_v17 = vpop.f32.mrf.mxu1  ;;  %v3512_v9 = vadd.f32 0.5, %v3498_v25  ;;  %v3513_v45 = vadd.f32 0.5, %v11723_v36 }
 0x46b   : > { %v11713_v12 = vpop.f32.mrf.mxu0 }
 0x46c   : > { %v11715_v15 = vpop.f32.mrf.mxu1  ;;  %v3527_v63 = vmul.f32 0.01724138, %v3513_v45 }
 0x46d   : > { %13532 = vst [vmem:[#allocation54_spill] sm:$0xff] %v11715_v15  ;;  %v9206_v19 = vpop.f32.mrf.mxu0 }
 0x46e   : > { %v9180_v35 = vpop.f32.mrf.mxu1 }
 0x46f   : > { %v11719_v3 = vpop.f32.mrf.mxu0  ;;  %v3526_v35 = vmul.f32 0.01724138, %v3512_v9  ;;  %v3176_v9 = vadd.f32 %v11674_v13, %v3023_v50  ;;  %v3177_v13 = vadd.f32 %v11678_v52, %v3024_v18 }
 0x470   : > { %13534 = vst [vmem:[#allocation55_spill] sm:$0xff] %v11719_v3  ;;  %v11725_v37 = vpop.f32.mrf.mxu1 }
 0x471   : > { %13536 = vst [vmem:[#allocation56_spill] sm:$0xff] %v11725_v37  ;;  %v9209_v39 = vpop.f32.mrf.mxu0 }
 0x472   : > { %v9183_v17 = vpop.f32.mrf.mxu1 }
 0x473   : > { %v11727_v41 = vpop.f32.mrf.mxu0  ;;  %v3540_v17 = vfloor.f32 %v3526_v35  ;;  %v13543_v35 = vld [vmem:[#allocation18_spill] sm:$0xff] }
 0x474   : > { %13537 = vst [vmem:[#allocation57_spill] sm:$0xff] %v11727_v41  ;;  %v11734_v19 = vpop.f32.mrf.mxu1  ;;  %v11741_v41 = vadd.f32 %v11711_v10, %v13541_v4  ;;  %v11751_v4 = vadd.f32 %v11711_v10, %v13543_v35 }
 0x475   : > { %13539 = vst [vmem:[#allocation58_spill] sm:$0xff] %v11734_v19  ;;  %v9210_v55 = vpop.f32.mrf.mxu0 }
 0x476   : > { %v9184_v59 = vpop.f32.mrf.mxu1  ;;  %v3541_v55 = vfloor.f32 %v3527_v63  ;;  %v3516_v57 = vadd.f32 0.5, %v11751_v4 }
 0x477   : > { %v11736_v38 = vpop.f32.mrf.mxu0  ;;  %v3528_v59 = vmul.f32 0.01724138, %v3514_v14 }
 0x478   : > { %13540 = vst [vmem:[#allocation59_spill] sm:$0xff] %v11736_v38  ;;  %v3274_v39 = vpop.f32.mrf.mxu1  ;;  %v3554_v38 = vmul.f32 58.0, %v3540_v17  ;;  %v3555_v63 = vmul.f32 58.0, %v3541_v55  ;;  %v3530_v40 = vmul.f32 0.01724138, %v3516_v57 }
 0x479   : > { %v9213_v37 = vpop.f32.mrf.mxu0  ;;  %v3542_v14 = vfloor.f32 %v3528_v59 }
 0x47a   : > { %v9219_v15 = vpop.f32.mrf.mxu1  ;;  %v3515_v37 = vadd.f32 0.5, %v11741_v41  ;;  %v3568_v17 = vsub.f32 %v3498_v25, %v3554_v38 }
 0x47b   : > { %v11745_v19 = vpop.f32.mrf.mxu0  ;;  %v3329_v15 = vadd.f32 %v3274_v39, %v3176_v9  ;;  %v3569_v39 = vsub.f32 %v11723_v36, %v3555_v63  ;;  %v3556_v55 = vmul.f32 58.0, %v3542_v14  ;;  %v11778_v36 = vadd.f32 %v11711_v10, %v10108_v27 }
 0x47c   : > { %13542 = vst [vmem:[#allocation60_spill] sm:$0xff] %v11745_v19  ;;  %v3277_v45 = vpop.f32.mrf.mxu1  ;;  %v3529_v35 = vmul.f32 0.01724138, %v3515_v37  ;;  %vm11770_vm8 = vcmp.lt.f32.partialorder %v3568_v17, 56.0 }
 0x47d   : > { %v9214_v1 = vpop.f32.mrf.mxu0  ;;  %v3330_v52 = vadd.f32 %v3277_v45, %v3177_v13  ;;  %vm11783_vm9 = vcmp.lt.f32.partialorder %v3569_v39, 56.0 }
 0x47e   : > { %v9220_v47 = vpop.f32.mrf.mxu1  ;;  %v7917_v1 = vld [vmem:[%s11757_s26 + $0x40] sm:$0xff]  ;;  %v3543_v20 = vfloor.f32 %v3529_v35  ;;  %v11790_v35 = vadd.f32 %v11711_v10, %v10110_v28  ;;  %v11999_v28 = vld [vmem:[%s13367_s7 + $0x10] sm:$0xf] (%p2142_p2) }
 0x47f   : > { %v3427_v19 = vpop.f32.mrf.mxu0  ;;  %13580 = vst [vmem:[#allocation23_spill] sm:$0xff] (%p2142_p2), %v11999_v28 }
 0x480   : > { %v3282_v50 = vpop.f32.mrf.mxu1  ;;  %v3482_v3 = vadd.f32 %v3427_v19, %v3329_v15  ;;  %v7918_v15 = vld [vmem:[%s11757_s26 + $0x48] sm:$0xff] }
 0x481   : > { %v9249_v5 = vpop.f32.mrf.mxu0 }
 0x482   : > { %v3602_v19 = vadd.f32 %v11222_v60, %v3482_v3  ;;  %v9223_v25 = vpop.f32.mrf.mxu1  ;;  %v3178_v5 = vadd.f32 %v11682_v54, %v3025_v49  ;;  %v3517_v3 = vadd.f32 0.5, %v11763_v11  ;;  %v3026_v54 = vadd.f32 %v11680_v42, %v11639_v53 }
 0x483   : > { %v3430_v38 = vpop.f32.mrf.mxu0 }
 0x484   : > { %v3631_v9 = vadd.f32 %v7917_v1, %v3602_v19  ;;  %v3285_v37 = vpop.f32.mrf.mxu1  ;;  %v3483_v18 = vadd.f32 %v3430_v38, %v3330_v52  ;;  %v3331_v45 = vadd.f32 %v3282_v50, %v3178_v5  ;;  %v3570_v1 = vsub.f32 %v11732_v0, %v3556_v55  ;;  %v7919_v19 = vld [vmem:[%s11757_s26 + $0x50] sm:$0xff] }
 0x485   : > { %v9250_v47 = vpop.f32.mrf.mxu0  ;;  %v3179_v49 = vadd.f32 %v11686_v24, %v3026_v54  ;;  %v3557_v0 = vmul.f32 58.0, %v3543_v20  ;;  %v3544_v38 = vfloor.f32 %v3530_v40  ;;  %v3531_v39 = vmul.f32 0.01724138, %v3517_v3 }
 0x486   : > { %v3645_v63 = vmax.f32 %v3631_v9, 0.0  ;;  %v3603_v14 = vadd.f32 %v11222_v60, %v3483_v18  ;;  %v9224_v13 = vpop.f32.mrf.mxu1  ;;  %v3518_v55 = vadd.f32 0.5, %v11778_v36  ;;  %v3027_v24 = vadd.f32 %v11684_v16, %v11642_v8 }
 0x487   : > { %v3435_v57 = vpop.f32.mrf.mxu0  ;;  %v3332_v5 = vadd.f32 %v3285_v37, %v3179_v49  ;;  %vm11805_vm10 = vcmp.lt.f32.partialorder %v3570_v1, 56.0  ;;  %v3519_v20 = vadd.f32 0.5, %v11790_v35  ;;  %v11812_v40 = vadd.f32 %v11711_v10, %v10112_v29  ;;  %v12004_v29 = vld [vmem:[%s13367_s7 + $0x14] sm:$0xf] (%p2142_p2) }
 0x488   : > { %v3687_v53 = vsel %vm11770_vm8, %v3645_v63, 0.0  ;;  %v3632_v42 = vadd.f32 %v7918_v15, %v3603_v14  ;;  %v3290_v50 = vpop.f32.mrf.mxu1  ;;  %v3484_v52 = vadd.f32 %v3435_v57, %v3331_v45  ;;  %v3180_v3 = vadd.f32 %v11690_v21, %v3027_v24  ;;  %v7920_v63 = vld [vmem:[%s11757_s26 + $0x58] sm:$0xff]  ;;  %v7921_v24 = vld [vmem:[%s11757_s26 + $0x60] sm:$0xff]  ;;  %13581 = vst [vmem:[#allocation24_spill] sm:$0xff] (%p2142_p2), %v12004_v29 }
 0x489   : > { %7931 = vst.msk [vmem:[%s11796_s27 + $0x40] sm:$0xff] %vm56_vm0, %v3687_v53  ;;  %v9253_v25 = vpop.f32.mrf.mxu0  ;;  %v3571_v45 = vsub.f32 %v11741_v41, %v3557_v0  ;;  %v3558_v13 = vmul.f32 58.0, %v3544_v38  ;;  %v3545_v57 = vfloor.f32 %v3531_v39  ;;  %v3532_v1 = vmul.f32 0.01724138, %v3518_v55 }
 0x48a   : > { %v3646_v59 = vmax.f32 %v3632_v42, 0.0  ;;  %v3604_v9 = vadd.f32 %v11222_v60, %v3484_v52  ;;  %v9227_v18 = vpop.f32.mrf.mxu1  ;;  %v3028_v49 = vadd.f32 %v11688_v43, %v11645_v48  ;;  %v3333_v21 = vadd.f32 %v3290_v50, %v3180_v3 }
 0x48b   : > { %v3438_v47 = vpop.f32.mrf.mxu0  ;;  %v3520_v25 = vadd.f32 0.5, %v11812_v40  ;;  %v11827_v41 = vadd.f32 %v11711_v10, %v10114_v30  ;;  %vm11834_vm11 = vcmp.lt.f32.partialorder %v3571_v45, 56.0  ;;  %v3572_v55 = vsub.f32 %v11751_v4, %v3558_v13  ;;  %v12009_v30 = vld [vmem:[%s13367_s7 + $0x18] sm:$0xf] (%p2142_p2) }
 0x48c   : > { %v3688_v8 = vsel %vm11783_vm9, %v3646_v59, 0.0  ;;  %v3633_v16 = vadd.f32 %v7919_v19, %v3604_v9  ;;  %v3293_v37 = vpop.f32.mrf.mxu1  ;;  %v3485_v54 = vadd.f32 %v3438_v47, %v3332_v5  ;;  %v3533_v19 = vmul.f32 0.01724138, %v3519_v20  ;;  %13582 = vst [vmem:[#allocation25_spill] sm:$0xff] (%p2142_p2), %v12009_v30 }
 0x48d   : > { %7932 = vst.msk [vmem:[%s11796_s27 + $0x48] sm:$0xff] %vm56_vm0, %v3688_v8  ;;  %v9254_v14 = vpop.f32.mrf.mxu0  ;;  %v3181_v0 = vadd.f32 %v11694_v6, %v3028_v49  ;;  %v3559_v59 = vmul.f32 58.0, %v3545_v57  ;;  %v3546_v9 = vfloor.f32 %v3532_v1  ;;  %v3029_v6 = vadd.f32 %v11692_v61, %v11648_v51 }
 0x48e   : > { %v3647_v17 = vmax.f32 %v3633_v16, 0.0  ;;  %v3605_v53 = vadd.f32 %v11222_v60, %v3485_v54  ;;  %v9228_v42 = vpop.f32.mrf.mxu1  ;;  %v3547_v8 = vfloor.f32 %v3533_v19  ;;  %v3534_v16 = vmul.f32 0.01724138, %v3520_v25 }
 0x48f   : > { %v3443_v52 = vpop.f32.mrf.mxu0  ;;  %v3334_v18 = vadd.f32 %v3293_v37, %v3181_v0  ;;  %v3521_v54 = vadd.f32 0.5, %v11827_v41  ;;  %v3182_v4 = vadd.f32 %v11698_v22, %v3029_v6  ;;  %vm11849_vm12 = vcmp.lt.f32.partialorder %v3572_v55, 56.0  ;;  %v7922_v37 = vld [vmem:[%s11757_s26 + $0x68] sm:$0xff] }
 0x490   : > { %v3689_v38 = vsel %vm11805_vm10, %v3647_v17, 0.0  ;;  %v3634_v48 = vadd.f32 %v7920_v63, %v3605_v53  ;;  %v3298_v43 = vpop.f32.mrf.mxu1  ;;  %v3486_v50 = vadd.f32 %v3443_v52, %v3333_v21  ;;  %v3573_v61 = vsub.f32 %v11763_v11, %v3559_v59 }
 0x491   : > { %7933 = vst.msk [vmem:[%s11796_s27 + $0x50] sm:$0xff] %vm56_vm0, %v3689_v38  ;;  %v9257_v5 = vpop.f32.mrf.mxu0  ;;  %v3560_v1 = vmul.f32 58.0, %v3546_v9  ;;  %v11857_v22 = vadd.f32 %v11711_v10, %v10116_v31  ;;  %v3030_v49 = vadd.f32 %v11696_v58, %v11651_v46  ;;  %v3335_v21 = vadd.f32 %v3298_v43, %v3182_v4  ;;  %v7923_v43 = vld [vmem:[%s11757_s26 + $0x70] sm:$0xff]  ;;  %v12014_v31 = vld [vmem:[%s13367_s7 + $0x1c] sm:$0xf] (%p2142_p2) }
 0x492   : > { %v3648_v15 = vmax.f32 %v3634_v48, 0.0  ;;  %v3606_v47 = vadd.f32 %v11222_v60, %v3486_v50  ;;  %v9231_v20 = vpop.f32.mrf.mxu1  ;;  %v3561_v19 = vmul.f32 58.0, %v3547_v8  ;;  %v3548_v11 = vfloor.f32 %v3534_v16  ;;  %13583 = vst [vmem:[#allocation26_spill] sm:$0xff] (%p2142_p2), %v12014_v31 }
 0x493   : > { %v3446_v3 = vpop.f32.mrf.mxu0  ;;  %v3535_v25 = vmul.f32 0.01724138, %v3521_v54  ;;  %v3183_v0 = vadd.f32 %v11702_v62, %v3030_v49  ;;  %vm11867_vm13 = vcmp.lt.f32.partialorder %v3573_v61, 56.0  ;;  %v3574_v58 = vsub.f32 %v11778_v36, %v3560_v1 }
 0x494   : > { %v3690_v45 = vsel %vm11834_vm11, %v3648_v15, 0.0  ;;  %v3635_v63 = vadd.f32 %v7921_v24, %v3606_v47  ;;  %v3301_v14 = vpop.f32.mrf.mxu1  ;;  %v3487_v13 = vadd.f32 %v3446_v3, %v3334_v18  ;;  %v3522_v24 = vadd.f32 0.5, %v11857_v22 }
 0x495   : > { %7934 = vst.msk [vmem:[%s11796_s27 + $0x58] sm:$0xff] %vm56_vm0, %v3690_v45  ;;  %v9258_v57 = vpop.f32.mrf.mxu0  ;;  %v11876_v62 = vadd.f32 %v11711_v10, %v10118_v32  ;;  %v3031_v5 = vadd.f32 %v11700_v56, %v11654_v44  ;;  %v3336_v59 = vadd.f32 %v3301_v14, %v3183_v0  ;;  %v3575_v36 = vsub.f32 %v11790_v35, %v3561_v19  ;;  %v7924_v56 = vld [vmem:[%s11757_s26 + $0x78] sm:$0xff]  ;;  %v12019_v32 = vld [vmem:[%s13367_s7 + $0x20] sm:$0xf] (%p2142_p2) }
 0x496   : > { %v3649_v17 = vmax.f32 %v3635_v63, 0.0  ;;  %v3607_v53 = vadd.f32 %v11222_v60, %v3487_v13  ;;  %v9232_v42 = vpop.f32.mrf.mxu1  ;;  %v3562_v47 = vmul.f32 58.0, %v3548_v11  ;;  %v3549_v20 = vfloor.f32 %v3535_v25  ;;  %13584 = vst [vmem:[#allocation27_spill] sm:$0xff] (%p2142_p2), %v12019_v32 }
 0x497   : > { %v3451_v52 = vpop.f32.mrf.mxu0  ;;  %v3184_v3 = vadd.f32 %v11707_v23, %v3031_v5  ;;  %vm11887_vm14 = vcmp.lt.f32.partialorder %v3574_v58, 56.0  ;;  %v3536_v63 = vmul.f32 0.01724138, %v3522_v24  ;;  %v3523_v35 = vadd.f32 0.5, %v11876_v62  ;;  %v13564_v5 = vld [vmem:[#allocation55_spill] sm:$0xff] }
 0x498   : > { %v3691_v38 = vsel %vm11849_vm12, %v3649_v17, 0.0  ;;  %v3636_v48 = vadd.f32 %v7922_v37, %v3607_v53  ;;  %v3306_v50 = vpop.f32.mrf.mxu1  ;;  %v3488_v39 = vadd.f32 %v3451_v52, %v3335_v21  ;;  %v11895_v23 = vadd.f32 %v11711_v10, %v10120_v33  ;;  %v7925_v52 = vld [vmem:[%s11757_s26 + $0x80] sm:$0xff] }
 0x499   : > { %7935 = vst.msk [vmem:[%s11796_s27 + $0x60] sm:$0xff] %vm56_vm0, %v3691_v38  ;;  %v9261_v55 = vpop.f32.mrf.mxu0  ;;  %v3032_v14 = vadd.f32 %v11704_v2, %v11657_v7  ;;  %v3337_v13 = vadd.f32 %v3306_v50, %v3184_v3  ;;  %vm11900_vm15 = vcmp.lt.f32.partialorder %v3575_v36, 56.0  ;;  %v3576_v49 = vsub.f32 %v11812_v40, %v3562_v47  ;;  %v13561_v38 = vld [vmem:[#allocation53_spill] sm:$0xff]  ;;  %v12024_v33 = vld [vmem:[%s13367_s7 + $0x24] sm:$0xf] (%p2142_p2) }
 0x49a   : > { %v3650_v9 = vmax.f32 %v3636_v48, 0.0  ;;  %v3608_v6 = vadd.f32 %v11222_v60, %v3488_v39  ;;  %v9235_v18 = vpop.f32.mrf.mxu1  ;;  %v3563_v21 = vmul.f32 58.0, %v3549_v20  ;;  %v3550_v11 = vfloor.f32 %v3536_v63  ;;  %13585 = vst [vmem:[#allocation28_spill] sm:$0xff] (%p2142_p2), %v12024_v33 }
 0x49b   : > { %v3454_v15 = vpop.f32.mrf.mxu0  ;;  %v3185_v17 = vadd.f32 %v11713_v12, %v3032_v14  ;;  %v3537_v25 = vmul.f32 0.01724138, %v3523_v35  ;;  %v3524_v0 = vadd.f32 0.5, %v11895_v23  ;;  %v11914_v40 = vadd.f32 %v11711_v10, %v10122_v34  ;;  %v13560_v12 = vld [vmem:[#allocation49_spill] sm:$0xff]  ;;  %v12029_v34 = vld [vmem:[%s13367_s7 + $0x28] sm:$0xf] (%p2142_p2) }
 0x49c   : > { %v3692_v8 = vsel %vm11867_vm13, %v3650_v9, 0.0  ;;  %v3637_v16 = vadd.f32 %v7923_v43, %v3608_v6  ;;  %v3309_v54 = vpop.f32.mrf.mxu1  ;;  %v3489_v4 = vadd.f32 %v3454_v15, %v3336_v59  ;;  %v3033_v48 = vadd.f32 %v13561_v38, %v13560_v12  ;;  %v7926_v15 = vld [vmem:[%s11757_s26 + $0x88] sm:$0xff]  ;;  %v13572_v38 = vld [vmem:[#allocation59_spill] sm:$0xff]  ;;  %13586 = vst [vmem:[#allocation29_spill] sm:$0xff] (%p2142_p2), %v12029_v34 }
 0x49d   : > { %7936 = vst.msk [vmem:[%s11796_s27 + $0x68] sm:$0xff] %vm56_vm0, %v3692_v8  ;;  %v9262_v45 = vpop.f32.mrf.mxu0  ;;  %v3338_v50 = vadd.f32 %v3309_v54, %v3185_v17  ;;  %vm11919_vm2 = vcmp.lt.f32.partialorder %v3576_v49, 56.0  ;;  %v3577_v24 = vsub.f32 %v11827_v41, %v3563_v21  ;;  %v3564_v47 = vmul.f32 58.0, %v3550_v11  ;;  %v13565_v41 = vld [vmem:[#allocation50_spill] sm:$0xff]  ;;  %v13569_v14 = vld [vmem:[#allocation57_spill] sm:$0xff] }
 0x49e   : > { %v3651_v51 = vmax.f32 %v3637_v16, 0.0  ;;  %v3609_v61 = vadd.f32 %v11222_v60, %v3489_v4  ;;  %v9236_v37 = vpop.f32.mrf.mxu1  ;;  %v3186_v59 = vadd.f32 %v13564_v5, %v3033_v48  ;;  %v3551_v20 = vfloor.f32 %v3537_v25  ;;  %v13566_v16 = vld [vmem:[#allocation54_spill] sm:$0xff] }
 0x49f   : > { %v3459_v1 = vpop.f32.mrf.mxu0  ;;  %v3538_v3 = vmul.f32 0.01724138, %v3524_v0  ;;  %v3525_v8 = vadd.f32 0.5, %v11914_v40  ;;  %v3034_v54 = vadd.f32 %v13566_v16, %v13565_v41  ;;  %vm11934_vm3 = vcmp.lt.f32.partialorder %v3577_v24, 56.0  ;;  %v7927_v49 = vld [vmem:[%s11757_s26 + $0x90] sm:$0xff]  ;;  %v7928_v43 = vld [vmem:[%s11757_s26 + $0x98] sm:$0xff] }
 0x4a0   : > { %v3693_v53 = vsel %vm11887_vm14, %v3651_v51, 0.0  ;;  %v3638_v42 = vadd.f32 %v7924_v56, %v3609_v61  ;;  %v3314_v2 = vpop.f32.mrf.mxu1  ;;  %v3490_v7 = vadd.f32 %v3459_v1, %v3337_v13  ;;  %v3578_v1 = vsub.f32 %v11857_v22, %v3564_v47 }
 0x4a1   : > { %7937 = vst.msk [vmem:[%s11796_s27 + $0x70] sm:$0xff] %vm56_vm0, %v3693_v53  ;;  %v9265_v19 = vpop.f32.mrf.mxu0  ;;  %v3339_v4 = vadd.f32 %v3314_v2, %v3186_v59  ;;  %v3187_v13 = vadd.f32 %v13569_v14, %v3034_v54  ;;  %v3565_v17 = vmul.f32 58.0, %v3551_v20  ;;  %v3552_v53 = vfloor.f32 %v3538_v3  ;;  %v13570_v2 = vld [vmem:[#allocation51_spill] sm:$0xff]  ;;  %v13573_v59 = vld [vmem:[#allocation52_spill] sm:$0xff] }
 0x4a2   : > { %v3652_v39 = vmax.f32 %v3638_v42, 0.0  ;;  %v3610_v46 = vadd.f32 %v11222_v60, %v3490_v7  ;;  %v9239_v58 = vpop.f32.mrf.mxu1  ;;  %v3539_v42 = vmul.f32 0.01724138, %v3525_v8  ;;  %v13571_v7 = vld [vmem:[#allocation56_spill] sm:$0xff]  ;;  %vm3592_vm4 = vcmp.lt.f32.partialorder %v3578_v1, 56.0 }
 0x4a3   : > { %v3462_v55 = vpop.f32.mrf.mxu0  ;;  %v3579_v58 = vsub.f32 %v11876_v62, %v3565_v17  ;;  %v3566_v24 = vmul.f32 58.0, %v3552_v53  ;;  %v13575_v20 = vld [vmem:[#allocation60_spill] sm:$0xff] }
 0x4a4   : > { %v3694_v10 = vsel %vm11900_vm15, %v3652_v39, 0.0  ;;  %v3639_v9 = vadd.f32 %v7925_v52, %v3610_v46  ;;  %v3317_v6 = vpop.f32.mrf.mxu1  ;;  %v3491_v18 = vadd.f32 %v3462_v55, %v3338_v50  ;;  %v3035_v52 = vadd.f32 %v13571_v7, %v13570_v2  ;;  %v7929_v54 = vld [vmem:[%s11757_s26 + $0xa0] sm:$0xff]  ;;  %v11989_v2 = vld [vmem:[%s13367_s7 + $0x8] sm:$0xf] (%p2142_p2)  ;;  %v11994_v7 = vld [vmem:[%s13367_s7 + $0xc] sm:$0xf] (%p2142_p2) }
 0x4a5   : > { %7938 = vst.msk [vmem:[%s11796_s27 + $0x78] sm:$0xff] %vm56_vm0, %v3694_v10  ;;  %v9266_v36 = vpop.f32.mrf.mxu0  ;;  %v3340_v19 = vadd.f32 %v3317_v6, %v3187_v13  ;;  %v3553_v5 = vfloor.f32 %v3539_v42  ;;  %v13574_v10 = vld [vmem:[#allocation58_spill] sm:$0xff]  ;;  %vm3593_vm5 = vcmp.lt.f32.partialorder %v3579_v58, 56.0  ;;  %v3580_v16 = vsub.f32 %v11895_v23, %v3566_v24  ;;  %v11984_v42 = vld [vmem:[%s13367_s7 + $0x4] sm:$0xf] (%p2142_p2)  ;;  %13578 = vst [vmem:[#allocation21_spill] sm:$0xff] (%p2142_p2), %v11989_v2 }
 0x4a6   : > { %v3653_v44 = vmax.f32 %v3639_v9, 0.0  ;;  %v3611_v56 = vadd.f32 %v11222_v60, %v3491_v18  ;;  %v9240_v45 = vpop.f32.mrf.mxu1  ;;  %v3188_v48 = vadd.f32 %v13572_v38, %v3035_v52  ;;  %v3036_v9 = vadd.f32 %v13574_v10, %v13573_v59  ;;  %13577 = vst [vmem:[#allocation20_spill] sm:$0xff] (%p2142_p2), %v11984_v42  ;;  %13579 = vst [vmem:[#allocation22_spill] sm:$0xff] (%p2142_p2), %v11994_v7  ;;  %v12039_v52 = vld [vmem:[%s13367_s7 + $0x30] sm:$0xf] (%p2142_p2) }
 0x4a7   : > { %v3467_v35 = vpop.f32.mrf.mxu0  ;;  %vm3594_vm6 = vcmp.lt.f32.partialorder %v3580_v16, 56.0  ;;  %13587 = vst [vmem:[#allocation30_spill] sm:$0xff] (%p2142_p2), %v12039_v52  ;;  %v12069_v38 = vld [vmem:[%s13368_s8] ss:$0 sm:$0xff] (%p2142_p2) }
 0x4a8   : > { %v3695_v51 = vsel %vm11919_vm2, %v3653_v44, 0.0  ;;  %v3640_v61 = vadd.f32 %v7926_v15, %v3611_v56  ;;  %v3322_v37 = vpop.f32.mrf.mxu1  ;;  %v3492_v57 = vadd.f32 %v3467_v35, %v3339_v4  ;;  %v3189_v3 = vadd.f32 %v13575_v20, %v3036_v9 }
 0x4a9   : > { %7939 = vst.msk [vmem:[%s11796_s27 + $0x80] sm:$0xff] %vm56_vm0, %v3695_v51  ;;  %v9269_v21 = vpop.f32.mrf.mxu0  ;;  %v3341_v6 = vadd.f32 %v3322_v37, %v3188_v48  ;;  %v3567_v44 = vmul.f32 58.0, %v3553_v5  ;;  %v7930_v37 = vld [vmem:[%s11757_s26 + $0xa8] sm:$0xff]  ;;  %s12071_s26 = smov (%p2142_p2), 0  }
 0x4aa   : > { %v3654_v11 = vmax.f32 %v3640_v61, 0.0  ;;  %v3612_v25 = vadd.f32 %v11222_v60, %v3492_v57  ;;  %v9243_v0 = vpop.f32.mrf.mxu1 }
 0x4ab   : > { %v3470_v12 = vpop.f32.mrf.mxu0  ;;  %v3581_v61 = vsub.f32 %v11914_v40, %v3567_v44  ;;  %v11979_v40 = vld [vmem:[%s13367_s7] sm:$0xf] (%p2142_p2) }
 0x4ac   : > { %v3696_v22 = vsel %vm11934_vm3, %v3654_v11, 0.0  ;;  %v3641_v50 = vadd.f32 %v7927_v49, %v3612_v25  ;;  %v3325_v39 = vpop.f32.mrf.mxu1  ;;  %v3493_v46 = vadd.f32 %v3470_v12, %v3340_v19  ;;  %13576 = vst [vmem:[#allocation19_spill] sm:$0xff] (%p2142_p2), %v11979_v40  ;;  %v12044_v19 = vld [vmem:[%s13367_s7 + $0x34] sm:$0xf] (%p2142_p2)  ;;  %v12049_v11 = vld [vmem:[%s13367_s7 + $0x38] sm:$0xf] (%p2142_p2) }
 0x4ad   : > { %7940 = vst.msk [vmem:[%s11796_s27 + $0x88] sm:$0xff] %vm56_vm0, %v3696_v22  ;;  %v9270_v55 = vpop.f32.mrf.mxu0  ;;  %v3342_v56 = vadd.f32 %v3325_v39, %v3189_v3  ;;  %vm3595_vm7 = vcmp.lt.f32.partialorder %v3581_v61, 56.0  ;;  %13588 = vst [vmem:[#allocation31_spill] sm:$0xff] (%p2142_p2), %v12044_v19  ;;  %v12054_v25 = vld [vmem:[%s13367_s7 + $0x3c] sm:$0xf] (%p2142_p2) }
 0x4ae   : > { %v3655_v18 = vmax.f32 %v3641_v50, 0.0  ;;  %v3613_v15 = vadd.f32 %v11222_v60, %v3493_v46  ;;  %v9244_v36 = vpop.f32.mrf.mxu1  ;;  %13589 = vst [vmem:[#allocation32_spill] sm:$0xff] (%p2142_p2), %v12049_v11  ;;  %13590 = vst [vmem:[#allocation33_spill] sm:$0xff] (%p2142_p2), %v12054_v25  ;;  %v12059_v0 = vld [vmem:[%s13367_s7 + $0x40] sm:$0xf] (%p2142_p2) }
 0x4af   : > { %v3475_v47 = vpop.f32.mrf.mxu0  ;;  %13591 = vst [vmem:[#allocation34_spill] sm:$0xff] (%p2142_p2), %v12059_v0  ;;  %v12064_v12 = vld [vmem:[%s13367_s7 + $0x44] sm:$0xf] (%p2142_p2) }
 0x4b0   : > { %v3697_v8 = vsel %vm3592_vm4, %v3655_v18, 0.0  ;;  %v3642_v41 = vadd.f32 %v7928_v43, %v3613_v15  ;;  %v3494_v62 = vadd.f32 %v3475_v47, %v3341_v6  ;;  %13592 = vst [vmem:[#allocation35_spill] sm:$0xff] (%p2142_p2), %v12064_v12 }
 0x4b1   : > { %7941 = vst.msk [vmem:[%s11796_s27 + $0x90] sm:$0xff] %vm56_vm0, %v3697_v8  ;;  %v9273_v4 = vpop.f32.mrf.mxu0 }
 0x4b2   : > { %v3656_v45 = vmax.f32 %v3642_v41, 0.0  ;;  %v3614_v63 = vadd.f32 %v11222_v60, %v3494_v62 }
 0x4b3   : > { %v3478_v35 = vpop.f32.mrf.mxu0 }
 0x4b4   : > { %v3698_v14 = vsel %vm3593_vm5, %v3656_v45, 0.0  ;;  %v3643_v13 = vadd.f32 %v7929_v54, %v3614_v63  ;;  %v3495_v51 = vadd.f32 %v3478_v35, %v3342_v56 }
 0x4b5   : > { %7942 = vst.msk [vmem:[%s11796_s27 + $0x98] sm:$0xff] %vm56_vm0, %v3698_v14  ;;  %v9274_v23 = vpop.f32.mrf.mxu0 }
 0x4b6   : > { %v3657_v57 = vmax.f32 %v3643_v13, 0.0  ;;  %v3615_v1 = vadd.f32 %v11222_v60, %v3495_v51  ;;  %v12034_v60 = vld [vmem:[%s13367_s7 + $0x2c] sm:$0xf] (%p2142_p2) }
 0x4b8   : > { %v3699_v49 = vsel %vm3594_vm6, %v3657_v57, 0.0  ;;  %v3644_v21 = vadd.f32 %v7930_v37, %v3615_v1 }
 0x4b9   : > { %7943 = vst.msk [vmem:[%s11796_s27 + $0xa0] sm:$0xff] %vm56_vm0, %v3699_v49  ;;  %2144 = sbr.rel (!%p2142_p2) target bundleno = 750 (0x2ee), region = 307 }
 0x4ba   : > { %v3658_v17 = vmax.f32 %v3644_v21, 0.0 }
 0x4bc   : > { %v3700_v53 = vsel %vm3595_vm7, %v3658_v17, 0.0 }
 0x4bd   : > { %7944 = vst.msk [vmem:[%s11796_s27 + $0xa8] sm:$0xff] %vm56_vm0, %v3700_v53 }
 0x4be LB: > { %v13593_v7 = vld [vmem:[#allocation22_spill] sm:$0xff]  ;;  %v13594_v2 = vld [vmem:[#allocation21_spill] sm:$0xff]  ;;  %v13595_v42 = vld [vmem:[#allocation20_spill] sm:$0xff]  ;;  %s7264_s7 = smul.u32 112, %s9794_s26  ;;  %s9794_s26 = sphi %s12071_s26, %s3748_s26  }
 0x4bf   : > { %v7975_v48 = vcombine.low %v13594_v2, %v13593_v7  ;;  %v13596_v40 = vld [vmem:[#allocation19_spill] sm:$0xff]  ;;  %v13597_v29 = vld [vmem:[#allocation24_spill] sm:$0xff]  ;;  %v13599_v31 = vld [vmem:[#allocation26_spill] sm:$0xff]  ;;  %s3749_s27 = smul.u32 56, %s9794_s26  ;;  %s3748_s26 = sadd.s32 1, %s9794_s26  }
 0x4c0   : > { %v7980_v22 = vcombine.low %v13596_v40, %v13595_v42  ;;  %v13598_v28 = vld [vmem:[#allocation23_spill] sm:$0xff]  ;;  %s12083_s8 = scalar_lea.vmem [#allocation4], %s7264_s7  ;;  %v13600_v30 = vld [vmem:[#allocation25_spill] sm:$0xff]  ;;  %v13601_v33 = vld [vmem:[#allocation28_spill] sm:$0xff]  ;;  %p3745_p3 = scmp.ge.s32.totalorder %s3748_s26, 29  }
 0x4c1   : > { %v7992_v50 = vcombine.low %v13598_v28, %v13597_v29  ;;  %9597 = vmatprep.subr.bf16.mxu1 %v7975_v48  ;;  %9275 = vmatprep.subr.bf16.mxu0 %v7975_v48  ;;  %v8004_v3 = vcombine.low %v13600_v30, %v13599_v31  ;;  %v13602_v32 = vld [vmem:[#allocation27_spill] sm:$0xff]  ;;  %v13603_v34 = vld [vmem:[#allocation29_spill] sm:$0xff]  ;;  %v13605_v52 = vld [vmem:[#allocation30_spill] sm:$0xff]  ;;  %s4709_s28 = scvt.s32.f32 %s3749_s27  ;;  %s12323_s29 = scalar_lea.vmem [#allocation5], %s3749_s27 }
 0x4c2   : > { %9598 = vmatpush3.bf16.msra.mxu1 %v7975_v48  ;;  %9276 = vmatpush3.bf16.msra.mxu0 %v7975_v48  ;;  %v8016_v41 = vcombine.low %v13602_v32, %v13601_v33  ;;  %v8028_v61 = vcombine.low %v13603_v34, %v12034_v60  ;;  %v13604_v19 = vld [vmem:[#allocation31_spill] sm:$0xff]  ;;  %v13606_v25 = vld [vmem:[#allocation33_spill] sm:$0xff]  ;;  %v13607_v11 = vld [vmem:[#allocation32_spill] sm:$0xff]  ;;  %s12543_s21 = smov (%p3745_p3), 0  }
 0x4c3   : > { %9285 = vmatprep.subr.bf16.mxu1 %v7980_v22  ;;  %9295 = vmatprep.subr.bf16.mxu0 %v7992_v50  ;;  %v8040_v37 = vcombine.low %v13605_v52, %v13604_v19  ;;  %v13608_v12 = vld [vmem:[#allocation35_spill] sm:$0xff]  ;;  %v13609_v0 = vld [vmem:[#allocation34_spill] sm:$0xff]  ;;  %v13612_v2 = vld [vmem:[#allocation17_spill] sm:$0xff] }
 0x4c4   : > { %v7968_v39 = vld [vmem:[%s12083_s8 + $0x6] ss:$2 sm:$0xff]  ;;  %v7969_v46 = vld [vmem:[%s12083_s8 + $0x16] ss:$2 sm:$0xff]  ;;  %v7961_v6 = vld [vmem:[%s12083_s8 + $0x5] ss:$2 sm:$0xff] }
 0x4c5   : > { %v7972_v58 = vld [vmem:[%s12083_s8 + $0x46] ss:$2 sm:$0xff]  ;;  %v3785_v43 = vpack.c.bf16 %v7969_v46, %v7968_v39  ;;  %v7973_v55 = vld [vmem:[%s12083_s8 + $0x56] ss:$2 sm:$0xff]  ;;  %v7962_v18 = vld [vmem:[%s12083_s8 + $0x15] ss:$2 sm:$0xff] }
 0x4c6   : > { %v7970_v24 = vld [vmem:[%s12083_s8 + $0x26] ss:$2 sm:$0xff]  ;;  %v7971_v5 = vld [vmem:[%s12083_s8 + $0x36] ss:$2 sm:$0xff]  ;;  %v3787_v59 = vpack.c.bf16 %v7973_v55, %v7972_v58  ;;  %v3766_v36 = vpack.c.bf16 %v7962_v18, %v7961_v6  ;;  %v7985_v47 = vld [vmem:[%s12083_s8 + $0x7] ss:$2 sm:$0xff] }
 0x4c7   : > { %v3786_v10 = vpack.c.bf16 %v7971_v5, %v7970_v24  ;;  %v7974_v9 = vld [vmem:[%s12083_s8 + $0x66] ss:$2 sm:$0xff]  ;;  %9277 = vmatprep.mubr.msk.bf16.mxu0 %vm56_vm0, %v3785_v43  ;;  %v7986_v20 = vld [vmem:[%s12083_s8 + $0x17] ss:$2 sm:$0xff]  ;;  %v7987_v62 = vld [vmem:[%s12083_s8 + $0x27] ss:$2 sm:$0xff] }
 0x4c8   : > { %v3788_v15 = vpack.c.bf16 %v7974_v9, %v7974_v9  ;;  %9281 = vmatprep.mubr.msk.bf16.mxu1 %vm56_vm0, %v3787_v59  ;;  %v3968_v8 = vpack.c.bf16 %v7986_v20, %v7985_v47  ;;  %v7988_v16 = vld [vmem:[%s12083_s8 + $0x37] ss:$2 sm:$0xff]  ;;  %v7989_v63 = vld [vmem:[%s12083_s8 + $0x47] ss:$2 sm:$0xff]  ;;  %v8009_v1 = vld [vmem:[%s12083_s8 + $0x40] ss:$2 sm:$0xff] }
 0x4c9   : > { %9278 = vmatmul.mubr.msk.bf16.vlgmr.msra.gmra.mxu0 %vm56_vm0, %v3786_v10  ;;  %v7963_v54 = vld [vmem:[%s12083_s8 + $0x25] ss:$2 sm:$0xff]  ;;  %v7964_v4 = vld [vmem:[%s12083_s8 + $0x35] ss:$2 sm:$0xff]  ;;  %v3969_v45 = vpack.c.bf16 %v7988_v16, %v7987_v62  ;;  %v8010_v49 = vld [vmem:[%s12083_s8 + $0x50] ss:$2 sm:$0xff] }
 0x4ca   : > { %9282 = vmatmul.mubr.msk.bf16.vlgmr.msra.gmra.mxu1 %vm56_vm0, %v3788_v15  ;;  %9296 = vmatpush3.bf16.msra.mxu0 %v7992_v50  ;;  %v7965_v44 = vld [vmem:[%s12083_s8 + $0x45] ss:$2 sm:$0xff]  ;;  %v7966_v56 = vld [vmem:[%s12083_s8 + $0x55] ss:$2 sm:$0xff]  ;;  %v3767_v14 = vpack.c.bf16 %v7964_v4, %v7963_v54  ;;  %v8011_v39 = vld [vmem:[%s12083_s8 + $0x60] ss:$2 sm:$0xff]  ;;  %v8052_v15 = vcombine.low %v13607_v11, %v13606_v25 }
 0x4cb   : > { %9286 = vmatpush3.bf16.msra.mxu1 %v7980_v22  ;;  %9287 = vmatprep.mubr.msk.bf16.mxu1 %vm56_vm0, %v3766_v36  ;;  %v7990_v35 = vld [vmem:[%s12083_s8 + $0x57] ss:$2 sm:$0xff]  ;;  %v3768_v13 = vpack.c.bf16 %v7966_v56, %v7965_v44  ;;  %v7991_v23 = vld [vmem:[%s12083_s8 + $0x67] ss:$2 sm:$0xff]  ;;  %v4184_v22 = vpack.c.bf16 %v8010_v49, %v8009_v1  ;;  %v8012_v46 = vld [vmem:[%s12083_s8 + $0x70] ss:$2 sm:$0xff]  ;;  %v8064_v36 = vcombine.low %v13609_v0, %v13608_v12 }
 0x4cc   : > { %9297 = vmatprep.mubr.msk.bf16.mxu0 %vm56_vm0, %v3968_v8  ;;  %9305 = vmatprep.subr.bf16.mxu1 %v8004_v3  ;;  %v3970_v51 = vpack.c.bf16 %v7990_v35, %v7989_v63  ;;  %v7967_v57 = vld [vmem:[%s12083_s8 + $0x65] ss:$2 sm:$0xff]  ;;  %v3971_v53 = vpack.c.bf16 %v7991_v23, %v7991_v23  ;;  %v4185_v5 = vpack.c.bf16 %v8012_v46, %v8011_v39  ;;  %v8013_v59 = vld [vmem:[%s12083_s8 + $0x80] ss:$2 sm:$0xff]  ;;  %v8014_v10 = vld [vmem:[%s12083_s8 + $0x90] ss:$2 sm:$0xff] }
 0x4cd   : > { %9315 = vmatprep.subr.bf16.mxu0 %v8016_v41  ;;  %v7997_v21 = vld [vmem:[%s12083_s8 + $0x3f] ss:$2 sm:$0xff]  ;;  %v7998_v17 = vld [vmem:[%s12083_s8 + $0x4f] ss:$2 sm:$0xff]  ;;  %v3769_v48 = vpack.c.bf16 %v7967_v57, %v7967_v57  ;;  %v4186_v18 = vpack.c.bf16 %v8014_v10, %v8013_v59  ;;  %v8015_v47 = vld [vmem:[%s12083_s8 + $0xa0] ss:$2 sm:$0xff] }
 0x4ce   : > { %v4076_v50 = vpack.c.bf16 %v7998_v17, %v7997_v21  ;;  %v7999_v58 = vld [vmem:[%s12083_s8 + $0x5f] ss:$2 sm:$0xff]  ;;  %v8000_v43 = vld [vmem:[%s12083_s8 + $0x6f] ss:$2 sm:$0xff]  ;;  %v4187_v16 = vpack.c.bf16 %v8015_v47, %v8015_v47 }
 0x4cf   : > { %v8001_v55 = vld [vmem:[%s12083_s8 + $0x7f] ss:$2 sm:$0xff]  ;;  %v8002_v24 = vld [vmem:[%s12083_s8 + $0x8f] ss:$2 sm:$0xff]  ;;  %v4077_v9 = vpack.c.bf16 %v8000_v43, %v7999_v58  ;;  %v8047_v43 = vld [vmem:[%s12083_s8 + $0x9a] ss:$2 sm:$0xff] }
 0x4d0   : > { %v4078_v6 = vpack.c.bf16 %v8002_v24, %v8001_v55  ;;  %v8003_v20 = vld [vmem:[%s12083_s8 + $0x9f] ss:$2 sm:$0xff]  ;;  %v13613_v19 = vld [vmem:[#allocation15_spill] sm:$0xff] }
 0x4d1   : > { %9298 = vmatmul.mubr.msk.bf16.vlgmr.msra.gmra.mxu0 %vm56_vm0, %v3969_v45  ;;  %v8034_v8 = vld [vmem:[%s12083_s8 + $0x89] ss:$2 sm:$0xff]  ;;  %v4079_v54 = vpack.c.bf16 %v8003_v20, %v8003_v20  ;;  %v8035_v56 = vld [vmem:[%s12083_s8 + $0x99] ss:$2 sm:$0xff] }
 0x4d2   : > { %9288 = vmatmul.mubr.msk.bf16.vlgmr.msra.gmra.mxu1 %vm56_vm0, %v3767_v14  ;;  %9316 = vmatpush3.bf16.msra.mxu0 %v8016_v41  ;;  %v8021_v41 = vld [vmem:[%s12083_s8 + $0x41] ss:$2 sm:$0xff]  ;;  %v8022_v62 = vld [vmem:[%s12083_s8 + $0x51] ss:$2 sm:$0xff] }
 0x4d3   : > { %9306 = vmatpush3.bf16.msra.mxu1 %v8004_v3  ;;  %9291 = vmatprep.mubr.msk.bf16.mxu1 %vm56_vm0, %v3768_v13  ;;  %v8033_v3 = vld [vmem:[%s12083_s8 + $0x79] ss:$2 sm:$0xff]  ;;  %v4292_v44 = vpack.c.bf16 %v8022_v62, %v8021_v41  ;;  %v8036_v45 = vld [vmem:[%s12083_s8 + $0xa9] ss:$2 sm:$0xff] }
 0x4d4   : > { %9301 = vmatprep.mubr.msk.bf16.mxu0 %vm56_vm0, %v3970_v51  ;;  %9325 = vmatprep.subr.bf16.mxu1 %v8028_v61  ;;  %v4400_v4 = vpack.c.bf16 %v8034_v8, %v8033_v3  ;;  %v8023_v63 = vld [vmem:[%s12083_s8 + $0x61] ss:$2 sm:$0xff]  ;;  %v8024_v35 = vld [vmem:[%s12083_s8 + $0x71] ss:$2 sm:$0xff]  ;;  %v4401_v51 = vpack.c.bf16 %v8036_v45, %v8035_v56  ;;  %v8051_v3 = vld [vmem:[%s12083_s8 + $0xda] ss:$2 sm:$0xff] }
 0x4d5   : > { %9335 = vmatprep.subr.bf16.mxu0 %v8040_v37  ;;  %v8025_v14 = vld [vmem:[%s12083_s8 + $0x81] ss:$2 sm:$0xff]  ;;  %v8026_v13 = vld [vmem:[%s12083_s8 + $0x91] ss:$2 sm:$0xff]  ;;  %v4293_v23 = vpack.c.bf16 %v8024_v35, %v8023_v63  ;;  %v4511_v41 = vpack.c.bf16 %v8051_v3, %v8051_v3 }
 0x4d6   : > { %v4294_v57 = vpack.c.bf16 %v8026_v13, %v8025_v14  ;;  %v8039_v49 = vld [vmem:[%s12083_s8 + $0xd9] ss:$2 sm:$0xff]  ;;  %v12381_v60 = vld [vmem:[%s13369_s9 + $0x10] sm:$0xf] (%p3745_p3) }
 0x4d7   : > { %v8027_v21 = vld [vmem:[%s12083_s8 + $0xa1] ss:$2 sm:$0xff]  ;;  %13625 = vst [vmem:[#allocation22_spill] sm:$0xff] (%p3745_p3), %v12381_v60 }
 0x4d8   : > { %v8057_v17 = vld [vmem:[%s12083_s8 + $0x7b] ss:$2 sm:$0xff]  ;;  %v4295_v39 = vpack.c.bf16 %v8027_v21, %v8027_v21  ;;  %v8060_v24 = vld [vmem:[%s12083_s8 + $0xab] ss:$2 sm:$0xff] }
 0x4d9   : > { %9302 = vmatmul.mubr.msk.bf16.gmra.mxu0 %vm56_vm0, %v3971_v53  ;;  %v8058_v53 = vld [vmem:[%s12083_s8 + $0x8b] ss:$2 sm:$0xff]  ;;  %v8059_v55 = vld [vmem:[%s12083_s8 + $0x9b] ss:$2 sm:$0xff] }
 0x4da   : > { %9292 = vmatmul.mubr.msk.bf16.gmra.mxu1 %vm56_vm0, %v3769_v48  ;;  %9317 = vmatprep.mubr.msk.bf16.mxu0 %vm56_vm0, %v4184_v22  ;;  %v8045_v48 = vld [vmem:[%s12083_s8 + $0x7a] ss:$2 sm:$0xff]  ;;  %v8046_v22 = vld [vmem:[%s12083_s8 + $0x8a] ss:$2 sm:$0xff]  ;;  %v4616_v46 = vpack.c.bf16 %v8058_v53, %v8057_v17  ;;  %v8061_v59 = vld [vmem:[%s12083_s8 + $0xbb] ss:$2 sm:$0xff] }
 0x4db   : > { %9307 = vmatprep.mubr.msk.bf16.mxu1 %vm56_vm0, %v4076_v50  ;;  %v4403_v50 = vpack.c.bf16 %v8039_v49, %v8039_v49  ;;  %v4508_v58 = vpack.c.bf16 %v8046_v22, %v8045_v48  ;;  %v8062_v10 = vld [vmem:[%s12083_s8 + $0xcb] ss:$2 sm:$0xff]  ;;  %v8063_v20 = vld [vmem:[%s12083_s8 + $0xdb] ss:$2 sm:$0xff] }
 0x4dc   : > { %v4619_v8 = vpack.c.bf16 %v8063_v20, %v8063_v20  ;;  %v13611_v3 = vld [vmem:[#allocation14_spill] sm:$0xff] }
 0x4e1   : > { %9318 = vmatmul.mubr.msk.bf16.vlgmr.msra.gmra.mxu0 %vm56_vm0, %v4185_v5  ;;  %v8048_v5 = vld [vmem:[%s12083_s8 + $0xaa] ss:$2 sm:$0xff] }
 0x4e2   : > { %9308 = vmatmul.mubr.msk.bf16.vlgmr.msra.gmra.mxu1 %vm56_vm0, %v4077_v9  ;;  %9336 = vmatpush3.bf16.msra.mxu0 %v8040_v37  ;;  %v8038_v37 = vld [vmem:[%s12083_s8 + $0xc9] ss:$2 sm:$0xff]  ;;  %v8049_v9 = vld [vmem:[%s12083_s8 + $0xba] ss:$2 sm:$0xff] }
 0x4e3   : > { %9326 = vmatpush3.bf16.msra.mxu1 %v8028_v61  ;;  %9311 = vmatprep.mubr.msk.bf16.mxu1 %vm56_vm0, %v4078_v6  ;;  %v8037_v61 = vld [vmem:[%s12083_s8 + $0xb9] ss:$2 sm:$0xff]  ;;  %v8050_v6 = vld [vmem:[%s12083_s8 + $0xca] ss:$2 sm:$0xff] }
 0x4e4   : > { %9321 = vmatprep.mubr.msk.bf16.mxu0 %vm56_vm0, %v4186_v18  ;;  %9345 = vmatprep.subr.bf16.mxu1 %v8052_v15  ;;  %v4402_v1 = vpack.c.bf16 %v8038_v37, %v8037_v61  ;;  %v4617_v18 = vpack.c.bf16 %v8060_v24, %v8059_v55  ;;  %v4510_v47 = vpack.c.bf16 %v8050_v6, %v8049_v9  ;;  %v12219_v24 = vstv %s4709_s28  ;;  %v13610_v9 = vld [vmem:[#allocation16_spill] sm:$0xff] }
 0x4e5   : > { %9355 = vmatprep.subr.bf16.mxu0 %v8064_v36  ;;  %v12225_v6 = vadd.f32 %v12219_v24, %v13610_v9  ;;  %v12247_v7 = vadd.f32 %v12219_v24, %v13612_v2  ;;  %v12251_v25 = vadd.f32 %v12219_v24, %v13613_v19 }
 0x4e7   : > { %v4720_v20 = vadd.f32 0.5, %v12225_v6  ;;  %v4719_v2 = vadd.f32 0.5, %v12251_v25 }
 0x4e9   : > { %9322 = vmatmul.mubr.msk.bf16.gmra.mxu0 %vm56_vm0, %v4187_v16  ;;  %v4727_v9 = vmul.f32 0.01724138, %v4720_v20  ;;  %v4721_v20 = vadd.f32 0.5, %v12247_v7 }
 0x4ea   : > { %9312 = vmatmul.mubr.msk.bf16.gmra.mxu1 %vm56_vm0, %v4079_v54  ;;  %9337 = vmatprep.mubr.msk.bf16.mxu0 %vm56_vm0, %v4400_v4 }
 0x4eb   : > { %9327 = vmatprep.mubr.msk.bf16.mxu1 %vm56_vm0, %v4292_v44  ;;  %v4734_v29 = vfloor.f32 %v4727_v9  ;;  %v4728_v42 = vmul.f32 0.01724138, %v4721_v20 }
 0x4f1   : > { %9338 = vmatmul.mubr.msk.bf16.vlgmr.msra.gmra.mxu0 %vm56_vm0, %v4401_v51 }
 0x4f2   : > { %9328 = vmatmul.mubr.msk.bf16.vlgmr.msra.gmra.mxu1 %vm56_vm0, %v4293_v23  ;;  %9356 = vmatpush3.bf16.msra.mxu0 %v8064_v36  ;;  %v4618_v36 = vpack.c.bf16 %v8062_v10, %v8061_v59 }
 0x4f3   : > { %9346 = vmatpush3.bf16.msra.mxu1 %v8052_v15  ;;  %9331 = vmatprep.mubr.msk.bf16.mxu1 %vm56_vm0, %v4294_v57  ;;  %v4509_v15 = vpack.c.bf16 %v8048_v5, %v8047_v43 }
 0x4f4   : > { %9341 = vmatprep.mubr.msk.bf16.mxu0 %vm56_vm0, %v4402_v1 }
 0x4f9   : > { %9342 = vmatmul.mubr.msk.bf16.gmra.mxu0 %vm56_vm0, %v4403_v50 }
 0x4fa   : > { %9332 = vmatmul.mubr.msk.bf16.gmra.mxu1 %vm56_vm0, %v4295_v39  ;;  %9357 = vmatprep.mubr.msk.bf16.mxu0 %vm56_vm0, %v4616_v46 }
 0x4fb   : > { %9347 = vmatprep.mubr.msk.bf16.mxu1 %vm56_vm0, %v4508_v58 }
 0x501   : > { %9358 = vmatmul.mubr.msk.bf16.vlgmr.msra.gmra.mxu0 %vm56_vm0, %v4617_v18 }
 0x502   : > { %9348 = vmatmul.mubr.msk.bf16.vlgmr.msra.gmra.mxu1 %vm56_vm0, %v4509_v15  ;;  %9361 = vmatprep.mubr.msk.bf16.mxu0 %vm56_vm0, %v4618_v36 }
 0x503   : > { %9351 = vmatprep.mubr.msk.bf16.mxu1 %vm56_vm0, %v4510_v47 }
 0x509   : > { %9362 = vmatmul.mubr.msk.bf16.gmra.mxu0 %vm56_vm0, %v4619_v8  ;;  %v12238_v8 = vadd.f32 %v12219_v24, %v13611_v3 }
 0x50a   : > { %9352 = vmatmul.mubr.msk.bf16.gmra.mxu1 %vm56_vm0, %v4511_v41 }
 0x50b   : > { %v4718_v0 = vadd.f32 0.5, %v12238_v8 }
 0x50d   : > { %v4725_v30 = vmul.f32 0.01724138, %v4718_v0  ;;  %v4741_v0 = vmul.f32 58.0, %v4734_v29 }
 0x50f   : > { %v4732_v9 = vfloor.f32 %v4725_v30 }
 0x589   : > { %v9279_v62 = vpop.f32.mrf.mxu0 }
 0x58a   : > { %v12196_v16 = vpop.f32.mrf.mxu1 }
 0x58b   : > { %v3841_v54 = vpop.f32.mrf.mxu0 }
 0x58c   : > { %v12198_v4 = vpop.f32.mrf.mxu1 }
 0x58d   : > { %v9280_v44 = vpop.f32.mrf.mxu0 }
 0x58e   : > { %v9284_v56 = vpop.f32.mrf.mxu1 }
 0x58f   : > { %v3844_v45 = vpop.f32.mrf.mxu0 }
 0x590   : > { %v12200_v63 = vpop.f32.mrf.mxu1 }
 0x591   : > { %v9299_v35 = vpop.f32.mrf.mxu0 }
 0x592   : > { %v9289_v14 = vpop.f32.mrf.mxu1 }
 0x593   : > { %v4024_v13 = vpop.f32.mrf.mxu0  ;;  %v3932_v11 = vadd.f32 %v9289_v14, %v9279_v62 }
 0x594   : > { %v3923_v51 = vpop.f32.mrf.mxu1 }
 0x595   : > { %v9300_v61 = vpop.f32.mrf.mxu0  ;;  %v4056_v31 = vadd.f32 %v9299_v35, %v3932_v11  ;;  %v13614_v11 = vld [vmem:[#allocation18_spill] sm:$0xff] }
 0x596   : > { %v9290_v37 = vpop.f32.mrf.mxu1 }
 0x597   : > { %v12202_v23 = vpop.f32.mrf.mxu0  ;;  %v3935_v32 = vadd.f32 %v9290_v37, %v9280_v44  ;;  %v12267_v44 = vadd.f32 %v12219_v24, %v13614_v11 }
 0x598   : > { %v3926_v57 = vpop.f32.mrf.mxu1 }
 0x599   : > { %v12204_v1 = vpop.f32.mrf.mxu0  ;;  %v3927_v34 = vadd.f32 %v3926_v57, %v3844_v45  ;;  %v4057_v35 = vadd.f32 %v9300_v61, %v3935_v32  ;;  %v4726_v45 = vmul.f32 0.01724138, %v4719_v2  ;;  %v4748_v32 = vsub.f32 %v12225_v6, %v4741_v0 }
 0x59a   : > { %v9293_v49 = vpop.f32.mrf.mxu1  ;;  %v4739_v61 = vmul.f32 58.0, %v4732_v9  ;;  %v4722_v2 = vadd.f32 0.5, %v12267_v44  ;;  %v12286_v6 = vadd.f32 %v12219_v24, %v10106_v26 }
 0x59b   : > { %v12206_v21 = vpop.f32.mrf.mxu0  ;;  %vm12293_vm8 = vcmp.lt.f32.partialorder %v4748_v32, 28.0 }
 0x59c   : > { %v3939_v17 = vpop.f32.mrf.mxu1 }
 0x59d   : > { %v9304_v53 = vpop.f32.mrf.mxu0 }
 0x59e   : > { %v9294_v48 = vpop.f32.mrf.mxu1 }
 0x59f   : > { %v12209_v22 = vpop.f32.mrf.mxu0 }
 0x5a0   : > { %v12211_v50 = vpop.f32.mrf.mxu1 }
 0x5a1   : > { %v9319_v39 = vpop.f32.mrf.mxu0 }
 0x5a2   : > { %v9309_v46 = vpop.f32.mrf.mxu1 }
 0x5a3   : > { %v12215_v58 = vpop.f32.mrf.mxu0  ;;  %v4164_v19 = vadd.f32 %v9309_v46, %v4056_v31  ;;  %v3948_v31 = vadd.f32 %v9293_v49, %v12196_v16  ;;  %v4055_v46 = vadd.f32 %v12202_v23, %v3927_v34 }
 0x5a4   : > { %v4132_v43 = vpop.f32.mrf.mxu1 }
 0x5a5   : > { %v12217_v55 = vpop.f32.mrf.mxu0  ;;  %v4060_v34 = vadd.f32 %v12204_v1, %v3948_v31 }
 0x5a6   : > { %v9310_v5 = vpop.f32.mrf.mxu1 }
 0x5a7   : > { %v12221_v59 = vpop.f32.mrf.mxu0  ;;  %v4165_v29 = vadd.f32 %v9310_v5, %v4057_v35 }
 0x5a8   : > { %v4135_v10 = vpop.f32.mrf.mxu1 }
 0x5a9   : > { %v12227_v18 = vpop.f32.mrf.mxu0  ;;  %v4163_v49 = vadd.f32 %v4135_v10, %v4055_v46 }
 0x5aa   : > { %v12229_v15 = vpop.f32.mrf.mxu1 }
 0x5ab   : > { %v12231_v36 = vpop.f32.mrf.mxu0 }
 0x5ac   : > { %v12233_v47 = vpop.f32.mrf.mxu1 }
 0x5ad   : > { %v9324_v41 = vpop.f32.mrf.mxu0 }
 0x5ae   : > { %v9314_v56 = vpop.f32.mrf.mxu1  ;;  %v3924_v41 = vadd.f32 %v3923_v51, %v3841_v54  ;;  %v12263_v54 = vadd.f32 %v12219_v24, %v10108_v27 }
 0x5af   : > { %v12240_v53 = vpop.f32.mrf.mxu0 }
 0x5b0   : > { %v12242_v48 = vpop.f32.mrf.mxu1  ;;  %v4054_v14 = vadd.f32 %v4024_v13, %v3924_v41  ;;  %v3940_v13 = vadd.f32 %v3939_v17, %v12198_v4  ;;  %v4272_v41 = vadd.f32 %v9319_v39, %v4164_v19  ;;  %v4724_v20 = vadd.f32 0.5, %v12263_v54 }
 0x5b1   : > { %v9339_v12 = vpop.f32.mrf.mxu0  ;;  %v3943_v39 = vadd.f32 %v12211_v50, %v12200_v63  ;;  %v4729_v63 = vmul.f32 0.01724138, %v4722_v2  ;;  %v4271_v50 = vadd.f32 %v12221_v59, %v4163_v49 }
 0x5b2   : > { %v9329_v3 = vpop.f32.mrf.mxu1  ;;  %v4162_v37 = vadd.f32 %v4132_v43, %v4054_v14  ;;  %v4735_v43 = vfloor.f32 %v4728_v42  ;;  %v4733_v14 = vfloor.f32 %v4726_v45  ;;  %v4058_v23 = vadd.f32 %v12206_v21, %v3940_v13 }
 0x5b3   : > { %v12253_v56 = vpop.f32.mrf.mxu0  ;;  %v4380_v4 = vadd.f32 %v9329_v3, %v4272_v41  ;;  %v4273_v42 = vadd.f32 %v12217_v55, %v4165_v29  ;;  %v4731_v10 = vmul.f32 0.01724138, %v4724_v20  ;;  %v4168_v3 = vadd.f32 %v12229_v15, %v4060_v34 }
 0x5b4   : > { %v4348_v28 = vpop.f32.mrf.mxu1  ;;  %v4270_v16 = vadd.f32 %v12215_v58, %v4162_v37  ;;  %v4166_v1 = vadd.f32 %v12233_v47, %v4058_v23  ;;  %v4059_v55 = vadd.f32 %v12209_v22, %v3943_v39  ;;  %v4742_v45 = vmul.f32 58.0, %v4735_v43 }
 0x5b5   : > { %v12256_v33 = vpop.f32.mrf.mxu0  ;;  %v4488_v24 = vadd.f32 %v9339_v12, %v4380_v4  ;;  %v4740_v15 = vmul.f32 58.0, %v4733_v14  ;;  %v4723_v47 = vadd.f32 0.5, %v12286_v6  ;;  %v4738_v29 = vfloor.f32 %v4731_v10 }
 0x5b6   : > { %v9330_v62 = vpop.f32.mrf.mxu1  ;;  %v4378_v19 = vadd.f32 %v4348_v28, %v4270_v16  ;;  %v4746_v28 = vsub.f32 %v12238_v8, %v4739_v61  ;;  %v4276_v59 = vadd.f32 %v12227_v18, %v4168_v3  ;;  %v4274_v12 = vadd.f32 %v12231_v36, %v4166_v1 }
 0x5b7   : > { %v12259_v40 = vpop.f32.mrf.mxu0  ;;  %v4381_v9 = vadd.f32 %v9330_v62, %v4273_v42  ;;  %v4167_v62 = vadd.f32 %v12242_v48, %v4059_v55  ;;  %v4736_v20 = vfloor.f32 %v4729_v63  ;;  %v4749_v18 = vsub.f32 %v12247_v7, %v4742_v45 }
 0x5b8   : > { %v4351_v51 = vpop.f32.mrf.mxu1  ;;  %v4486_v31 = vadd.f32 %v12253_v56, %v4378_v19  ;;  %vm12306_vm9 = vcmp.lt.f32.partialorder %v4746_v28, 28.0  ;;  %v4730_v49 = vmul.f32 0.01724138, %v4723_v47  ;;  %v4747_v23 = vsub.f32 %v12251_v25, %v4740_v15 }
 0x5b9   : > { %v12269_v52 = vpop.f32.mrf.mxu0  ;;  %v4379_v13 = vadd.f32 %v4351_v51, %v4271_v50  ;;  %v4489_v22 = vadd.f32 %v12256_v33, %v4381_v9  ;;  %v4275_v14 = vadd.f32 %v12240_v53, %v4167_v62  ;;  %v4745_v39 = vmul.f32 58.0, %v4738_v29 }
 0x5ba   : > { %v9333_v57 = vpop.f32.mrf.mxu1  ;;  %v4737_v63 = vfloor.f32 %v4730_v49  ;;  %vm12327_vm10 = vcmp.lt.f32.partialorder %v4749_v18, 28.0  ;;  %vm4754_vm11 = vcmp.lt.f32.partialorder %v4747_v23, 28.0  ;;  %v12366_v18 = vld [vmem:[%s13369_s9 + $0x4] sm:$0xf] (%p3745_p3)  ;;  %v12371_v49 = vld [vmem:[%s13369_s9 + $0x8] sm:$0xf] (%p3745_p3) }
 0x5bb   : > { %v12274_v30 = vpop.f32.mrf.mxu0  ;;  %v4384_v51 = vadd.f32 %v9333_v57, %v4276_v59  ;;  %v4487_v36 = vadd.f32 %v12259_v40, %v4379_v13  ;;  %13622 = vst [vmem:[#allocation19_spill] sm:$0xff] (%p3745_p3), %v12366_v18  ;;  %13623 = vst [vmem:[#allocation20_spill] sm:$0xff] (%p3745_p3), %v12371_v49  ;;  %v12421_v23 = vld [vmem:[%s13369_s9 + $0x30] sm:$0xf] (%p3745_p3) }
 0x5bc   : > { %v4364_v11 = vpop.f32.mrf.mxu1  ;;  %v4744_v13 = vmul.f32 58.0, %v4737_v63  ;;  %13633 = vst [vmem:[#allocation30_spill] sm:$0xff] (%p3745_p3), %v12421_v23  ;;  %v12481_v63 = vld [vmem:[%s13369_s9 + $0x60] sm:$0xf] (%p3745_p3) }
 0x5bd   : > { %v9344_v17 = vpop.f32.mrf.mxu0  ;;  %v4382_v2 = vadd.f32 %v4364_v11, %v4274_v12  ;;  %v4492_v40 = vadd.f32 %v12269_v52, %v4384_v51  ;;  %13645 = vst [vmem:[#allocation67_spill] sm:$0xff] (%p3745_p3), %v12481_v63  ;;  %v12511_v52 = vld [vmem:[%s13369_s9 + $0x78] sm:$0xf] (%p3745_p3) }
 0x5be   : > { %v9334_v5 = vpop.f32.mrf.mxu1  ;;  %13651 = vst [vmem:[#allocation73_spill] sm:$0xff] (%p3745_p3), %v12511_v52 }
 0x5bf   : > { %v12289_v58 = vpop.f32.mrf.mxu0  ;;  %v4743_v5 = vmul.f32 58.0, %v4736_v20  ;;  %v4490_v10 = vadd.f32 %v12274_v30, %v4382_v2 }
 0x5c0   : > { %v4367_v0 = vpop.f32.mrf.mxu1 }
 0x5c1   : > { %v9359_v35 = vpop.f32.mrf.mxu0  ;;  %v4383_v3 = vadd.f32 %v4367_v0, %v4275_v14  ;;  %v4752_v0 = vsub.f32 %v12263_v54, %v4745_v39  ;;  %v4750_v47 = vsub.f32 %v12267_v44, %v4743_v5  ;;  %v12411_v14 = vld [vmem:[%s13369_s9 + $0x28] sm:$0xf] (%p3745_p3)  ;;  %v12426_v39 = vld [vmem:[%s13369_s9 + $0x34] sm:$0xf] (%p3745_p3)  ;;  %v12431_v5 = vld [vmem:[%s13369_s9 + $0x38] sm:$0xf] (%p3745_p3) }
 0x5c2   : > { %v9349_v37 = vpop.f32.mrf.mxu1  ;;  %13631 = vst [vmem:[#allocation28_spill] sm:$0xff] (%p3745_p3), %v12411_v14  ;;  %13634 = vst [vmem:[#allocation31_spill] sm:$0xff] (%p3745_p3), %v12426_v39 }
 0x5c3   : > { %v4596_v46 = vadd.f32 %v9349_v37, %v4488_v24  ;;  %v4672_v41 = vpop.f32.mrf.mxu0  ;;  %v4491_v54 = vadd.f32 %v12289_v58, %v4383_v3  ;;  %vm4759_vm12 = vcmp.lt.f32.partialorder %v4752_v0, 28.0  ;;  %vm4757_vm13 = vcmp.lt.f32.partialorder %v4750_v47, 28.0  ;;  %13635 = vst [vmem:[#allocation32_spill] sm:$0xff] (%p3745_p3), %v12431_v5  ;;  %v12471_v3 = vld [vmem:[%s13369_s9 + $0x58] sm:$0xf] (%p3745_p3) }
 0x5c4   : > { %v4564_v8 = vpop.f32.mrf.mxu1  ;;  %13643 = vst [vmem:[#allocation65_spill] sm:$0xff] (%p3745_p3), %v12471_v3  ;;  %v12521_v0 = vld [vmem:[%s13369_s9 + $0x80] sm:$0xf] (%p3745_p3) }
 0x5c5   : > { %v4704_v32 = vadd.f32 %v9359_v35, %v4596_v46  ;;  %v4594_v61 = vadd.f32 %v4564_v8, %v4486_v31  ;;  %v9360_v56 = vpop.f32.mrf.mxu0  ;;  %13653 = vst [vmem:[#allocation75_spill] sm:$0xff] (%p3745_p3), %v12521_v0 }
 0x5c6   : > { %v9350_v16 = vpop.f32.mrf.mxu1 }
 0x5c7   : > { %v4768_v48 = vadd.f32 %v12069_v38, %v4704_v32  ;;  %v4702_v4 = vadd.f32 %v4672_v41, %v4594_v61  ;;  %v4597_v17 = vadd.f32 %v9350_v16, %v4489_v22  ;;  %v4675_v33 = vpop.f32.mrf.mxu0  ;;  %v4751_v22 = vsub.f32 %v12286_v6, %v4744_v13  ;;  %v12361_v6 = vld [vmem:[%s13369_s9] sm:$0xf] (%p3745_p3) }
 0x5c8   : > { %v4567_v34 = vpop.f32.mrf.mxu1  ;;  %13621 = vst [vmem:[#allocation36_spill] sm:$0xff] (%p3745_p3), %v12361_v6 }
 0x5c9   : > { %v4775_v57 = vmax.f32 %v4768_v48, 0.0  ;;  %v4766_v11 = vadd.f32 %v12069_v38, %v4702_v4  ;;  %v4705_v7 = vadd.f32 %v9360_v56, %v4597_v17  ;;  %v4595_v42 = vadd.f32 %v4567_v34, %v4487_v36  ;;  %v9363_v19 = vpop.f32.mrf.mxu0  ;;  %v12376_v36 = vld [vmem:[%s13369_s9 + $0xc] sm:$0xf] (%p3745_p3)  ;;  %v12391_v48 = vld [vmem:[%s13369_s9 + $0x18] sm:$0xf] (%p3745_p3) }
 0x5ca   : > { %v9353_v1 = vpop.f32.mrf.mxu1  ;;  %vm4758_vm14 = vcmp.lt.f32.partialorder %v4751_v22, 28.0  ;;  %13624 = vst [vmem:[#allocation21_spill] sm:$0xff] (%p3745_p3), %v12376_v36  ;;  %13627 = vst [vmem:[#allocation24_spill] sm:$0xff] (%p3745_p3), %v12391_v48  ;;  %v12396_v4 = vld [vmem:[%s13369_s9 + $0x1c] sm:$0xf] (%p3745_p3) }
 0x5cb   : > { %v4796_v53 = vsel %vm12293_vm8, %v4775_v57, 0.0  ;;  %v4773_v25 = vmax.f32 %v4766_v11, 0.0  ;;  %v4769_v50 = vadd.f32 %v12069_v38, %v4705_v7  ;;  %v4703_v24 = vadd.f32 %v4675_v33, %v4595_v42  ;;  %v4688_v9 = vpop.f32.mrf.mxu0  ;;  %13628 = vst [vmem:[#allocation25_spill] sm:$0xff] (%p3745_p3), %v12396_v4  ;;  %v12401_v17 = vld [vmem:[%s13369_s9 + $0x20] sm:$0xf] (%p3745_p3) }
 0x5cc   : > { %8072 = vst.msk [vmem:[%s12323_s29 + $0x50] sm:$0xff] %vm105_vm1, %v4796_v53  ;;  %v4600_v30 = vadd.f32 %v9353_v1, %v4492_v40  ;;  %v4580_v21 = vpop.f32.mrf.mxu1  ;;  %13629 = vst [vmem:[#allocation26_spill] sm:$0xff] (%p3745_p3), %v12401_v17  ;;  %v12406_v33 = vld [vmem:[%s13369_s9 + $0x24] sm:$0xf] (%p3745_p3)  ;;  %v12416_v34 = vld [vmem:[%s13369_s9 + $0x2c] sm:$0xf] (%p3745_p3) }
 0x5cd   : > { %v4794_v35 = vsel %vm12306_vm9, %v4773_v25, 0.0  ;;  %v4776_v28 = vmax.f32 %v4769_v50, 0.0  ;;  %v4767_v55 = vadd.f32 %v12069_v38, %v4703_v24  ;;  %v4598_v37 = vadd.f32 %v4580_v21, %v4490_v10  ;;  %v9364_v45 = vpop.f32.mrf.mxu0  ;;  %13630 = vst [vmem:[#allocation27_spill] sm:$0xff] (%p3745_p3), %v12406_v33  ;;  %13632 = vst [vmem:[#allocation29_spill] sm:$0xff] (%p3745_p3), %v12416_v34  ;;  %v12436_v57 = vld [vmem:[%s13369_s9 + $0x3c] sm:$0xf] (%p3745_p3) }
 0x5ce   : > { %8070 = vst.msk [vmem:[%s12323_s29 + $0x40] sm:$0xff] %vm105_vm1, %v4794_v35  ;;  %v4708_v15 = vadd.f32 %v9363_v19, %v4600_v30  ;;  %v9354_v31 = vpop.f32.mrf.mxu1  ;;  %13636 = vst [vmem:[#allocation33_spill] sm:$0xff] (%p3745_p3), %v12436_v57  ;;  %v12441_v11 = vld [vmem:[%s13369_s9 + $0x40] sm:$0xf] (%p3745_p3)  ;;  %v12446_v7 = vld [vmem:[%s13369_s9 + $0x44] sm:$0xf] (%p3745_p3) }
 0x5cf   : > { %v4797_v46 = vsel %vm12327_vm10, %v4776_v28, 0.0  ;;  %v4774_v41 = vmax.f32 %v4767_v55, 0.0  ;;  %v4706_v29 = vadd.f32 %v4688_v9, %v4598_v37  ;;  %v4691_v20 = vpop.f32.mrf.mxu0  ;;  %13637 = vst [vmem:[#allocation34_spill] sm:$0xff] (%p3745_p3), %v12441_v11  ;;  %13638 = vst [vmem:[#allocation35_spill] sm:$0xff] (%p3745_p3), %v12446_v7  ;;  %v12451_v42 = vld [vmem:[%s13369_s9 + $0x48] sm:$0xf] (%p3745_p3) }
 0x5d0   : > { %8073 = vst.msk [vmem:[%s12323_s29 + $0x58] sm:$0xff] %vm105_vm1, %v4797_v46  ;;  %v4772_v59 = vadd.f32 %v12069_v38, %v4708_v15  ;;  %v4583_v12 = vpop.f32.mrf.mxu1  ;;  %13639 = vst [vmem:[#allocation61_spill] sm:$0xff] (%p3745_p3), %v12451_v42  ;;  %v12456_v19 = vld [vmem:[%s13369_s9 + $0x4c] sm:$0xf] (%p3745_p3)  ;;  %v12461_v40 = vld [vmem:[%s13369_s9 + $0x50] sm:$0xf] (%p3745_p3) }
 0x5d1   : > { %v4795_v62 = vsel %vm4754_vm11, %v4774_v41, 0.0  ;;  %v4770_v44 = vadd.f32 %v12069_v38, %v4706_v29  ;;  %v4599_v8 = vadd.f32 %v4583_v12, %v4491_v54  ;;  %13640 = vst [vmem:[#allocation62_spill] sm:$0xff] (%p3745_p3), %v12456_v19  ;;  %13641 = vst [vmem:[#allocation63_spill] sm:$0xff] (%p3745_p3), %v12461_v40  ;;  %v12466_v10 = vld [vmem:[%s13369_s9 + $0x54] sm:$0xf] (%p3745_p3) }
 0x5d2   : > { %8071 = vst.msk [vmem:[%s12323_s29 + $0x48] sm:$0xff] %vm105_vm1, %v4795_v62  ;;  %v4779_v58 = vmax.f32 %v4772_v59, 0.0  ;;  %13642 = vst [vmem:[#allocation64_spill] sm:$0xff] (%p3745_p3), %v12466_v10  ;;  %v12476_v1 = vld [vmem:[%s13369_s9 + $0x5c] sm:$0xf] (%p3745_p3) }
 0x5d3   : > { %v4777_v32 = vmax.f32 %v4770_v44, 0.0  ;;  %v4707_v61 = vadd.f32 %v4691_v20, %v4599_v8  ;;  %13644 = vst [vmem:[#allocation66_spill] sm:$0xff] (%p3745_p3), %v12476_v1  ;;  %v12486_v53 = vld [vmem:[%s13369_s9 + $0x64] sm:$0xf] (%p3745_p3)  ;;  %v12491_v25 = vld [vmem:[%s13369_s9 + $0x68] sm:$0xf] (%p3745_p3) }
 0x5d4   : > { %v4800_v43 = vsel %vm4759_vm12, %v4779_v58, 0.0  ;;  %13646 = vst [vmem:[#allocation68_spill] sm:$0xff] (%p3745_p3), %v12486_v53  ;;  %13647 = vst [vmem:[#allocation69_spill] sm:$0xff] (%p3745_p3), %v12491_v25  ;;  %v12496_v50 = vld [vmem:[%s13369_s9 + $0x6c] sm:$0xf] (%p3745_p3) }
 0x5d5   : > { %8076 = vst.msk [vmem:[%s12323_s29 + $0x70] sm:$0xff] %vm105_vm1, %v4800_v43  ;;  %v4798_v56 = vsel %vm4757_vm13, %v4777_v32, 0.0  ;;  %v4771_v51 = vadd.f32 %v12069_v38, %v4707_v61  ;;  %v12386_v38 = vld [vmem:[%s13369_s9 + $0x14] sm:$0xf] (%p3745_p3)  ;;  %13648 = vst [vmem:[#allocation70_spill] sm:$0xff] (%p3745_p3), %v12496_v50 }
 0x5d6   : > { %8074 = vst.msk [vmem:[%s12323_s29 + $0x60] sm:$0xff] %vm105_vm1, %v4798_v56  ;;  %3747 = sbr.rel (!%p3745_p3) target bundleno = 1214 (0x4be), region = 318  ;;  %13626 = vst [vmem:[#allocation23_spill] sm:$0xff] (%p3745_p3), %v12386_v38  ;;  %v12501_v24 = vld [vmem:[%s13369_s9 + $0x70] sm:$0xf] (%p3745_p3) }
 0x5d7   : > { %v4778_v2 = vmax.f32 %v4771_v51, 0.0  ;;  %13649 = vst [vmem:[#allocation71_spill] sm:$0xff] (%p3745_p3), %v12501_v24  ;;  %v12506_v9 = vld [vmem:[%s13369_s9 + $0x74] sm:$0xf] (%p3745_p3)  ;;  %v12516_v30 = vld [vmem:[%s13369_s9 + $0x7c] sm:$0xf] (%p3745_p3) }
 0x5d8   :  { %13650 = vst [vmem:[#allocation72_spill] sm:$0xff] (%p3745_p3), %v12506_v9  ;;  %13652 = vst [vmem:[#allocation74_spill] sm:$0xff] (%p3745_p3), %v12516_v30  ;;  %v12526_v21 = vld [vmem:[%s13369_s9 + $0x84] sm:$0xf] (%p3745_p3)  ;;  %v12531_v35 = vld [vmem:[%s13369_s9 + $0x88] sm:$0xf] (%p3745_p3) }
 0x5d9   : > { %v4799_v16 = vsel %vm4758_vm14, %v4778_v2, 0.0  ;;  %13654 = vst [vmem:[#allocation76_spill] sm:$0xff] (%p3745_p3), %v12526_v21  ;;  %13655 = vst [vmem:[#allocation77_spill] sm:$0xff] (%p3745_p3), %v12531_v35  ;;  %v12536_v28 = vld [vmem:[%s13369_s9 + $0x8c] sm:$0xf] (%p3745_p3) }
 0x5da   : > { %8075 = vst.msk [vmem:[%s12323_s29 + $0x68] sm:$0xff] %vm105_vm1, %v4799_v16  ;;  %13656 = vst [vmem:[#allocation78_spill] sm:$0xff] (%p3745_p3), %v12536_v28  ;;  %v12541_v55 = vld [vmem:[%s13370_s10] ss:$0 sm:$0xff] (%p3745_p3) }
 0x5db LB: > { %v13657_v4 = vld [vmem:[#allocation25_spill] sm:$0xff]  ;;  %v13658_v48 = vld [vmem:[#allocation24_spill] sm:$0xff]  ;;  %v13660_v60 = vld [vmem:[#allocation22_spill] sm:$0xff]  ;;  %s12553_s9 = smul.u32 56, %s9798_s21  ;;  %s4860_s21 = sadd.s32 1, %s9798_s21   ;;  %s9798_s21 = sphi %s12543_s21, %s4860_s21  }
 0x5dc   : > { %v8124_v37 = vcombine.low %v13658_v48, %v13657_v4  ;;  %v13661_v36 = vld [vmem:[#allocation21_spill] sm:$0xff]  ;;  %v13662_v49 = vld [vmem:[#allocation20_spill] sm:$0xff]  ;;  %v13665_v18 = vld [vmem:[#allocation19_spill] sm:$0xff]  ;;  %p4857_p4 = scmp.ge.s32.totalorder %s4860_s21, 29  }
 0x5dd   : > { %v13659_v38 = vld [vmem:[#allocation23_spill] sm:$0xff]  ;;  %v8130_v15 = vcombine.low %v13662_v49, %v13661_v36  ;;  %s12558_s10 = scalar_lea.vmem [#allocation5], %s12553_s9  ;;  %v13663_v34 = vld [vmem:[#allocation29_spill] sm:$0xff]  ;;  %v13664_v14 = vld [vmem:[#allocation28_spill] sm:$0xff]  ;;  %s5820_s2 = scvt.s32.f32 %s12553_s9 }
 0x5de   : > { %v8123_v45 = vcombine.low %v13660_v60, %v13659_v38  ;;  %9365 = vmatprep.subr.bf16.mxu0 %v8124_v37  ;;  %9599 = vmatprep.subr.bf16.mxu1 %v8124_v37  ;;  %v8143_v54 = vcombine.low %v13664_v14, %v13663_v34  ;;  %v13666_v6 = vld [vmem:[#allocation36_spill] sm:$0xff]  ;;  %v13667_v33 = vld [vmem:[#allocation27_spill] sm:$0xff]  ;;  %v13668_v17 = vld [vmem:[#allocation26_spill] sm:$0xff]  ;;  %s12810_s22 = scalar_lea.vmem [#allocation6], %s12553_s9  ;;  %s13032_s5 = smov (%p4857_p4), 0  }
 0x5df   : > { %9366 = vmatpush3.bf16.msra.mxu0 %v8124_v37  ;;  %9601 = vmatpush3.bf16.msra.mxu1 %v8124_v37  ;;  %v8129_v22 = vcombine.low %v13666_v6, %v13665_v18  ;;  %v8142_v32 = vcombine.low %v13668_v17, %v13667_v33  ;;  %v13669_v57 = vld [vmem:[#allocation33_spill] sm:$0xff]  ;;  %v13670_v5 = vld [vmem:[#allocation32_spill] sm:$0xff]  ;;  %v13671_v19 = vld [vmem:[#allocation62_spill] sm:$0xff] }
 0x5e0   : > { %9367 = vmatprep.subr.bf16.mxu0 %v8123_v45  ;;  %9600 = vmatprep.subr.bf16.mxu1 %v8123_v45  ;;  %v13672_v42 = vld [vmem:[#allocation61_spill] sm:$0xff]  ;;  %v13673_v39 = vld [vmem:[#allocation31_spill] sm:$0xff]  ;;  %v13674_v23 = vld [vmem:[#allocation30_spill] sm:$0xff] }
 0x5e1   : > { %v8116_v47 = vld [vmem:[%s12558_s10 + $0x6] sm:$0xff]  ;;  %v8117_v31 = vld [vmem:[%s12558_s10 + $0xe] sm:$0xff]  ;;  %v8118_v29 = vld [vmem:[%s12558_s10 + $0x16] sm:$0xff] }
 0x5e2   : > { %v8120_v13 = vld [vmem:[%s12558_s10 + $0x26] sm:$0xff]  ;;  %v4884_v46 = vpack.c.bf16 %v8117_v31, %v8116_v47  ;;  %v8121_v41 = vld [vmem:[%s12558_s10 + $0x2e] sm:$0xff]  ;;  %v8119_v59 = vld [vmem:[%s12558_s10 + $0x1e] sm:$0xff]  ;;  %v8156_v47 = vcombine.low %v13670_v5, %v13669_v57  ;;  %v8169_v31 = vcombine.low %v13672_v42, %v13671_v19 }
 0x5e3   : > { %9368 = vmatpush3.bf16.msra.mxu0 %v8123_v45  ;;  %9602 = vmatpush3.bf16.msra.mxu1 %v8123_v45  ;;  %v4886_v12 = vpack.c.bf16 %v8121_v41, %v8120_v13  ;;  %v4885_v62 = vpack.c.bf16 %v8119_v59, %v8118_v29  ;;  %v8122_v44 = vld [vmem:[%s12558_s10 + $0x36] sm:$0xff]  ;;  %v8109_v8 = vld [vmem:[%s12558_s10 + $0x5] sm:$0xff]  ;;  %v8110_v58 = vld [vmem:[%s12558_s10 + $0xd] sm:$0xff] }
 0x5e4   : > { %9369 = vmatprep.mubr.msk.bf16.mxu0 %vm105_vm1, %v4884_v46  ;;  %v4887_v20 = vpack.c.bf16 %v8122_v44, %v8122_v44  ;;  %9377 = vmatprep.subr.bf16.mxu1 %v8130_v15  ;;  %v8135_v61 = vld [vmem:[%s12558_s10 + $0x7] sm:$0xff]  ;;  %v8136_v43 = vld [vmem:[%s12558_s10 + $0xf] sm:$0xff]  ;;  %v4871_v56 = vpack.c.bf16 %v8110_v58, %v8109_v8  ;;  %v8112_v16 = vld [vmem:[%s12558_s10 + $0x1d] sm:$0xff] }
 0x5e5   : > { %9373 = vmatprep.mubr.msk.bf16.mxu1 %vm105_vm1, %v4886_v12  ;;  %9389 = vmatprep.subr.bf16.mxu0 %v8143_v54  ;;  %v5073_v51 = vpack.c.bf16 %v8136_v43, %v8135_v61  ;;  %v8111_v2 = vld [vmem:[%s12558_s10 + $0x15] sm:$0xff]  ;;  %v8138_v45 = vld [vmem:[%s12558_s10 + $0x1f] sm:$0xff]  ;;  %v8114_v46 = vld [vmem:[%s12558_s10 + $0x2d] sm:$0xff] }
 0x5e6   : > { %9370 = vmatmul.mubr.msk.bf16.vlgmr.msra.gmra.mxu0 %vm105_vm1, %v4885_v62  ;;  %9374 = vmatmul.mubr.msk.bf16.vlgmr.msra.gmra.mxu1 %vm105_vm1, %v4887_v20  ;;  %v8137_v37 = vld [vmem:[%s12558_s10 + $0x17] sm:$0xff]  ;;  %v8113_v13 = vld [vmem:[%s12558_s10 + $0x25] sm:$0xff]  ;;  %v8155_v62 = vcombine.low %v13674_v23, %v13673_v39  ;;  %v13675_v7 = vld [vmem:[#allocation35_spill] sm:$0xff] }
 0x5e7   : > { %9378 = vmatpush3.bf16.msra.mxu1 %v8130_v15  ;;  %9390 = vmatpush3.bf16.msra.mxu0 %v8143_v54  ;;  %v8139_v41 = vld [vmem:[%s12558_s10 + $0x27] sm:$0xff]  ;;  %v8140_v15 = vld [vmem:[%s12558_s10 + $0x2f] sm:$0xff]  ;;  %v4872_v54 = vpack.c.bf16 %v8112_v16, %v8111_v2  ;;  %v5074_v29 = vpack.c.bf16 %v8138_v45, %v8137_v37  ;;  %v4873_v59 = vpack.c.bf16 %v8114_v46, %v8113_v13  ;;  %v8141_v58 = vld [vmem:[%s12558_s10 + $0x37] sm:$0xff] }
 0x5e8   : > { %9379 = vmatprep.subr.bf16.mxu1 %v8129_v22  ;;  %9391 = vmatprep.subr.bf16.mxu0 %v8142_v32  ;;  %v5075_v12 = vpack.c.bf16 %v8140_v15, %v8139_v41  ;;  %v13676_v11 = vld [vmem:[#allocation34_spill] sm:$0xff]  ;;  %v8115_v8 = vld [vmem:[%s12558_s10 + $0x35] sm:$0xff]  ;;  %v13678_v3 = vld [vmem:[#allocation65_spill] sm:$0xff]  ;;  %v5076_v2 = vpack.c.bf16 %v8141_v58, %v8141_v58 }
 0x5e9   : > { %9381 = vmatprep.mubr.msk.bf16.mxu1 %vm105_vm1, %v4871_v56  ;;  %9393 = vmatprep.mubr.msk.bf16.mxu0 %vm105_vm1, %v5073_v51  ;;  %v8168_v44 = vcombine.low %v13676_v11, %v13675_v7  ;;  %v8148_v20 = vld [vmem:[%s12558_s10 + $0x3f] sm:$0xff]  ;;  %v8162_v61 = vld [vmem:[%s12558_s10 + $0x48] sm:$0xff]  ;;  %v4874_v51 = vpack.c.bf16 %v8115_v8, %v8115_v8  ;;  %v13681_v10 = vld [vmem:[#allocation64_spill] sm:$0xff] }
 0x5ea   : > { %v13677_v1 = vld [vmem:[#allocation66_spill] sm:$0xff]  ;;  %v13680_v25 = vld [vmem:[#allocation69_spill] sm:$0xff]  ;;  %v8150_v45 = vld [vmem:[%s12558_s10 + $0x4f] sm:$0xff] }
 0x5eb   : > { %9380 = vmatpush3.bf16.msra.mxu1 %v8129_v22  ;;  %9392 = vmatpush3.bf16.msra.mxu0 %v8142_v32  ;;  %v8149_v22 = vld [vmem:[%s12558_s10 + $0x47] sm:$0xff]  ;;  %v8182_v43 = vcombine.low %v13678_v3, %v13677_v1  ;;  %v8164_v13 = vld [vmem:[%s12558_s10 + $0x58] sm:$0xff]  ;;  %v8154_v58 = vld [vmem:[%s12558_s10 + $0x6f] sm:$0xff]  ;;  %v12706_v3 = vstv %s5820_s2 }
 0x5ec   : > { %9401 = vmatprep.subr.bf16.mxu1 %v8156_v47  ;;  %9413 = vmatprep.subr.bf16.mxu0 %v8169_v31  ;;  %v8161_v32 = vld [vmem:[%s12558_s10 + $0x40] sm:$0xff]  ;;  %v5181_v16 = vpack.c.bf16 %v8149_v22, %v8148_v20  ;;  %v13682_v40 = vld [vmem:[#allocation63_spill] sm:$0xff]  ;;  %v13683_v53 = vld [vmem:[#allocation68_spill] sm:$0xff] }
 0x5ed   : > { %v13679_v50 = vld [vmem:[#allocation70_spill] sm:$0xff]  ;;  %v5289_v37 = vpack.c.bf16 %v8162_v61, %v8161_v32  ;;  %v13684_v63 = vld [vmem:[#allocation67_spill] sm:$0xff]  ;;  %v8187_v61 = vld [vmem:[%s12558_s10 + $0x79] sm:$0xff] }
 0x5ee   : > { %9382 = vmatmul.mubr.msk.bf16.vlgmr.msra.gmra.mxu1 %vm105_vm1, %v4872_v54  ;;  %9394 = vmatmul.mubr.msk.bf16.vlgmr.msra.gmra.mxu0 %vm105_vm1, %v5074_v29  ;;  %v8195_v56 = vcombine.low %v13680_v25, %v13679_v50  ;;  %v8152_v46 = vld [vmem:[%s12558_s10 + $0x5f] sm:$0xff]  ;;  %v8153_v41 = vld [vmem:[%s12558_s10 + $0x67] sm:$0xff]  ;;  %v8194_v8 = vcombine.low %v13684_v63, %v13683_v53  ;;  %v8167_v20 = vld [vmem:[%s12558_s10 + $0x70] sm:$0xff] }
 0x5ef   : > { %9402 = vmatpush3.bf16.msra.mxu1 %v8156_v47  ;;  %9414 = vmatpush3.bf16.msra.mxu0 %v8169_v31  ;;  %v8151_v47 = vld [vmem:[%s12558_s10 + $0x57] sm:$0xff]  ;;  %v8165_v15 = vld [vmem:[%s12558_s10 + $0x60] sm:$0xff]  ;;  %v8166_v54 = vld [vmem:[%s12558_s10 + $0x68] sm:$0xff] }
 0x5f0   : > { %9385 = vmatprep.mubr.msk.bf16.mxu1 %vm105_vm1, %v4873_v59  ;;  %9397 = vmatprep.mubr.msk.bf16.mxu0 %vm105_vm1, %v5075_v12  ;;  %v8163_v31 = vld [vmem:[%s12558_s10 + $0x50] sm:$0xff]  ;;  %v5182_v29 = vpack.c.bf16 %v8151_v47, %v8150_v45  ;;  %v5183_v12 = vpack.c.bf16 %v8153_v41, %v8152_v46  ;;  %v8174_v22 = vld [vmem:[%s12558_s10 + $0x41] sm:$0xff] }
 0x5f1   : > { %9403 = vmatprep.subr.bf16.mxu1 %v8155_v62  ;;  %9415 = vmatprep.subr.bf16.mxu0 %v8168_v44  ;;  %v5290_v59 = vpack.c.bf16 %v8164_v13, %v8163_v31  ;;  %v8175_v32 = vld [vmem:[%s12558_s10 + $0x49] sm:$0xff]  ;;  %v13686_v52 = vld [vmem:[#allocation73_spill] sm:$0xff]  ;;  %v8176_v47 = vld [vmem:[%s12558_s10 + $0x51] sm:$0xff] }
 0x5f2   : > { %v13685_v30 = vld [vmem:[#allocation74_spill] sm:$0xff]  ;;  %v13688_v35 = vld [vmem:[#allocation77_spill] sm:$0xff]  ;;  %v8190_v46 = vld [vmem:[%s12558_s10 + $0x91] sm:$0xff] }
 0x5f3   : > { %9404 = vmatpush3.bf16.msra.mxu1 %v8155_v62  ;;  %9416 = vmatpush3.bf16.msra.mxu0 %v8168_v44  ;;  %v5291_v62 = vpack.c.bf16 %v8166_v54, %v8165_v15  ;;  %v8181_v44 = vcombine.low %v13682_v40, %v13681_v10  ;;  %v13687_v28 = vld [vmem:[#allocation78_spill] sm:$0xff]  ;;  %v8177_v31 = vld [vmem:[%s12558_s10 + $0x59] sm:$0xff]  ;;  %v13690_v24 = vld [vmem:[#allocation71_spill] sm:$0xff] }
 0x5f4   : > { %9425 = vmatprep.subr.bf16.mxu1 %v8182_v43  ;;  %9437 = vmatprep.subr.bf16.mxu0 %v8195_v56  ;;  %v8189_v13 = vld [vmem:[%s12558_s10 + $0x89] sm:$0xff]  ;;  %v8178_v41 = vld [vmem:[%s12558_s10 + $0x61] sm:$0xff]  ;;  %v8191_v54 = vld [vmem:[%s12558_s10 + $0x99] sm:$0xff] }
 0x5f5   : > { %v8179_v15 = vld [vmem:[%s12558_s10 + $0x69] sm:$0xff]  ;;  %v13689_v9 = vld [vmem:[#allocation72_spill] sm:$0xff] }
 0x5f6   : > { %9386 = vmatmul.mubr.msk.bf16.gmra.mxu1 %vm105_vm1, %v4874_v51  ;;  %9398 = vmatmul.mubr.msk.bf16.gmra.mxu0 %vm105_vm1, %v5076_v2  ;;  %v8188_v51 = vld [vmem:[%s12558_s10 + $0x81] sm:$0xff]  ;;  %v8208_v2 = vcombine.low %v13686_v52, %v13685_v30  ;;  %v13691_v21 = vld [vmem:[#allocation76_spill] sm:$0xff]  ;;  %v13692_v0 = vld [vmem:[#allocation75_spill] sm:$0xff] }
 0x5f7   : > { %9405 = vmatprep.mubr.msk.bf16.mxu1 %vm105_vm1, %v5181_v16  ;;  %9417 = vmatprep.mubr.msk.bf16.mxu0 %vm105_vm1, %v5289_v37  ;;  %v8221_v16 = vcombine.low %v13688_v35, %v13687_v28  ;;  %v5397_v37 = vpack.c.bf16 %v8175_v32, %v8174_v22  ;;  %v5505_v45 = vpack.c.bf16 %v8188_v51, %v8187_v61  ;;  %v8193_v22 = vld [vmem:[%s12558_s10 + $0xa9] sm:$0xff]  ;;  %v8200_v32 = vld [vmem:[%s12558_s10 + $0x7a] sm:$0xff] }
 0x5f8   : > { %v8201_v61 = vld [vmem:[%s12558_s10 + $0x82] sm:$0xff]  ;;  %v13696_v35 = vld [vmem:[#allocation15_spill] sm:$0xff] }
 0x5f9   : > { %v8213_v51 = vld [vmem:[%s12558_s10 + $0x7b] sm:$0xff]  ;;  %v13694_v18 = vld [vmem:[#allocation14_spill] sm:$0xff]  ;;  %v12740_v36 = vadd.f32 %v12706_v3, %v13696_v35 }
 0x5fa   : > { %v12727_v19 = vadd.f32 %v12706_v3, %v13694_v18  ;;  %v13695_v30 = vld [vmem:[#allocation17_spill] sm:$0xff] }
 0x5fb   : > { %v12736_v33 = vadd.f32 %v12706_v3, %v13695_v30  ;;  %v5830_v30 = vadd.f32 0.5, %v12740_v36 }
 0x5fc   : > { %v5829_v28 = vadd.f32 0.5, %v12727_v19 }
 0x5fd   : > { %v5837_v60 = vmul.f32 0.01724138, %v5830_v30 }
 0x5fe   : > { %9406 = vmatmul.mubr.msk.bf16.vlgmr.msra.gmra.mxu1 %vm105_vm1, %v5182_v29  ;;  %9418 = vmatmul.mubr.msk.bf16.vlgmr.msra.gmra.mxu0 %vm105_vm1, %v5290_v59  ;;  %v8192_v29 = vld [vmem:[%s12558_s10 + $0xa1] sm:$0xff]  ;;  %v5398_v59 = vpack.c.bf16 %v8177_v31, %v8176_v47  ;;  %v8203_v47 = vld [vmem:[%s12558_s10 + $0x92] sm:$0xff]  ;;  %v5836_v42 = vmul.f32 0.01724138, %v5829_v28 }
 0x5ff   : > { %9426 = vmatpush3.bf16.msra.mxu1 %v8182_v43  ;;  %9438 = vmatpush3.bf16.msra.mxu0 %v8195_v56  ;;  %v5184_v43 = vpack.c.bf16 %v8154_v58, %v8154_v58  ;;  %v5292_v56 = vpack.c.bf16 %v8167_v20, %v8167_v20  ;;  %v8220_v58 = vcombine.low %v13692_v0, %v13691_v21  ;;  %v8180_v20 = vld [vmem:[%s12558_s10 + $0x71] sm:$0xff]  ;;  %v5844_v30 = vfloor.f32 %v5837_v60 }
 0x600   : > { %9409 = vmatprep.mubr.msk.bf16.mxu1 %vm105_vm1, %v5183_v12  ;;  %9421 = vmatprep.mubr.msk.bf16.mxu0 %vm105_vm1, %v5291_v62  ;;  %v5506_v12 = vpack.c.bf16 %v8190_v46, %v8189_v13  ;;  %v5399_v62 = vpack.c.bf16 %v8179_v15, %v8178_v41  ;;  %v8215_v31 = vld [vmem:[%s12558_s10 + $0x8b] sm:$0xff]  ;;  %v8216_v13 = vld [vmem:[%s12558_s10 + $0x93] sm:$0xff]  ;;  %v8205_v41 = vld [vmem:[%s12558_s10 + $0xa2] sm:$0xff]  ;;  %v5843_v28 = vfloor.f32 %v5836_v42 }
 0x601   : > { %9427 = vmatprep.subr.bf16.mxu1 %v8181_v44  ;;  %9439 = vmatprep.subr.bf16.mxu0 %v8194_v8  ;;  %v8204_v46 = vld [vmem:[%s12558_s10 + $0x9a] sm:$0xff] }
 0x602   : > { %v8217_v15 = vld [vmem:[%s12558_s10 + $0x9b] sm:$0xff] }
 0x603   : > { %9428 = vmatpush3.bf16.msra.mxu1 %v8181_v44  ;;  %9440 = vmatpush3.bf16.msra.mxu0 %v8194_v8  ;;  %v5507_v44 = vpack.c.bf16 %v8192_v29, %v8191_v54  ;;  %v8207_v8 = vcombine.low %v13690_v24, %v13689_v9  ;;  %v8218_v54 = vld [vmem:[%s12558_s10 + $0xa3] sm:$0xff]  ;;  %v13693_v9 = vld [vmem:[#allocation16_spill] sm:$0xff] }
 0x604   : > { %9449 = vmatprep.subr.bf16.mxu1 %v8208_v2  ;;  %9461 = vmatprep.subr.bf16.mxu0 %v8221_v16 }
 0x606   : > { %9410 = vmatmul.mubr.msk.bf16.gmra.mxu1 %vm105_vm1, %v5184_v43  ;;  %9422 = vmatmul.mubr.msk.bf16.gmra.mxu0 %vm105_vm1, %v5292_v56  ;;  %v8214_v43 = vld [vmem:[%s12558_s10 + $0x83] sm:$0xff]  ;;  %v5613_v56 = vpack.c.bf16 %v8201_v61, %v8200_v32 }
 0x607   : > { %9429 = vmatprep.mubr.msk.bf16.mxu1 %vm105_vm1, %v5397_v37  ;;  %9441 = vmatprep.mubr.msk.bf16.mxu0 %vm105_vm1, %v5505_v45  ;;  %v5721_v37 = vpack.c.bf16 %v8214_v43, %v8213_v51  ;;  %v8202_v45 = vld [vmem:[%s12558_s10 + $0x8a] sm:$0xff] }
 0x608   : > { %v5614_v29 = vpack.c.bf16 %v8203_v47, %v8202_v45 }
 0x60e   : > { %9430 = vmatmul.mubr.msk.bf16.vlgmr.msra.gmra.mxu1 %vm105_vm1, %v5398_v59  ;;  %9442 = vmatmul.mubr.msk.bf16.vlgmr.msra.gmra.mxu0 %vm105_vm1, %v5506_v12  ;;  %v5722_v59 = vpack.c.bf16 %v8216_v13, %v8215_v31  ;;  %v5615_v12 = vpack.c.bf16 %v8205_v41, %v8204_v46 }
 0x60f   : > { %9450 = vmatpush3.bf16.msra.mxu1 %v8208_v2  ;;  %9462 = vmatpush3.bf16.msra.mxu0 %v8221_v16  ;;  %v5400_v2 = vpack.c.bf16 %v8180_v20, %v8180_v20  ;;  %v5508_v16 = vpack.c.bf16 %v8193_v22, %v8193_v22 }
 0x610   : > { %9433 = vmatprep.mubr.msk.bf16.mxu1 %vm105_vm1, %v5399_v62  ;;  %9445 = vmatprep.mubr.msk.bf16.mxu0 %vm105_vm1, %v5507_v44  ;;  %v5723_v62 = vpack.c.bf16 %v8218_v54, %v8217_v15  ;;  %v8206_v44 = vld [vmem:[%s12558_s10 + $0xaa] sm:$0xff] }
 0x611   : > { %9451 = vmatprep.subr.bf16.mxu1 %v8207_v8  ;;  %9463 = vmatprep.subr.bf16.mxu0 %v8220_v58 }
 0x613   : > { %9452 = vmatpush3.bf16.msra.mxu1 %v8207_v8  ;;  %9464 = vmatpush3.bf16.msra.mxu0 %v8220_v58  ;;  %v8219_v8 = vld [vmem:[%s12558_s10 + $0xab] sm:$0xff]  ;;  %v5616_v58 = vpack.c.bf16 %v8206_v44, %v8206_v44 }
 0x614   : > { %v5724_v20 = vpack.c.bf16 %v8219_v8, %v8219_v8 }
 0x616   : > { %9434 = vmatmul.mubr.msk.bf16.gmra.mxu1 %vm105_vm1, %v5400_v2  ;;  %9446 = vmatmul.mubr.msk.bf16.gmra.mxu0 %vm105_vm1, %v5508_v16 }
 0x617   : > { %9453 = vmatprep.mubr.msk.bf16.mxu1 %vm105_vm1, %v5613_v56  ;;  %9465 = vmatprep.mubr.msk.bf16.mxu0 %vm105_vm1, %v5721_v37 }
 0x61e   : > { %9454 = vmatmul.mubr.msk.bf16.vlgmr.msra.gmra.mxu1 %vm105_vm1, %v5614_v29  ;;  %9466 = vmatmul.mubr.msk.bf16.vlgmr.msra.gmra.mxu0 %vm105_vm1, %v5722_v59 }
 0x61f   : > { %9457 = vmatprep.mubr.msk.bf16.mxu1 %vm105_vm1, %v5615_v12  ;;  %9469 = vmatprep.mubr.msk.bf16.mxu0 %vm105_vm1, %v5723_v62 }
 0x626   : > { %9458 = vmatmul.mubr.msk.bf16.gmra.mxu1 %vm105_vm1, %v5616_v58  ;;  %9470 = vmatmul.mubr.msk.bf16.gmra.mxu0 %vm105_vm1, %v5724_v20 }
 0x6a6   : > { %v9371_v22 = vpop.f32.mrf.mxu0  ;;  %v12689_v32 = vpop.f32.mrf.mxu1 }
 0x6a8   : > { %v4946_v61 = vpop.f32.mrf.mxu0  ;;  %v12691_v51 = vpop.f32.mrf.mxu1 }
 0x6aa   : > { %v9372_v43 = vpop.f32.mrf.mxu0  ;;  %v9376_v2 = vpop.f32.mrf.mxu1 }
 0x6ac   : > { %v4949_v16 = vpop.f32.mrf.mxu0  ;;  %v12693_v56 = vpop.f32.mrf.mxu1 }
 0x6ae   : > { %v9383_v37 = vpop.f32.mrf.mxu1  ;;  %v9395_v45 = vpop.f32.mrf.mxu0 }
 0x6af   : > { %v5043_v34 = vadd.f32 %v9383_v37, %v9371_v22 }
 0x6b0   : > { %v5034_v47 = vpop.f32.mrf.mxu1  ;;  %v5135_v31 = vpop.f32.mrf.mxu0 }
 0x6b1   : > { %v5167_v48 = vadd.f32 %v9395_v45, %v5043_v34  ;;  %v13697_v34 = vld [vmem:[#allocation18_spill] sm:$0xff] }
 0x6b2   : > { %v9384_v13 = vpop.f32.mrf.mxu1  ;;  %v9396_v46 = vpop.f32.mrf.mxu0 }
 0x6b3   : > { %v5046_v49 = vadd.f32 %v9384_v13, %v9372_v43  ;;  %v12756_v43 = vadd.f32 %v12706_v3, %v13697_v34 }
 0x6b4   : > { %v5037_v41 = vpop.f32.mrf.mxu1  ;;  %v12695_v15 = vpop.f32.mrf.mxu0 }
 0x6b5   : > { %v5038_v35 = vadd.f32 %v5037_v41, %v4949_v16  ;;  %v5168_v45 = vadd.f32 %v9396_v46, %v5046_v49 }
 0x6b6   : > { %v9387_v54 = vpop.f32.mrf.mxu1  ;;  %v12697_v29 = vpop.f32.mrf.mxu0 }
 0x6b7   : > { %v5059_v16 = vadd.f32 %v9387_v54, %v12689_v32  ;;  %v5833_v32 = vadd.f32 0.5, %v12756_v43 }
 0x6b8   : > { %v5050_v59 = vpop.f32.mrf.mxu1  ;;  %v12699_v12 = vpop.f32.mrf.mxu0 }
 0x6ba   : > { %v9388_v62 = vpop.f32.mrf.mxu1  ;;  %v9400_v44 = vpop.f32.mrf.mxu0 }
 0x6bb   : > { %v12714_v62 = vadd.f32 %v12706_v3, %v13693_v9 }
 0x6bc   : > { %v12701_v8 = vpop.f32.mrf.mxu1  ;;  %v12703_v58 = vpop.f32.mrf.mxu0 }
 0x6bd   : > { %v5831_v17 = vadd.f32 0.5, %v12714_v62 }
 0x6be   : > { %v9407_v20 = vpop.f32.mrf.mxu1  ;;  %v9419_v2 = vpop.f32.mrf.mxu0 }
 0x6bf   : > { %v5838_v25 = vmul.f32 0.01724138, %v5831_v17  ;;  %v5832_v17 = vadd.f32 0.5, %v12736_v33  ;;  %v5275_v52 = vadd.f32 %v9407_v20, %v5167_v48  ;;  %v5051_v48 = vadd.f32 %v5050_v59, %v12691_v51 }
 0x6c0   : > { %v5243_v0 = vpop.f32.mrf.mxu1  ;;  %v5351_v1 = vpop.f32.mrf.mxu0  ;;  %v5166_v20 = vadd.f32 %v12695_v15, %v5038_v35 }
 0x6c1   : > { %v5845_v40 = vfloor.f32 %v5838_v25  ;;  %v5839_v57 = vmul.f32 0.01724138, %v5832_v17 }
 0x6c2   : > { %v9408_v4 = vpop.f32.mrf.mxu1  ;;  %v12708_v5 = vpop.f32.mrf.mxu0 }
 0x6c3   : > { %v5852_v25 = vmul.f32 58.0, %v5845_v40  ;;  %v5276_v40 = vadd.f32 %v9408_v4, %v5168_v45  ;;  %v5846_v46 = vfloor.f32 %v5839_v57  ;;  %v5054_v4 = vadd.f32 %v12701_v8, %v12693_v56 }
 0x6c4   : > { %v5246_v6 = vpop.f32.mrf.mxu1  ;;  %v12710_v7 = vpop.f32.mrf.mxu0  ;;  %v5840_v56 = vmul.f32 0.01724138, %v5833_v32 }
 0x6c5   : > { %v5859_v49 = vsub.f32 %v12714_v62, %v5852_v25  ;;  %v5274_v51 = vadd.f32 %v5246_v6, %v5166_v20  ;;  %v12774_v62 = vadd.f32 %v12706_v3, %v10106_v26  ;;  %v5384_v57 = vadd.f32 %v12708_v5, %v5276_v40 }
 0x6c6   : > { %v12716_v44 = vpop.f32.mrf.mxu1  ;;  %v12718_v10 = vpop.f32.mrf.mxu0  ;;  %v5853_v34 = vmul.f32 58.0, %v5846_v46 }
 0x6c7   : > { %vm12781_vm0 = vcmp.lt.f32.partialorder %v5859_v49, 28.0  ;;  %v5382_v8 = vadd.f32 %v12710_v7, %v5274_v51  ;;  %v5834_v45 = vadd.f32 0.5, %v12774_v62 }
 0x6c8   : > { %v12720_v11 = vpop.f32.mrf.mxu1  ;;  %v12722_v14 = vpop.f32.mrf.mxu0 }
 0x6ca   : > { %v9412_v21 = vpop.f32.mrf.mxu1  ;;  %v9424_v23 = vpop.f32.mrf.mxu0 }
 0x6cb   : > { %v5035_v21 = vadd.f32 %v5034_v47, %v4946_v61  ;;  %v12750_v61 = vadd.f32 %v12706_v3, %v10108_v27 }
 0x6cc   : > { %v12729_v24 = vpop.f32.mrf.mxu1  ;;  %v12731_v9 = vpop.f32.mrf.mxu0 }
 0x6cd   : > { %v5165_v37 = vadd.f32 %v5135_v31, %v5035_v21  ;;  %v5383_v21 = vadd.f32 %v9419_v2, %v5275_v52  ;;  %v5835_v42 = vadd.f32 0.5, %v12750_v61  ;;  %v5169_v52 = vadd.f32 %v12699_v12, %v5051_v48 }
 0x6ce   : > { %v9431_v18 = vpop.f32.mrf.mxu1  ;;  %v9443_v38 = vpop.f32.mrf.mxu0 }
 0x6cf   : > { %v5273_v13 = vadd.f32 %v5243_v0, %v5165_v37  ;;  %v5850_v0 = vmul.f32 58.0, %v5843_v28  ;;  %v5491_v59 = vadd.f32 %v9431_v18, %v5383_v21  ;;  %v5171_v37 = vadd.f32 %v12697_v29, %v5059_v16 }
 0x6d0   : > { %v5459_v23 = vpop.f32.mrf.mxu1  ;;  %v12742_v39 = vpop.f32.mrf.mxu0  ;;  %v5277_v60 = vadd.f32 %v12720_v11, %v5169_v52  ;;  %v5851_v11 = vmul.f32 58.0, %v5844_v30 }
 0x6d1   : > { %v5381_v54 = vadd.f32 %v5351_v1, %v5273_v13  ;;  %v5842_v1 = vmul.f32 0.01724138, %v5835_v42  ;;  %v5279_v6 = vadd.f32 %v12716_v44, %v5171_v37  ;;  %v5599_v3 = vadd.f32 %v9443_v38, %v5491_v59 }
 0x6d2   : > { %v9432_v50 = vpop.f32.mrf.mxu1  ;;  %v12746_v22 = vpop.f32.mrf.mxu0  ;;  %v5857_v5 = vsub.f32 %v12727_v19, %v5850_v0  ;;  %v5385_v38 = vadd.f32 %v12722_v14, %v5277_v60  ;;  %v5841_v14 = vmul.f32 0.01724138, %v5834_v45  ;;  %v5858_v52 = vsub.f32 %v12740_v36, %v5851_v11 }
 0x6d3   : > { %v5489_v35 = vadd.f32 %v5459_v23, %v5381_v54  ;;  %v5492_v25 = vadd.f32 %v9432_v50, %v5384_v57  ;;  %v5170_v23 = vadd.f32 %v12703_v58, %v5054_v4  ;;  %v5849_v20 = vfloor.f32 %v5842_v1 }
 0x6d4   : > { %v5462_v47 = vpop.f32.mrf.mxu1  ;;  %v12752_v53 = vpop.f32.mrf.mxu0  ;;  %v5387_v21 = vadd.f32 %v12718_v10, %v5279_v6  ;;  %v5847_v58 = vfloor.f32 %v5840_v56  ;;  %vm12794_vm15 = vcmp.lt.f32.partialorder %v5857_v5, 28.0  ;;  %v5860_v10 = vsub.f32 %v12736_v33, %v5853_v34 }
 0x6d5   : > { %v5597_v13 = vadd.f32 %v12742_v39, %v5489_v35  ;;  %v5490_v16 = vadd.f32 %v5462_v47, %v5382_v8  ;;  %v5278_v7 = vadd.f32 %v12729_v24, %v5170_v23  ;;  %v5600_v40 = vadd.f32 %v12746_v22, %v5492_v25 }
 0x6d6   : > { %v9435_v31 = vpop.f32.mrf.mxu1  ;;  %v12760_v41 = vpop.f32.mrf.mxu0  ;;  %v5856_v4 = vmul.f32 58.0, %v5849_v20  ;;  %vm12814_vm2 = vcmp.lt.f32.partialorder %v5860_v10, 28.0  ;;  %vm5865_vm3 = vcmp.lt.f32.partialorder %v5858_v52, 28.0  ;;  %v12858_v10 = vld [vmem:[%s13371_s11 + $0x8] sm:$0xf] (%p4857_p4) }
 0x6d7   : > { %v5495_v39 = vadd.f32 %v9435_v31, %v5387_v21  ;;  %v5598_v24 = vadd.f32 %v12752_v53, %v5490_v16  ;;  %v5386_v22 = vadd.f32 %v12731_v9, %v5278_v7  ;;  %v5854_v31 = vmul.f32 58.0, %v5847_v58  ;;  %13706 = vst [vmem:[#allocation21_spill] sm:$0xff] (%p4857_p4), %v12858_v10  ;;  %v12908_v52 = vld [vmem:[%s13371_s11 + $0x30] sm:$0xf] (%p4857_p4) }
 0x6d8   : > { %v5475_v17 = vpop.f32.mrf.mxu1  ;;  %v12764_v63 = vpop.f32.mrf.mxu0  ;;  %v5848_v9 = vfloor.f32 %v5841_v14  ;;  %v12863_v14 = vld [vmem:[%s13371_s11 + $0xc] sm:$0xf] (%p4857_p4)  ;;  %13716 = vst [vmem:[#allocation31_spill] sm:$0xff] (%p4857_p4), %v12908_v52 }
 0x6d9   : > { %v5493_v47 = vadd.f32 %v5475_v17, %v5385_v38  ;;  %v5603_v53 = vadd.f32 %v12760_v41, %v5495_v39  ;;  %v5861_v34 = vsub.f32 %v12756_v43, %v5854_v31  ;;  %13707 = vst [vmem:[#allocation22_spill] sm:$0xff] (%p4857_p4), %v12863_v14  ;;  %v12918_v31 = vld [vmem:[%s13371_s11 + $0x38] sm:$0xf] (%p4857_p4)  ;;  %v12993_v41 = vld [vmem:[%s13371_s11 + $0x74] sm:$0xf] (%p4857_p4) }
 0x6da   : > { %v9436_v15 = vpop.f32.mrf.mxu1  ;;  %v9448_v2 = vpop.f32.mrf.mxu0  ;;  %13718 = vst [vmem:[#allocation33_spill] sm:$0xff] (%p4857_p4), %v12918_v31  ;;  %13733 = vst [vmem:[#allocation72_spill] sm:$0xff] (%p4857_p4), %v12993_v41 }
 0x6db   : > { %v5601_v57 = vadd.f32 %v12764_v63, %v5493_v47  ;;  %vm5868_vm5 = vcmp.lt.f32.partialorder %v5861_v34, 28.0 }
 0x6dc   : > { %v5478_v29 = vpop.f32.mrf.mxu1  ;;  %v12779_v18 = vpop.f32.mrf.mxu0 }
 0x6dd   : > { %v5494_v35 = vadd.f32 %v5478_v29, %v5386_v22  ;;  %v5863_v29 = vsub.f32 %v12750_v61, %v5856_v4  ;;  %v5855_v61 = vmul.f32 58.0, %v5848_v9  ;;  %v12893_v22 = vld [vmem:[%s13371_s11 + $0x24] sm:$0xf] (%p4857_p4)  ;;  %v12913_v4 = vld [vmem:[%s13371_s11 + $0x34] sm:$0xf] (%p4857_p4) }
 0x6de   : > { %v9455_v28 = vpop.f32.mrf.mxu1  ;;  %v9467_v44 = vpop.f32.mrf.mxu0  ;;  %13713 = vst [vmem:[#allocation28_spill] sm:$0xff] (%p4857_p4), %v12893_v22  ;;  %13717 = vst [vmem:[#allocation32_spill] sm:$0xff] (%p4857_p4), %v12913_v4  ;;  %v12968_v9 = vld [vmem:[%s13371_s11 + $0x60] sm:$0xf] (%p4857_p4) }
 0x6df   : > { %v5707_v48 = vadd.f32 %v9455_v28, %v5599_v3  ;;  %vm5870_vm4 = vcmp.lt.f32.partialorder %v5863_v29, 28.0  ;;  %v5862_v58 = vsub.f32 %v12774_v62, %v5855_v61  ;;  %v12848_v62 = vld [vmem:[%s13371_s11] sm:$0xf] (%p4857_p4)  ;;  %13728 = vst [vmem:[#allocation67_spill] sm:$0xff] (%p4857_p4), %v12968_v9  ;;  %v13003_v29 = vld [vmem:[%s13371_s11 + $0x7c] sm:$0xf] (%p4857_p4) }
 0x6e0   : > { %v5675_v19 = vpop.f32.mrf.mxu1  ;;  %v5783_v50 = vpop.f32.mrf.mxu0  ;;  %13704 = vst [vmem:[#allocation19_spill] sm:$0xff] (%p4857_p4), %v12848_v62  ;;  %13734 = vst [vmem:[#allocation73_spill] sm:$0xff] (%p4857_p4), %v13003_v29 }
 0x6e1   : > { %v5815_v42 = vadd.f32 %v9467_v44, %v5707_v48  ;;  %v5705_v49 = vadd.f32 %v5675_v19, %v5597_v13  ;;  %v5602_v13 = vadd.f32 %v12779_v18, %v5494_v35  ;;  %vm5869_vm6 = vcmp.lt.f32.partialorder %v5862_v58, 28.0  ;;  %v12953_v35 = vld [vmem:[%s13371_s11 + $0x54] sm:$0xf] (%p4857_p4) }
 0x6e2   : > { %v9456_v46 = vpop.f32.mrf.mxu1  ;;  %v9468_v32 = vpop.f32.mrf.mxu0  ;;  %13725 = vst [vmem:[#allocation64_spill] sm:$0xff] (%p4857_p4), %v12953_v35 }
 0x6e3   : > { %v5879_v54 = vadd.f32 %v12541_v55, %v5815_v42  ;;  %v5813_v51 = vadd.f32 %v5783_v50, %v5705_v49  ;;  %v5708_v59 = vadd.f32 %v9456_v46, %v5600_v40 }
 0x6e4   : > { %v5678_v30 = vpop.f32.mrf.mxu1  ;;  %v5786_v37 = vpop.f32.mrf.mxu0 }
 0x6e5   : > { %v5886_v17 = vmax.f32 %v5879_v54, 0.0  ;;  %v5877_v15 = vadd.f32 %v12541_v55, %v5813_v51  ;;  %v5816_v33 = vadd.f32 %v9468_v32, %v5708_v59  ;;  %v5706_v2 = vadd.f32 %v5678_v30, %v5598_v24  ;;  %v12853_v32 = vld [vmem:[%s13371_s11 + $0x4] sm:$0xf] (%p4857_p4)  ;;  %v12873_v24 = vld [vmem:[%s13371_s11 + $0x14] sm:$0xf] (%p4857_p4) }
 0x6e6   : > { %v9459_v1 = vpop.f32.mrf.mxu1  ;;  %v9471_v6 = vpop.f32.mrf.mxu0  ;;  %13705 = vst [vmem:[#allocation20_spill] sm:$0xff] (%p4857_p4), %v12853_v32  ;;  %13709 = vst [vmem:[#allocation24_spill] sm:$0xff] (%p4857_p4), %v12873_v24  ;;  %v12878_v54 = vld [vmem:[%s13371_s11 + $0x18] sm:$0xf] (%p4857_p4)  ;;  %v12883_v51 = vld [vmem:[%s13371_s11 + $0x1c] sm:$0xf] (%p4857_p4) }
 0x6e7   : > { %v5907_v60 = vsel %vm12781_vm0, %v5886_v17, 0.0  ;;  %v5884_v36 = vmax.f32 %v5877_v15, 0.0  ;;  %v5880_v56 = vadd.f32 %v12541_v55, %v5816_v33  ;;  %v5814_v8 = vadd.f32 %v5786_v37, %v5706_v2  ;;  %13710 = vst [vmem:[#allocation25_spill] sm:$0xff] (%p4857_p4), %v12878_v54  ;;  %13711 = vst [vmem:[#allocation26_spill] sm:$0xff] (%p4857_p4), %v12883_v51  ;;  %v12888_v59 = vld [vmem:[%s13371_s11 + $0x20] sm:$0xf] (%p4857_p4) }
 0x6e8   : > { %8229 = vst.msk [vmem:[%s12810_s22 + $0x50] sm:$0xff] %vm105_vm1, %v5907_v60  ;;  %v5711_v63 = vadd.f32 %v9459_v1, %v5603_v53  ;;  %v5691_v3 = vpop.f32.mrf.mxu1  ;;  %v5799_v12 = vpop.f32.mrf.mxu0  ;;  %13712 = vst [vmem:[#allocation27_spill] sm:$0xff] (%p4857_p4), %v12888_v59  ;;  %v12898_v30 = vld [vmem:[%s13371_s11 + $0x28] sm:$0xf] (%p4857_p4)  ;;  %v12903_v37 = vld [vmem:[%s13371_s11 + $0x2c] sm:$0xf] (%p4857_p4) }
 0x6e9   : > { %v5905_v25 = vsel %vm12794_vm15, %v5884_v36, 0.0  ;;  %v5887_v5 = vmax.f32 %v5880_v56, 0.0  ;;  %v5878_v23 = vadd.f32 %v12541_v55, %v5814_v8  ;;  %v5709_v28 = vadd.f32 %v5691_v3, %v5601_v57  ;;  %13714 = vst [vmem:[#allocation29_spill] sm:$0xff] (%p4857_p4), %v12898_v30  ;;  %13715 = vst [vmem:[#allocation30_spill] sm:$0xff] (%p4857_p4), %v12903_v37  ;;  %v12923_v17 = vld [vmem:[%s13371_s11 + $0x3c] sm:$0xf] (%p4857_p4) }
 0x6ea   : > { %8227 = vst.msk [vmem:[%s12810_s22 + $0x40] sm:$0xff] %vm105_vm1, %v5905_v25  ;;  %v5819_v44 = vadd.f32 %v9471_v6, %v5711_v63  ;;  %v9460_v11 = vpop.f32.mrf.mxu1  ;;  %v9472_v45 = vpop.f32.mrf.mxu0  ;;  %13719 = vst [vmem:[#allocation34_spill] sm:$0xff] (%p4857_p4), %v12923_v17  ;;  %v12928_v15 = vld [vmem:[%s13371_s11 + $0x40] sm:$0xf] (%p4857_p4)  ;;  %v12933_v33 = vld [vmem:[%s13371_s11 + $0x44] sm:$0xf] (%p4857_p4) }
 0x6eb   : > { %v5908_v16 = vsel %vm12814_vm2, %v5887_v5, 0.0  ;;  %v5885_v48 = vmax.f32 %v5878_v23, 0.0  ;;  %v5817_v20 = vadd.f32 %v5799_v12, %v5709_v28  ;;  %13720 = vst [vmem:[#allocation35_spill] sm:$0xff] (%p4857_p4), %v12928_v15  ;;  %13721 = vst [vmem:[#allocation36_spill] sm:$0xff] (%p4857_p4), %v12933_v33  ;;  %v12938_v2 = vld [vmem:[%s13371_s11 + $0x48] sm:$0xf] (%p4857_p4) }
 0x6ec   : > { %8230 = vst.msk [vmem:[%s12810_s22 + $0x58] sm:$0xff] %vm105_vm1, %v5908_v16  ;;  %v5883_v21 = vadd.f32 %v12541_v55, %v5819_v44  ;;  %v5694_v38 = vpop.f32.mrf.mxu1  ;;  %v5802_v50 = vpop.f32.mrf.mxu0  ;;  %13722 = vst [vmem:[#allocation61_spill] sm:$0xff] (%p4857_p4), %v12938_v2  ;;  %v12943_v53 = vld [vmem:[%s13371_s11 + $0x4c] sm:$0xf] (%p4857_p4)  ;;  %v12948_v57 = vld [vmem:[%s13371_s11 + $0x50] sm:$0xf] (%p4857_p4) }
 0x6ed   : > { %v5906_v7 = vsel %vm5865_vm3, %v5885_v48, 0.0  ;;  %v5881_v43 = vadd.f32 %v12541_v55, %v5817_v20  ;;  %v5710_v19 = vadd.f32 %v5694_v38, %v5602_v13  ;;  %13723 = vst [vmem:[#allocation62_spill] sm:$0xff] (%p4857_p4), %v12943_v53  ;;  %13724 = vst [vmem:[#allocation63_spill] sm:$0xff] (%p4857_p4), %v12948_v57  ;;  %v12958_v1 = vld [vmem:[%s13371_s11 + $0x58] sm:$0xf] (%p4857_p4)  ;;  %v13030_v28 = vmov (%p4857_p4), 0.0  }
 0x6ee   : > { %8228 = vst.msk [vmem:[%s12810_s22 + $0x48] sm:$0xff] %vm105_vm1, %v5906_v7  ;;  %v5890_v18 = vmax.f32 %v5883_v21, 0.0  ;;  %13726 = vst [vmem:[#allocation65_spill] sm:$0xff] (%p4857_p4), %v12958_v1  ;;  %v12963_v6 = vld [vmem:[%s13371_s11 + $0x5c] sm:$0xf] (%p4857_p4) }
 0x6ef   : > { %v5888_v40 = vmax.f32 %v5881_v43, 0.0  ;;  %v5818_v42 = vadd.f32 %v5802_v50, %v5710_v19  ;;  %13727 = vst [vmem:[#allocation66_spill] sm:$0xff] (%p4857_p4), %v12963_v6  ;;  %v12973_v60 = vld [vmem:[%s13371_s11 + $0x64] sm:$0xf] (%p4857_p4)  ;;  %v12978_v36 = vld [vmem:[%s13371_s11 + $0x68] sm:$0xf] (%p4857_p4) }
 0x6f0   : > { %v5911_v49 = vsel %vm5870_vm4, %v5890_v18, 0.0  ;;  %13729 = vst [vmem:[#allocation68_spill] sm:$0xff] (%p4857_p4), %v12973_v60  ;;  %13730 = vst [vmem:[#allocation69_spill] sm:$0xff] (%p4857_p4), %v12978_v36  ;;  %v12983_v56 = vld [vmem:[%s13371_s11 + $0x6c] sm:$0xf] (%p4857_p4) }
 0x6f1   : > { %8233 = vst.msk [vmem:[%s12810_s22 + $0x70] sm:$0xff] %vm105_vm1, %v5911_v49  ;;  %v5909_v0 = vsel %vm5868_vm5, %v5888_v40, 0.0  ;;  %v5882_v39 = vadd.f32 %v12541_v55, %v5818_v42  ;;  %v12868_v55 = vld [vmem:[%s13371_s11 + $0x10] sm:$0xf] (%p4857_p4)  ;;  %13731 = vst [vmem:[#allocation70_spill] sm:$0xff] (%p4857_p4), %v12983_v56 }
 0x6f2   : > { %8231 = vst.msk [vmem:[%s12810_s22 + $0x60] sm:$0xff] %vm105_vm1, %v5909_v0  ;;  %4859 = sbr.rel (!%p4857_p4) target bundleno = 1499 (0x5db), region = 329  ;;  %13708 = vst [vmem:[#allocation23_spill] sm:$0xff] (%p4857_p4), %v12868_v55  ;;  %v12988_v8 = vld [vmem:[%s13371_s11 + $0x70] sm:$0xf] (%p4857_p4) }
 0x6f3   : > { %v5889_v47 = vmax.f32 %v5882_v39, 0.0  ;;  %13732 = vst [vmem:[#allocation71_spill] sm:$0xff] (%p4857_p4), %v12988_v8  ;;  %v12998_v63 = vld [vmem:[%s13371_s11 + $0x78] sm:$0xf] (%p4857_p4)  ;;  %v13008_v3 = vld [vmem:[%s13371_s11 + $0x80] sm:$0xf] (%p4857_p4) }
 0x6f4   :  { %13735 = vst [vmem:[#allocation74_spill] sm:$0xff] (%p4857_p4), %v13008_v3  ;;  %v13013_v12 = vld [vmem:[%s13371_s11 + $0x84] sm:$0xf] (%p4857_p4)  ;;  %v13018_v25 = vld [vmem:[%s13371_s11 + $0x88] sm:$0xf] (%p4857_p4) }
 0x6f5   : > { %v5910_v46 = vsel %vm5869_vm6, %v5889_v47, 0.0  ;;  %13736 = vst [vmem:[#allocation75_spill] sm:$0xff] (%p4857_p4), %v13013_v12  ;;  %13737 = vst [vmem:[#allocation76_spill] sm:$0xff] (%p4857_p4), %v13018_v25  ;;  %v13023_v5 = vld [vmem:[%s13371_s11 + $0x8c] sm:$0xf] (%p4857_p4) }
 0x6f6   : > { %8232 = vst.msk [vmem:[%s12810_s22 + $0x68] sm:$0xff] %vm105_vm1, %v5910_v46  ;;  %13738 = vst [vmem:[#allocation77_spill] sm:$0xff] (%p4857_p4), %v13023_v5  ;;  %v13028_v23 = vld [vmem:[%s13372_s12] ss:$0 sm:$0xff] (%p4857_p4) }
 0x6f7 LB: > { %v13739_v51 = vld [vmem:[#allocation26_spill] sm:$0xff]  ;;  %v13740_v54 = vld [vmem:[#allocation25_spill] sm:$0xff]  ;;  %v13741_v24 = vld [vmem:[#allocation24_spill] sm:$0xff]  ;;  %s13045_s11 = smul.u32 56, %s9806_s5  ;;  %s5970_s5 = sadd.s32 1, %s9806_s5   ;;  %s9806_s5 = sphi %s13032_s5, %s5970_s5   ;;  %v9802_v28 = vphi %v13030_v28, %v13785_v28  }
 0x6f8   : > { %v8281_v44 = vcombine.low %v13740_v54, %v13739_v51  ;;  %v13743_v14 = vld [vmem:[#allocation22_spill] sm:$0xff]  ;;  %v13744_v10 = vld [vmem:[#allocation21_spill] sm:$0xff]  ;;  %v13747_v32 = vld [vmem:[#allocation20_spill] sm:$0xff]  ;;  %p5967_p5 = scmp.ge.s32.totalorder %s5970_s5, 29  }
 0x6f9   : > { %v13742_v55 = vld [vmem:[#allocation23_spill] sm:$0xff]  ;;  %v8287_v11 = vcombine.low %v13744_v10, %v13743_v14  ;;  %s13050_s12 = scalar_lea.vmem [#allocation6], %s13045_s11  ;;  %v13745_v37 = vld [vmem:[#allocation30_spill] sm:$0xff]  ;;  %v13746_v30 = vld [vmem:[#allocation29_spill] sm:$0xff]  ;;  %s6931_s6 = scvt.s32.f32 %s13045_s11  ;;  %vm9816_vm14 = vmmov (%p5967_p5), 0   ;;  %vm7120_vm0 = vcmask (%p5967_p5), 40960  }
 0x6fa   : > { %v8280_v34 = vcombine.low %v13742_v55, %v13741_v24  ;;  %9473 = vmatprep.subr.bf16.mxu0 %v8281_v44  ;;  %9603 = vmatprep.subr.bf16.mxu1 %v8281_v44  ;;  %v8300_v16 = vcombine.low %v13746_v30, %v13745_v37  ;;  %v13748_v62 = vld [vmem:[#allocation19_spill] sm:$0xff]  ;;  %v13749_v22 = vld [vmem:[#allocation28_spill] sm:$0xff]  ;;  %v13751_v17 = vld [vmem:[#allocation34_spill] sm:$0xff]  ;;  %s13281_s25 = scalar_lea.vmem [#allocation5], %s13045_s11  ;;  %vm7133_vm2 = vcmask (%p5967_p5), 0  }
 0x6fb   : > { %9474 = vmatpush3.bf16.msra.mxu0 %v8281_v44  ;;  %9605 = vmatpush3.bf16.msra.mxu1 %v8281_v44  ;;  %v8286_v40 = vcombine.low %v13748_v62, %v13747_v32  ;;  %v13750_v59 = vld [vmem:[#allocation27_spill] sm:$0xff]  ;;  %v13752_v31 = vld [vmem:[#allocation33_spill] sm:$0xff]  ;;  %v13753_v53 = vld [vmem:[#allocation62_spill] sm:$0xff] }
 0x6fc   : > { %9475 = vmatprep.subr.bf16.mxu0 %v8280_v34  ;;  %9604 = vmatprep.subr.bf16.mxu1 %v8280_v34  ;;  %v8299_v42 = vcombine.low %v13750_v59, %v13749_v22  ;;  %v13754_v2 = vld [vmem:[#allocation61_spill] sm:$0xff]  ;;  %v13755_v4 = vld [vmem:[#allocation32_spill] sm:$0xff]  ;;  %v13756_v52 = vld [vmem:[#allocation31_spill] sm:$0xff] }
 0x6fd   : > { %v8273_v45 = vld [vmem:[%s13050_s12 + $0x6] sm:$0xff]  ;;  %v8274_v61 = vld [vmem:[%s13050_s12 + $0xe] sm:$0xff]  ;;  %v8275_v21 = vld [vmem:[%s13050_s12 + $0x16] sm:$0xff] }
 0x6fe   : > { %v8277_v13 = vld [vmem:[%s13050_s12 + $0x26] sm:$0xff]  ;;  %v5995_v48 = vpack.c.bf16 %v8274_v61, %v8273_v45  ;;  %v8278_v20 = vld [vmem:[%s13050_s12 + $0x2e] sm:$0xff]  ;;  %v8276_v38 = vld [vmem:[%s13050_s12 + $0x1e] sm:$0xff]  ;;  %v8313_v61 = vcombine.low %v13752_v31, %v13751_v17 }
 0x6ff   : > { %9476 = vmatpush3.bf16.msra.mxu0 %v8280_v34  ;;  %9606 = vmatpush3.bf16.msra.mxu1 %v8280_v34  ;;  %v5997_v7 = vpack.c.bf16 %v8278_v20, %v8277_v13  ;;  %v5996_v43 = vpack.c.bf16 %v8276_v38, %v8275_v21  ;;  %v8279_v19 = vld [vmem:[%s13050_s12 + $0x36] sm:$0xff]  ;;  %v8266_v18 = vld [vmem:[%s13050_s12 + $0x5] sm:$0xff]  ;;  %v8267_v50 = vld [vmem:[%s13050_s12 + $0xd] sm:$0xff]  ;;  %v8326_v13 = vcombine.low %v13754_v2, %v13753_v53 }
 0x700   : > { %9477 = vmatprep.mubr.msk.bf16.mxu0 %vm105_vm1, %v5995_v48  ;;  %v5998_v58 = vpack.c.bf16 %v8279_v19, %v8279_v19  ;;  %9485 = vmatprep.subr.bf16.mxu1 %v8287_v11  ;;  %v8292_v49 = vld [vmem:[%s13050_s12 + $0x7] sm:$0xff]  ;;  %v8293_v0 = vld [vmem:[%s13050_s12 + $0xf] sm:$0xff]  ;;  %v5982_v39 = vpack.c.bf16 %v8267_v50, %v8266_v18  ;;  %v8269_v44 = vld [vmem:[%s13050_s12 + $0x1d] sm:$0xff]  ;;  %v8312_v19 = vcombine.low %v13756_v52, %v13755_v4 }
 0x701   : > { %9481 = vmatprep.mubr.msk.bf16.mxu1 %vm105_vm1, %v5997_v7  ;;  %9497 = vmatprep.subr.bf16.mxu0 %v8300_v16  ;;  %v6184_v47 = vpack.c.bf16 %v8293_v0, %v8292_v49  ;;  %v8268_v46 = vld [vmem:[%s13050_s12 + $0x15] sm:$0xff]  ;;  %v8295_v45 = vld [vmem:[%s13050_s12 + $0x1f] sm:$0xff]  ;;  %v8271_v20 = vld [vmem:[%s13050_s12 + $0x2d] sm:$0xff] }
 0x702   : > { %9478 = vmatmul.mubr.msk.bf16.vlgmr.msra.gmra.mxu0 %vm105_vm1, %v5996_v43  ;;  %9482 = vmatmul.mubr.msk.bf16.vlgmr.msra.gmra.mxu1 %vm105_vm1, %v5998_v58  ;;  %v8294_v34 = vld [vmem:[%s13050_s12 + $0x17] sm:$0xff]  ;;  %v8270_v48 = vld [vmem:[%s13050_s12 + $0x25] sm:$0xff]  ;;  %v13758_v15 = vld [vmem:[#allocation35_spill] sm:$0xff] }
 0x703   : > { %9486 = vmatpush3.bf16.msra.mxu1 %v8287_v11  ;;  %9498 = vmatpush3.bf16.msra.mxu0 %v8300_v16  ;;  %v8296_v21 = vld [vmem:[%s13050_s12 + $0x27] sm:$0xff]  ;;  %v8297_v11 = vld [vmem:[%s13050_s12 + $0x2f] sm:$0xff]  ;;  %v5983_v16 = vpack.c.bf16 %v8269_v44, %v8268_v46  ;;  %v6185_v38 = vpack.c.bf16 %v8295_v45, %v8294_v34  ;;  %v5984_v7 = vpack.c.bf16 %v8271_v20, %v8270_v48  ;;  %v8298_v58 = vld [vmem:[%s13050_s12 + $0x37] sm:$0xff] }
 0x704   : > { %9487 = vmatprep.subr.bf16.mxu1 %v8286_v40  ;;  %9499 = vmatprep.subr.bf16.mxu0 %v8299_v42  ;;  %v6186_v43 = vpack.c.bf16 %v8297_v11, %v8296_v21  ;;  %v13757_v33 = vld [vmem:[#allocation36_spill] sm:$0xff]  ;;  %v8318_v49 = vld [vmem:[%s13050_s12 + $0x40] sm:$0xff]  ;;  %v8319_v0 = vld [vmem:[%s13050_s12 + $0x48] sm:$0xff]  ;;  %v6187_v44 = vpack.c.bf16 %v8298_v58, %v8298_v58 }
 0x705   : > { %9489 = vmatprep.mubr.msk.bf16.mxu1 %vm105_vm1, %v5982_v39  ;;  %9501 = vmatprep.mubr.msk.bf16.mxu0 %vm105_vm1, %v6184_v47  ;;  %v8325_v18 = vcombine.low %v13758_v15, %v13757_v33  ;;  %v8272_v50 = vld [vmem:[%s13050_s12 + $0x35] sm:$0xff]  ;;  %v13759_v6 = vld [vmem:[#allocation66_spill] sm:$0xff]  ;;  %v13760_v1 = vld [vmem:[#allocation65_spill] sm:$0xff]  ;;  %v6400_v45 = vpack.c.bf16 %v8319_v0, %v8318_v49 }
 0x706   : > { %v8339_v39 = vcombine.low %v13760_v1, %v13759_v6  ;;  %v13761_v56 = vld [vmem:[#allocation70_spill] sm:$0xff]  ;;  %v13762_v36 = vld [vmem:[#allocation69_spill] sm:$0xff]  ;;  %v5985_v46 = vpack.c.bf16 %v8272_v50, %v8272_v50  ;;  %v8320_v48 = vld [vmem:[%s13050_s12 + $0x50] sm:$0xff] }
 0x707   : > { %9488 = vmatpush3.bf16.msra.mxu1 %v8286_v40  ;;  %9500 = vmatpush3.bf16.msra.mxu0 %v8299_v42  ;;  %v8305_v40 = vld [vmem:[%s13050_s12 + $0x3f] sm:$0xff]  ;;  %v8306_v42 = vld [vmem:[%s13050_s12 + $0x47] sm:$0xff]  ;;  %v8352_v47 = vcombine.low %v13762_v36, %v13761_v56  ;;  %v13763_v35 = vld [vmem:[#allocation64_spill] sm:$0xff] }
 0x708   : > { %9509 = vmatprep.subr.bf16.mxu1 %v8313_v61  ;;  %9521 = vmatprep.subr.bf16.mxu0 %v8326_v13  ;;  %v6292_v34 = vpack.c.bf16 %v8306_v42, %v8305_v40  ;;  %v8321_v20 = vld [vmem:[%s13050_s12 + $0x58] sm:$0xff]  ;;  %v8310_v11 = vld [vmem:[%s13050_s12 + $0x67] sm:$0xff]  ;;  %v8311_v40 = vld [vmem:[%s13050_s12 + $0x6f] sm:$0xff] }
 0x709   : > { %v8309_v21 = vld [vmem:[%s13050_s12 + $0x5f] sm:$0xff]  ;;  %v13764_v57 = vld [vmem:[#allocation63_spill] sm:$0xff]  ;;  %v13765_v60 = vld [vmem:[#allocation68_spill] sm:$0xff] }
 0x70a   : > { %9490 = vmatmul.mubr.msk.bf16.vlgmr.msra.gmra.mxu1 %vm105_vm1, %v5983_v16  ;;  %9502 = vmatmul.mubr.msk.bf16.vlgmr.msra.gmra.mxu0 %vm105_vm1, %v6185_v38  ;;  %v8322_v16 = vld [vmem:[%s13050_s12 + $0x60] sm:$0xff]  ;;  %v8323_v38 = vld [vmem:[%s13050_s12 + $0x68] sm:$0xff]  ;;  %v8338_v50 = vcombine.low %v13764_v57, %v13763_v35  ;;  %v8324_v42 = vld [vmem:[%s13050_s12 + $0x70] sm:$0xff] }
 0x70b   : > { %9510 = vmatpush3.bf16.msra.mxu1 %v8313_v61  ;;  %9522 = vmatpush3.bf16.msra.mxu0 %v8326_v13  ;;  %v8307_v61 = vld [vmem:[%s13050_s12 + $0x4f] sm:$0xff]  ;;  %v8308_v13 = vld [vmem:[%s13050_s12 + $0x57] sm:$0xff]  ;;  %v8331_v49 = vld [vmem:[%s13050_s12 + $0x41] sm:$0xff] }
 0x70c   : > { %9493 = vmatprep.mubr.msk.bf16.mxu1 %vm105_vm1, %v5984_v7  ;;  %9505 = vmatprep.mubr.msk.bf16.mxu0 %vm105_vm1, %v6186_v43  ;;  %v6293_v7 = vpack.c.bf16 %v8308_v13, %v8307_v61  ;;  %v6401_v43 = vpack.c.bf16 %v8321_v20, %v8320_v48  ;;  %v13766_v9 = vld [vmem:[#allocation67_spill] sm:$0xff]  ;;  %v13767_v29 = vld [vmem:[#allocation73_spill] sm:$0xff]  ;;  %v13769_v25 = vld [vmem:[#allocation76_spill] sm:$0xff] }
 0x70d   : > { %9511 = vmatprep.subr.bf16.mxu1 %v8312_v19  ;;  %9523 = vmatprep.subr.bf16.mxu0 %v8325_v18  ;;  %v8351_v58 = vcombine.low %v13766_v9, %v13765_v60  ;;  %v8332_v0 = vld [vmem:[%s13050_s12 + $0x49] sm:$0xff]  ;;  %v13768_v5 = vld [vmem:[#allocation77_spill] sm:$0xff]  ;;  %v8333_v48 = vld [vmem:[%s13050_s12 + $0x51] sm:$0xff]  ;;  %v13198_v9 = vstv %s6931_s6 }
 0x70e   : > { %v6508_v61 = vpack.c.bf16 %v8332_v0, %v8331_v49  ;;  %v8334_v20 = vld [vmem:[%s13050_s12 + $0x59] sm:$0xff]  ;;  %v13771_v8 = vld [vmem:[#allocation71_spill] sm:$0xff]  ;;  %v13773_v3 = vld [vmem:[#allocation74_spill] sm:$0xff] }
 0x70f   : > { %9512 = vmatpush3.bf16.msra.mxu1 %v8312_v19  ;;  %9524 = vmatpush3.bf16.msra.mxu0 %v8325_v18  ;;  %v6294_v19 = vpack.c.bf16 %v8310_v11, %v8309_v21  ;;  %v6402_v18 = vpack.c.bf16 %v8323_v38, %v8322_v16  ;;  %v8346_v21 = vld [vmem:[%s13050_s12 + $0x89] sm:$0xff]  ;;  %v8347_v11 = vld [vmem:[%s13050_s12 + $0x91] sm:$0xff]  ;;  %v8335_v16 = vld [vmem:[%s13050_s12 + $0x61] sm:$0xff] }
 0x710   : > { %9533 = vmatprep.subr.bf16.mxu1 %v8339_v39  ;;  %9545 = vmatprep.subr.bf16.mxu0 %v8352_v47  ;;  %v8336_v38 = vld [vmem:[%s13050_s12 + $0x69] sm:$0xff]  ;;  %v13770_v41 = vld [vmem:[#allocation72_spill] sm:$0xff]  ;;  %v13776_v54 = vld [vmem:[#allocation17_spill] sm:$0xff] }
 0x711   : > { %v13772_v12 = vld [vmem:[#allocation75_spill] sm:$0xff]  ;;  %v13775_v31 = vld [vmem:[#allocation14_spill] sm:$0xff] }
 0x712   : > { %9494 = vmatmul.mubr.msk.bf16.gmra.mxu1 %vm105_vm1, %v5985_v46  ;;  %9506 = vmatmul.mubr.msk.bf16.gmra.mxu0 %vm105_vm1, %v6187_v44  ;;  %v8344_v46 = vld [vmem:[%s13050_s12 + $0x79] sm:$0xff]  ;;  %v8345_v44 = vld [vmem:[%s13050_s12 + $0x81] sm:$0xff]  ;;  %v8337_v49 = vld [vmem:[%s13050_s12 + $0x71] sm:$0xff]  ;;  %v13217_v32 = vadd.f32 %v13198_v9, %v13775_v31 }
 0x713   : > { %9513 = vmatprep.mubr.msk.bf16.mxu1 %vm105_vm1, %v6292_v34  ;;  %9525 = vmatprep.mubr.msk.bf16.mxu0 %vm105_vm1, %v6400_v45  ;;  %v8365_v34 = vcombine.low %v12998_v63, %v13767_v29  ;;  %v8378_v45 = vcombine.low %v13769_v25, %v13768_v5  ;;  %v6616_v13 = vpack.c.bf16 %v8345_v44, %v8344_v46  ;;  %v8350_v0 = vld [vmem:[%s13050_s12 + $0xa9] sm:$0xff]  ;;  %v8357_v46 = vld [vmem:[%s13050_s12 + $0x7a] sm:$0xff] }
 0x714   : > { %v8358_v44 = vld [vmem:[%s13050_s12 + $0x82] sm:$0xff] }
 0x71a   : > { %9514 = vmatmul.mubr.msk.bf16.vlgmr.msra.gmra.mxu1 %vm105_vm1, %v6293_v7  ;;  %9526 = vmatmul.mubr.msk.bf16.vlgmr.msra.gmra.mxu0 %vm105_vm1, %v6401_v43  ;;  %v8348_v7 = vld [vmem:[%s13050_s12 + $0x99] sm:$0xff]  ;;  %v8349_v43 = vld [vmem:[%s13050_s12 + $0xa1] sm:$0xff] }
 0x71b   : > { %9534 = vmatpush3.bf16.msra.mxu1 %v8339_v39  ;;  %9546 = vmatpush3.bf16.msra.mxu0 %v8352_v47  ;;  %v6295_v39 = vpack.c.bf16 %v8311_v40, %v8311_v40  ;;  %v6403_v47 = vpack.c.bf16 %v8324_v42, %v8324_v42  ;;  %v8364_v40 = vcombine.low %v13771_v8, %v13770_v41 }
 0x71c   : > { %9517 = vmatprep.mubr.msk.bf16.mxu1 %vm105_vm1, %v6294_v19  ;;  %9529 = vmatprep.mubr.msk.bf16.mxu0 %vm105_vm1, %v6402_v18  ;;  %v6509_v19 = vpack.c.bf16 %v8334_v20, %v8333_v48  ;;  %v6617_v18 = vpack.c.bf16 %v8347_v11, %v8346_v21  ;;  %v8377_v42 = vcombine.low %v13773_v3, %v13772_v12  ;;  %v8359_v48 = vld [vmem:[%s13050_s12 + $0x8a] sm:$0xff]  ;;  %v8360_v20 = vld [vmem:[%s13050_s12 + $0x92] sm:$0xff] }
 0x71d   : > { %9535 = vmatprep.subr.bf16.mxu1 %v8338_v50  ;;  %9547 = vmatprep.subr.bf16.mxu0 %v8351_v58  ;;  %v8372_v21 = vld [vmem:[%s13050_s12 + $0x8b] sm:$0xff]  ;;  %v8373_v11 = vld [vmem:[%s13050_s12 + $0x93] sm:$0xff] }
 0x71f   : > { %9536 = vmatpush3.bf16.msra.mxu1 %v8338_v50  ;;  %9548 = vmatpush3.bf16.msra.mxu0 %v8351_v58  ;;  %v6510_v50 = vpack.c.bf16 %v8336_v38, %v8335_v16  ;;  %v6618_v58 = vpack.c.bf16 %v8349_v43, %v8348_v7  ;;  %v8361_v16 = vld [vmem:[%s13050_s12 + $0x9a] sm:$0xff]  ;;  %v8362_v38 = vld [vmem:[%s13050_s12 + $0xa2] sm:$0xff] }
 0x720   : > { %9557 = vmatprep.subr.bf16.mxu1 %v8365_v34  ;;  %9569 = vmatprep.subr.bf16.mxu0 %v8378_v45  ;;  %v8374_v7 = vld [vmem:[%s13050_s12 + $0x9b] sm:$0xff]  ;;  %v8375_v43 = vld [vmem:[%s13050_s12 + $0xa3] sm:$0xff] }
 0x722   : > { %9518 = vmatmul.mubr.msk.bf16.gmra.mxu1 %vm105_vm1, %v6295_v39  ;;  %9530 = vmatmul.mubr.msk.bf16.gmra.mxu0 %vm105_vm1, %v6403_v47  ;;  %v8370_v39 = vld [vmem:[%s13050_s12 + $0x7b] sm:$0xff]  ;;  %v8371_v47 = vld [vmem:[%s13050_s12 + $0x83] sm:$0xff] }
 0x723   : > { %9537 = vmatprep.mubr.msk.bf16.mxu1 %vm105_vm1, %v6508_v61  ;;  %9549 = vmatprep.mubr.msk.bf16.mxu0 %vm105_vm1, %v6616_v13  ;;  %v6724_v61 = vpack.c.bf16 %v8358_v44, %v8357_v46  ;;  %v6832_v13 = vpack.c.bf16 %v8371_v47, %v8370_v39 }
 0x72a   : > { %9538 = vmatmul.mubr.msk.bf16.vlgmr.msra.gmra.mxu1 %vm105_vm1, %v6509_v19  ;;  %9550 = vmatmul.mubr.msk.bf16.vlgmr.msra.gmra.mxu0 %vm105_vm1, %v6617_v18  ;;  %v6725_v19 = vpack.c.bf16 %v8360_v20, %v8359_v48  ;;  %v6833_v18 = vpack.c.bf16 %v8373_v11, %v8372_v21 }
 0x72b   : > { %9558 = vmatpush3.bf16.msra.mxu1 %v8365_v34  ;;  %9570 = vmatpush3.bf16.msra.mxu0 %v8378_v45  ;;  %v6511_v34 = vpack.c.bf16 %v8337_v49, %v8337_v49  ;;  %v6619_v45 = vpack.c.bf16 %v8350_v0, %v8350_v0 }
 0x72c   : > { %9541 = vmatprep.mubr.msk.bf16.mxu1 %vm105_vm1, %v6510_v50  ;;  %9553 = vmatprep.mubr.msk.bf16.mxu0 %vm105_vm1, %v6618_v58  ;;  %v6726_v50 = vpack.c.bf16 %v8362_v38, %v8361_v16  ;;  %v6834_v58 = vpack.c.bf16 %v8375_v43, %v8374_v7 }
 0x72d   : > { %9559 = vmatprep.subr.bf16.mxu1 %v8364_v40  ;;  %9571 = vmatprep.subr.bf16.mxu0 %v8377_v42 }
 0x72f   : > { %9560 = vmatpush3.bf16.msra.mxu1 %v8364_v40  ;;  %9572 = vmatpush3.bf16.msra.mxu0 %v8377_v42  ;;  %v8363_v40 = vld [vmem:[%s13050_s12 + $0xaa] sm:$0xff] }
 0x730   : > { %v8376_v42 = vld [vmem:[%s13050_s12 + $0xab] sm:$0xff]  ;;  %v6727_v49 = vpack.c.bf16 %v8363_v40, %v8363_v40 }
 0x731   : > { %v6835_v0 = vpack.c.bf16 %v8376_v42, %v8376_v42 }
 0x732   : > { %9542 = vmatmul.mubr.msk.bf16.gmra.mxu1 %vm105_vm1, %v6511_v34  ;;  %9554 = vmatmul.mubr.msk.bf16.gmra.mxu0 %vm105_vm1, %v6619_v45 }
 0x733   : > { %9561 = vmatprep.mubr.msk.bf16.mxu1 %vm105_vm1, %v6724_v61  ;;  %9573 = vmatprep.mubr.msk.bf16.mxu0 %vm105_vm1, %v6832_v13 }
 0x73a   : > { %9562 = vmatmul.mubr.msk.bf16.vlgmr.msra.gmra.mxu1 %vm105_vm1, %v6725_v19  ;;  %9574 = vmatmul.mubr.msk.bf16.vlgmr.msra.gmra.mxu0 %vm105_vm1, %v6833_v18 }
 0x73b   : > { %9565 = vmatprep.mubr.msk.bf16.mxu1 %vm105_vm1, %v6726_v50  ;;  %9577 = vmatprep.mubr.msk.bf16.mxu0 %vm105_vm1, %v6834_v58 }
 0x742   : > { %9566 = vmatmul.mubr.msk.bf16.gmra.mxu1 %vm105_vm1, %v6727_v49  ;;  %9578 = vmatmul.mubr.msk.bf16.gmra.mxu0 %vm105_vm1, %v6835_v0 }
 0x7c2   : > { %v9479_v46 = vpop.f32.mrf.mxu0  ;;  %v13181_v44 = vpop.f32.mrf.mxu1 }
 0x7c4   : > { %v6057_v39 = vpop.f32.mrf.mxu0  ;;  %v13183_v47 = vpop.f32.mrf.mxu1 }
 0x7c6   : > { %v9480_v34 = vpop.f32.mrf.mxu0  ;;  %v9484_v45 = vpop.f32.mrf.mxu1 }
 0x7c8   : > { %v6060_v61 = vpop.f32.mrf.mxu0  ;;  %v13185_v13 = vpop.f32.mrf.mxu1 }
 0x7ca   : > { %v9491_v48 = vpop.f32.mrf.mxu1  ;;  %v9503_v20 = vpop.f32.mrf.mxu0 }
 0x7cb   : > { %v6154_v30 = vadd.f32 %v9491_v48, %v9479_v46  ;;  %v13224_v46 = vadd.f32 %v13198_v9, %v13776_v54  ;;  %v13777_v48 = vld [vmem:[#allocation15_spill] sm:$0xff] }
 0x7cc   : > { %v6145_v21 = vpop.f32.mrf.mxu1  ;;  %v6246_v11 = vpop.f32.mrf.mxu0  ;;  %v13228_v31 = vadd.f32 %v13198_v9, %v13777_v48 }
 0x7cd   : > { %v6146_v35 = vadd.f32 %v6145_v21, %v6057_v39  ;;  %v6278_v51 = vadd.f32 %v9503_v20, %v6154_v30  ;;  %v6943_v54 = vadd.f32 0.5, %v13224_v46 }
 0x7ce   : > { %v9492_v16 = vpop.f32.mrf.mxu1  ;;  %v9504_v38 = vpop.f32.mrf.mxu0  ;;  %v6941_v48 = vadd.f32 0.5, %v13228_v31 }
 0x7cf   : > { %v6276_v55 = vadd.f32 %v6246_v11, %v6146_v35 }
 0x7d0   : > { %v6148_v7 = vpop.f32.mrf.mxu1  ;;  %v6249_v43 = vpop.f32.mrf.mxu0 }
 0x7d1   : > { %v6149_v39 = vadd.f32 %v6148_v7, %v6060_v61 }
 0x7d2   : > { %v9495_v19 = vpop.f32.mrf.mxu1  ;;  %v13187_v18 = vpop.f32.mrf.mxu0 }
 0x7d3   : > { %v6170_v57 = vadd.f32 %v9495_v19, %v13181_v44  ;;  %v6277_v62 = vadd.f32 %v6249_v43, %v6149_v39 }
 0x7d4   : > { %v6161_v50 = vpop.f32.mrf.mxu1  ;;  %v13189_v58 = vpop.f32.mrf.mxu0 }
 0x7d6   : > { %v9496_v40 = vpop.f32.mrf.mxu1  ;;  %v9508_v42 = vpop.f32.mrf.mxu0 }
 0x7d7   : > { %v13774_v40 = vld [vmem:[#allocation16_spill] sm:$0xff] }
 0x7d8   : > { %v13191_v49 = vpop.f32.mrf.mxu1  ;;  %v13193_v0 = vpop.f32.mrf.mxu0  ;;  %v13204_v42 = vadd.f32 %v13198_v9, %v13774_v40 }
 0x7da   : > { %v9515_v45 = vpop.f32.mrf.mxu1  ;;  %v9527_v1 = vpop.f32.mrf.mxu0  ;;  %v6942_v24 = vadd.f32 0.5, %v13204_v42 }
 0x7dc   : > { %v6354_v2 = vpop.f32.mrf.mxu1  ;;  %v6462_v3 = vpop.f32.mrf.mxu0  ;;  %v6949_v36 = vmul.f32 0.01724138, %v6942_v24  ;;  %v6386_v24 = vadd.f32 %v9515_v45, %v6278_v51 }
 0x7dd   : > { %v6384_v20 = vadd.f32 %v6354_v2, %v6276_v55  ;;  %v13778_v55 = vld [vmem:[#allocation18_spill] sm:$0xff] }
 0x7de   : > { %v9516_v4 = vpop.f32.mrf.mxu1  ;;  %v9528_v5 = vpop.f32.mrf.mxu0  ;;  %v6956_v21 = vfloor.f32 %v6949_v36  ;;  %v6494_v35 = vadd.f32 %v9527_v1, %v6386_v24  ;;  %v6162_v36 = vadd.f32 %v6161_v50, %v13183_v47  ;;  %v13242_v2 = vadd.f32 %v13198_v9, %v13778_v55 }
 0x7df   : > { %v6492_v44 = vadd.f32 %v6462_v3, %v6384_v20  ;;  %v6165_v1 = vadd.f32 %v13191_v49, %v13185_v13  ;;  %v13249_v47 = vadd.f32 %v13198_v9, %v10108_v27  ;;  %v6950_v3 = vmul.f32 0.01724138, %v6943_v54 }
 0x7e0   : > { %v6357_v6 = vpop.f32.mrf.mxu1  ;;  %v13196_v8 = vpop.f32.mrf.mxu0  ;;  %v6963_v51 = vmul.f32 58.0, %v6956_v21  ;;  %v6944_v13 = vadd.f32 0.5, %v13242_v2 }
 0x7e2   : > { %v9519_v10 = vpop.f32.mrf.mxu1  ;;  %v13200_v12 = vpop.f32.mrf.mxu0  ;;  %v6970_v24 = vsub.f32 %v13204_v42, %v6963_v51  ;;  %v6281_v42 = vadd.f32 %v13193_v0, %v6165_v1  ;;  %v6951_v51 = vmul.f32 0.01724138, %v6944_v13  ;;  %v8387_v13 = vld [vmem:[%s13281_s25 + $0x58] sm:$0xff] }
 0x7e4   : > { %v13206_v14 = vpop.f32.mrf.mxu1  ;;  %v13208_v15 = vpop.f32.mrf.mxu0  ;;  %vm13276_vm7 = vcmp.lt.f32.partialorder %v6970_v24, 28.0 }
 0x7e6   : > { %v9520_v17 = vpop.f32.mrf.mxu1  ;;  %v9532_v22 = vpop.f32.mrf.mxu0 }
 0x7e7   : > { %v6157_v17 = vadd.f32 %v9492_v16, %v9480_v34  ;;  %v6940_v22 = vadd.f32 0.5, %v13217_v32 }
 0x7e8   : > { %v13211_v25 = vpop.f32.mrf.mxu1  ;;  %v13213_v29 = vpop.f32.mrf.mxu0 }
 0x7e9   : > { %v6279_v34 = vadd.f32 %v9504_v38, %v6157_v17  ;;  %v6947_v16 = vmul.f32 0.01724138, %v6940_v22  ;;  %v6385_v38 = vadd.f32 %v6357_v6, %v6277_v62  ;;  %v6282_v17 = vadd.f32 %v13187_v18, %v6170_v57 }
 0x7ea   : > { %v9539_v33 = vpop.f32.mrf.mxu1  ;;  %v9551_v40 = vpop.f32.mrf.mxu0  ;;  %v6948_v22 = vmul.f32 0.01724138, %v6941_v48  ;;  %v6280_v62 = vadd.f32 %v13189_v58, %v6162_v36  ;;  %v13258_v18 = vadd.f32 %v13198_v9, %v10106_v26  ;;  %v6957_v9 = vfloor.f32 %v6950_v3  ;;  %v7064_v26 = vld [vmem:[%s13374_s14] sm:$0x1] (%p5967_p5) }
 0x7eb   : > { %v6387_v61 = vadd.f32 %v9516_v4, %v6279_v34  ;;  %v6602_v19 = vadd.f32 %v9539_v33, %v6494_v35  ;;  %v6954_v45 = vfloor.f32 %v6947_v16  ;;  %v6390_v33 = vadd.f32 %v9519_v10, %v6282_v17 }
 0x7ec   : > { %v6570_v37 = vpop.f32.mrf.mxu1  ;;  %v6678_v41 = vpop.f32.mrf.mxu0  ;;  %v6493_v49 = vadd.f32 %v13196_v8, %v6385_v38  ;;  %v6388_v58 = vadd.f32 %v13206_v14, %v6280_v62  ;;  %v6955_v20 = vfloor.f32 %v6948_v22  ;;  %v6946_v16 = vadd.f32 0.5, %v13249_v47 }
 0x7ed   : > { %v6495_v50 = vadd.f32 %v9528_v5, %v6387_v61  ;;  %v6600_v39 = vadd.f32 %v6570_v37, %v6492_v44  ;;  %v6710_v21 = vadd.f32 %v9551_v40, %v6602_v19  ;;  %v13261_v37 = vmul.f32 58.0, %v6954_v45 }
 0x7ee   : > { %v9540_v52 = vpop.f32.mrf.mxu1  ;;  %v13220_v53 = vpop.f32.mrf.mxu0  ;;  %v6498_v61 = vadd.f32 %v13200_v12, %v6390_v33  ;;  %v6389_v8 = vadd.f32 %v13211_v25, %v6281_v42  ;;  %v6945_v0 = vadd.f32 0.5, %v13258_v18  ;;  %v6962_v19 = vmul.f32 58.0, %v6955_v20 }
 0x7ef   : > { %v6603_v5 = vadd.f32 %v9540_v52, %v6495_v50  ;;  %v6708_v54 = vadd.f32 %v6678_v41, %v6600_v39  ;;  %v6968_v41 = vsub.f32 %v13217_v32, %v13261_v37  ;;  %v6953_v25 = vmul.f32 0.01724138, %v6946_v16  ;;  %v8386_v32 = vld [vmem:[%s13281_s25 + $0x50] sm:$0xff]  ;;  %v8385_v16 = vld [vmem:[%s13281_s25 + $0x48] sm:$0xff] }
 0x7f0   : > { %v6573_v56 = vpop.f32.mrf.mxu1  ;;  %v13230_v30 = vpop.f32.mrf.mxu0  ;;  %v6958_v50 = vfloor.f32 %v6951_v51  ;;  %v6952_v39 = vmul.f32 0.01724138, %v6945_v0 }
 0x7f1   : > { %v6601_v48 = vadd.f32 %v6573_v56, %v6493_v49  ;;  %v6711_v14 = vadd.f32 %v13220_v53, %v6603_v5  ;;  %v6496_v56 = vadd.f32 %v13208_v15, %v6388_v58  ;;  %v6497_v53 = vadd.f32 %v13213_v29, %v6389_v8 }
 0x7f2   : > { %v9543_v59 = vpop.f32.mrf.mxu1  ;;  %v13233_v60 = vpop.f32.mrf.mxu0  ;;  %v6969_v49 = vsub.f32 %v13228_v31, %v6962_v19  ;;  %v6960_v37 = vfloor.f32 %v6953_v25  ;;  %vm13292_vm8 = vcmp.lt.f32.partialorder %v6968_v41, 28.0  ;;  %v13787_v41 = vlaneseq (%p5967_p5) }
 0x7f3   : > { %v6606_v44 = vadd.f32 %v9543_v59, %v6498_v61  ;;  %v6709_v45 = vadd.f32 %v13230_v30, %v6601_v48  ;;  %v8384_v59 = vld [vmem:[%s13281_s25 + $0x40] sm:$0xff] }
 0x7f4   : > { %v6586_v11 = vpop.f32.mrf.mxu1  ;;  %v13238_v7 = vpop.f32.mrf.mxu0  ;;  %v6967_v51 = vmul.f32 58.0, %v6960_v37  ;;  %vm13299_vm9 = vcmp.lt.f32.partialorder %v6969_v49, 28.0 }
 0x7f5   : > { %v6714_v62 = vadd.f32 %v13233_v60, %v6606_v44  ;;  %v6959_v60 = vfloor.f32 %v6952_v39 }
 0x7f6   : > { %v9544_v4 = vpop.f32.mrf.mxu1  ;;  %v9556_v43 = vpop.f32.mrf.mxu0 }
 0x7f7   : > { %v6604_v43 = vadd.f32 %v6586_v11, %v6496_v56  ;;  %v6964_v11 = vmul.f32 58.0, %v6957_v9  ;;  %v6965_v9 = vmul.f32 58.0, %v6958_v50  ;;  %v6966_v25 = vmul.f32 58.0, %v6959_v60 }
 0x7f8   : > { %v6589_v6 = vpop.f32.mrf.mxu1  ;;  %v13253_v57 = vpop.f32.mrf.mxu0 }
 0x7f9   : > { %v6605_v33 = vadd.f32 %v6589_v6, %v6497_v53  ;;  %v6712_v20 = vadd.f32 %v13238_v7, %v6604_v43  ;;  %v6974_v53 = vsub.f32 %v13249_v47, %v6967_v51  ;;  %v9682_v51 = vld [vmem:[%s13373_s13 + $0x8] sm:$0xff] (%p5967_p5)  }
 0x7fa   : > { %v9563_v10 = vpop.f32.mrf.mxu1  ;;  %v9575_v34 = vpop.f32.mrf.mxu0 }
 0x7fb   : > { %v6818_v35 = vadd.f32 %v9563_v10, %v6710_v21  ;;  %vm6981_vm12 = vcmp.lt.f32.partialorder %v6974_v53, 28.0 }
 0x7fc   : > { %v6786_v52 = vpop.f32.mrf.mxu1  ;;  %v6894_v40 = vpop.f32.mrf.mxu0 }
 0x7fd   : > { %v6926_v36 = vadd.f32 %v9575_v34, %v6818_v35  ;;  %v6816_v55 = vadd.f32 %v6786_v52, %v6708_v54  ;;  %v6971_v52 = vsub.f32 %v13224_v46, %v6964_v11  ;;  %v6972_v46 = vsub.f32 %v13242_v2, %v6965_v9  ;;  %v8389_v11 = vld [vmem:[%s13281_s25 + $0x68] sm:$0xff] }
 0x7fe   : > { %v9564_v38 = vpop.f32.mrf.mxu1  ;;  %v9576_v12 = vpop.f32.mrf.mxu0 }
 0x7ff   : > { %v6990_v17 = vadd.f32 %v13028_v23, %v6926_v36  ;;  %v6924_v1 = vadd.f32 %v6894_v40, %v6816_v55  ;;  %v6819_v4 = vadd.f32 %v9564_v38, %v6711_v14  ;;  %v6713_v36 = vadd.f32 %v13253_v57, %v6605_v33  ;;  %v8390_v38 = vld [vmem:[%s13281_s25 + $0x70] sm:$0xff] }
 0x800   : > { %v6789_v15 = vpop.f32.mrf.mxu1  ;;  %v6897_v30 = vpop.f32.mrf.mxu0  ;;  %vm6978_vm10 = vcmp.lt.f32.partialorder %v6971_v52, 28.0  ;;  %vm6979_vm11 = vcmp.lt.f32.partialorder %v6972_v46, 28.0 }
 0x801   : > { %v6988_v3 = vadd.f32 %v13028_v23, %v6924_v1  ;;  %v6927_v29 = vadd.f32 %v9576_v12, %v6819_v4  ;;  %v6817_v24 = vadd.f32 %v6789_v15, %v6709_v45  ;;  %v7005_v42 = vadd.f32 %v8386_v32, %v6990_v17  ;;  %v8388_v1 = vld [vmem:[%s13281_s25 + $0x60] sm:$0xff] }
 0x802   : > { %v9567_v21 = vpop.f32.mrf.mxu1  ;;  %v9579_v5 = vpop.f32.mrf.mxu0 }
 0x803   : > { %v7003_v58 = vadd.f32 %v8384_v59, %v6988_v3  ;;  %v6991_v10 = vadd.f32 %v13028_v23, %v6927_v29  ;;  %v6925_v34 = vadd.f32 %v6897_v30, %v6817_v24  ;;  %v6822_v54 = vadd.f32 %v9567_v21, %v6714_v62 }
 0x804   : > { %v6802_v48 = vpop.f32.mrf.mxu1  ;;  %v6910_v35 = vpop.f32.mrf.mxu0  ;;  %v7012_v55 = vmax.f32 %v7005_v42, 0.0  ;;  %v6973_v29 = vsub.f32 %v13258_v18, %v6966_v25 }
 0x805   : > { %v7010_v31 = vmax.f32 %v7003_v58, 0.0  ;;  %v7006_v61 = vadd.f32 %v8387_v13, %v6991_v10  ;;  %v6989_v8 = vadd.f32 %v13028_v23, %v6925_v34  ;;  %v6930_v40 = vadd.f32 %v9579_v5, %v6822_v54 }
 0x806   : > { %v6820_v7 = vadd.f32 %v6802_v48, %v6712_v20  ;;  %v9568_v0 = vpop.f32.mrf.mxu1  ;;  %v9580_v14 = vpop.f32.mrf.mxu0  ;;  %v7033_v59 = vsel %vm13276_vm7, %v7012_v55, 0.0  ;;  %vm6980_vm13 = vcmp.lt.f32.partialorder %v6973_v29, 28.0 }
 0x807   : > { %v7004_v56 = vadd.f32 %v8385_v16, %v6989_v8  ;;  %v6994_v44 = vadd.f32 %v13028_v23, %v6930_v40  ;;  %v7031_v45 = vsel %vm13292_vm8, %v7010_v31, 0.0  ;;  %v7013_v17 = vmax.f32 %v7006_v61, 0.0 }
 0x808   : > { %v6928_v12 = vadd.f32 %v6910_v35, %v6820_v7  ;;  %v6805_v19 = vpop.f32.mrf.mxu1  ;;  %v6913_v32 = vpop.f32.mrf.mxu0  ;;  %v7038_v50 = vsel %vm105_vm1, %v7031_v45, 0.0  ;;  %v7041_v22 = vsel %vm105_vm1, %v7033_v59, 0.0  ;;  %v13786_v40 = vmov (%p5967_p5), 0.0  }
 0x809   : > { %v7011_v57 = vmax.f32 %v7004_v56, 0.0  ;;  %v6821_v4 = vadd.f32 %v6805_v19, %v6713_v36  ;;  %v7009_v15 = vadd.f32 %v8390_v38, %v6994_v44  ;;  %v7034_v47 = vsel %vm6978_vm10, %v7013_v17, 0.0  ;;  %9581 = vmatprep.subr.bf16.mxu0 (%p5967_p5), %v13786_v40  ;;  %9585 = vmatprep.mubr.msk.bf16.mxu0 (%p5967_p5), %vm9816_vm14, %v13786_v40 }
 0x80a   : > { %v6992_v43 = vadd.f32 %v13028_v23, %v6928_v12  ;;  %v7043_v5 = vsel %vm105_vm1, %v7034_v47, 0.0  ;;  %9582 = vmatpush3.bf16.msra.mxu0 (%p5967_p5), %v9682_v51  ;;  %v7136_v56 = vand.u32 (%p5967_p5), 127, %v13787_v41 }
 0x80b   : > { %v7032_v2 = vsel %vm13299_vm9, %v7011_v57, 0.0  ;;  %v6929_v30 = vadd.f32 %v6913_v32, %v6821_v4  ;;  %v7016_v49 = vmax.f32 %v7009_v15, 0.0  ;;  %9583 = vmatprep.subr.bf16.mxu0 (%p5967_p5), %v13786_v40 }
 0x80c   : > { %v7039_v39 = vsel %vm105_vm1, %v7032_v2, 0.0  ;;  %v7007_v3 = vadd.f32 %v8388_v1, %v6992_v43 }
 0x80d   : > { %v7040_v24 = vadd.f32 %v7039_v39, %v7038_v50  ;;  %v6993_v62 = vadd.f32 %v13028_v23, %v6929_v30  ;;  %v7037_v10 = vsel %vm6981_vm12, %v7016_v49, 0.0 }
 0x80e   : > { %v7014_v33 = vmax.f32 %v7007_v3, 0.0  ;;  %v7049_v48 = vsel %vm105_vm1, %v7037_v10, 0.0 }
 0x80f   : > { %v7042_v13 = vadd.f32 %v7041_v22, %v7040_v24  ;;  %v7008_v21 = vadd.f32 %v8389_v11, %v6993_v62 }
 0x810   : > { %v7035_v37 = vsel %vm6979_vm11, %v7014_v33, 0.0 }
 0x811   : > { %v7044_v42 = vadd.f32 %v7043_v5, %v7042_v13  ;;  %v7015_v58 = vmax.f32 %v7008_v21, 0.0  ;;  %v7045_v18 = vsel %vm105_vm1, %v7035_v37, 0.0 }
 0x813   : > { %v7046_v34 = vadd.f32 %v7045_v18, %v7044_v42  ;;  %v7036_v20 = vsel %vm6980_vm13, %v7015_v58, 0.0 }
 0x814   : > { %v7047_v16 = vsel %vm105_vm1, %v7036_v20, 0.0 }
 0x815   : > { %v7048_v54 = vadd.f32 %v7047_v16, %v7046_v34 }
 0x817   : > { %v7050_v35 = vadd.f32 %v7049_v48, %v7048_v54 }
 0x819   : > { %v7051_v9 = vrot.slane %v7050_v35, 4 }
 0x81b   : > { %v7052_v60 = vadd.f32 %v7051_v9, %v7050_v35 }
 0x81d   : > { %v7053_v6 = vrot.slane %v7052_v60, 2 }
 0x81f   : > { %v7054_v31 = vadd.f32 %v7053_v6, %v7052_v60 }
 0x821   : > { %v7055_v61 = vrot.slane %v7054_v31, 1 }
 0x823   : > { %v7056_v8 = vadd.f32 %v7055_v61, %v7054_v31  ;;  %5969 = sbr.rel (!%p5967_p5) target bundleno = 1783 (0x6f7), region = 340 }
 0x825   : > { %v7057_v52 = vadd.f32 %v9802_v28, %v7056_v8  }
 0x827   : > { %v13785_v28 = vmov %v7057_v52  ;;  %v7058_v7 = vmul.f32 (%p5967_p5), 0.0012755102, %v7057_v52 }
 0x828   :  { %v9683_v28 = vld [vmem:[%s13373_s13] sm:$0xff]   ;;  %s9817_s13 = smov [#allocation7]  }
 0x829   :  { %v7059_v0 = vpack.c.bf16 %v7058_v7, %v7058_v7  ;;  %9584 = vmatpush3.bf16.msra.mxu0 %v9683_v28  ;;  %s7161_s14 = sshll.u32 %s9817_s13, 4  ;;  %s7162_s14 = int_to_ptr.vmem [resolvable:$true] %s7161_s14 }
 0x82a   :  { %s9688_s0 = scalar_lea.vmem %s7162_s14, 16  ;;  %s9692_s30 = scalar_lea.vmem %s7162_s14, 32 }
 0x82b   :  { %p9689_p6 = scmp.ne.s32.totalorder %s7162_s14, %s9688_s0  ;;  %p9693_p7 = scmp.lt.s32.totalorder %s7162_s14, %s7162_s14 }
 0x82c   :  { %9586 = vmatmul.mubr.msk.bf16.vlgmr.msra.gmra.mxu0 %vm105_vm1, %v7059_v0  ;;  %p9694_p8 = scmp.lt.s32.totalorder %s9692_s30, %s9688_s0 }
 0x82e   :  { %p9695_p9 = por %p9694_p8, %p9693_p7 }
 0x830   :  { %p9696_p10 = pnand %p9695_p9, %p9689_p6 }
 0x8ec   :  { %v7114_v27 = vpop.f32.mrf.mxu0 }
 0x8ed   :  { %v7115_v63 = vadd.f32 %v7114_v27, %v7064_v26 }
 0x8ee   :  { %v9587_v23 = vpop.f32.mrf.mxu0 }
 0x8ef   :  { %v7122_v14 = vsel %vm7120_vm0, %v7115_v63, -inf  ;;  %7121 = vst.msk [vmem:[#allocation11] sm:$0x1] %vm7120_vm0, %v7115_v63 }
 0x8f0   :  { %7123 = vmax.xlane.f32.xlu0 %v7122_v14  ;;  %v7117_v36 = vpop.f32.mrf.mxu0 }
 0x8f2   :  { %v9588_v55 = vpop.f32.mrf.mxu0 }
 0x979   :  { %v7124_v44 = vpop.xlane.xlu0 %7123 }
 0x97a   :  { %v7125_v38 = vsub.f32 %v7115_v63, %v7124_v44  ;;  %vm7137_vm1 = vcmp.ge.f32.partialorder %v7115_v63, %v7124_v44 }
 0x97b   :  { %v7138_v12 = vsel %vm7137_vm1, %v7136_v56, 6 }
 0x97c   :  { %v7126_v46 = vmul.f32 1.442695, %v7125_v38  ;;  %v7139_v19 = vsel %vm7120_vm0, %v7138_v12, 2147483647 }
 0x97d   :  { %v7141_v25 = vshra.s32 %v7139_v19, 16  ;;  %v7140_v1 = vand.u32 65535, %v7139_v19 }
 0x97e   :  { %9684 = vpow2.f32 %v7126_v46 }
 0x97f   :  { %v7143_v45 = vcvt.s32.f32 %v7141_v25  ;;  %v7142_v53 = vcvt.s32.f32 %v7140_v1 }
 0x981   :  { %7144 = vmin.xlane.f32.xlu0 %v7143_v45 }
 0x98b   :  { %v9685_v17 = vpop.eup %9684 }
 0x98c   :  { %v7128_v57 = vsel %vm7120_vm0, %v9685_v17, 0.0 }
 0x98d   :  { %7129 = vadd.xlane.f32.xlu1 %v7128_v57 }
 0xa0a   :  { %v7145_v4 = vpop.xlane.xlu0 %7144 }
 0xa0b   :  { %vm7146_vm15 = vcmp.eq.f32.partialorder %v7143_v45, %v7145_v4 }
 0xa0c   :  { %v7147_v43 = vsel %vm7146_vm15, %v7142_v53, inf }
 0xa0d   :  { %7148 = vmin.xlane.f32.xlu1 %v7147_v43 }
 0xa16   :  { %v7130_v32 = vpop.xlane.xlu1 %7129 }
 0xa17   :  { %9686 = vrcp.f32 %v7130_v32 }
 0xa24   :  { %v9687_v59 = vpop.eup %9686 }
 0xa25   :  { %7134 = vst.msk [vmem:[#allocation7] sm:$0x1] %vm7133_vm2, %v9687_v59 }
 0xa26   :  { %9699 = shalt.err (!%p9696_p10)
}
 0xa27   :  { %7164 = dma.vmem_to_hbm [thread:$0]  %s7162_s14, 16, %s13375_s15, [#allocation8]   ;;  %v7151_v2 = vcvt.f32.s32 %v7145_v4 }
 0xa28   :  { %s9818_s1 = smov [#allocation9]   ;;  %s9819_s3 = smov [#allocation11]  }
 0xa29   :  { %s7171_s20 = sshll.u32 %s9818_s1, 4  ;;  %v7152_v30 = vshll.u32 %v7151_v2, 16  ;;  %s7181_s4 = sshll.u32 %s9819_s3, 4  ;;  %s7172_s20 = int_to_ptr.vmem [resolvable:$true] %s7171_s20  ;;  %s7182_s4 = int_to_ptr.vmem [resolvable:$true] %s7181_s4 }
 0xa2a   :  { %s9708_s21 = scalar_lea.vmem %s7172_s20, 16  ;;  %s9712_s9 = scalar_lea.vmem %s7172_s20, 32 }
 0xa2b   :  { %p9709_p11 = scmp.ne.s32.totalorder %s7172_s20, %s9708_s21  ;;  %p9713_p12 = scmp.lt.s32.totalorder %s7172_s20, %s7172_s20 }
 0xa2c   :  { %p9714_p13 = scmp.lt.s32.totalorder %s9712_s9, %s9708_s21 }
 0xa2e   :  { %p9715_p0 = por %p9714_p13, %p9713_p12 }
 0xa30   :  { %p9716_p1 = pnand %p9715_p0, %p9709_p11 }
 0xa96   :  { %v7149_v15 = vpop.xlane.xlu1 %7148 }
 0xa97   :  { %v7150_v50 = vcvt.f32.s32 %v7149_v15 }
 0xa99   :  { %v7153_v39 = vadd.s32 %v7152_v30, %v7150_v50 }
 0xa9b   :  { %7154 = vst.msk [vmem:[#allocation9] sm:$0x1] %vm7133_vm2, %v7153_v39 }
 0xa9c   :  { %9719 = shalt.err (!%p9716_p1)
}
 0xa9d   :  { %7174 = dma.vmem_to_hbm [thread:$0]  %s7172_s20, 16, %s13376_s16, [#allocation10]  }
 0xa9e   :  { %s9728_s2 = scalar_lea.vmem %s7182_s4, 16  ;;  %s9732_s22 = scalar_lea.vmem %s7182_s4, 32 }
 0xa9f   :  { %p9729_p2 = scmp.ne.s32.totalorder %s7182_s4, %s9728_s2  ;;  %p9733_p3 = scmp.lt.s32.totalorder %s7182_s4, %s7182_s4 }
 0xaa0   :  { %p9734_p4 = scmp.lt.s32.totalorder %s9732_s22, %s9728_s2 }
 0xaa2   :  { %p9735_p5 = por %p9734_p4, %p9733_p3 }
 0xaa4   :  { %p9736_p6 = pnand %p9735_p5, %p9729_p2 }
 0xaa6   :  { %9739 = shalt.err (!%p9736_p6)
}
 0xaa7   :  { %7184 = dma.vmem_to_hbm [thread:$0]  %s7182_s4, 16, %s13377_s17, [#allocation10]  }
 0xaa8   :  { %9776 = dma.done.wait [#allocation8], 16  }
 0xaa9   :  { %9777 = vsyncadd [#allocation8], 4294967280 }
 0xaaa   :  { %9778 = dma.done.wait [#allocation10], 32  }
 0xaab   :  { %9779 = vsyncadd [#allocation10], 4294967264 }
 0xaac   :  { %7194 = vsyncpa [#allocation8], 1 }
 0xaad   :  { %7195 = vsyncpa [#allocation10], 1 }

</bundles_post_ra>
